<compile_context>
chip_gen: v5e
topology: v5e:2x2
jax: 0.10.0
libtpu: 0.0.40
codegen_flags: <defaults>
</compile_context>

<pallas_src>
from functools import partial

import jax
import jax.numpy as jnp
from jax import lax
from jax.experimental import pallas as pl
from jax.experimental.pallas import tpu as pltpu

LEAKY_SLOPE = 0.01   # PyTorch nn.LeakyReLU default negative_slope
BN_EPS = 1e-5        # PyTorch nn.BatchNorm2d default eps
LANES = 128          # TPU lane width
SUBL = 16            # sublane tile for bf16 (keeps all row offsets aligned)


def _round_up(x, m):
    return ((x + m - 1) // m) * m


def _vmem_capacity_bytes():
    try:
        info = pltpu.get_tpu_info()
        for attr in ("vmem_capacity_bytes", "vmem_size_bytes", "vmem_bytes"):
            v = getattr(info, attr, None)
            if v:
                return int(v)
    except Exception:
        pass
    return 64 * 1024 * 1024   # conservative default (v7x per-TensorCore VMEM)


def _double_conv_kernel(x_hbm, w1_ref, s1_ref, b1_ref, w2_ref, s2_ref, b2_ref, o_ref,
                        xwin_ref, sem_ref, *col_refs,
                        H, W, Wp, TH, nH, direct_conv1):
    # x_hbm   : (N, rows*Wp, Cx)        bf16 HBM-resident padded input (rows flattened)
    # w1_ref  : (Cx, Cmidp) [direct] or (3, 3*Cx, Cmidp) [stacked]     bf16
    # s*/b*   : (1, Cp)                 f32  folded BN scale / bias (includes conv bias)
    # o_ref   : (1, TH*Wp, Coutp)       bf16 output tile
    # xwin_ref: (2, (TH+halo)*Wp, Cx)   bf16 double-buffered input window
    # col_refs: [col1 ((TH+2)*Wp, 3*Cx)] col2 (TH*Wp, 3*Cmidp)         bf16
    if direct_conv1:
        (col2_ref,) = col_refs
    else:
        col1_ref, col2_ref = col_refs
    Cmidp = col2_ref.shape[-1] // 3
    R1 = (TH + 2) * Wp            # conv1-activation rows per tile (1-row recomputed halo)
    R2 = TH * Wp                  # output rows per tile
    win_rows = xwin_ref.shape[1]
    f32 = jnp.float32

    b = pl.program_id(0)
    h = pl.program_id(1)

    # ---- manual double-buffered fetch of this tile's input window (pattern P4) ----
    def fetch(h_idx, slot):
        pltpu.make_async_copy(x_hbm.at[b, pl.ds(h_idx * TH * Wp, win_rows), :],
                              xwin_ref.at[slot], sem_ref.at[slot]).start()

    @pl.when(h == 0)
    def _():
        fetch(0, 0)                # prime the per-image chain (h axis runs sequentially)

    slot = h % 2

    @pl.when(h + 1 < nH)
    def _():
        fetch(h + 1, 1 - slot)     # prefetch the next tile while this one computes

    pltpu.make_async_copy(x_hbm.at[b, pl.ds(0, win_rows), :],   # src here only fixes the shape
                          xwin_ref.at[slot], sem_ref.at[slot]).wait()

    def shift_rows(z, delta):
        # y[r] = z[(r + delta) % rows]; wrapped rows only land in pad columns (masked/sliced).
        return z if delta == 0 else pltpu.roll(z, shift=(-delta) % z.shape[0], axis=0)

    def lrelu(v):
        return jnp.where(v >= 0, v, LEAKY_SLOPE * v)

    xw = xwin_ref[slot]            # (win_rows, Cx)

    # ---------------- conv1 ----------------
    if direct_conv1:
        # 9-tap im2col built in the wrapper: one MXU matmul with K = 9*Cin (padded to 128).
        acc1 = jnp.dot(xw, w1_ref[...], preferred_element_type=f32)
    else:
        # ky taps stacked along K (K = 3*Cin); the kx taps fold in via XLU row rolls.
        Cinp = xw.shape[-1]
        for ky in range(3):
            col1_ref[:, ky * Cinp:(ky + 1) * Cinp] = xw[ky * Wp:ky * Wp + R1, :]
        col1 = col1_ref[...]
        acc1 = jnp.dot(col1, w1_ref[1], preferred_element_type=f32)
        acc1 += shift_rows(jnp.dot(col1, w1_ref[0], preferred_element_type=f32), -1)
        acc1 += shift_rows(jnp.dot(col1, w1_ref[2], preferred_element_type=f32), +1)

    # folded BN1 + LeakyReLU, then zero everything conv2 must see as padding:
    #   - pad columns (c == 0 or c > W)  (also neutralizes the roll wrap-around rows)
    #   - rows outside the real image (conv2's vertical zero padding + H->Hp round-up rows)
    y1 = lrelu(acc1 * s1_ref[...] + b1_ref[...]).reshape(TH + 2, Wp, Cmidp)
    c_idx = lax.broadcasted_iota(jnp.int32, (1, Wp, 1), 1)
    m_idx = lax.broadcasted_iota(jnp.int32, (TH + 2, 1, 1), 0) + (h * TH - 1)
    y1 = jnp.where((c_idx >= 1) & (c_idx <= W), y1, 0.0)
    y1 = jnp.where((m_idx >= 0) & (m_idx < H), y1, 0.0)
    y1 = y1.reshape(R1, Cmidp).astype(col2_ref.dtype)

    # ------- conv2 (conv1 epilogue fused straight into col2; no "mid" buffer) -------
    for ky in range(3):
        col2_ref[:, ky * Cmidp:(ky + 1) * Cmidp] = y1[ky * Wp:ky * Wp + R2, :]
    col2 = col2_ref[...]
    acc2 = jnp.dot(col2, w2_ref[1], preferred_element_type=f32)
    acc2 += shift_rows(jnp.dot(col2, w2_ref[0], preferred_element_type=f32), -1)
    acc2 += shift_rows(jnp.dot(col2, w2_ref[2], preferred_element_type=f32), +1)

    y2 = lrelu(acc2 * s2_ref[...] + b2_ref[...])
    o_ref[0] = y2.astype(o_ref.dtype)      # lane-dense bf16 store


def _fold_bn(conv_bias, gamma, beta, mean, var):
    scale = gamma / jnp.sqrt(var + BN_EPS)
    bias = beta + scale * (conv_bias - mean)
    return scale, bias


def double_conv_pallas(x_nchw, p, *, tile_h=None, compute_dtype=jnp.bfloat16,
                       out_dtype=jnp.float32):
    """DoubleConv forward. x_nchw: (N, Cin, H, W) -> (N, Cout, H, W)."""
    N, Cin, H, W = x_nchw.shape
    Cmid = p["w1"].shape[0]
    Cout = p["w2"].shape[0]
    Cmidp = _round_up(Cmid, LANES)
    Coutp = _round_up(Cout, LANES)
    Wp = _round_up(W + 2, SUBL)             # padded width; multiple of 16 keeps bf16 tiles aligned
    itemsize = jnp.dtype(compute_dtype).itemsize

    # Tiny-Cin (first UNet layer) path: full 9-tap im2col keeps K at one MXU pass instead of
    # 3 matmuls whose contraction is >95% channel padding.
    direct1 = 9 * Cin <= LANES
    Cx = _round_up(9 * Cin, LANES) if direct1 else _round_up(Cin, LANES)
    halo = 2 if direct1 else 4              # extra input rows fetched per H tile

    # ---- per-generation VMEM budget -> H tile size ----
    vmem_cap = _vmem_capacity_bytes()

    def est_bytes(th):
        win = 2 * (th + halo) * Wp * Cx * itemsize                       # dbl-buffered input win
        col1 = 0 if direct1 else (th + 2) * Wp * 3 * Cx * itemsize
        col2 = th * Wp * 3 * Cmidp * itemsize
        outb = 2 * th * Wp * Coutp * itemsize                            # dbl-buffered bf16 out
        acc = (th + 2) * Wp * Cmidp * 4 + th * Wp * Coutp * 4            # f32 acc temporaries
        wts = (Cx * Cmidp if direct1 else 9 * Cx * Cmidp) * itemsize + 9 * Cmidp * Coutp * itemsize
        return win + col1 + col2 + outb + 2 * acc + 2 * wts

    if tile_h is None:
        budget = int(vmem_cap * 0.7)
        tile_h = 8
        for cand in (256, 128, 64, 32, 16, 8):
            if cand <= max(8, H) and est_bytes(cand) <= budget:
                tile_h = cand
                break
    TH = max(1, min(int(tile_h), _round_up(H, 8)))
    Hp = _round_up(H, TH)
    nH = Hp // TH
    vmem_limit = int(min(vmem_cap * 0.85, max(est_bytes(TH) * 3 // 2, 32 * 1024 * 1024)))

    # ---- input: NCHW -> channels-last, zero halo, channel pad, rows flattened ----
    x = jnp.transpose(x_nchw, (0, 2, 3, 1)).astype(jnp.float32)          # (N, H, W, Cin)
    if direct1:
        xp = jnp.pad(x, ((0, 0), (1, 1), (1, 1), (0, 0)))
        xi = jnp.concatenate([xp[:, dy:dy + H, dx:dx + W, :]
                              for dy in range(3) for dx in range(3)], axis=-1)   # 9-tap im2col
        xi = jnp.pad(xi, ((0, 0), (1, Hp - H + 1), (1, Wp - W - 1), (0, Cx - 9 * Cin)))
        img_rows = Hp + 2
    else:
        xi = jnp.pad(x, ((0, 0), (2, Hp - H + 2), (1, Wp - W - 1), (0, Cx - Cin)))
        img_rows = Hp + 4
    xi = xi.reshape(N, img_rows * Wp, Cx).astype(compute_dtype)

    # ---- weights: PyTorch OIHW -> MXU-friendly layouts, channel-padded, bf16 ----
    def prep_w_stacked(w, cip, cop):            # -> [kx, ky*cip + ci, co]
        w = jnp.transpose(w, (2, 3, 1, 0)).astype(jnp.float32)           # (ky, kx, ci, co)
        w = jnp.pad(w, ((0, 0), (0, 0), (0, cip - w.shape[2]), (0, cop - w.shape[3])))
        return jnp.transpose(w, (1, 0, 2, 3)).reshape(3, 3 * cip, cop).astype(compute_dtype)

    def prep_w_direct(w, kp, cop):              # -> [(ky*3 + kx)*Cin + ci, co]
        w = jnp.transpose(w, (2, 3, 1, 0)).astype(jnp.float32)           # (ky, kx, ci, co)
        w = w.reshape(9 * w.shape[2], w.shape[3])
        return jnp.pad(w, ((0, kp - w.shape[0]), (0, cop - w.shape[1]))).astype(compute_dtype)

    w1 = prep_w_direct(p["w1"], Cx, Cmidp) if direct1 else prep_w_stacked(p["w1"], Cx, Cmidp)
    w2 = prep_w_stacked(p["w2"], Cmidp, Coutp)

    def prep_sb(bias, gamma, beta, mean, var, cp):
        s, bb = _fold_bn(bias, gamma, beta, mean, var)
        s = jnp.pad(s.astype(jnp.float32), (0, cp - s.shape[0])).reshape(1, cp)
        bb = jnp.pad(bb.astype(jnp.float32), (0, cp - bb.shape[0])).reshape(1, cp)
        return s, bb

    s1, b1 = prep_sb(p["bias1"], p["gamma1"], p["beta1"], p["mean1"], p["var1"], Cmidp)
    s2, b2 = prep_sb(p["bias2"], p["gamma2"], p["beta2"], p["mean2"], p["var2"], Coutp)

    kernel = partial(_double_conv_kernel, H=H, W=W, Wp=Wp, TH=TH, nH=nH, direct_conv1=direct1)

    def build(single_buffer_weights):
        def const_spec(shape):
            kwargs = {}
            if single_buffer_weights and hasattr(pl, "Buffered"):
                kwargs["pipeline_mode"] = pl.Buffered(1)   # never re-fetched across grid steps
            idx = (lambda b, h: (0, 0, 0)) if len(shape) == 3 else (lambda b, h: (0, 0))
            return pl.BlockSpec(shape, idx, **kwargs)

        scratch = [pltpu.VMEM((2, (TH + halo) * Wp, Cx), compute_dtype),    # input window x2
                   pltpu.SemaphoreType.DMA((2,))]
        if not direct1:
            scratch.append(pltpu.VMEM(((TH + 2) * Wp, 3 * Cx), compute_dtype))   # col1
        scratch.append(pltpu.VMEM((TH * Wp, 3 * Cmidp), compute_dtype))          # col2

        return pl.pallas_call(
            kernel,
            out_shape=jax.ShapeDtypeStruct((N, Hp * Wp, Coutp), compute_dtype),
            grid_spec=pltpu.PrefetchScalarGridSpec(
                num_scalar_prefetch=0,
                grid=(N, nH),
                in_specs=[
                    pl.BlockSpec(memory_space=pl.ANY),   # x stays in HBM; windows DMA'd by hand
                    const_spec(w1.shape),
                    const_spec(s1.shape), const_spec(b1.shape),
                    const_spec(w2.shape),
                    const_spec(s2.shape), const_spec(b2.shape),
                ],
                out_specs=pl.BlockSpec((1, TH * Wp, Coutp), lambda b, h: (b, h, 0)),
                scratch_shapes=scratch,
            ),
            compiler_params=pltpu.CompilerParams(
                # batch axis feeds v7x megacore; the H-tile axis stays sequential so the manual
                # input-window prefetch chain (primed at h == 0) is valid per image.
                dimension_semantics=("parallel", "arbitrary"),
                vmem_limit_bytes=vmem_limit,
            ),
        )

    args = (xi, w1, s1, b1, w2, s2, b2)
    try:
        out_flat = build(True)(*args)
    except Exception:   # pl.Buffered(1) not supported here -> default double buffering
        out_flat = build(False)(*args)

    out = out_flat.reshape(N, Hp, Wp, Coutp)[:, :H, 1:W + 1, :Cout]
    return jnp.transpose(out, (0, 3, 1, 2)).astype(out_dtype)


def double_conv_reference(x_nchw, p):
    """Pure-JAX f32 reference (NCHW, matches PyTorch eval-mode DoubleConv)."""
    def conv(x, w, b):
        y = lax.conv_general_dilated(
            x, w, window_strides=(1, 1), padding=((1, 1), (1, 1)),
            dimension_numbers=("NCHW", "OIHW", "NCHW"))
        return y + b.reshape(1, -1, 1, 1)

    def bn(x, g, beta, m, v):
        return (g.reshape(1, -1, 1, 1) * (x - m.reshape(1, -1, 1, 1))
                / jnp.sqrt(v.reshape(1, -1, 1, 1) + BN_EPS)
                + beta.reshape(1, -1, 1, 1))

    def lrelu(x):
        return jnp.where(x >= 0, x, LEAKY_SLOPE * x)

    y = lrelu(bn(conv(x_nchw, p["w1"], p["bias1"]),
                 p["gamma1"], p["beta1"], p["mean1"], p["var1"]))
    y = lrelu(bn(conv(y, p["w2"], p["bias2"]),
                 p["gamma2"], p["beta2"], p["mean2"], p["var2"]))
    return y


def init_params(key, in_channels, out_channels, mid_channels=None):
    if not mid_channels:
        mid_channels = out_channels
    ks = jax.random.split(key, 13)
    f32 = jnp.float32
    p = {
        "w1": 0.1 * jax.random.normal(ks[0], (mid_channels, in_channels, 3, 3), f32),
        "bias1": 0.1 * jax.random.normal(ks[1], (mid_channels,), f32),
        "gamma1": 1.0 + 0.1 * jax.random.normal(ks[2], (mid_channels,), f32),
        "beta1": 0.1 * jax.random.normal(ks[3], (mid_channels,), f32),
        "mean1": 0.1 * jax.random.normal(ks[4], (mid_channels,), f32),
        "var1": 1.0 + 0.2 * jax.random.uniform(ks[5], (mid_channels,), f32),
        "w2": 0.1 * jax.random.normal(ks[6], (out_channels, mid_channels, 3, 3), f32),
        "bias2": 0.1 * jax.random.normal(ks[7], (out_channels,), f32),
        "gamma2": 1.0 + 0.1 * jax.random.normal(ks[8], (out_channels,), f32),
        "beta2": 0.1 * jax.random.normal(ks[9], (out_channels,), f32),
        "mean2": 0.1 * jax.random.normal(ks[10], (out_channels,), f32),
        "var2": 1.0 + 0.2 * jax.random.uniform(ks[11], (out_channels,), f32),
    }
    return p, ks[12]


if __name__ == "__main__":
    def run_case(seed, N, Cin, Cout, H, W, tile_h):
        params, xkey = init_params(jax.random.PRNGKey(seed), Cin, Cout)
        x = jax.random.normal(xkey, (N, Cin, H, W), jnp.float32)
        out = jax.block_until_ready(double_conv_pallas(x, params, tile_h=tile_h))
        ref = jax.block_until_ready(double_conv_reference(x, params))
        assert out.shape == (N, Cout, H, W), out.shape
        err = float(jnp.max(jnp.abs(out - ref)))
        # bf16 MXU operands + bf16 output storage (f32 accumulate / f32 epilogue).
        assert jnp.allclose(out, ref, atol=7e-2, rtol=7e-2), err

    # tiny-Cin path (9*Cin <= 128): conv1 as a single im2col matmul; 2 H tiles per image.
    run_case(0, N=2, Cin=4, Cout=8, H=16, W=16, tile_h=8)
    # generic ky-stacked path: larger Cin, H not a multiple of the tile, odd W, N=1.
    run_case(1, N=1, Cin=16, Cout=8, H=13, W=10, tile_h=8)
    print("KERNEL_OK")
</pallas_src>

<mosaic_0001>
module attributes {stable_mosaic.version = 11 : i64} {
  func.func @_double_conv_kernel(%arg0: i32, %arg1: i32, %arg2: memref<2x576x128xbf16, #tpu.memory_space<any>>, %arg3: memref<128x128xbf16, #tpu.memory_space<vmem>>, %arg4: memref<1x128xf32, #tpu.memory_space<vmem>>, %arg5: memref<1x128xf32, #tpu.memory_space<vmem>>, %arg6: memref<3x384x128xbf16, #tpu.memory_space<vmem>>, %arg7: memref<1x128xf32, #tpu.memory_space<vmem>>, %arg8: memref<1x128xf32, #tpu.memory_space<vmem>>, %arg9: memref<1x256x128xbf16, #tpu.memory_space<vmem>>, %arg10: memref<2x320x128xbf16, #tpu.memory_space<vmem>>, %arg11: memref<2x!tpu.dma_semaphore, #tpu.memory_space<semaphore_mem>>, %arg12: memref<256x384xbf16, #tpu.memory_space<vmem>>) attributes {dimension_semantics = [#tpu.dimension_semantics<parallel>, #tpu.dimension_semantics<arbitrary>], iteration_bounds = array<i64: 2, 2>, scalar_prefetch = 0 : i64, scratch_operands = 3 : i64, tpu.core_type = #tpu.core_type<tc>, window_params = [{}, {pipeline_mode = #tpu.pipeline_mode<synchronous>, transform_indices = @transform_1, window_bounds = array<i64: 128, 128>}, {pipeline_mode = #tpu.pipeline_mode<synchronous>, transform_indices = @transform_2, window_bounds = array<i64: 1, 128>}, {pipeline_mode = #tpu.pipeline_mode<synchronous>, transform_indices = @transform_3, window_bounds = array<i64: 1, 128>}, {pipeline_mode = #tpu.pipeline_mode<synchronous>, transform_indices = @transform_4, window_bounds = array<i64: 3, 384, 128>}, {pipeline_mode = #tpu.pipeline_mode<synchronous>, transform_indices = @transform_5, window_bounds = array<i64: 1, 128>}, {pipeline_mode = #tpu.pipeline_mode<synchronous>, transform_indices = @transform_6, window_bounds = array<i64: 1, 128>}, {transform_indices = @transform_7, window_bounds = array<i64: 1, 256, 128>}]} {
    %c0_i32 = arith.constant 0 : i32
    %0 = arith.cmpi eq, %arg1, %c0_i32 : i32
    %1 = arith.extui %0 : i1 to i32
    %c0_i32_0 = arith.constant 0 : i32
    %2 = arith.cmpi ne, %1, %c0_i32_0 : i32
    scf.if %2 {
      %c0_i32_53 = arith.constant 0 : i32
      %c0_i32_54 = arith.constant 0 : i32
      %c0_i32_55 = arith.constant 0 : i32
      %c0_i32_56 = arith.constant 0 : i32
      %101 = tpu.memref_slice %arg2[%arg0, %c0_i32_55, %c0_i32_56] : memref<2x576x128xbf16, #tpu.memory_space<any>> -> memref<1x320x128xbf16, #tpu.memory_space<any>>
      %102 = tpu.memref_squeeze %101 : memref<1x320x128xbf16, #tpu.memory_space<any>> -> memref<320x128xbf16, #tpu.memory_space<any>>
      %c0_i32_57 = arith.constant 0 : i32
      %c0_i32_58 = arith.constant 0 : i32
      %103 = tpu.memref_slice %arg10[%c0_i32_53, %c0_i32_57, %c0_i32_58] : memref<2x320x128xbf16, #tpu.memory_space<vmem>> -> memref<1x320x128xbf16, #tpu.memory_space<vmem>>
      %104 = tpu.memref_squeeze %103 : memref<1x320x128xbf16, #tpu.memory_space<vmem>> -> memref<320x128xbf16, #tpu.memory_space<vmem>>
      %105 = tpu.memref_slice %arg11[%c0_i32_54] : memref<2x!tpu.dma_semaphore, #tpu.memory_space<semaphore_mem>> -> memref<1x!tpu.dma_semaphore, #tpu.memory_space<semaphore_mem>>
      %106 = tpu.memref_squeeze %105 : memref<1x!tpu.dma_semaphore, #tpu.memory_space<semaphore_mem>> -> memref<!tpu.dma_semaphore, #tpu.memory_space<semaphore_mem>>
      tpu.enqueue_dma source(%102 : memref<320x128xbf16, #tpu.memory_space<any>>) target(%104 : memref<320x128xbf16, #tpu.memory_space<vmem>>) target_semaphore(%106 : memref<!tpu.dma_semaphore, #tpu.memory_space<semaphore_mem>>)
    } else {
    }
    %c2_i32 = arith.constant 2 : i32
    %c0_i32_1 = arith.constant 0 : i32
    %3 = arith.cmpi eq, %c2_i32, %c0_i32_1 : i32
    %c1_i32 = arith.constant 1 : i32
    %4 = arith.select %3, %c1_i32, %c2_i32 : i32
    %5 = arith.remsi %arg1, %4 : i32
    %c0_i32_2 = arith.constant 0 : i32
    %6 = arith.cmpi ne, %5, %c0_i32_2 : i32
    %c0_i32_3 = arith.constant 0 : i32
    %7 = arith.cmpi slt, %5, %c0_i32_3 : i32
    %c0_i32_4 = arith.constant 0 : i32
    %8 = arith.cmpi slt, %4, %c0_i32_4 : i32
    %9 = arith.xori %7, %8 : i1
    %10 = arith.andi %9, %6 : i1
    %11 = arith.addi %5, %4 : i32
    %12 = arith.select %10, %11, %5 : i32
    %c1_i32_5 = arith.constant 1 : i32
    %13 = arith.addi %arg1, %c1_i32_5 : i32
    %c2_i32_6 = arith.constant 2 : i32
    %14 = arith.cmpi slt, %13, %c2_i32_6 : i32
    %15 = arith.extui %14 : i1 to i32
    %c0_i32_7 = arith.constant 0 : i32
    %16 = arith.cmpi ne, %15, %c0_i32_7 : i32
    scf.if %16 {
      %c1_i32_53 = arith.constant 1 : i32
      %101 = arith.addi %arg1, %c1_i32_53 : i32
      %c1_i32_54 = arith.constant 1 : i32
      %102 = arith.subi %c1_i32_54, %12 : i32
      %c8_i32_55 = arith.constant 8 : i32
      %103 = arith.muli %101, %c8_i32_55 : i32
      %c32_i32 = arith.constant 32 : i32
      %104 = arith.muli %103, %c32_i32 : i32
      %c0_i32_56 = arith.constant 0 : i32
      %105 = tpu.memref_slice %arg2[%arg0, %104, %c0_i32_56] : memref<2x576x128xbf16, #tpu.memory_space<any>> -> memref<1x320x128xbf16, #tpu.memory_space<any>>
      %106 = tpu.memref_squeeze %105 : memref<1x320x128xbf16, #tpu.memory_space<any>> -> memref<320x128xbf16, #tpu.memory_space<any>>
      %c0_i32_57 = arith.constant 0 : i32
      %c0_i32_58 = arith.constant 0 : i32
      %107 = tpu.memref_slice %arg10[%102, %c0_i32_57, %c0_i32_58] : memref<2x320x128xbf16, #tpu.memory_space<vmem>> -> memref<1x320x128xbf16, #tpu.memory_space<vmem>>
      %108 = tpu.memref_squeeze %107 : memref<1x320x128xbf16, #tpu.memory_space<vmem>> -> memref<320x128xbf16, #tpu.memory_space<vmem>>
      %109 = tpu.memref_slice %arg11[%102] : memref<2x!tpu.dma_semaphore, #tpu.memory_space<semaphore_mem>> -> memref<1x!tpu.dma_semaphore, #tpu.memory_space<semaphore_mem>>
      %110 = tpu.memref_squeeze %109 : memref<1x!tpu.dma_semaphore, #tpu.memory_space<semaphore_mem>> -> memref<!tpu.dma_semaphore, #tpu.memory_space<semaphore_mem>>
      tpu.enqueue_dma source(%106 : memref<320x128xbf16, #tpu.memory_space<any>>) target(%108 : memref<320x128xbf16, #tpu.memory_space<vmem>>) target_semaphore(%110 : memref<!tpu.dma_semaphore, #tpu.memory_space<semaphore_mem>>)
    } else {
    }
    %c0_i32_8 = arith.constant 0 : i32
    %c0_i32_9 = arith.constant 0 : i32
    %17 = tpu.memref_slice %arg2[%arg0, %c0_i32_8, %c0_i32_9] : memref<2x576x128xbf16, #tpu.memory_space<any>> -> memref<1x320x128xbf16, #tpu.memory_space<any>>
    %18 = tpu.memref_squeeze %17 : memref<1x320x128xbf16, #tpu.memory_space<any>> -> memref<320x128xbf16, #tpu.memory_space<any>>
    %c0_i32_10 = arith.constant 0 : i32
    %c0_i32_11 = arith.constant 0 : i32
    %19 = tpu.memref_slice %arg10[%12, %c0_i32_10, %c0_i32_11] : memref<2x320x128xbf16, #tpu.memory_space<vmem>> -> memref<1x320x128xbf16, #tpu.memory_space<vmem>>
    %20 = tpu.memref_squeeze %19 : memref<1x320x128xbf16, #tpu.memory_space<vmem>> -> memref<320x128xbf16, #tpu.memory_space<vmem>>
    %21 = tpu.memref_slice %arg11[%12] : memref<2x!tpu.dma_semaphore, #tpu.memory_space<semaphore_mem>> -> memref<1x!tpu.dma_semaphore, #tpu.memory_space<semaphore_mem>>
    %22 = tpu.memref_squeeze %21 : memref<1x!tpu.dma_semaphore, #tpu.memory_space<semaphore_mem>> -> memref<!tpu.dma_semaphore, #tpu.memory_space<semaphore_mem>>
    tpu.wait_dma2 semaphore(%22 : memref<!tpu.dma_semaphore, #tpu.memory_space<semaphore_mem>>) src(%18 : memref<320x128xbf16, #tpu.memory_space<any>>) dst(%20 : memref<320x128xbf16, #tpu.memory_space<vmem>>)
    %23 = arith.index_cast %12 : i32 to index
    %c0 = arith.constant 0 : index
    %c0_12 = arith.constant 0 : index
    %24 = vector.load %arg10[%23, %c0, %c0_12] : memref<2x320x128xbf16, #tpu.memory_space<vmem>>, vector<1x320x128xbf16>
    %25 = vector.shape_cast %24 : vector<1x320x128xbf16> to vector<320x128xbf16>
    %c0_13 = arith.constant 0 : index
    %c0_14 = arith.constant 0 : index
    %26 = vector.load %arg3[%c0_13, %c0_14] : memref<128x128xbf16, #tpu.memory_space<vmem>>, vector<128x128xbf16>
    %cst = arith.constant dense<0.000000e+00> : vector<320x128xf32>
    %27 = tpu.matmul %25, %26, %cst {dimension_numbers = #tpu.dot_dimension_numbers<[1], [0], [0], [1], [0, 0, 1, 1], [], []>} : vector<320x128xbf16>, vector<128x128xbf16>, vector<320x128xf32> -> vector<320x128xf32>
    %c0_15 = arith.constant 0 : index
    %c0_16 = arith.constant 0 : index
    %28 = vector.load %arg4[%c0_15, %c0_16] : memref<1x128xf32, #tpu.memory_space<vmem>>, vector<1x128xf32>
    %29 = vector.broadcast %28 : vector<1x128xf32> to vector<320x128xf32>
    %30 = arith.mulf %27, %29 : vector<320x128xf32>
    %c0_17 = arith.constant 0 : index
    %c0_18 = arith.constant 0 : index
    %31 = vector.load %arg5[%c0_17, %c0_18] : memref<1x128xf32, #tpu.memory_space<vmem>>, vector<1x128xf32>
    %32 = vector.broadcast %31 : vector<1x128xf32> to vector<320x128xf32>
    %33 = arith.addf %30, %32 : vector<320x128xf32>
    %cst_19 = arith.constant 0.000000e+00 : f32
    %34 = vector.broadcast %cst_19 : f32 to vector<320x128xf32>
    %35 = arith.cmpf oge, %33, %34 : vector<320x128xf32>
    %cst_20 = arith.constant 0.00999999977 : f32
    %36 = vector.broadcast %cst_20 : f32 to vector<320x128xf32>
    %37 = arith.mulf %36, %33 : vector<320x128xf32>
    %38 = arith.select %35, %33, %37 : vector<320x128xi1>, vector<320x128xf32>
    %39 = vector.shape_cast %38 : vector<320x128xf32> to vector<10x32x128xf32>
    %40 = tpu.iota {dimensions = array<i32: 1>} : vector<1x32x1xi32>
    %41 = tpu.iota {dimensions = array<i32: 0>} : vector<10x1x1xi32>
    %c8_i32 = arith.constant 8 : i32
    %42 = arith.muli %arg1, %c8_i32 : i32
    %c1_i32_21 = arith.constant 1 : i32
    %43 = arith.subi %42, %c1_i32_21 : i32
    %44 = vector.broadcast %43 : i32 to vector<10x1x1xi32>
    %45 = arith.addi %41, %44 : vector<10x1x1xi32>
    %c1_i32_22 = arith.constant 1 : i32
    %46 = vector.broadcast %c1_i32_22 : i32 to vector<1x32x1xi32>
    %47 = arith.cmpi sge, %40, %46 : vector<1x32x1xi32>
    %c16_i32 = arith.constant 16 : i32
    %48 = vector.broadcast %c16_i32 : i32 to vector<1x32x1xi32>
    %49 = arith.cmpi sle, %40, %48 : vector<1x32x1xi32>
    %50 = arith.andi %47, %49 : vector<1x32x1xi1>
    %cst_23 = arith.constant 0.000000e+00 : f32
    %51 = vector.shape_cast %50 : vector<1x32x1xi1> to vector<1x32x1xi1>
    %52 = vector.broadcast %51 : vector<1x32x1xi1> to vector<10x32x128xi1>
    %53 = vector.broadcast %cst_23 : f32 to vector<10x32x128xf32>
    %54 = arith.select %52, %39, %53 : vector<10x32x128xi1>, vector<10x32x128xf32>
    %c0_i32_24 = arith.constant 0 : i32
    %55 = vector.broadcast %c0_i32_24 : i32 to vector<10x1x1xi32>
    %56 = arith.cmpi sge, %45, %55 : vector<10x1x1xi32>
    %c16_i32_25 = arith.constant 16 : i32
    %57 = vector.broadcast %c16_i32_25 : i32 to vector<10x1x1xi32>
    %58 = arith.cmpi slt, %45, %57 : vector<10x1x1xi32>
    %59 = arith.andi %56, %58 : vector<10x1x1xi1>
    %cst_26 = arith.constant 0.000000e+00 : f32
    %60 = vector.shape_cast %59 : vector<10x1x1xi1> to vector<10x1x1xi1>
    %61 = vector.broadcast %60 : vector<10x1x1xi1> to vector<10x32x128xi1>
    %62 = vector.broadcast %cst_26 : f32 to vector<10x32x128xf32>
    %63 = arith.select %61, %54, %62 : vector<10x32x128xi1>, vector<10x32x128xf32>
    %64 = vector.shape_cast %63 : vector<10x32x128xf32> to vector<320x128xf32>
    %65 = arith.truncf %64 : vector<320x128xf32> to vector<320x128xbf16>
    %66 = vector.extract_strided_slice %65 {offsets = [0, 0], sizes = [256, 128], strides = [1, 1]} : vector<320x128xbf16> to vector<256x128xbf16>
    %c0_27 = arith.constant 0 : index
    %c0_28 = arith.constant 0 : index
    %67 = vector.load %arg12[%c0_27, %c0_28] : memref<256x384xbf16, #tpu.memory_space<vmem>>, vector<256x128xbf16>
    tpu.vector_store %arg12[%c0_27, %c0_28], %66 {strides = array<i32>} : memref<256x384xbf16, #tpu.memory_space<vmem>>, vector<256x128xbf16>,
    %68 = vector.extract_strided_slice %65 {offsets = [32, 0], sizes = [256, 128], strides = [1, 1]} : vector<320x128xbf16> to vector<256x128xbf16>
    %c0_29 = arith.constant 0 : index
    %c128 = arith.constant 128 : index
    %69 = vector.load %arg12[%c0_29, %c128] : memref<256x384xbf16, #tpu.memory_space<vmem>>, vector<256x128xbf16>
    tpu.vector_store %arg12[%c0_29, %c128], %68 {strides = array<i32>} : memref<256x384xbf16, #tpu.memory_space<vmem>>, vector<256x128xbf16>,
    %70 = vector.extract_strided_slice %65 {offsets = [64, 0], sizes = [256, 128], strides = [1, 1]} : vector<320x128xbf16> to vector<256x128xbf16>
    %c0_30 = arith.constant 0 : index
    %c256 = arith.constant 256 : index
    %71 = vector.load %arg12[%c0_30, %c256] : memref<256x384xbf16, #tpu.memory_space<vmem>>, vector<256x128xbf16>
    tpu.vector_store %arg12[%c0_30, %c256], %70 {strides = array<i32>} : memref<256x384xbf16, #tpu.memory_space<vmem>>, vector<256x128xbf16>,
    %c0_31 = arith.constant 0 : index
    %c0_32 = arith.constant 0 : index
    %72 = vector.load %arg12[%c0_31, %c0_32] : memref<256x384xbf16, #tpu.memory_space<vmem>>, vector<256x384xbf16>
    %c1 = arith.constant 1 : index
    %c0_33 = arith.constant 0 : index
    %c0_34 = arith.constant 0 : index
    %73 = vector.load %arg6[%c1, %c0_33, %c0_34] : memref<3x384x128xbf16, #tpu.memory_space<vmem>>, vector<1x384x128xbf16>
    %74 = vector.shape_cast %73 : vector<1x384x128xbf16> to vector<384x128xbf16>
    %cst_35 = arith.constant dense<0.000000e+00> : vector<256x128xf32>
    %75 = tpu.matmul %72, %74, %cst_35 {dimension_numbers = #tpu.dot_dimension_numbers<[1], [0], [0], [1], [0, 0, 1, 1], [], []>} : vector<256x384xbf16>, vector<384x128xbf16>, vector<256x128xf32> -> vector<256x128xf32>
    %c0_36 = arith.constant 0 : index
    %c0_37 = arith.constant 0 : index
    %c0_38 = arith.constant 0 : index
    %76 = vector.load %arg6[%c0_36, %c0_37, %c0_38] : memref<3x384x128xbf16, #tpu.memory_space<vmem>>, vector<1x384x128xbf16>
    %77 = vector.shape_cast %76 : vector<1x384x128xbf16> to vector<384x128xbf16>
    %cst_39 = arith.constant dense<0.000000e+00> : vector<256x128xf32>
    %78 = tpu.matmul %72, %77, %cst_39 {dimension_numbers = #tpu.dot_dimension_numbers<[1], [0], [0], [1], [0, 0, 1, 1], [], []>} : vector<256x384xbf16>, vector<384x128xbf16>, vector<256x128xf32> -> vector<256x128xf32>
    %c1_i32_40 = arith.constant 1 : i32
    %79 = tpu.dynamic_rotate %78 by %c1_i32_40 dim 0 : vector<256x128xf32>, i32 -> vector<256x128xf32>
    %80 = arith.addf %75, %79 : vector<256x128xf32>
    %c2 = arith.constant 2 : index
    %c0_41 = arith.constant 0 : index
    %c0_42 = arith.constant 0 : index
    %81 = vector.load %arg6[%c2, %c0_41, %c0_42] : memref<3x384x128xbf16, #tpu.memory_space<vmem>>, vector<1x384x128xbf16>
    %82 = vector.shape_cast %81 : vector<1x384x128xbf16> to vector<384x128xbf16>
    %cst_43 = arith.constant dense<0.000000e+00> : vector<256x128xf32>
    %83 = tpu.matmul %72, %82, %cst_43 {dimension_numbers = #tpu.dot_dimension_numbers<[1], [0], [0], [1], [0, 0, 1, 1], [], []>} : vector<256x384xbf16>, vector<384x128xbf16>, vector<256x128xf32> -> vector<256x128xf32>
    %c255_i32 = arith.constant 255 : i32
    %84 = tpu.dynamic_rotate %83 by %c255_i32 dim 0 : vector<256x128xf32>, i32 -> vector<256x128xf32>
    %85 = arith.addf %80, %84 : vector<256x128xf32>
    %c0_44 = arith.constant 0 : index
    %c0_45 = arith.constant 0 : index
    %86 = vector.load %arg7[%c0_44, %c0_45] : memref<1x128xf32, #tpu.memory_space<vmem>>, vector<1x128xf32>
    %87 = vector.broadcast %86 : vector<1x128xf32> to vector<256x128xf32>
    %88 = arith.mulf %85, %87 : vector<256x128xf32>
    %c0_46 = arith.constant 0 : index
    %c0_47 = arith.constant 0 : index
    %89 = vector.load %arg8[%c0_46, %c0_47] : memref<1x128xf32, #tpu.memory_space<vmem>>, vector<1x128xf32>
    %90 = vector.broadcast %89 : vector<1x128xf32> to vector<256x128xf32>
    %91 = arith.addf %88, %90 : vector<256x128xf32>
    %cst_48 = arith.constant 0.000000e+00 : f32
    %92 = vector.broadcast %cst_48 : f32 to vector<256x128xf32>
    %93 = arith.cmpf oge, %91, %92 : vector<256x128xf32>
    %cst_49 = arith.constant 0.00999999977 : f32
    %94 = vector.broadcast %cst_49 : f32 to vector<256x128xf32>
    %95 = arith.mulf %94, %91 : vector<256x128xf32>
    %96 = arith.select %93, %91, %95 : vector<256x128xi1>, vector<256x128xf32>
    %97 = arith.truncf %96 : vector<256x128xf32> to vector<256x128xbf16>
    %c0_50 = arith.constant 0 : index
    %c0_51 = arith.constant 0 : index
    %c0_52 = arith.constant 0 : index
    %98 = vector.load %arg9[%c0_50, %c0_51, %c0_52] : memref<1x256x128xbf16, #tpu.memory_space<vmem>>, vector<1x256x128xbf16>
    %99 = vector.shape_cast %98 : vector<1x256x128xbf16> to vector<256x128xbf16>
    %100 = vector.shape_cast %97 : vector<256x128xbf16> to vector<1x256x128xbf16>
    tpu.vector_store %arg9[%c0_50, %c0_51, %c0_52], %100 {strides = array<i32>} : memref<1x256x128xbf16, #tpu.memory_space<vmem>>, vector<1x256x128xbf16>,
    return
  }
  func.func @transform_1(%arg0: i32, %arg1: i32) -> (i32, i32) {
    %c0_i32 = arith.constant 0 : i32
    %c0_i32_0 = arith.constant 0 : i32
    %c0_i32_1 = arith.constant 0 : i32
    return %c0_i32, %c0_i32_0 : i32, i32
  }
  func.func @transform_2(%arg0: i32, %arg1: i32) -> (i32, i32) {
    %c0_i32 = arith.constant 0 : i32
    %c0_i32_0 = arith.constant 0 : i32
    %c0_i32_1 = arith.constant 0 : i32
    return %c0_i32, %c0_i32_0 : i32, i32
  }
  func.func @transform_3(%arg0: i32, %arg1: i32) -> (i32, i32) {
    %c0_i32 = arith.constant 0 : i32
    %c0_i32_0 = arith.constant 0 : i32
    %c0_i32_1 = arith.constant 0 : i32
    return %c0_i32, %c0_i32_0 : i32, i32
  }
  func.func @transform_4(%arg0: i32, %arg1: i32) -> (i32, i32, i32) {
    %c0_i32 = arith.constant 0 : i32
    %c0_i32_0 = arith.constant 0 : i32
    %c0_i32_1 = arith.constant 0 : i32
    %c0_i32_2 = arith.constant 0 : i32
    return %c0_i32, %c0_i32_0, %c0_i32_1 : i32, i32, i32
  }
  func.func @transform_5(%arg0: i32, %arg1: i32) -> (i32, i32) {
    %c0_i32 = arith.constant 0 : i32
    %c0_i32_0 = arith.constant 0 : i32
    %c0_i32_1 = arith.constant 0 : i32
    return %c0_i32, %c0_i32_0 : i32, i32
  }
  func.func @transform_6(%arg0: i32, %arg1: i32) -> (i32, i32) {
    %c0_i32 = arith.constant 0 : i32
    %c0_i32_0 = arith.constant 0 : i32
    %c0_i32_1 = arith.constant 0 : i32
    return %c0_i32, %c0_i32_0 : i32, i32
  }
  func.func @transform_7(%arg0: i32, %arg1: i32) -> (i32, i32, i32) {
    %c0_i32 = arith.constant 0 : i32
    %c0_i32_0 = arith.constant 0 : i32
    return %arg0, %arg1, %c0_i32 : i32, i32, i32
  }
}

module attributes {stable_mosaic.version = 11 : i64} {
  func.func @_double_conv_kernel(%arg0: i32, %arg1: i32, %arg2: memref<2x576x128xbf16, #tpu.memory_space<any>>, %arg3: memref<128x128xbf16, #tpu.memory_space<vmem>>, %arg4: memref<1x128xf32, #tpu.memory_space<vmem>>, %arg5: memref<1x128xf32, #tpu.memory_space<vmem>>, %arg6: memref<3x384x128xbf16, #tpu.memory_space<vmem>>, %arg7: memref<1x128xf32, #tpu.memory_space<vmem>>, %arg8: memref<1x128xf32, #tpu.memory_space<vmem>>, %arg9: memref<1x256x128xbf16, #tpu.memory_space<vmem>>, %arg10: memref<2x320x128xbf16, #tpu.memory_space<vmem>>, %arg11: memref<2x!tpu.dma_semaphore, #tpu.memory_space<semaphore_mem>>, %arg12: memref<256x384xbf16, #tpu.memory_space<vmem>>) attributes {dimension_semantics = [#tpu.dimension_semantics<parallel>, #tpu.dimension_semantics<arbitrary>], iteration_bounds = array<i64: 2, 2>, scalar_prefetch = 0 : i64, scratch_operands = 3 : i64, tpu.core_type = #tpu.core_type<tc>, window_params = [{}, {pipeline_mode = #tpu.pipeline_mode<synchronous>, transform_indices = @transform_1, window_bounds = array<i64: 128, 128>}, {pipeline_mode = #tpu.pipeline_mode<synchronous>, transform_indices = @transform_2, window_bounds = array<i64: 1, 128>}, {pipeline_mode = #tpu.pipeline_mode<synchronous>, transform_indices = @transform_3, window_bounds = array<i64: 1, 128>}, {pipeline_mode = #tpu.pipeline_mode<synchronous>, transform_indices = @transform_4, window_bounds = array<i64: 3, 384, 128>}, {pipeline_mode = #tpu.pipeline_mode<synchronous>, transform_indices = @transform_5, window_bounds = array<i64: 1, 128>}, {pipeline_mode = #tpu.pipeline_mode<synchronous>, transform_indices = @transform_6, window_bounds = array<i64: 1, 128>}, {transform_indices = @transform_7, window_bounds = array<i64: 1, 256, 128>}]} {
    %c0_i32 = arith.constant 0 : i32
    %0 = arith.cmpi eq, %arg1, %c0_i32 : i32
    %1 = arith.extui %0 : i1 to i32
    %c0_i32_0 = arith.constant 0 : i32
    %2 = arith.cmpi ne, %1, %c0_i32_0 : i32
    scf.if %2 {
      %c0_i32_53 = arith.constant 0 : i32
      %c0_i32_54 = arith.constant 0 : i32
      %c0_i32_55 = arith.constant 0 : i32
      %c0_i32_56 = arith.constant 0 : i32
      %101 = tpu.memref_slice %arg2[%arg0, %c0_i32_55, %c0_i32_56] : memref<2x576x128xbf16, #tpu.memory_space<any>> -> memref<1x320x128xbf16, #tpu.memory_space<any>>
      %102 = tpu.memref_squeeze %101 : memref<1x320x128xbf16, #tpu.memory_space<any>> -> memref<320x128xbf16, #tpu.memory_space<any>>
      %c0_i32_57 = arith.constant 0 : i32
      %c0_i32_58 = arith.constant 0 : i32
      %103 = tpu.memref_slice %arg10[%c0_i32_53, %c0_i32_57, %c0_i32_58] : memref<2x320x128xbf16, #tpu.memory_space<vmem>> -> memref<1x320x128xbf16, #tpu.memory_space<vmem>>
      %104 = tpu.memref_squeeze %103 : memref<1x320x128xbf16, #tpu.memory_space<vmem>> -> memref<320x128xbf16, #tpu.memory_space<vmem>>
      %105 = tpu.memref_slice %arg11[%c0_i32_54] : memref<2x!tpu.dma_semaphore, #tpu.memory_space<semaphore_mem>> -> memref<1x!tpu.dma_semaphore, #tpu.memory_space<semaphore_mem>>
      %106 = tpu.memref_squeeze %105 : memref<1x!tpu.dma_semaphore, #tpu.memory_space<semaphore_mem>> -> memref<!tpu.dma_semaphore, #tpu.memory_space<semaphore_mem>>
      tpu.enqueue_dma source(%102 : memref<320x128xbf16, #tpu.memory_space<any>>) target(%104 : memref<320x128xbf16, #tpu.memory_space<vmem>>) target_semaphore(%106 : memref<!tpu.dma_semaphore, #tpu.memory_space<semaphore_mem>>)
    } else {
    }
    %c2_i32 = arith.constant 2 : i32
    %c0_i32_1 = arith.constant 0 : i32
    %3 = arith.cmpi eq, %c2_i32, %c0_i32_1 : i32
    %c1_i32 = arith.constant 1 : i32
    %4 = arith.select %3, %c1_i32, %c2_i32 : i32
    %5 = arith.remsi %arg1, %4 : i32
    %c0_i32_2 = arith.constant 0 : i32
    %6 = arith.cmpi ne, %5, %c0_i32_2 : i32
    %c0_i32_3 = arith.constant 0 : i32
    %7 = arith.cmpi slt, %5, %c0_i32_3 : i32
    %c0_i32_4 = arith.constant 0 : i32
    %8 = arith.cmpi slt, %4, %c0_i32_4 : i32
    %9 = arith.xori %7, %8 : i1
    %10 = arith.andi %9, %6 : i1
    %11 = arith.addi %5, %4 : i32
    %12 = arith.select %10, %11, %5 : i32
    %c1_i32_5 = arith.constant 1 : i32
    %13 = arith.addi %arg1, %c1_i32_5 : i32
    %c2_i32_6 = arith.constant 2 : i32
    %14 = arith.cmpi slt, %13, %c2_i32_6 : i32
    %15 = arith.extui %14 : i1 to i32
    %c0_i32_7 = arith.constant 0 : i32
    %16 = arith.cmpi ne, %15, %c0_i32_7 : i32
    scf.if %16 {
      %c1_i32_53 = arith.constant 1 : i32
      %101 = arith.addi %arg1, %c1_i32_53 : i32
      %c1_i32_54 = arith.constant 1 : i32
      %102 = arith.subi %c1_i32_54, %12 : i32
      %c8_i32_55 = arith.constant 8 : i32
      %103 = arith.muli %101, %c8_i32_55 : i32
      %c32_i32 = arith.constant 32 : i32
      %104 = arith.muli %103, %c32_i32 : i32
      %c0_i32_56 = arith.constant 0 : i32
      %105 = tpu.memref_slice %arg2[%arg0, %104, %c0_i32_56] : memref<2x576x128xbf16, #tpu.memory_space<any>> -> memref<1x320x128xbf16, #tpu.memory_space<any>>
      %106 = tpu.memref_squeeze %105 : memref<1x320x128xbf16, #tpu.memory_space<any>> -> memref<320x128xbf16, #tpu.memory_space<any>>
      %c0_i32_57 = arith.constant 0 : i32
      %c0_i32_58 = arith.constant 0 : i32
      %107 = tpu.memref_slice %arg10[%102, %c0_i32_57, %c0_i32_58] : memref<2x320x128xbf16, #tpu.memory_space<vmem>> -> memref<1x320x128xbf16, #tpu.memory_space<vmem>>
      %108 = tpu.memref_squeeze %107 : memref<1x320x128xbf16, #tpu.memory_space<vmem>> -> memref<320x128xbf16, #tpu.memory_space<vmem>>
      %109 = tpu.memref_slice %arg11[%102] : memref<2x!tpu.dma_semaphore, #tpu.memory_space<semaphore_mem>> -> memref<1x!tpu.dma_semaphore, #tpu.memory_space<semaphore_mem>>
      %110 = tpu.memref_squeeze %109 : memref<1x!tpu.dma_semaphore, #tpu.memory_space<semaphore_mem>> -> memref<!tpu.dma_semaphore, #tpu.memory_space<semaphore_mem>>
      tpu.enqueue_dma source(%106 : memref<320x128xbf16, #tpu.memory_space<any>>) target(%108 : memref<320x128xbf16, #tpu.memory_space<vmem>>) target_semaphore(%110 : memref<!tpu.dma_semaphore, #tpu.memory_space<semaphore_mem>>)
    } else {
    }
    %c0_i32_8 = arith.constant 0 : i32
    %c0_i32_9 = arith.constant 0 : i32
    %17 = tpu.memref_slice %arg2[%arg0, %c0_i32_8, %c0_i32_9] : memref<2x576x128xbf16, #tpu.memory_space<any>> -> memref<1x320x128xbf16, #tpu.memory_space<any>>
    %18 = tpu.memref_squeeze %17 : memref<1x320x128xbf16, #tpu.memory_space<any>> -> memref<320x128xbf16, #tpu.memory_space<any>>
    %c0_i32_10 = arith.constant 0 : i32
    %c0_i32_11 = arith.constant 0 : i32
    %19 = tpu.memref_slice %arg10[%12, %c0_i32_10, %c0_i32_11] : memref<2x320x128xbf16, #tpu.memory_space<vmem>> -> memref<1x320x128xbf16, #tpu.memory_space<vmem>>
    %20 = tpu.memref_squeeze %19 : memref<1x320x128xbf16, #tpu.memory_space<vmem>> -> memref<320x128xbf16, #tpu.memory_space<vmem>>
    %21 = tpu.memref_slice %arg11[%12] : memref<2x!tpu.dma_semaphore, #tpu.memory_space<semaphore_mem>> -> memref<1x!tpu.dma_semaphore, #tpu.memory_space<semaphore_mem>>
    %22 = tpu.memref_squeeze %21 : memref<1x!tpu.dma_semaphore, #tpu.memory_space<semaphore_mem>> -> memref<!tpu.dma_semaphore, #tpu.memory_space<semaphore_mem>>
    tpu.wait_dma2 semaphore(%22 : memref<!tpu.dma_semaphore, #tpu.memory_space<semaphore_mem>>) src(%18 : memref<320x128xbf16, #tpu.memory_space<any>>) dst(%20 : memref<320x128xbf16, #tpu.memory_space<vmem>>)
    %23 = arith.index_cast %12 : i32 to index
    %c0 = arith.constant 0 : index
    %c0_12 = arith.constant 0 : index
    %24 = vector.load %arg10[%23, %c0, %c0_12] : memref<2x320x128xbf16, #tpu.memory_space<vmem>>, vector<1x320x128xbf16>
    %25 = vector.shape_cast %24 : vector<1x320x128xbf16> to vector<320x128xbf16>
    %c0_13 = arith.constant 0 : index
    %c0_14 = arith.constant 0 : index
    %26 = vector.load %arg3[%c0_13, %c0_14] : memref<128x128xbf16, #tpu.memory_space<vmem>>, vector<128x128xbf16>
    %cst = arith.constant dense<0.000000e+00> : vector<320x128xf32>
    %27 = tpu.matmul %25, %26, %cst {dimension_numbers = #tpu.dot_dimension_numbers<[1], [0], [0], [1], [0, 0, 1, 1], [], []>} : vector<320x128xbf16>, vector<128x128xbf16>, vector<320x128xf32> -> vector<320x128xf32>
    %c0_15 = arith.constant 0 : index
    %c0_16 = arith.constant 0 : index
    %28 = vector.load %arg4[%c0_15, %c0_16] : memref<1x128xf32, #tpu.memory_space<vmem>>, vector<1x128xf32>
    %29 = vector.broadcast %28 : vector<1x128xf32> to vector<320x128xf32>
    %30 = arith.mulf %27, %29 : vector<320x128xf32>
    %c0_17 = arith.constant 0 : index
    %c0_18 = arith.constant 0 : index
    %31 = vector.load %arg5[%c0_17, %c0_18] : memref<1x128xf32, #tpu.memory_space<vmem>>, vector<1x128xf32>
    %32 = vector.broadcast %31 : vector<1x128xf32> to vector<320x128xf32>
    %33 = arith.addf %30, %32 : vector<320x128xf32>
    %cst_19 = arith.constant 0.000000e+00 : f32
    %34 = vector.broadcast %cst_19 : f32 to vector<320x128xf32>
    %35 = arith.cmpf oge, %33, %34 : vector<320x128xf32>
    %cst_20 = arith.constant 0.00999999977 : f32
    %36 = vector.broadcast %cst_20 : f32 to vector<320x128xf32>
    %37 = arith.mulf %36, %33 : vector<320x128xf32>
    %38 = arith.select %35, %33, %37 : vector<320x128xi1>, vector<320x128xf32>
    %39 = vector.shape_cast %38 : vector<320x128xf32> to vector<10x32x128xf32>
    %40 = tpu.iota {dimensions = array<i32: 1>} : vector<1x32x1xi32>
    %41 = tpu.iota {dimensions = array<i32: 0>} : vector<10x1x1xi32>
    %c8_i32 = arith.constant 8 : i32
    %42 = arith.muli %arg1, %c8_i32 : i32
    %c1_i32_21 = arith.constant 1 : i32
    %43 = arith.subi %42, %c1_i32_21 : i32
    %44 = vector.broadcast %43 : i32 to vector<10x1x1xi32>
    %45 = arith.addi %41, %44 : vector<10x1x1xi32>
    %c1_i32_22 = arith.constant 1 : i32
    %46 = vector.broadcast %c1_i32_22 : i32 to vector<1x32x1xi32>
    %47 = arith.cmpi sge, %40, %46 : vector<1x32x1xi32>
    %c16_i32 = arith.constant 16 : i32
    %48 = vector.broadcast %c16_i32 : i32 to vector<1x32x1xi32>
    %49 = arith.cmpi sle, %40, %48 : vector<1x32x1xi32>
    %50 = arith.andi %47, %49 : vector<1x32x1xi1>
    %cst_23 = arith.constant 0.000000e+00 : f32
    %51 = vector.shape_cast %50 : vector<1x32x1xi1> to vector<1x32x1xi1>
    %52 = vector.broadcast %51 : vector<1x32x1xi1> to vector<10x32x128xi1>
    %53 = vector.broadcast %cst_23 : f32 to vector<10x32x128xf32>
    %54 = arith.select %52, %39, %53 : vector<10x32x128xi1>, vector<10x32x128xf32>
    %c0_i32_24 = arith.constant 0 : i32
    %55 = vector.broadcast %c0_i32_24 : i32 to vector<10x1x1xi32>
    %56 = arith.cmpi sge, %45, %55 : vector<10x1x1xi32>
    %c16_i32_25 = arith.constant 16 : i32
    %57 = vector.broadcast %c16_i32_25 : i32 to vector<10x1x1xi32>
    %58 = arith.cmpi slt, %45, %57 : vector<10x1x1xi32>
    %59 = arith.andi %56, %58 : vector<10x1x1xi1>
    %cst_26 = arith.constant 0.000000e+00 : f32
    %60 = vector.shape_cast %59 : vector<10x1x1xi1> to vector<10x1x1xi1>
    %61 = vector.broadcast %60 : vector<10x1x1xi1> to vector<10x32x128xi1>
    %62 = vector.broadcast %cst_26 : f32 to vector<10x32x128xf32>
    %63 = arith.select %61, %54, %62 : vector<10x32x128xi1>, vector<10x32x128xf32>
    %64 = vector.shape_cast %63 : vector<10x32x128xf32> to vector<320x128xf32>
    %65 = arith.truncf %64 : vector<320x128xf32> to vector<320x128xbf16>
    %66 = vector.extract_strided_slice %65 {offsets = [0, 0], sizes = [256, 128], strides = [1, 1]} : vector<320x128xbf16> to vector<256x128xbf16>
    %c0_27 = arith.constant 0 : index
    %c0_28 = arith.constant 0 : index
    %67 = vector.load %arg12[%c0_27, %c0_28] : memref<256x384xbf16, #tpu.memory_space<vmem>>, vector<256x128xbf16>
    tpu.vector_store %arg12[%c0_27, %c0_28], %66 {strides = array<i32>} : memref<256x384xbf16, #tpu.memory_space<vmem>>, vector<256x128xbf16>,
    %68 = vector.extract_strided_slice %65 {offsets = [32, 0], sizes = [256, 128], strides = [1, 1]} : vector<320x128xbf16> to vector<256x128xbf16>
    %c0_29 = arith.constant 0 : index
    %c128 = arith.constant 128 : index
    %69 = vector.load %arg12[%c0_29, %c128] : memref<256x384xbf16, #tpu.memory_space<vmem>>, vector<256x128xbf16>
    tpu.vector_store %arg12[%c0_29, %c128], %68 {strides = array<i32>} : memref<256x384xbf16, #tpu.memory_space<vmem>>, vector<256x128xbf16>,
    %70 = vector.extract_strided_slice %65 {offsets = [64, 0], sizes = [256, 128], strides = [1, 1]} : vector<320x128xbf16> to vector<256x128xbf16>
    %c0_30 = arith.constant 0 : index
    %c256 = arith.constant 256 : index
    %71 = vector.load %arg12[%c0_30, %c256] : memref<256x384xbf16, #tpu.memory_space<vmem>>, vector<256x128xbf16>
    tpu.vector_store %arg12[%c0_30, %c256], %70 {strides = array<i32>} : memref<256x384xbf16, #tpu.memory_space<vmem>>, vector<256x128xbf16>,
    %c0_31 = arith.constant 0 : index
    %c0_32 = arith.constant 0 : index
    %72 = vector.load %arg12[%c0_31, %c0_32] : memref<256x384xbf16, #tpu.memory_space<vmem>>, vector<256x384xbf16>
    %c1 = arith.constant 1 : index
    %c0_33 = arith.constant 0 : index
    %c0_34 = arith.constant 0 : index
    %73 = vector.load %arg6[%c1, %c0_33, %c0_34] : memref<3x384x128xbf16, #tpu.memory_space<vmem>>, vector<1x384x128xbf16>
    %74 = vector.shape_cast %73 : vector<1x384x128xbf16> to vector<384x128xbf16>
    %cst_35 = arith.constant dense<0.000000e+00> : vector<256x128xf32>
    %75 = tpu.matmul %72, %74, %cst_35 {dimension_numbers = #tpu.dot_dimension_numbers<[1], [0], [0], [1], [0, 0, 1, 1], [], []>} : vector<256x384xbf16>, vector<384x128xbf16>, vector<256x128xf32> -> vector<256x128xf32>
    %c0_36 = arith.constant 0 : index
    %c0_37 = arith.constant 0 : index
    %c0_38 = arith.constant 0 : index
    %76 = vector.load %arg6[%c0_36, %c0_37, %c0_38] : memref<3x384x128xbf16, #tpu.memory_space<vmem>>, vector<1x384x128xbf16>
    %77 = vector.shape_cast %76 : vector<1x384x128xbf16> to vector<384x128xbf16>
    %cst_39 = arith.constant dense<0.000000e+00> : vector<256x128xf32>
    %78 = tpu.matmul %72, %77, %cst_39 {dimension_numbers = #tpu.dot_dimension_numbers<[1], [0], [0], [1], [0, 0, 1, 1], [], []>} : vector<256x384xbf16>, vector<384x128xbf16>, vector<256x128xf32> -> vector<256x128xf32>
    %c1_i32_40 = arith.constant 1 : i32
    %79 = tpu.dynamic_rotate %78 by %c1_i32_40 dim 0 : vector<256x128xf32>, i32 -> vector<256x128xf32>
    %80 = arith.addf %75, %79 : vector<256x128xf32>
    %c2 = arith.constant 2 : index
    %c0_41 = arith.constant 0 : index
    %c0_42 = arith.constant 0 : index
    %81 = vector.load %arg6[%c2, %c0_41, %c0_42] : memref<3x384x128xbf16, #tpu.memory_space<vmem>>, vector<1x384x128xbf16>
    %82 = vector.shape_cast %81 : vector<1x384x128xbf16> to vector<384x128xbf16>
    %cst_43 = arith.constant dense<0.000000e+00> : vector<256x128xf32>
    %83 = tpu.matmul %72, %82, %cst_43 {dimension_numbers = #tpu.dot_dimension_numbers<[1], [0], [0], [1], [0, 0, 1, 1], [], []>} : vector<256x384xbf16>, vector<384x128xbf16>, vector<256x128xf32> -> vector<256x128xf32>
    %c255_i32 = arith.constant 255 : i32
    %84 = tpu.dynamic_rotate %83 by %c255_i32 dim 0 : vector<256x128xf32>, i32 -> vector<256x128xf32>
    %85 = arith.addf %80, %84 : vector<256x128xf32>
    %c0_44 = arith.constant 0 : index
    %c0_45 = arith.constant 0 : index
    %86 = vector.load %arg7[%c0_44, %c0_45] : memref<1x128xf32, #tpu.memory_space<vmem>>, vector<1x128xf32>
    %87 = vector.broadcast %86 : vector<1x128xf32> to vector<256x128xf32>
    %88 = arith.mulf %85, %87 : vector<256x128xf32>
    %c0_46 = arith.constant 0 : index
    %c0_47 = arith.constant 0 : index
    %89 = vector.load %arg8[%c0_46, %c0_47] : memref<1x128xf32, #tpu.memory_space<vmem>>, vector<1x128xf32>
    %90 = vector.broadcast %89 : vector<1x128xf32> to vector<256x128xf32>
    %91 = arith.addf %88, %90 : vector<256x128xf32>
    %cst_48 = arith.constant 0.000000e+00 : f32
    %92 = vector.broadcast %cst_48 : f32 to vector<256x128xf32>
    %93 = arith.cmpf oge, %91, %92 : vector<256x128xf32>
    %cst_49 = arith.constant 0.00999999977 : f32
    %94 = vector.broadcast %cst_49 : f32 to vector<256x128xf32>
    %95 = arith.mulf %94, %91 : vector<256x128xf32>
    %96 = arith.select %93, %91, %95 : vector<256x128xi1>, vector<256x128xf32>
    %97 = arith.truncf %96 : vector<256x128xf32> to vector<256x128xbf16>
    %c0_50 = arith.constant 0 : index
    %c0_51 = arith.constant 0 : index
    %c0_52 = arith.constant 0 : index
    %98 = vector.load %arg9[%c0_50, %c0_51, %c0_52] : memref<1x256x128xbf16, #tpu.memory_space<vmem>>, vector<1x256x128xbf16>
    %99 = vector.shape_cast %98 : vector<1x256x128xbf16> to vector<256x128xbf16>
    %100 = vector.shape_cast %97 : vector<256x128xbf16> to vector<1x256x128xbf16>
    tpu.vector_store %arg9[%c0_50, %c0_51, %c0_52], %100 {strides = array<i32>} : memref<1x256x128xbf16, #tpu.memory_space<vmem>>, vector<1x256x128xbf16>,
    return
  }
  func.func @transform_1(%arg0: i32, %arg1: i32) -> (i32, i32) {
    %c0_i32 = arith.constant 0 : i32
    %c0_i32_0 = arith.constant 0 : i32
    %c0_i32_1 = arith.constant 0 : i32
    return %c0_i32, %c0_i32_0 : i32, i32
  }
  func.func @transform_2(%arg0: i32, %arg1: i32) -> (i32, i32) {
    %c0_i32 = arith.constant 0 : i32
    %c0_i32_0 = arith.constant 0 : i32
    %c0_i32_1 = arith.constant 0 : i32
    return %c0_i32, %c0_i32_0 : i32, i32
  }
  func.func @transform_3(%arg0: i32, %arg1: i32) -> (i32, i32) {
    %c0_i32 = arith.constant 0 : i32
    %c0_i32_0 = arith.constant 0 : i32
    %c0_i32_1 = arith.constant 0 : i32
    return %c0_i32, %c0_i32_0 : i32, i32
  }
  func.func @transform_4(%arg0: i32, %arg1: i32) -> (i32, i32, i32) {
    %c0_i32 = arith.constant 0 : i32
    %c0_i32_0 = arith.constant 0 : i32
    %c0_i32_1 = arith.constant 0 : i32
    %c0_i32_2 = arith.constant 0 : i32
    return %c0_i32, %c0_i32_0, %c0_i32_1 : i32, i32, i32
  }
  func.func @transform_5(%arg0: i32, %arg1: i32) -> (i32, i32) {
    %c0_i32 = arith.constant 0 : i32
    %c0_i32_0 = arith.constant 0 : i32
    %c0_i32_1 = arith.constant 0 : i32
    return %c0_i32, %c0_i32_0 : i32, i32
  }
  func.func @transform_6(%arg0: i32, %arg1: i32) -> (i32, i32) {
    %c0_i32 = arith.constant 0 : i32
    %c0_i32_0 = arith.constant 0 : i32
    %c0_i32_1 = arith.constant 0 : i32
    return %c0_i32, %c0_i32_0 : i32, i32
  }
  func.func @transform_7(%arg0: i32, %arg1: i32) -> (i32, i32, i32) {
    %c0_i32 = arith.constant 0 : i32
    %c0_i32_0 = arith.constant 0 : i32
    return %arg0, %arg1, %c0_i32 : i32, i32, i32
  }
}

</mosaic_0001>

<bundles_post_ra>
// kernel: tpu_custom_call.1
= control target key start
LH: loop header
LB: loop body
LE: loop exit
PB: predicated region body
PF: predicated region fallthrough
CT: control target
= control target key end

     0   :  { %s6123_s0 = inlined_call_operand.hbm [shape: bf16[2,576,128], index: 0, kind: input, shape index: {}]   ;;  %s6124_s1 = inlined_call_operand.hbm [shape: bf16[128,128], index: 1, kind: input, shape index: {}]   ;;  %s6125_s2 = inlined_call_operand.vmem [shape: f32[1,128], index: 2, kind: input, shape index: {}]   ;;  %s6126_s3 = inlined_call_operand.vmem [shape: f32[1,128], index: 3, kind: input, shape index: {}]   ;;  %s6127_s4 = inlined_call_operand.hbm [shape: bf16[3,384,128], index: 4, kind: input, shape index: {}]   ;;  %s6128_s5 = inlined_call_operand.vmem [shape: f32[1,128], index: 5, kind: input, shape index: {}]   ;;  %s6129_s6 = inlined_call_operand.vmem [shape: f32[1,128], index: 6, kind: input, shape index: {}]   ;;  %s6130_s7 = inlined_call_operand.hbm [shape: bf16[2,512,128], index: 7, kind: output, shape index: {}]  }
   0x1   :  { %6172 = sst [smem:[#allocation70_spill]] %s6124_s1 }
   0x2   :  { %6173 = sst [smem:[#allocation71_spill]] %s6127_s4 }
   0x3   :  { %12 = vsyncpa [#allocation6], 0 }
   0x4   :  { %13 = vsyncpa [#allocation9], 0 }
   0x5   :  { %14 = vsyncpa [#allocation7], 0 }
   0x6   :  { %16 = vsyncpa [#allocation7 + $0x1], 0  ;;  %s4689_s24 = smov 0   ;;  %s4691_s25 = smov 0  }
   0x7   :  { %s4693_s26 = smov 0   ;;  %s4695_s27 = smov 0  }
   0x8   :  { %s4697_s28 = smov 0   ;;  %s4699_s29 = smov 0  }
   0x9   :  { %s4701_s30 = smov 0   ;;  %s4703_s8 = smov 0  }
   0xa LB: > { %6174 = sst [smem:[#allocation21_spill]] %s4631_s29  ;;  %s3416_s9 = sadd.s32 4294967295, %s4639_s8   ;;  %s4639_s8 = sphi %s4703_s8, %s22_s8   ;;  %s4635_s30 = sphi %s4701_s30, %s6329_s30   ;;  %s4631_s29 = sphi %s4699_s29, %s6328_s29   ;;  %s4627_s28 = sphi %s4697_s28, %s6327_s28   ;;  %s4623_s27 = sphi %s4695_s27, %s6333_s27   ;;  %s4619_s26 = sphi %s4693_s26, %s6332_s26   ;;  %s4615_s25 = sphi %s4691_s25, %s6331_s25   ;;  %s4611_s24 = sphi %s4689_s24, %s6330_s24  }
   0xb   : > { %6175 = sst [smem:[#allocation22_spill]] %s4635_s30  ;;  %s3417_s10 = sadd.s32 4294967294, %s4639_s8  }
   0xc   : > { %s31_s11 = sadd.s32 1, %s4631_s29  ;;  %s34_s12 = sadd.s32 1, %s4635_s30 }
   0xd   : > { %p32_p0 = scmp.ge.s32.totalorder %s31_s11, 2  ;;  %s169_s13 = sadd.s32 1, %s4619_s26 }
   0xe   : > { %p179_p1 = scmp.ne.s32.totalorder %s4619_s26, %s4615_s25  ;;  %p180_p2 = scmp.eq.s32.totalorder %s3416_s9, 3 }
   0xf   : > { %s6335_s11 = smov (%p32_p0, %s31_s11), 0  ;;  %s6337_s12 = smov (!%p32_p0, %s34_s12), %s4635_s30 }
  0x10   : > { %6176 = sst [smem:[#allocation23_spill]] %s6335_s11  ;;  %s165_s14 = ssub.s32 %s4631_s29, %s6335_s11 }
  0x11   : > { %p4741_p3 = por %p180_p2, %p179_p1  ;;  %p36_p4 = scmp.ge.s32.totalorder %s6337_s12, 2 }
  0x12   : > { %p185_p5 = scmp.ne.s32.totalorder %s4615_s25, %s4611_s24  ;;  %p186_p6 = scmp.eq.s32.totalorder %s3417_s10, 3 }
  0x13   : > { %p3418_p7 = scmp.ge.s32.totalorder %s4639_s8, 1  ;;  %s6339_s12 = smov (%p36_p4, %s6337_s12), 0 }
  0x14   : > { %6178 = sst [smem:[#allocation24_spill]] %s6339_s12  ;;  %p4750_p8 = por %p186_p6, %p185_p5 }
  0x15   : > { %p193_p9 = scmp.lt.s32.totalorder %s4639_s8, 5  ;;  %s164_s17 = ssub.s32 %s4635_s30, %s6339_s12 }
  0x16   : > { %s6179_s16 = scalar_select %p4750_p8, 1, 0 }
  0x17   : > { %s166_s18 = sor.u32 %s165_s14, %s164_s17  ;;  %p4757_p10 = pnand %p3418_p7, %p193_p9 }
  0x18   : > { %6180 = sst [smem:[#allocation25_spill]] %s6179_s16  ;;  %p167_p11 = scmp.eq.s32.totalorder %s166_s18, 0 }
  0x19   : > { %p4761_p12 = scmp.eq.s32.totalorder %s3416_s9, 0  ;;  %p4323_p13 = pneg %p4757_p10 }
  0x1a   : > { %s6183_s1 = sld [smem:[#allocation70_spill]]  ;;  %s4641_s14 = smov [#allocation5]  }
  0x1b   : > { %s4771_s10 = scalar_select %p167_p11, %s4619_s26, %s169_s13  }
  0x1c   : > { %s206_s17 = sshll.u32 %s4641_s14, 4  ;;  %p4324_p0 = pnand %p4761_p12, %p4323_p13  ;;  %s207_s17 = int_to_ptr.vmem [resolvable:$true] %s206_s17 }
  0x1d   : > { %6184 = sst [smem:[#allocation26_spill]] %s4771_s10  ;;  %s4642_s18 = smov 64  }
  0x1e   : > { %s4643_s9 = smov 4   ;;  %s6185_s4 = sld [smem:[#allocation71_spill]] }
  0x1f   : > { %s4644_s29 = smov [#allocation8]  }
  0x20   : > { %s204_s23 = sshll.u32 %s6183_s1, 4  ;;  %s226_s16 = sshll.u32 %s4644_s29, 4  ;;  %s205_s23 = int_to_ptr.hbm [resolvable:$true] %s204_s23  ;;  %s227_s16 = int_to_ptr.vmem [resolvable:$true] %s226_s16 }
  0x21   : > { %4326 = dma.hbm_to_vmem [thread:$0]  (!%p4324_p0), %s205_s23, 1024, %s207_s17, [#allocation6], %s4642_s18, %s4642_s18, %s4643_s9  }
  0x22   : > { %248 = sbr.rel (%p4757_p10) target bundleno = 1228 (0x4cc), region = 44 }
  0x24   : > { %s224_s30 = sshll.u32 %s6185_s4, 4  ;;  %s225_s30 = int_to_ptr.hbm [resolvable:$true] %s224_s30 }
  0x25   : > { %4329 = dma.hbm_to_vmem [thread:$0]  (!%p4324_p0), %s225_s30, 9216, %s227_s16, [#allocation9], %s4642_s18, %s4642_s18, %s4643_s9  }
  0x27   : > { %4596 = dma.done.wait (%p4761_p12), [#allocation6], 1024  }
  0x28   : > { %4598 = vsyncadd (%p4761_p12), [#allocation6], 4294966272 }
  0x29   : > { %4600 = dma.done.wait (%p4761_p12), [#allocation9], 9216  }
  0x2a   : > { %4602 = vsyncadd (%p4761_p12), [#allocation9], 4294958080  ;;  %s6136_s29 = sand.u32 1, %s4615_s25   ;;  %p4338_p1 = scmp.eq.s32.totalorder %s4623_s27, 0 }
  0x2b   : > { %s4791_s30 = sshll.u32 %s6136_s29, 7  ;;  %s4037_s11 = smul.u32 288, %s4627_s28 }
  0x2c   : > { %p300_p2 = scmp.lt.s32.totalorder %s4623_s27, 0  ;;  %s6137_s19 = smov [#allocation2]  }
  0x2d   : > { %s286_s16 = scalar_lea.hbm %s6123_s0, %s4037_s11  ;;  %s296_s20 = sshll.u32 %s6137_s19, 4  ;;  %s297_s20 = int_to_ptr.vmem [resolvable:$true] %s296_s20 }
  0x2e   : > { %s294_s21 = sshll.u32 %s286_s16, 4  ;;  %s301_s22 = ssub.s32 0, %s4623_s27  ;;  %s295_s21 = int_to_ptr.hbm [resolvable:$true] %s294_s21 }
  0x2f   : > { %s4479_s23 = sshra.s32 %s295_s21, 4  ;;  %s6138_s9 = scalar_lea.hbm %s6123_s0, 576  ;;  %s4480_s23 = int_to_ptr.hbm [resolvable:$true] %s4479_s23 }
  0x30   : > { %s4481_s14 = scalar_lea.hbm %s4480_s23, 160  ;;  %p4486_p7 = scmp.lt.s32.totalorder %s4480_s23, %s6123_s0 }
  0x31   : > { %p4482_p4 = scmp.ne.s32.totalorder %s4480_s23, %s4481_s14  ;;  %p4487_p9 = scmp.lt.s32.totalorder %s6138_s9, %s4481_s14 }
  0x33   : > { %p4483_p5 = pnand %p4482_p4, %p4338_p1  ;;  %p4488_p10 = por %p4487_p9, %p4486_p7 }
  0x35   : > { %p4484_p6 = pneg %p4483_p5 }
  0x37   : > { %p4489_p11 = pnand %p4488_p10, %p4484_p6 }
  0x39   : > { %4492 = shalt.err (!%p4489_p11)  }
  0x3a   : > { %4318 = dma.hbm_to_vmem [thread:$0]  (%p4338_p1), %s295_s21, 2560, %s297_s20, [#allocation3] }
  0x3b   : > { %s3427_s17 = smin.u32 %s4623_s27, %s301_s22  ;;  %s312_s18 = sadd.s32 1, %s4623_s27 }
  0x3c   : > { %s303_s12 = sand.u32 1, %s3427_s17   ;;  %s4038_s11 = sshll.u32 %s4623_s27, 8 }
  0x3d   : > { %s304_s23 = ssub.s32 0, %s303_s12  ;;  %s321_s13 = smul.u32 72, %s4627_s28 }
  0x3e   : > { %s6341_s23 = smov (!%p300_p2, %s304_s23), %s303_s12  ;;  %s4039_s16 = sadd.s32 256, %s4038_s11 }
  0x3f   : > { %p3429_p12 = scmp.lt.s32.totalorder %s6341_s23, 0  ;;  %s310_s14 = sadd.s32 2, %s6341_s23 }
  0x40   : > { %p4823_p13 = scmp.lt.s32.totalorder %s312_s18, 2  ;;  %s319_s20 = sshra.s32 %s4039_s16, 3 }
  0x41   : > { %s6343_s14 = smov (!%p3429_p12, %s310_s14), %s6341_s23  ;;  %s322_s22 = sadd.s32 %s321_s13, %s319_s20 }
  0x42   : > { %s317_s21 = ssub.s32 1, %s6343_s14  ;;  %s3432_s17 = sshll.u32 %s322_s22, 2 }
  0x43   : > { %s4040_s19 = smul.u32 160, %s317_s21  ;;  %s324_s1 = scalar_lea.hbm %s6123_s0, %s3432_s17 }
  0x44   : > { %s336_s4 = sshll.u32 %s324_s1, 4  ;;  %s4041_s18 = smul.u32 160, %s6343_s14  ;;  %s4831_s4 = int_to_ptr.hbm [resolvable:$true] %s336_s4 }
  0x45   : > { %s327_s23 = scalar_lea.vmem [#allocation2], %s4040_s19  ;;  %s328_s16 = scalar_lea.sflag [#allocation3], %s317_s21 }
  0x46   : > { %s4833_s11 = sshll.u32 %s327_s23, 4  ;;  %s4507_s10 = sshra.s32 %s4831_s4, 4  ;;  %s339_s11 = int_to_ptr.vmem [resolvable:$true] %s4833_s11  ;;  %s4508_s10 = int_to_ptr.hbm [resolvable:$true] %s4507_s10 }
  0x47   : > { %s4509_s13 = scalar_lea.hbm %s4508_s10, 160  ;;  %p4514_p4 = scmp.lt.s32.totalorder %s4508_s10, %s6123_s0 }
  0x48   : > { %p4510_p0 = scmp.ne.s32.totalorder %s4508_s10, %s4509_s13  ;;  %s6187_s19 = scalar_lea.hbm %s6123_s0, 576 }
  0x49   : > { %p4515_p5 = scmp.lt.s32.totalorder %s6187_s19, %s4509_s13 }
  0x4a   : > { %p4511_p1 = pnand %p4510_p0, %p4823_p13 }
  0x4b   : > { %p4516_p6 = por %p4515_p5, %p4514_p4 }
  0x4c   : > { %p4512_p2 = pneg %p4511_p1 }
  0x4e   : > { %p4517_p7 = pnand %p4516_p6, %p4512_p2 }
  0x50   : > { %4520 = shalt.err (!%p4517_p7)  }
  0x51   : > { %s4521_s21 = sshra.s32 %s339_s11, 4  ;;  %s6188_s12 = smov [#allocation2]   ;;  %s4522_s21 = int_to_ptr.vmem [resolvable:$true] %s4521_s21 }
  0x52   : > { %s4523_s17 = scalar_lea.vmem %s4522_s21, 160  ;;  %s4527_s23 = scalar_lea.vmem %s6188_s12, 320 }
  0x53   : > { %p4524_p9 = scmp.ne.s32.totalorder %s4522_s21, %s4523_s17  ;;  %p4528_p12 = scmp.lt.s32.totalorder %s4522_s21, [#allocation2] }
  0x54   : > { %p4529_p0 = scmp.lt.s32.totalorder %s4527_s23, %s4523_s17 }
  0x55   : > { %p4525_p10 = pnand %p4524_p9, %p4823_p13 }
  0x56   : > { %p4530_p1 = por %p4529_p0, %p4528_p12 }
  0x57   : > { %p4526_p11 = pneg %p4525_p10 }
  0x59   : > { %p4531_p8 = pnand %p4530_p1, %p4526_p11 }
  0x5b   : > { %4534 = shalt.err (!%p4531_p8)  }
  0x5c   : > { %4320 = dma.hbm_to_vmem [thread:$0]  (%p4823_p13), %s4831_s4, 2560, %s339_s11, %s328_s16 }
  0x5d   : > { %s4854_s10 = scalar_lea.vmem [#allocation10], %s4791_s30  ;;  %s4856_s13 = scalar_lea.vmem [#allocation2], %s4041_s18 }
  0x5e   : > { %s345_s9 = scalar_lea.sflag [#allocation3], %s6343_s14 }
  0x5f   : > { %4603 = dma.done.wait %s345_s9, 2560 }
  0x60   : > { %4604 = vsyncadd %s345_s9, 4294964736  ;;  %v4069_v0 = vld [vmem:[#allocation5 + $0x38] sm:$0xff]  ;;  %v4068_v1 = vld [vmem:[#allocation5 + $0x30] sm:$0xff]  ;;  %s3547_s4 = sshll.u32 %s4623_s27, 3  ;;  %v891_v25 = vlaneseq  ;;  %v4646_v26 = vmov 0.0|0.0   ;;  %s4030_s23 = sshll.u32 %s4623_s27, 5 }
  0x61   : > { %574 = vmatpush.bf16.msra.mxu0 %v4069_v0  ;;  %4285 = vmatpush.bf16.msra.mxu3 %v4069_v0  ;;  %v4067_v2 = vld [vmem:[#allocation5 + $0x28] sm:$0xff]  ;;  %v4066_v3 = vld [vmem:[#allocation5 + $0x20] sm:$0xff]  ;;  %v4065_v4 = vld [vmem:[#allocation5 + $0x18] sm:$0xff]  ;;  %s3548_s14 = sadd.s32 4294967295, %s3547_s4  ;;  %1101 = vst [vmem:[#allocation4 + $0x24] sm:$0xf] %v4646_v26 }
  0x62   : > { %v4064_v5 = vld [vmem:[#allocation5 + $0x10] sm:$0xff]  ;;  %v4063_v6 = vld [vmem:[#allocation5 + $0x8] sm:$0xff]  ;;  %v4062_v7 = vld [vmem:[#allocation5] sm:$0xff]  ;;  %1105 = vst [vmem:[#allocation4 + $0x54] sm:$0xf] %v4646_v26  ;;  %v4879_v30 = vstv %s3548_s14  ;;  %v4882_v32 = vshrl.u32 %v891_v25, 7 }
  0x63   : > { %v4042_v8 = vld [vmem:[%s4856_s13] sm:$0xff]  ;;  %v4043_v9 = vld [vmem:[%s4856_s13 + $0x8] sm:$0xff]  ;;  %v4044_v10 = vld [vmem:[%s4856_s13 + $0x10] sm:$0xff]  ;;  %1109 = vst [vmem:[#allocation4 + $0x84] sm:$0xf] %v4646_v26  ;;  %vm968_vm0 = vcmp.ge.s32.totalorder %v4879_v30, 0 }
  0x64   : > { %v4045_v11 = vld [vmem:[%s4856_s13 + $0x18] sm:$0xff]  ;;  %v4046_v12 = vld [vmem:[%s4856_s13 + $0x20] sm:$0xff]  ;;  %v4047_v13 = vld [vmem:[%s4856_s13 + $0x28] sm:$0xff]  ;;  %1113 = vst [vmem:[#allocation4 + $0xb4] sm:$0xf] %v4646_v26  ;;  %vm978_vm1 = vcmp.lt.s32.totalorder %v4879_v30, 16 }
  0x65   : > { %575 = vmatpush.bf16.msra.mxu0 %v4068_v1  ;;  %4286 = vmatpush.bf16.msra.mxu3 %v4068_v1  ;;  %v4149_v14 = vld [vmem:[#allocation8 + $0x38] sm:$0xff]  ;;  %v4048_v15 = vld [vmem:[%s4856_s13 + $0x30] sm:$0xff]  ;;  %v4147_v17 = vld [vmem:[#allocation8 + $0x28] sm:$0xff]  ;;  %1117 = vst [vmem:[#allocation4 + $0xe4] sm:$0xf] %v4646_v26  ;;  %vm908_vm3 = vcmp.ge.s32.totalorder %v4882_v32, 1 }
  0x66   : > { %1755 = vmatpush.bf16.msra.mxu1 %v4149_v14  ;;  %v4148_v16 = vld [vmem:[#allocation8 + $0x30] sm:$0xff]  ;;  %v4146_v18 = vld [vmem:[#allocation8 + $0x20] sm:$0xff]  ;;  %v4145_v19 = vld [vmem:[#allocation8 + $0x18] sm:$0xff]  ;;  %1121 = vst [vmem:[#allocation4 + $0x114] sm:$0xf] %v4646_v26  ;;  %v4903_v50 = vadd.s32 16, %v4882_v32 }
  0x67   : > { %v4049_v20 = vld [vmem:[%s4856_s13 + $0x38] sm:$0xff]  ;;  %v4144_v21 = vld [vmem:[#allocation8 + $0x10] sm:$0xff]  ;;  %v4143_v22 = vld [vmem:[#allocation8 + $0x8] sm:$0xff]  ;;  %1125 = vst [vmem:[#allocation4 + $0x144] sm:$0xf] %v4646_v26  ;;  %v899_v61 = vadd.s32 1, %v4879_v30 }
  0x68   : > { %v4142_v23 = vld [vmem:[#allocation8] sm:$0xff]  ;;  %1129 = vst [vmem:[#allocation4 + $0x174] sm:$0xf] %v4646_v26  ;;  %vm4888_vm4 = vmand %vm968_vm0, %vm978_vm1  ;;  %v4051_v45 = vld [vmem:[%s4856_s13 + $0x48] sm:$0xff]  ;;  %vm914_vm7 = vcmp.le.s32.totalorder %v4903_v50, 16  ;;  %v900_v35 = vadd.s32 2, %v4879_v30 }
  0x69   : > { %576 = vmatpush.bf16.msra.mxu0 %v4067_v2  ;;  %4287 = vmatpush.bf16.msra.mxu3 %v4067_v2  ;;  %v4871_v24 = vld [vmem:[%s6125_s2] ss:$0 sm:$0xff]  ;;  %1133 = vst [vmem:[#allocation4 + $0x28] sm:$0xf] %v4646_v26  ;;  %v4052_v62 = vld [vmem:[%s4856_s13 + $0x50] sm:$0xff]  ;;  %vm969_vm8 = vcmp.ge.s32.totalorder %v899_v61, 0 }
  0x6a   : > { %1756 = vmatpush.bf16.msra.mxu1 %v4148_v16  ;;  %v4876_v27 = vld [vmem:[%s6126_s3] ss:$0 sm:$0xff]  ;;  %1137 = vst [vmem:[#allocation4 + $0x58] sm:$0xf] %v4646_v26  ;;  %vm979_vm9 = vcmp.lt.s32.totalorder %v899_v61, 16  ;;  %vm970_vm14 = vcmp.ge.s32.totalorder %v900_v35, 0 }
  0x6b   : > { %v4050_v28 = vld [vmem:[%s4856_s13 + $0x40] sm:$0xff]  ;;  %1141 = vst [vmem:[#allocation4 + $0x88] sm:$0xf] %v4646_v26  ;;  %vm4918_vm11 = vmand %vm969_vm8, %vm979_vm9  ;;  %vm980_vm15 = vcmp.lt.s32.totalorder %v900_v35, 16  ;;  %v4125_v35 = vld [vmem:[#allocation8 + $0xf8] sm:$0xff]  ;;  %s3302_s30 = sshll.u32 %s4854_s10, 4  ;;  %s3303_s30 = int_to_ptr.vmem [resolvable:$true] %s3302_s30 }
  0x6c   : > { %1145 = vst [vmem:[#allocation4 + $0xb8] sm:$0xf] %v4646_v26  ;;  %vm4947_vm1 = vmand %vm970_vm14, %vm980_vm15  ;;  %v4189_v50 = vld [vmem:[#allocation8 + $0x238] sm:$0xff]  ;;  %s6322_s11 = sand.u32 1, %s4615_s25   ;;  %s4555_s19 = scalar_lea.hbm %s6130_s7, 512 }
  0x6d   : > { %577 = vmatpush.bf16.msra.mxu0 %v4066_v3  ;;  %4288 = vmatpush.bf16.msra.mxu3 %v4066_v3  ;;  %1149 = vst [vmem:[#allocation4 + $0xe8] sm:$0xf] %v4646_v26  ;;  %s3288_s18 = scalar_lea.sflag [#allocation7], %s6322_s11 }
  0x6e   : > { %1757 = vmatpush.bf16.msra.mxu1 %v4147_v17  ;;  %1153 = vst [vmem:[#allocation4 + $0x118] sm:$0xf] %v4646_v26 }
  0x6f   : > { %1157 = vst [vmem:[#allocation4 + $0x148] sm:$0xf] %v4646_v26 }
  0x70   : > { %1161 = vst [vmem:[#allocation4 + $0x178] sm:$0xf] %v4646_v26 }
  0x71   : > { %578 = vmatpush.bf16.msra.mxu0 %v4065_v4  ;;  %4289 = vmatpush.bf16.msra.mxu3 %v4065_v4  ;;  %1165 = vst [vmem:[#allocation4 + $0x2c] sm:$0xf] %v4646_v26 }
  0x72   : > { %1758 = vmatpush.bf16.msra.mxu1 %v4146_v18  ;;  %1169 = vst [vmem:[#allocation4 + $0x5c] sm:$0xf] %v4646_v26 }
  0x73   : > { %1173 = vst [vmem:[#allocation4 + $0x8c] sm:$0xf] %v4646_v26 }
  0x74   : > { %1177 = vst [vmem:[#allocation4 + $0xbc] sm:$0xf] %v4646_v26 }
  0x75   : > { %579 = vmatpush.bf16.msra.mxu0 %v4064_v5  ;;  %4290 = vmatpush.bf16.msra.mxu3 %v4064_v5  ;;  %1181 = vst [vmem:[#allocation4 + $0xec] sm:$0xf] %v4646_v26 }
  0x76   : > { %1759 = vmatpush.bf16.msra.mxu1 %v4145_v19  ;;  %1185 = vst [vmem:[#allocation4 + $0x11c] sm:$0xf] %v4646_v26 }
  0x77   : > { %1189 = vst [vmem:[#allocation4 + $0x14c] sm:$0xf] %v4646_v26 }
  0x78   : > { %1193 = vst [vmem:[#allocation4 + $0x17c] sm:$0xf] %v4646_v26 }
  0x79   : > { %580 = vmatpush.bf16.msra.mxu0 %v4063_v6  ;;  %4291 = vmatpush.bf16.msra.mxu3 %v4063_v6 }
  0x7a   : > { %1760 = vmatpush.bf16.msra.mxu1 %v4144_v21 }
  0x7d   : > { %581 = vmatpush.bf16.msra.mxu0 %v4062_v7  ;;  %4292 = vmatpush.bf16.msra.mxu3 %v4062_v7 }
  0x7e   : > { %1761 = vmatpush.bf16.msra.mxu1 %v4143_v22 }
  0x80   : > { %582 = vmatmul.bf16.vlgmr.msra.gmra.mxu0 %v4042_v8  ;;  %v4074_v8 = vld [vmem:[#allocation4 + $0x20] sm:$0xf0] }
  0x81   : > { %4293 = vmatpush.bf16.msrb.mxu3 %v4149_v14 }
  0x82   : > { %1762 = vmatpush.bf16.msra.mxu1 %v4142_v23 }
  0x85   : > { %4294 = vmatpush.bf16.msrb.mxu3 %v4148_v16  ;;  %v4053_v16 = vld [vmem:[%s4856_s13 + $0x58] sm:$0xff] }
  0x86   : > { %2231 = vmatpush.bf16.msrb.mxu1 %v4125_v35 }
  0x89   : > { %4295 = vmatpush.bf16.msrb.mxu3 %v4147_v17 }
  0x8d   : > { %4296 = vmatpush.bf16.msrb.mxu3 %v4146_v18 }
  0x90   : > { %587 = vmatmul.bf16.gmra.mxu0 %v4043_v9 }
  0x91   : > { %4297 = vmatpush.bf16.msrb.mxu3 %v4145_v19 }
  0x95   : > { %4298 = vmatpush.bf16.msrb.mxu3 %v4144_v21 }
  0x99   : > { %4299 = vmatpush.bf16.msrb.mxu3 %v4143_v22 }
  0x9d   : > { %4300 = vmatpush.bf16.msrb.mxu3 %v4142_v23 }
  0xa0   : > { %592 = vmatmul.bf16.gmra.mxu0 %v4044_v10 }
  0xb0   : > { %597 = vmatmul.bf16.gmra.mxu0 %v4045_v11 }
  0xc0   : > { %602 = vmatmul.bf16.gmra.mxu0 %v4046_v12 }
  0xd0   : > { %607 = vmatmul.bf16.gmra.mxu0 %v4047_v13 }
  0xe0   : > { %612 = vmatmul.bf16.gmra.mxu0 %v4048_v15 }
  0xf0   : > { %617 = vmatmul.bf16.gmra.mxu0 %v4049_v20 }
  0xfd   : > { %v583_v29 = vpop.f32.mrf.mxu0 }
  0xfe   : > { %v687_v31 = vmul.f32 %v4871_v24, %v583_v29 }
 0x100   : > { %v731_v33 = vadd.f32 %v4876_v27, %v687_v31  ;;  %622 = vmatmul.bf16.gmra.mxu0 %v4050_v28 }
 0x102   : > { %vm771_vm2 = vcmp.ge.f32.partialorder %v731_v33, 0.0  ;;  %v811_v34 = vmul.f32 0.01, %v731_v33 }
 0x104   : > { %v851_v36 = vsel %vm771_vm2, %v731_v33, %v811_v34 }
 0x105   : > { %v928_v37 = vsel %vm908_vm3, %v851_v36, 0.0  ;;  %v585_v38 = vpop.f32.mrf.mxu0  ;;  %v4054_v36 = vld [vmem:[%s4856_s13 + $0x60] sm:$0xff] }
 0x106   : > { %v1018_v39 = vsel %vm4888_vm4, %v928_v37, 0.0  ;;  %v688_v40 = vmul.f32 %v4871_v24, %v585_v38 }
 0x107   : > { %v1058_v41 = vpack.c.bf16 %v1018_v39, %v1018_v39 }
 0x108   : > { %v732_v42 = vadd.f32 %v4876_v27, %v688_v40 }
 0x109   : > { %1098 = vst [vmem:[#allocation4] sm:$0xf] %v1058_v41 }
 0x10a   : > { %vm772_vm5 = vcmp.ge.f32.partialorder %v732_v42, 0.0  ;;  %v812_v43 = vmul.f32 0.01, %v732_v42 }
 0x10c   : > { %v852_v44 = vsel %vm772_vm5, %v732_v42, %v812_v43 }
 0x10d   : > { %v1019_v46 = vsel %vm4888_vm4, %v852_v44, 0.0  ;;  %v588_v47 = vpop.f32.mrf.mxu0 }
 0x10e   : > { %v1059_v48 = vpack.c.bf16 %v1019_v46, %v1019_v46  ;;  %v689_v49 = vmul.f32 %v4871_v24, %v588_v47  ;;  %v4080_v46 = vld [vmem:[#allocation4 + $0x50] sm:$0xf0] }
 0x110   : > { %1099 = vst [vmem:[#allocation4 + $0xc] sm:$0xf] %v1059_v48  ;;  %v733_v51 = vadd.f32 %v4876_v27, %v689_v49  ;;  %627 = vmatmul.bf16.gmra.mxu0 %v4051_v45  ;;  %v3551_v58 = vld [vmem:[#allocation4] sm:$0xf] }
 0x112   : > { %vm773_vm6 = vcmp.ge.f32.partialorder %v733_v51, 0.0  ;;  %v813_v52 = vmul.f32 0.01, %v733_v51 }
 0x114   : > { %v853_v53 = vsel %vm773_vm6, %v733_v51, %v813_v52 }
 0x115   : > { %v930_v54 = vsel %vm914_vm7, %v853_v53, 0.0  ;;  %v590_v55 = vpop.f32.mrf.mxu0 }
 0x116   : > { %v1020_v56 = vsel %vm4888_vm4, %v930_v54, 0.0  ;;  %v4055_v55 = vld [vmem:[%s4856_s13 + $0x68] sm:$0xff] }
 0x117   : > { %v1060_v57 = vpack.c.bf16 %v1020_v56, %v1020_v56  ;;  %v4071_v59 = vld [vmem:[#allocation4 + $0x8] sm:$0xf0] }
 0x118   : > { %v4911_v60 = vor.u32 %v4071_v59, %v3551_v58 }
 0x119   : > { %1100 = vst [vmem:[#allocation4 + $0x18] sm:$0xf] %v1060_v57 }
 0x11a   : > { %1763 = vmatmul.bf16.vlgmr.msra.gmra.mxu1 %v4911_v60 }
 0x11d   : > { %v593_v63 = vpop.f32.mrf.mxu0 }
 0x11e   : > { %v691_v0 = vmul.f32 %v4871_v24, %v593_v63 }
 0x120   : > { %v735_v1 = vadd.f32 %v4876_v27, %v691_v0  ;;  %632 = vmatmul.bf16.gmra.mxu0 %v4052_v62  ;;  %v3563_v7 = vld [vmem:[#allocation4 + $0x18] sm:$0xf] }
 0x121   : > { %v4928_v13 = vor.u32 %v4074_v8, %v3563_v7  ;;  %v901_v7 = vadd.s32 3, %v4879_v30  ;;  %v4056_v8 = vld [vmem:[%s4856_s13 + $0x70] sm:$0xff] }
 0x122   : > { %vm775_vm10 = vcmp.ge.f32.partialorder %v735_v1, 0.0  ;;  %v815_v2 = vmul.f32 0.01, %v735_v1 }
 0x123   : > { %vm971_vm5 = vcmp.ge.s32.totalorder %v901_v7, 0  ;;  %vm981_vm6 = vcmp.lt.s32.totalorder %v901_v7, 16 }
 0x124   : > { %v855_v4 = vsel %vm775_vm10, %v735_v1, %v815_v2  ;;  %vm4976_vm9 = vmand %vm971_vm5, %vm981_vm6 }
 0x125   : > { %v932_v5 = vsel %vm908_vm3, %v855_v4, 0.0  ;;  %v595_v6 = vpop.f32.mrf.mxu0 }
 0x126   : > { %v1022_v9 = vsel %vm4918_vm11, %v932_v5, 0.0  ;;  %v692_v10 = vmul.f32 %v4871_v24, %v595_v6 }
 0x127   : > { %v1062_v11 = vpack.c.bf16 %v1022_v9, %v1022_v9 }
 0x128   : > { %v736_v12 = vadd.f32 %v4876_v27, %v692_v10 }
 0x129   : > { %1102 = vst [vmem:[#allocation4 + $0x30] sm:$0xf] %v1062_v11 }
 0x12a   : > { %1130 = vst [vmem:[#allocation4 + $0x4] sm:$0xf] %v1062_v11  ;;  %vm776_vm12 = vcmp.ge.f32.partialorder %v736_v12, 0.0  ;;  %v816_v14 = vmul.f32 0.01, %v736_v12  ;;  %1768 = vmatmul.bf16.gmra.mxu1 %v4928_v13 }
 0x12c   : > { %v856_v15 = vsel %vm776_vm12, %v736_v12, %v816_v14  ;;  %v4157_v12 = vld [vmem:[#allocation8 + $0x78] sm:$0xff] }
 0x12d   : > { %v1023_v17 = vsel %vm4918_vm11, %v856_v15, 0.0  ;;  %v598_v18 = vpop.f32.mrf.mxu0  ;;  %1844 = vmatpush.bf16.msrb.mxu0 %v4157_v12  ;;  %4301 = vmatpush.bf16.msra.mxu2 %v4157_v12 }
 0x12e   : > { %v1063_v19 = vpack.c.bf16 %v1023_v17, %v1023_v17  ;;  %v693_v20 = vmul.f32 %v4871_v24, %v598_v18 }
 0x130   : > { %1103 = vst [vmem:[#allocation4 + $0x3c] sm:$0xf] %v1063_v19  ;;  %v737_v21 = vadd.f32 %v4876_v27, %v693_v20  ;;  %637 = vmatmul.bf16.gmra.mxu0 %v4053_v16  ;;  %v3575_v31 = vld [vmem:[#allocation4 + $0x30] sm:$0xf] }
 0x131   : > { %1131 = vst [vmem:[#allocation4 + $0x10] sm:$0xf] %v1063_v19  ;;  %v4060_v16 = vld [vmem:[%s4856_s13 + $0x90] sm:$0xff] }
 0x132   : > { %vm777_vm13 = vcmp.ge.f32.partialorder %v737_v21, 0.0  ;;  %v817_v22 = vmul.f32 0.01, %v737_v21  ;;  %672 = vmatmul.bf16.vlgmr.msra.gmra.mxu3 %v4060_v16  ;;  %v4092_v16 = vld [vmem:[#allocation4 + $0xb0] sm:$0xf0] }
 0x134   : > { %v857_v23 = vsel %vm777_vm13, %v737_v21, %v817_v22  ;;  %v4086_v21 = vld [vmem:[#allocation4 + $0x80] sm:$0xf0]  ;;  %v4156_v22 = vld [vmem:[#allocation8 + $0x70] sm:$0xff] }
 0x135   : > { %v934_v25 = vsel %vm914_vm7, %v857_v23, 0.0  ;;  %v600_v26 = vpop.f32.mrf.mxu0  ;;  %1845 = vmatpush.bf16.msrb.mxu0 %v4156_v22  ;;  %4302 = vmatpush.bf16.msra.mxu2 %v4156_v22 }
 0x136   : > { %v1024_v28 = vsel %vm4918_vm11, %v934_v25, 0.0 }
 0x137   : > { %v1064_v29 = vpack.c.bf16 %v1024_v28, %v1024_v28  ;;  %v4077_v33 = vld [vmem:[#allocation4 + $0x38] sm:$0xf0] }
 0x138   : > { %v4940_v34 = vor.u32 %v4077_v33, %v3575_v31  ;;  %v4155_v31 = vld [vmem:[#allocation8 + $0x68] sm:$0xff] }
 0x139   : > { %1104 = vst [vmem:[#allocation4 + $0x48] sm:$0xf] %v1064_v29  ;;  %1846 = vmatpush.bf16.msrb.mxu0 %v4155_v31  ;;  %4303 = vmatpush.bf16.msra.mxu2 %v4155_v31 }
 0x13a   : > { %1132 = vst [vmem:[#allocation4 + $0x1c] sm:$0xf] %v1064_v29  ;;  %1773 = vmatmul.bf16.gmra.mxu1 %v4940_v34 }
 0x13d   : > { %v603_v37 = vpop.f32.mrf.mxu0 }
 0x13e   : > { %v695_v38 = vmul.f32 %v4871_v24, %v603_v37  ;;  %v4057_v37 = vld [vmem:[%s4856_s13 + $0x78] sm:$0xff] }
 0x140   : > { %v739_v39 = vadd.f32 %v4876_v27, %v695_v38  ;;  %642 = vmatmul.bf16.gmra.mxu0 %v4054_v36  ;;  %v3587_v45 = vld [vmem:[#allocation4 + $0x48] sm:$0xf] }
 0x141   : > { %v4957_v52 = vor.u32 %v4080_v46, %v3587_v45  ;;  %v4153_v45 = vld [vmem:[#allocation8 + $0x58] sm:$0xff] }
 0x142   : > { %vm779_vm0 = vcmp.ge.f32.partialorder %v739_v39, 0.0  ;;  %v819_v40 = vmul.f32 0.01, %v739_v39 }
 0x144   : > { %v859_v42 = vsel %vm779_vm0, %v739_v39, %v819_v40  ;;  %v4154_v40 = vld [vmem:[#allocation8 + $0x60] sm:$0xff] }
 0x145   : > { %v936_v43 = vsel %vm908_vm3, %v859_v42, 0.0  ;;  %v605_v44 = vpop.f32.mrf.mxu0  ;;  %1847 = vmatpush.bf16.msrb.mxu0 %v4154_v40  ;;  %4304 = vmatpush.bf16.msra.mxu2 %v4154_v40 }
 0x146   : > { %v1026_v47 = vsel %vm4947_vm1, %v936_v43, 0.0  ;;  %v696_v48 = vmul.f32 %v4871_v24, %v605_v44  ;;  %v4124_v43 = vld [vmem:[#allocation8 + $0xf0] sm:$0xff] }
 0x147   : > { %v1066_v49 = vpack.c.bf16 %v1026_v47, %v1026_v47  ;;  %2232 = vmatpush.bf16.msrb.mxu1 %v4124_v43  ;;  %v4061_v47 = vld [vmem:[%s4856_s13 + $0x98] sm:$0xff] }
 0x148   : > { %v740_v51 = vadd.f32 %v4876_v27, %v696_v48  ;;  %v4123_v48 = vld [vmem:[#allocation8 + $0xe8] sm:$0xff]  ;;  %677 = vmatmul.bf16.gmra.mxu3 %v4061_v47 }
 0x149   : > { %1106 = vst [vmem:[#allocation4 + $0x60] sm:$0xf] %v1066_v49  ;;  %1848 = vmatpush.bf16.msrb.mxu0 %v4153_v45  ;;  %4305 = vmatpush.bf16.msra.mxu2 %v4153_v45 }
 0x14a   : > { %1134 = vst [vmem:[#allocation4 + $0x34] sm:$0xf] %v1066_v49  ;;  %vm780_vm2 = vcmp.ge.f32.partialorder %v740_v51, 0.0  ;;  %v820_v53 = vmul.f32 0.01, %v740_v51  ;;  %1778 = vmatmul.bf16.gmra.mxu1 %v4957_v52 }
 0x14b   : > { %1162 = vst [vmem:[#allocation4 + $0x8] sm:$0xf] %v1066_v49  ;;  %2233 = vmatpush.bf16.msrb.mxu1 %v4123_v48  ;;  %v3553_v48 = vld [vmem:[#allocation4 + $0xc] sm:$0xf0] }
 0x14c   : > { %v860_v54 = vsel %vm780_vm2, %v740_v51, %v820_v53 }
 0x14d   : > { %v1027_v56 = vsel %vm4947_vm1, %v860_v54, 0.0  ;;  %v608_v57 = vpop.f32.mrf.mxu0  ;;  %v4152_v54 = vld [vmem:[#allocation8 + $0x50] sm:$0xff] }
 0x14e   : > { %v1067_v58 = vpack.c.bf16 %v1027_v56, %v1027_v56  ;;  %v697_v59 = vmul.f32 %v4871_v24, %v608_v57  ;;  %1849 = vmatpush.bf16.msrb.mxu0 %v4152_v54  ;;  %4306 = vmatpush.bf16.msra.mxu2 %v4152_v54  ;;  %v4070_v54 = vld [vmem:[#allocation4 + $0x4] sm:$0xf] }
 0x150   : > { %1107 = vst [vmem:[#allocation4 + $0x6c] sm:$0xf] %v1067_v58  ;;  %v741_v61 = vadd.f32 %v4876_v27, %v697_v59  ;;  %647 = vmatmul.bf16.gmra.mxu0 %v4055_v55  ;;  %v3599_v4 = vld [vmem:[#allocation4 + $0x60] sm:$0xf] }
 0x151   : > { %1135 = vst [vmem:[#allocation4 + $0x40] sm:$0xf] %v1067_v58  ;;  %v4122_v59 = vld [vmem:[#allocation8 + $0xe0] sm:$0xff] }
 0x152   : > { %1163 = vst [vmem:[#allocation4 + $0x14] sm:$0xf] %v1067_v58  ;;  %vm781_vm4 = vcmp.ge.f32.partialorder %v741_v61, 0.0  ;;  %v821_v62 = vmul.f32 0.01, %v741_v61  ;;  %2234 = vmatpush.bf16.msrb.mxu1 %v4122_v59 }
 0x153   : > { %v3637_v59 = vld [vmem:[#allocation4 + $0xb4] sm:$0xf0] }
 0x154   : > { %v861_v63 = vsel %vm781_vm4, %v741_v61, %v821_v62  ;;  %v4151_v62 = vld [vmem:[#allocation8 + $0x48] sm:$0xff] }
 0x155   : > { %v938_v0 = vsel %vm914_vm7, %v861_v63, 0.0  ;;  %v610_v1 = vpop.f32.mrf.mxu0  ;;  %1850 = vmatpush.bf16.msrb.mxu0 %v4151_v62  ;;  %v4121_v63 = vld [vmem:[#allocation8 + $0xd8] sm:$0xff]  ;;  %4307 = vmatpush.bf16.msra.mxu2 %v4151_v62 }
 0x156   : > { %v1028_v2 = vsel %vm4947_vm1, %v938_v0, 0.0  ;;  %v902_v0 = vadd.s32 4, %v4879_v30  ;;  %v4058_v1 = vld [vmem:[%s4856_s13 + $0x80] sm:$0xff]  ;;  %2235 = vmatpush.bf16.msrb.mxu1 %v4121_v63 }
 0x157   : > { %v1068_v3 = vpack.c.bf16 %v1028_v2, %v1028_v2  ;;  %v4083_v5 = vld [vmem:[#allocation4 + $0x68] sm:$0xf0] }
 0x158   : > { %v4969_v6 = vor.u32 %v4083_v5, %v3599_v4  ;;  %v4120_v5 = vld [vmem:[#allocation8 + $0xd0] sm:$0xff]  ;;  %vm972_vm12 = vcmp.ge.s32.totalorder %v902_v0, 0  ;;  %vm982_vm13 = vcmp.lt.s32.totalorder %v902_v0, 16 }
 0x159   : > { %1108 = vst [vmem:[#allocation4 + $0x78] sm:$0xf] %v1068_v3  ;;  %vm5007_vm15 = vmand %vm972_vm12, %vm982_vm13 }
 0x15a   : > { %1136 = vst [vmem:[#allocation4 + $0x4c] sm:$0xf] %v1068_v3  ;;  %1783 = vmatmul.bf16.gmra.mxu1 %v4969_v6 }
 0x15b   : > { %1164 = vst [vmem:[#allocation4 + $0x20] sm:$0xf] %v1068_v3  ;;  %v4150_v3 = vld [vmem:[#allocation8 + $0x40] sm:$0xff]  ;;  %2236 = vmatpush.bf16.msrb.mxu1 %v4120_v5 }
 0x15c   : > { %1851 = vmatpush.bf16.msrb.mxu0 %v4150_v3  ;;  %4308 = vmatpush.bf16.msra.mxu2 %v4150_v3 }
 0x15d   : > { %v613_v9 = vpop.f32.mrf.mxu0 }
 0x15e   : > { %v699_v10 = vmul.f32 %v4871_v24, %v613_v9 }
 0x160   : > { %v743_v11 = vadd.f32 %v4876_v27, %v699_v10  ;;  %652 = vmatmul.bf16.gmra.mxu0 %v4056_v8  ;;  %v3611_v20 = vld [vmem:[#allocation4 + $0x78] sm:$0xf]  ;;  %v4119_v10 = vld [vmem:[#allocation8 + $0xc8] sm:$0xff] }
 0x161   : > { %v4987_v29 = vor.u32 %v4086_v21, %v3611_v20  ;;  %2237 = vmatpush.bf16.msrb.mxu1 %v4119_v10  ;;  %v4118_v20 = vld [vmem:[#allocation8 + $0xc0] sm:$0xff] }
 0x162   : > { %vm783_vm8 = vcmp.ge.f32.partialorder %v743_v11, 0.0  ;;  %v823_v14 = vmul.f32 0.01, %v743_v11 }
 0x164   : > { %v863_v17 = vsel %vm783_vm8, %v743_v11, %v823_v14 }
 0x165   : > { %v940_v18 = vsel %vm908_vm3, %v863_v17, 0.0  ;;  %v615_v19 = vpop.f32.mrf.mxu0  ;;  %2238 = vmatpush.bf16.msrb.mxu1 %v4118_v20 }
 0x166   : > { %v1030_v23 = vsel %vm4976_vm9, %v940_v18, 0.0  ;;  %v700_v25 = vmul.f32 %v4871_v24, %v615_v19 }
 0x167   : > { %v1070_v26 = vpack.c.bf16 %v1030_v23, %v1030_v23 }
 0x168   : > { %v744_v28 = vadd.f32 %v4876_v27, %v700_v25 }
 0x169   : > { %1110 = vst [vmem:[#allocation4 + $0x90] sm:$0xf] %v1070_v26 }
 0x16a   : > { %1138 = vst [vmem:[#allocation4 + $0x64] sm:$0xf] %v1070_v26  ;;  %vm784_vm10 = vcmp.ge.f32.partialorder %v744_v28, 0.0  ;;  %v824_v33 = vmul.f32 0.01, %v744_v28  ;;  %1788 = vmatmul.bf16.gmra.mxu1 %v4987_v29 }
 0x16b   : > { %1166 = vst [vmem:[#allocation4 + $0x38] sm:$0xf] %v1070_v26  ;;  %v4059_v26 = vld [vmem:[%s4856_s13 + $0x88] sm:$0xff]  ;;  %s4031_s13 = sshll.u32 %s4627_s28, 6 }
 0x16c   : > { %v864_v36 = vsel %vm784_vm10, %v744_v28, %v824_v33  ;;  %s3299_s9 = sadd.s32 %s4031_s13, %s4030_s23 }
 0x16d   : > { %v1031_v38 = vsel %vm4976_vm9, %v864_v36, 0.0  ;;  %v618_v39 = vpop.f32.mrf.mxu0  ;;  %s4032_s27 = sshll.u32 %s3299_s9, 2 }
 0x16e   : > { %v1071_v41 = vpack.c.bf16 %v1031_v38, %v1031_v38  ;;  %v701_v42 = vmul.f32 %v4871_v24, %v618_v39  ;;  %v4133_v38 = vld [vmem:[#allocation8 + $0x138] sm:$0xff]  ;;  %s3301_s29 = scalar_lea.hbm %s6130_s7, %s4032_s27 }
 0x16f   : > { %2320 = vmatpush.bf16.msrb.mxu2 %v4133_v38  ;;  %s3304_s14 = sshll.u32 %s3301_s29, 4  ;;  %s3305_s14 = int_to_ptr.hbm [resolvable:$true] %s3304_s14 }
 0x170   : > { %1111 = vst [vmem:[#allocation4 + $0x9c] sm:$0xf] %v1071_v41  ;;  %v745_v44 = vadd.f32 %v4876_v27, %v701_v42  ;;  %657 = vmatmul.bf16.gmra.mxu0 %v4057_v37  ;;  %v3623_v57 = vld [vmem:[#allocation4 + $0x90] sm:$0xf]  ;;  %s4549_s16 = sshra.s32 %s3305_s14, 4  ;;  %s4550_s16 = int_to_ptr.hbm [resolvable:$true] %s4549_s16 }
 0x171   : > { %1139 = vst [vmem:[#allocation4 + $0x70] sm:$0xf] %v1071_v41  ;;  %s4551_s20 = scalar_lea.hbm %s4550_s16, 128  ;;  %p4556_p4 = scmp.lt.s32.totalorder %s4550_s16, %s6130_s7 }
 0x172   : > { %1167 = vst [vmem:[#allocation4 + $0x44] sm:$0xf] %v1071_v41  ;;  %vm785_vm11 = vcmp.ge.f32.partialorder %v745_v44, 0.0  ;;  %v825_v46 = vmul.f32 0.01, %v745_v44  ;;  %p4552_p8 = scmp.ne.s32.totalorder %s4550_s16, %s4551_s20  ;;  %p4557_p5 = scmp.lt.s32.totalorder %s4555_s19, %s4551_s20 }
 0x174   : > { %v865_v49 = vsel %vm785_vm11, %v745_v44, %v825_v46  ;;  %p4553_p13 = pnand %p4552_p8, %p4741_p3  ;;  %p4558_p6 = por %p4557_p5, %p4556_p4 }
 0x175   : > { %v942_v51 = vsel %vm914_vm7, %v865_v49, 0.0  ;;  %v620_v53 = vpop.f32.mrf.mxu0  ;;  %v4132_v49 = vld [vmem:[#allocation8 + $0x130] sm:$0xff] }
 0x176   : > { %v1032_v55 = vsel %vm4976_vm9, %v942_v51, 0.0  ;;  %v903_v51 = vadd.s32 5, %v4879_v30  ;;  %2321 = vmatpush.bf16.msrb.mxu2 %v4132_v49  ;;  %v4165_v49 = vld [vmem:[#allocation8 + $0xb8] sm:$0xff]  ;;  %p4554_p2 = pneg %p4553_p13 }
 0x177   : > { %v1072_v56 = vpack.c.bf16 %v1032_v55, %v1032_v55  ;;  %v4089_v58 = vld [vmem:[#allocation4 + $0x98] sm:$0xf0]  ;;  %1933 = vmatpush.bf16.msra.mxu3 %v4165_v49 }
 0x178   : > { %v5000_v61 = vor.u32 %v4089_v58, %v3623_v57  ;;  %v4098_v57 = vld [vmem:[#allocation4 + $0xe0] sm:$0xf0]  ;;  %vm973_vm2 = vcmp.ge.s32.totalorder %v903_v51, 0  ;;  %vm983_vm4 = vcmp.lt.s32.totalorder %v903_v51, 16  ;;  %v4131_v51 = vld [vmem:[#allocation8 + $0x128] sm:$0xff]  ;;  %p4559_p7 = pnand %p4558_p6, %p4554_p2 }
 0x179   : > { %1112 = vst [vmem:[#allocation4 + $0xa8] sm:$0xf] %v1072_v56  ;;  %vm5046_vm6 = vmand %vm973_vm2, %vm983_vm4 }
 0x17a   : > { %1140 = vst [vmem:[#allocation4 + $0x7c] sm:$0xf] %v1072_v56  ;;  %1793 = vmatmul.bf16.gmra.mxu1 %v5000_v61  ;;  %2322 = vmatpush.bf16.msrb.mxu2 %v4131_v51  ;;  %v4163_v51 = vld [vmem:[#allocation8 + $0xa8] sm:$0xff] }
 0x17b   : > { %1168 = vst [vmem:[#allocation4 + $0x50] sm:$0xf] %v1072_v56  ;;  %v5036_v56 = vor.u32 %v4070_v54, %v3553_v48  ;;  %v3577_v48 = vld [vmem:[#allocation4 + $0x3c] sm:$0xf0] }
 0x17d   : > { %v623_v2 = vpop.f32.mrf.mxu0 }
 0x17e   : > { %v703_v4 = vmul.f32 %v4871_v24, %v623_v2 }
 0x180   : > { %v747_v7 = vadd.f32 %v4876_v27, %v703_v4  ;;  %662 = vmatmul.bf16.gmra.mxu0 %v4058_v1  ;;  %v3635_v15 = vld [vmem:[#allocation4 + $0xa8] sm:$0xf]  ;;  %v3601_v4 = vld [vmem:[#allocation4 + $0x6c] sm:$0xf0] }
 0x181   : > { %v5017_v22 = vor.u32 %v4092_v16, %v3635_v15  ;;  %v4073_v16 = vld [vmem:[#allocation4 + $0x1c] sm:$0xf] }
 0x182   : > { %vm787_vm14 = vcmp.ge.f32.partialorder %v747_v7, 0.0  ;;  %v827_v8 = vmul.f32 0.01, %v747_v7 }
 0x184   : > { %v867_v11 = vsel %vm787_vm14, %v747_v7, %v827_v8 }
 0x185   : > { %v944_v12 = vsel %vm908_vm3, %v867_v11, 0.0  ;;  %v625_v14 = vpop.f32.mrf.mxu0 }
 0x186   : > { %v1034_v17 = vsel %vm5007_vm15, %v944_v12, 0.0  ;;  %v704_v18 = vmul.f32 %v4871_v24, %v625_v14 }
 0x187   : > { %v1074_v19 = vpack.c.bf16 %v1034_v17, %v1034_v17  ;;  %v3565_v17 = vld [vmem:[#allocation4 + $0x24] sm:$0xf0] }
 0x188   : > { %v748_v21 = vadd.f32 %v4876_v27, %v704_v18 }
 0x189   : > { %1114 = vst [vmem:[#allocation4 + $0xc0] sm:$0xf] %v1074_v19 }
 0x18a   : > { %1142 = vst [vmem:[#allocation4 + $0x94] sm:$0xf] %v1074_v19  ;;  %vm788_vm0 = vcmp.ge.f32.partialorder %v748_v21, 0.0  ;;  %v828_v23 = vmul.f32 0.01, %v748_v21  ;;  %1798 = vmatmul.bf16.gmra.mxu1 %v5017_v22 }
 0x18b   : > { %1170 = vst [vmem:[#allocation4 + $0x68] sm:$0xf] %v1074_v19 }
 0x18c   : > { %v868_v25 = vsel %vm788_vm0, %v748_v21, %v828_v23 }
 0x18d   : > { %v1035_v28 = vsel %vm5007_vm15, %v868_v25, 0.0  ;;  %v628_v31 = vpop.f32.mrf.mxu0  ;;  %v5064_v25 = vor.u32 %v4073_v16, %v3565_v17  ;;  %v3661_v16 = vld [vmem:[#allocation4 + $0xe4] sm:$0xf0] }
 0x18e   : > { %v1075_v33 = vpack.c.bf16 %v1035_v28, %v1035_v28  ;;  %v705_v35 = vmul.f32 %v4871_v24, %v628_v31 }
 0x190   : > { %1115 = vst [vmem:[#allocation4 + $0xcc] sm:$0xf] %v1075_v33  ;;  %v749_v36 = vadd.f32 %v4876_v27, %v705_v35  ;;  %667 = vmatmul.bf16.gmra.mxu0 %v4059_v26  ;;  %v3647_v45 = vld [vmem:[#allocation4 + $0xc0] sm:$0xf] }
 0x191   : > { %1143 = vst [vmem:[#allocation4 + $0xa0] sm:$0xf] %v1075_v33 }
 0x192   : > { %1171 = vst [vmem:[#allocation4 + $0x74] sm:$0xf] %v1075_v33  ;;  %vm789_vm1 = vcmp.ge.f32.partialorder %v749_v36, 0.0  ;;  %v829_v37 = vmul.f32 0.01, %v749_v36 }
 0x194   : > { %v869_v39 = vsel %vm789_vm1, %v749_v36, %v829_v37 }
 0x195   : > { %v946_v40 = vsel %vm914_vm7, %v869_v39, 0.0  ;;  %v630_v41 = vpop.f32.mrf.mxu0 }
 0x196   : > { %v1036_v42 = vsel %vm5007_vm15, %v946_v40, 0.0 }
 0x197   : > { %v1076_v43 = vpack.c.bf16 %v1036_v42, %v1036_v42  ;;  %v5029_v44 = vpop.f32.mrf.mxu1  ;;  %v4095_v46 = vld [vmem:[#allocation4 + $0xc8] sm:$0xf0] }
 0x198   : > { %v5031_v47 = vor.u32 %v4095_v46, %v3647_v45 }
 0x199   : > { %1116 = vst [vmem:[#allocation4 + $0xd8] sm:$0xf] %v1076_v43 }
 0x19a   : > { %1144 = vst [vmem:[#allocation4 + $0xac] sm:$0xf] %v1076_v43  ;;  %1803 = vmatmul.bf16.gmra.mxu1 %v5031_v47 }
 0x19b   : > { %1172 = vst [vmem:[#allocation4 + $0x80] sm:$0xf] %v1076_v43 }
 0x19d   : > { %v633_v53 = vpop.f32.mrf.mxu0 }
 0x19e   : > { %v707_v55 = vmul.f32 %v4871_v24, %v633_v53  ;;  %v904_v53 = vadd.s32 6, %v4879_v30 }
 0x19f   : > { %v5038_v58 = vpop.f32.mrf.mxu1 }
 0x1a0   : > { %v751_v62 = vadd.f32 %v4876_v27, %v707_v55  ;;  %1852 = vmatmul.bf16.vlgmr.msrb.gmra.mxu0 %v5036_v56  ;;  %v3659_v63 = vld [vmem:[#allocation4 + $0xd8] sm:$0xf]  ;;  %v4076_v55 = vld [vmem:[#allocation4 + $0x34] sm:$0xf]  ;;  %vm974_vm10 = vcmp.ge.s32.totalorder %v904_v53, 0  ;;  %vm984_vm11 = vcmp.lt.s32.totalorder %v904_v53, 16 }
 0x1a1   : > { %v5042_v0 = vor.u32 %v4098_v57, %v3659_v63  ;;  %v4091_v1 = vld [vmem:[#allocation4 + $0xac] sm:$0xf]  ;;  %v4164_v57 = vld [vmem:[#allocation8 + $0xb0] sm:$0xff]  ;;  %vm5091_vm13 = vmand %vm974_vm10, %vm984_vm11 }
 0x1a2   : > { %vm791_vm5 = vcmp.ge.f32.partialorder %v751_v62, 0.0  ;;  %v831_v2 = vmul.f32 0.01, %v751_v62  ;;  %v5044_v3 = vor.u32 %v4091_v1, %v3637_v59  ;;  %1934 = vmatpush.bf16.msra.mxu3 %v4164_v57  ;;  %v4172_v57 = vld [vmem:[#allocation8 + $0x1b0] sm:$0xff] }
 0x1a3   : > { %1808 = vmatmul.bf16.vlgmr.msrb.gmra.mxu3 %v5042_v0 }
 0x1a4   : > { %v871_v5 = vsel %vm791_vm5, %v751_v62, %v831_v2  ;;  %1887 = vmatmul.bf16.vlgmr.msra.gmra.mxu2 %v5044_v3  ;;  %v5085_v62 = vor.u32 %v4076_v55, %v3577_v48  ;;  %v4173_v48 = vld [vmem:[#allocation8 + $0x1b8] sm:$0xff] }
 0x1a5   : > { %v948_v7 = vsel %vm908_vm3, %v871_v5, 0.0  ;;  %v635_v8 = vpop.f32.mrf.mxu0  ;;  %2691 = vmatpush.bf16.msra.mxu0 %v4173_v48 }
 0x1a6   : > { %v1038_v9 = vsel %vm5046_vm6, %v948_v7, 0.0  ;;  %v708_v10 = vmul.f32 %v4871_v24, %v635_v8  ;;  %1935 = vmatpush.bf16.msra.mxu3 %v4163_v51  ;;  %v4110_v51 = vld [vmem:[#allocation4 + $0x140] sm:$0xf0] }
 0x1a7   : > { %v1078_v11 = vpack.c.bf16 %v1038_v9, %v1038_v9  ;;  %v5057_v12 = vpop.f32.mrf.mxu1 }
 0x1a8   : > { %v752_v14 = vadd.f32 %v4876_v27, %v708_v10  ;;  %v4104_v10 = vld [vmem:[#allocation4 + $0x110] sm:$0xf0] }
 0x1a9   : > { %1118 = vst [vmem:[#allocation4 + $0xf0] sm:$0xf] %v1078_v11  ;;  %2692 = vmatpush.bf16.msra.mxu0 %v4172_v57 }
 0x1aa   : > { %1146 = vst [vmem:[#allocation4 + $0xc4] sm:$0xf] %v1078_v11  ;;  %vm792_vm8 = vcmp.ge.f32.partialorder %v752_v14, 0.0  ;;  %v832_v15 = vmul.f32 0.01, %v752_v14  ;;  %2239 = vmatmul.bf16.vlgmr.msrb.gmra.mxu1 %v4911_v60 }
 0x1ab   : > { %1174 = vst [vmem:[#allocation4 + $0x98] sm:$0xf] %v1078_v11 }
 0x1ac   : > { %v872_v18 = vsel %vm792_vm8, %v752_v14, %v832_v15 }
 0x1ad   : > { %v1039_v19 = vsel %vm5046_vm6, %v872_v18, 0.0  ;;  %v638_v20 = vpop.f32.mrf.mxu0 }
 0x1ae   : > { %v1079_v21 = vpack.c.bf16 %v1039_v19, %v1039_v19  ;;  %v709_v23 = vmul.f32 %v4871_v24, %v638_v20 }
 0x1af   : > { %v5066_v26 = vpop.f32.mrf.mxu1 }
 0x1b0   : > { %1119 = vst [vmem:[#allocation4 + $0xfc] sm:$0xf] %v1079_v21  ;;  %v753_v28 = vadd.f32 %v4876_v27, %v709_v23  ;;  %1857 = vmatmul.bf16.gmra.mxu0 %v5064_v25  ;;  %v3671_v40 = vld [vmem:[#allocation4 + $0xf0] sm:$0xf]  ;;  %v3589_v23 = vld [vmem:[#allocation4 + $0x54] sm:$0xf0] }
 0x1b1   : > { %1147 = vst [vmem:[#allocation4 + $0xd0] sm:$0xf] %v1079_v21  ;;  %v4094_v43 = vld [vmem:[#allocation4 + $0xc4] sm:$0xf] }
 0x1b2   : > { %1175 = vst [vmem:[#allocation4 + $0xa4] sm:$0xf] %v1079_v21  ;;  %vm793_vm9 = vcmp.ge.f32.partialorder %v753_v28, 0.0  ;;  %v833_v31 = vmul.f32 0.01, %v753_v28 }
 0x1b4   : > { %v873_v33 = vsel %vm793_vm9, %v753_v28, %v833_v31  ;;  %v4079_v31 = vld [vmem:[#allocation4 + $0x4c] sm:$0xf] }
 0x1b5   : > { %v950_v35 = vsel %vm914_vm7, %v873_v33, 0.0  ;;  %v640_v36 = vpop.f32.mrf.mxu0  ;;  %v4130_v33 = vld [vmem:[#allocation8 + $0x120] sm:$0xff] }
 0x1b6   : > { %v1040_v37 = vsel %vm5046_vm6, %v950_v35, 0.0  ;;  %2323 = vmatpush.bf16.msrb.mxu2 %v4130_v33 }
 0x1b7   : > { %v1080_v38 = vpack.c.bf16 %v1040_v37, %v1040_v37  ;;  %v5074_v39 = vpop.f32.mrf.mxu1  ;;  %v4101_v41 = vld [vmem:[#allocation4 + $0xf8] sm:$0xf0] }
 0x1b8   : > { %v5076_v42 = vor.u32 %v4101_v41, %v3671_v40  ;;  %v3649_v45 = vld [vmem:[#allocation4 + $0xcc] sm:$0xf0]  ;;  %v5113_v41 = vor.u32 %v4079_v31, %v3589_v23  ;;  %v4082_v23 = vld [vmem:[#allocation4 + $0x64] sm:$0xf] }
 0x1b9   : > { %1120 = vst [vmem:[#allocation4 + $0x108] sm:$0xf] %v1080_v38  ;;  %v5078_v46 = vor.u32 %v4094_v43, %v3649_v45  ;;  %v5134_v33 = vor.u32 %v4082_v23, %v3601_v4  ;;  %v4085_v23 = vld [vmem:[#allocation4 + $0x7c] sm:$0xf] }
 0x1ba   : > { %1148 = vst [vmem:[#allocation4 + $0xdc] sm:$0xf] %v1080_v38  ;;  %1813 = vmatmul.bf16.gmra.mxu3 %v5076_v42  ;;  %2244 = vmatmul.bf16.gmra.mxu1 %v4928_v13 }
 0x1bb   : > { %1176 = vst [vmem:[#allocation4 + $0xb0] sm:$0xf] %v1080_v38  ;;  %1892 = vmatmul.bf16.gmra.mxu2 %v5078_v46 }
 0x1bd   : > { %v643_v54 = vpop.f32.mrf.mxu0 }
 0x1be   : > { %v711_v59 = vmul.f32 %v4871_v24, %v643_v54 }
 0x1bf   : > { %v5087_v63 = vpop.f32.mrf.mxu1 }
 0x1c0   : > { %v755_v1 = vadd.f32 %v4876_v27, %v711_v59  ;;  %1862 = vmatmul.bf16.gmra.mxu0 %v5085_v62  ;;  %v3683_v9 = vld [vmem:[#allocation4 + $0x108] sm:$0xf] }
 0x1c1   : > { %v4097_v15 = vld [vmem:[#allocation4 + $0xdc] sm:$0xf]  ;;  %v5103_v20 = vor.u32 %v4104_v10, %v3683_v9 }
 0x1c2   : > { %vm795_vm12 = vcmp.ge.f32.partialorder %v755_v1, 0.0  ;;  %v835_v2 = vmul.f32 0.01, %v755_v1  ;;  %v5105_v21 = vor.u32 %v4097_v15, %v3661_v16  ;;  %v4129_v15 = vld [vmem:[#allocation8 + $0x118] sm:$0xff]  ;;  %v4162_v16 = vld [vmem:[#allocation8 + $0xa0] sm:$0xff] }
 0x1c3   : > { %2324 = vmatpush.bf16.msrb.mxu2 %v4129_v15  ;;  %1936 = vmatpush.bf16.msra.mxu3 %v4162_v16  ;;  %v3613_v15 = vld [vmem:[#allocation4 + $0x84] sm:$0xf0] }
 0x1c4   : > { %v875_v5 = vsel %vm795_vm12, %v755_v1, %v835_v2  ;;  %v4167_v16 = vld [vmem:[#allocation8 + $0x188] sm:$0xff] }
 0x1c5   : > { %v952_v7 = vsel %vm908_vm3, %v875_v5, 0.0  ;;  %v645_v8 = vpop.f32.mrf.mxu0 }
 0x1c6   : > { %v1042_v11 = vsel %vm5091_vm13, %v952_v7, 0.0  ;;  %v712_v14 = vmul.f32 %v4871_v24, %v645_v8 }
 0x1c7   : > { %v1082_v17 = vpack.c.bf16 %v1042_v11, %v1042_v11  ;;  %v5100_v18 = vpop.f32.mrf.mxu1 }
 0x1c8   : > { %v756_v19 = vadd.f32 %v4876_v27, %v712_v14  ;;  %v4171_v14 = vld [vmem:[#allocation8 + $0x1a8] sm:$0xff] }
 0x1c9   : > { %1122 = vst [vmem:[#allocation4 + $0x120] sm:$0xf] %v1082_v17  ;;  %2693 = vmatpush.bf16.msra.mxu0 %v4171_v14  ;;  %v673_v14 = vpop.f32.mrf.mxu3 }
 0x1ca   : > { %1150 = vst [vmem:[#allocation4 + $0xf4] sm:$0xf] %v1082_v17  ;;  %vm796_vm14 = vcmp.ge.f32.partialorder %v756_v19, 0.0  ;;  %v836_v28 = vmul.f32 0.01, %v756_v19  ;;  %1818 = vmatmul.bf16.gmra.mxu3 %v5103_v20  ;;  %2249 = vmatmul.bf16.gmra.mxu1 %v4940_v34 }
 0x1cb   : > { %1178 = vst [vmem:[#allocation4 + $0xc8] sm:$0xf] %v1082_v17  ;;  %1897 = vmatmul.bf16.gmra.mxu2 %v5105_v21  ;;  %v905_v17 = vadd.s32 7, %v4879_v30 }
 0x1cc   : > { %v876_v35 = vsel %vm796_vm14, %v756_v19, %v836_v28  ;;  %v4170_v28 = vld [vmem:[#allocation8 + $0x1a0] sm:$0xff] }
 0x1cd   : > { %v1043_v36 = vsel %vm5091_vm13, %v876_v35, 0.0  ;;  %v648_v37 = vpop.f32.mrf.mxu0  ;;  %2694 = vmatpush.bf16.msra.mxu0 %v4170_v28  ;;  %vm975_vm0 = vcmp.ge.s32.totalorder %v905_v17, 0  ;;  %vm985_vm1 = vcmp.lt.s32.totalorder %v905_v17, 16  ;;  %v4161_v28 = vld [vmem:[#allocation8 + $0x98] sm:$0xff] }
 0x1ce   : > { %v1083_v38 = vpack.c.bf16 %v1043_v36, %v1043_v36  ;;  %v713_v40 = vmul.f32 %v4871_v24, %v648_v37  ;;  %v4169_v37 = vld [vmem:[#allocation8 + $0x198] sm:$0xff]  ;;  %vm5140_vm4 = vmand %vm975_vm0, %vm985_vm1  ;;  %1937 = vmatpush.bf16.msra.mxu3 %v4161_v28 }
 0x1cf   : > { %v5115_v43 = vpop.f32.mrf.mxu1 }
 0x1d0   : > { %1123 = vst [vmem:[#allocation4 + $0x12c] sm:$0xf] %v1083_v38  ;;  %v757_v45 = vadd.f32 %v4876_v27, %v713_v40  ;;  %1867 = vmatmul.bf16.gmra.mxu0 %v5113_v41  ;;  %v3695_v5 = vld [vmem:[#allocation4 + $0x120] sm:$0xf] }
 0x1d1   : > { %1151 = vst [vmem:[#allocation4 + $0x100] sm:$0xf] %v1083_v38  ;;  %v4100_v9 = vld [vmem:[#allocation4 + $0xf4] sm:$0xf]  ;;  %2695 = vmatpush.bf16.msra.mxu0 %v4169_v37 }
 0x1d2   : > { %1179 = vst [vmem:[#allocation4 + $0xd4] sm:$0xf] %v1083_v38  ;;  %vm797_vm15 = vcmp.ge.f32.partialorder %v757_v45, 0.0  ;;  %v837_v49 = vmul.f32 0.01, %v757_v45 }
 0x1d4   : > { %v877_v53 = vsel %vm797_vm15, %v757_v45, %v837_v49 }
 0x1d5   : > { %v954_v54 = vsel %vm914_vm7, %v877_v53, 0.0  ;;  %v650_v55 = vpop.f32.mrf.mxu0 }
 0x1d6   : > { %v1044_v59 = vsel %vm5091_vm13, %v954_v54, 0.0  ;;  %v5151_v54 = vld [vmem:[%s6125_s2] ss:$0 sm:$0xff] }
 0x1d7   : > { %v1084_v1 = vpack.c.bf16 %v1044_v59, %v1044_v59  ;;  %v5123_v2 = vpop.f32.mrf.mxu1  ;;  %v4107_v7 = vld [vmem:[#allocation4 + $0x128] sm:$0xf0]  ;;  %v3685_v59 = vld [vmem:[#allocation4 + $0x114] sm:$0xf0] }
 0x1d8   : > { %v5125_v8 = vor.u32 %v4107_v7, %v3695_v5  ;;  %v3673_v10 = vld [vmem:[#allocation4 + $0xfc] sm:$0xf0] }
 0x1d9   : > { %1124 = vst [vmem:[#allocation4 + $0x138] sm:$0xf] %v1084_v1  ;;  %v5127_v11 = vor.u32 %v4100_v9, %v3673_v10  ;;  %v5159_v7 = vld [vmem:[%s6126_s3] ss:$0 sm:$0xff] }
 0x1da   : > { %1152 = vst [vmem:[#allocation4 + $0x10c] sm:$0xf] %v1084_v1  ;;  %1823 = vmatmul.bf16.gmra.mxu3 %v5125_v8  ;;  %2254 = vmatmul.bf16.gmra.mxu1 %v4957_v52 }
 0x1db   : > { %1180 = vst [vmem:[#allocation4 + $0xe0] sm:$0xf] %v1084_v1  ;;  %1902 = vmatmul.bf16.gmra.mxu2 %v5127_v11 }
 0x1dd   : > { %v653_v19 = vpop.f32.mrf.mxu0 }
 0x1de   : > { %v715_v31 = vmul.f32 %v4871_v24, %v653_v19  ;;  %v4128_v19 = vld [vmem:[#allocation8 + $0x110] sm:$0xff] }
 0x1df   : > { %v5136_v35 = vpop.f32.mrf.mxu1  ;;  %2325 = vmatpush.bf16.msrb.mxu2 %v4128_v19 }
 0x1e0   : > { %v759_v36 = vadd.f32 %v4876_v27, %v715_v31  ;;  %1872 = vmatmul.bf16.gmra.mxu0 %v5134_v33  ;;  %v3707_v49 = vld [vmem:[#allocation4 + $0x138] sm:$0xf]  ;;  %v4168_v27 = vld [vmem:[#allocation8 + $0x190] sm:$0xff] }
 0x1e1   : > { %v4103_v57 = vld [vmem:[#allocation4 + $0x10c] sm:$0xf]  ;;  %2696 = vmatpush.bf16.msra.mxu0 %v4168_v27  ;;  %v5162_v10 = vor.u32 %v4110_v51, %v3707_v49  ;;  %v4160_v51 = vld [vmem:[#allocation8 + $0x90] sm:$0xff] }
 0x1e2   : > { %vm799_vm2 = vcmp.ge.f32.partialorder %v759_v36, 0.0  ;;  %v839_v38 = vmul.f32 0.01, %v759_v36  ;;  %v5164_v4 = vor.u32 %v4103_v57, %v3685_v59  ;;  %v907_v57 = vadd.s32 9, %v4879_v30  ;;  %1938 = vmatpush.bf16.msra.mxu3 %v4160_v51 }
 0x1e4   : > { %v879_v24 = vsel %vm799_vm2, %v759_v36, %v839_v38  ;;  %v4166_v38 = vld [vmem:[#allocation8 + $0x180] sm:$0xff]  ;;  %vm977_vm8 = vcmp.ge.s32.totalorder %v907_v57, 0  ;;  %vm987_vm9 = vcmp.lt.s32.totalorder %v907_v57, 16 }
 0x1e5   : > { %v956_v45 = vsel %vm908_vm3, %v879_v24, 0.0  ;;  %v655_v48 = vpop.f32.mrf.mxu0  ;;  %2697 = vmatpush.bf16.msra.mxu0 %v4167_v16  ;;  %vm5185_vm11 = vmand %vm977_vm8, %vm987_vm9 }
 0x1e6   : > { %v1046_v53 = vsel %vm5140_vm4, %v956_v45, 0.0  ;;  %v716_v55 = vmul.f32 %v5151_v54, %v655_v48  ;;  %v5172_v48 = vor.u32 %v4085_v23, %v3613_v15 }
 0x1e7   : > { %v1086_v1 = vpack.c.bf16 %v1046_v53, %v1046_v53  ;;  %v5154_v5 = vpop.f32.mrf.mxu1  ;;  %v675_v53 = vpop.f32.mrf.mxu3 }
 0x1e8   : > { %v760_v9 = vadd.f32 %v5159_v7, %v716_v55  ;;  %v723_v55 = vmul.f32 %v5151_v54, %v673_v14 }
 0x1e9   : > { %1126 = vst [vmem:[#allocation4 + $0x150] sm:$0xf] %v1086_v1  ;;  %2698 = vmatpush.bf16.msra.mxu0 %v4166_v38 }
 0x1ea   : > { %1154 = vst [vmem:[#allocation4 + $0x124] sm:$0xf] %v1086_v1  ;;  %vm800_vm5 = vcmp.ge.f32.partialorder %v760_v9, 0.0  ;;  %v840_v17 = vmul.f32 0.01, %v760_v9  ;;  %1828 = vmatmul.bf16.gmra.mxu3 %v5162_v10  ;;  %2259 = vmatmul.bf16.gmra.mxu1 %v4969_v6 }
 0x1eb   : > { %1182 = vst [vmem:[#allocation4 + $0xf8] sm:$0xf] %v1086_v1  ;;  %1907 = vmatmul.bf16.gmra.mxu2 %v5164_v4  ;;  %v767_v1 = vadd.f32 %v5159_v7, %v723_v55 }
 0x1ec   : > { %v880_v31 = vsel %vm800_vm5, %v760_v9, %v840_v17  ;;  %v4159_v9 = vld [vmem:[#allocation8 + $0x88] sm:$0xff] }
 0x1ed   : > { %v1047_v36 = vsel %vm5140_vm4, %v880_v31, 0.0  ;;  %v658_v37 = vpop.f32.mrf.mxu0  ;;  %vm807_vm10 = vcmp.ge.f32.partialorder %v767_v1, 0.0  ;;  %v847_v19 = vmul.f32 0.01, %v767_v1  ;;  %1939 = vmatpush.bf16.msra.mxu3 %v4159_v9 }
 0x1ee   : > { %v1087_v24 = vpack.c.bf16 %v1047_v36, %v1047_v36  ;;  %v717_v45 = vmul.f32 %v5151_v54, %v658_v37 }
 0x1ef   : > { %v5174_v49 = vpop.f32.mrf.mxu1  ;;  %v887_v38 = vsel %vm807_vm10, %v767_v1, %v847_v19  ;;  %v678_v40 = vpop.f32.mrf.mxu3  ;;  %v3625_v1 = vld [vmem:[#allocation4 + $0x9c] sm:$0xf0]  ;;  %v906_v19 = vadd.s32 8, %v4879_v30 }
 0x1f0   : > { %6205 = vst [vmem:[#allocation27_spill] sm:$0xff] %v5174_v49  ;;  %v761_v27 = vadd.f32 %v5159_v7, %v717_v45  ;;  %1877 = vmatmul.bf16.gmra.mxu0 %v5172_v48  ;;  %v3719_v36 = vld [vmem:[#allocation4 + $0x150] sm:$0xf]  ;;  %v964_v55 = vsel %vm908_vm3, %v887_v38, 0.0 }
 0x1f1   : > { %1127 = vst [vmem:[#allocation4 + $0x15c] sm:$0xf] %v1087_v24  ;;  %v4106_v51 = vld [vmem:[#allocation4 + $0x124] sm:$0xf]  ;;  %vm976_vm14 = vcmp.ge.s32.totalorder %v906_v19, 0  ;;  %vm986_vm15 = vcmp.lt.s32.totalorder %v906_v19, 16 }
 0x1f2   : > { %1155 = vst [vmem:[#allocation4 + $0x130] sm:$0xf] %v1087_v24  ;;  %vm801_vm6 = vcmp.ge.f32.partialorder %v761_v27, 0.0  ;;  %v841_v59 = vmul.f32 0.01, %v761_v27  ;;  %vm5216_vm1 = vmand %vm976_vm14, %vm986_vm15 }
 0x1f3   : > { %1183 = vst [vmem:[#allocation4 + $0x104] sm:$0xf] %v1087_v24  ;;  %v4158_v24 = vld [vmem:[#allocation8 + $0x80] sm:$0xff] }
 0x1f4   : > { %v881_v15 = vsel %vm801_vm6, %v761_v27, %v841_v59  ;;  %v1054_v59 = vsel %vm5185_vm11, %v964_v55, 0.0  ;;  %1940 = vmatpush.bf16.msra.mxu3 %v4158_v24 }
 0x1f5   : > { %v958_v16 = vsel %vm914_vm7, %v881_v15, 0.0  ;;  %v660_v17 = vpop.f32.mrf.mxu0  ;;  %v1094_v9 = vpack.c.bf16 %v1054_v59, %v1054_v59  ;;  %v724_v15 = vmul.f32 %v5151_v54, %v675_v53 }
 0x1f6   : > { %v1048_v14 = vsel %vm5140_vm4, %v958_v16, 0.0  ;;  %v725_v16 = vmul.f32 %v5151_v54, %v678_v40  ;;  %v4127_v17 = vld [vmem:[#allocation8 + $0x108] sm:$0xff]  ;;  %vm2990_vm4 = vcmp.lt.s32.totalorder %v4882_v32, 7 }
 0x1f7   : > { %v1088_v28 = vpack.c.bf16 %v1048_v14, %v1048_v14  ;;  %v5189_v31 = vpop.f32.mrf.mxu1  ;;  %v4088_v14 = vld [vmem:[#allocation4 + $0x94] sm:$0xf]  ;;  %1190 = vst [vmem:[#allocation4 + $0x158] sm:$0xf] %v1094_v9  ;;  %2326 = vmatpush.bf16.msrb.mxu2 %v4127_v17  ;;  %v680_v40 = vpop.f32.mrf.mxu3 }
 0x1f8   : > { %6208 = vst [vmem:[#allocation28_spill] sm:$0xff] %v5189_v31  ;;  %v4113_v37 = vld [vmem:[#allocation4 + $0x158] sm:$0xf0]  ;;  %v5207_v24 = vor.u32 %v4088_v14, %v3625_v1 }
 0x1f9   : > { %v5191_v45 = vor.u32 %v4113_v37, %v3719_v36  ;;  %v3697_v27 = vld [vmem:[#allocation4 + $0x12c] sm:$0xf0]  ;;  %1128 = vst [vmem:[#allocation4 + $0x168] sm:$0xf] %v1088_v28  ;;  %v768_v36 = vadd.f32 %v5159_v7, %v724_v15  ;;  %v769_v37 = vadd.f32 %v5159_v7, %v725_v16 }
 0x1fa   : > { %v5195_v57 = vor.u32 %v4106_v51, %v3697_v27  ;;  %1156 = vst [vmem:[#allocation4 + $0x13c] sm:$0xf] %v1088_v28  ;;  %2264 = vmatmul.bf16.gmra.mxu1 %v4987_v29 }
 0x1fb   : > { %1833 = vmatmul.bf16.gmra.mxu3 %v5191_v45  ;;  %1184 = vst [vmem:[#allocation4 + $0x110] sm:$0xf] %v1088_v28  ;;  %vm808_vm12 = vcmp.ge.f32.partialorder %v768_v36, 0.0  ;;  %v848_v51 = vmul.f32 0.01, %v768_v36  ;;  %vm809_vm13 = vcmp.ge.f32.partialorder %v769_v37, 0.0 }
 0x1fc   : > { %6209 = vst [vmem:[#allocation29_spill] sm:$0xff] %v5195_v57  ;;  %1912 = vmatmul.bf16.gmra.mxu2 %v5195_v57  ;;  %v849_v27 = vmul.f32 0.01, %v769_v37 }
 0x1fd   : > { %v663_v38 = vpop.f32.mrf.mxu0  ;;  %v888_v55 = vsel %vm808_vm12, %v768_v36, %v848_v51 }
 0x1fe   : > { %v719_v53 = vmul.f32 %v5151_v54, %v663_v38  ;;  %v1055_v59 = vsel %vm5185_vm11, %v888_v55, 0.0  ;;  %v889_v1 = vsel %vm809_vm13, %v769_v37, %v849_v27 }
 0x1ff   : > { %v5210_v28 = vpop.f32.mrf.mxu1  ;;  %v1095_v15 = vpack.c.bf16 %v1055_v59, %v1055_v59  ;;  %v966_v17 = vsel %vm914_vm7, %v889_v1, 0.0  ;;  %v3709_v59 = vld [vmem:[#allocation4 + $0x144] sm:$0xf0] }
 0x200   : > { %6210 = vst [vmem:[#allocation30_spill] sm:$0xff] %v5210_v28  ;;  %v763_v30 = vadd.f32 %v5159_v7, %v719_v53  ;;  %1882 = vmatmul.bf16.gmra.mxu0 %v5207_v24  ;;  %v1056_v19 = vsel %vm5185_vm11, %v966_v17, 0.0  ;;  %v3731_v37 = vld [vmem:[#allocation4 + $0x168] sm:$0xf]  ;;  %v4116_v53 = vld [vmem:[#allocation4 + $0x170] sm:$0xf0] }
 0x201   : > { %1191 = vst [vmem:[#allocation4 + $0x164] sm:$0xf] %v1095_v15  ;;  %v1096_v51 = vpack.c.bf16 %v1056_v19, %v1056_v19  ;;  %v4109_v40 = vld [vmem:[#allocation4 + $0x13c] sm:$0xf]  ;;  %v4126_v15 = vld [vmem:[#allocation8 + $0x100] sm:$0xff] }
 0x202   : > { %vm803_vm0 = vcmp.ge.f32.partialorder %v763_v30, 0.0  ;;  %v843_v9 = vmul.f32 0.01, %v763_v30  ;;  %v5232_v17 = vor.u32 %v4109_v40, %v3709_v59  ;;  %2327 = vmatpush.bf16.msrb.mxu2 %v4126_v15 }
 0x203   : > { %1192 = vst [vmem:[#allocation4 + $0x170] sm:$0xf] %v1096_v51 }
 0x204   : > { %v883_v14 = vsel %vm803_vm0, %v763_v30, %v843_v9  ;;  %v5230_v9 = vor.u32 %v4116_v53, %v3731_v37  ;;  %6213 = vst [vmem:[#allocation31_spill] sm:$0xff] %v5232_v17 }
 0x205   : > { %v960_v36 = vsel %vm908_vm3, %v883_v14, 0.0  ;;  %v665_v38 = vpop.f32.mrf.mxu0 }
 0x206   : > { %v1050_v27 = vsel %vm5216_vm1, %v960_v36, 0.0  ;;  %v720_v55 = vmul.f32 %v5151_v54, %v665_v38  ;;  %2869 = vmatpush.bf16.msra.mxu2 %v4189_v50 }
 0x207   : > { %v1090_v1 = vpack.c.bf16 %v1050_v27, %v1050_v27  ;;  %v1799_v30 = vpop.f32.mrf.mxu1 }
 0x208   : > { %v764_v23 = vadd.f32 %v5159_v7, %v720_v55 }
 0x209   : > { %1158 = vst [vmem:[#allocation4 + $0x154] sm:$0xf] %v1090_v1 }
 0x20a   : > { %1186 = vst [vmem:[#allocation4 + $0x128] sm:$0xf] %v1090_v1  ;;  %vm804_vm3 = vcmp.ge.f32.partialorder %v764_v23, 0.0  ;;  %v844_v14 = vmul.f32 0.01, %v764_v23  ;;  %2269 = vmatmul.bf16.gmra.mxu1 %v5000_v61 }
 0x20b   : > { %1838 = vmatmul.bf16.gmra.mxu3 %v5230_v9 }
 0x20c   : > { %1917 = vmatmul.bf16.gmra.mxu2 %v5232_v17  ;;  %v884_v19 = vsel %vm804_vm3, %v764_v23, %v844_v14  ;;  %v4072_v23 = vld [vmem:[#allocation4 + $0x10] sm:$0xf0] }
 0x20d   : > { %v1051_v36 = vsel %vm5216_vm1, %v884_v19, 0.0  ;;  %v668_v38 = vpop.f32.mrf.mxu0 }
 0x20e   : > { %v1091_v37 = vpack.c.bf16 %v1051_v36, %v1051_v36  ;;  %v721_v53 = vmul.f32 %v5151_v54, %v668_v38  ;;  %v3559_v38 = vld [vmem:[#allocation4 + $0x8] sm:$0xf] }
 0x20f   : > { %v1801_v51 = vpop.f32.mrf.mxu1 }
 0x210   : > { %1159 = vst [vmem:[#allocation4 + $0x160] sm:$0xf] %v1091_v37  ;;  %v765_v27 = vadd.f32 %v5159_v7, %v721_v53  ;;  %2699 = vmatmul.bf16.vlgmr.msra.gmra.mxu0 %v4911_v60  ;;  %v4112_v19 = vld [vmem:[#allocation4 + $0x154] sm:$0xf]  ;;  %v5248_v60 = vor.u32 %v4072_v23, %v3559_v38  ;;  %v4181_v53 = vld [vmem:[#allocation8 + $0x1f8] sm:$0xff] }
 0x211   : > { %1187 = vst [vmem:[#allocation4 + $0x134] sm:$0xf] %v1091_v37  ;;  %v4141_v37 = vld [vmem:[#allocation8 + $0x178] sm:$0xff]  ;;  %2780 = vmatpush.bf16.msra.mxu1 %v4181_v53  ;;  %v4078_v53 = vld [vmem:[#allocation4 + $0x40] sm:$0xf0] }
 0x212   : > { %vm805_vm2 = vcmp.ge.f32.partialorder %v765_v27, 0.0  ;;  %v845_v55 = vmul.f32 0.01, %v765_v27  ;;  %6215 = vst [vmem:[#allocation33_spill] sm:$0xff] %v5248_v60  ;;  %2409 = vmatpush.bf16.msrb.mxu3 %v4141_v37 }
 0x214   : > { %v885_v40 = vsel %vm805_vm2, %v765_v27, %v845_v55  ;;  %v3571_v27 = vld [vmem:[#allocation4 + $0x20] sm:$0xf]  ;;  %v4075_v55 = vld [vmem:[#allocation4 + $0x28] sm:$0xf0] }
 0x215   : > { %v962_v59 = vsel %vm914_vm7, %v885_v40, 0.0  ;;  %v670_v1 = vpop.f32.mrf.mxu0  ;;  %vm2054_vm7 = vcmp.lt.s32.totalorder %v4882_v32, 1 }
 0x216   : > { %v1052_v15 = vsel %vm5216_vm1, %v962_v59, 0.0  ;;  %v3733_v59 = vld [vmem:[#allocation4 + $0x174] sm:$0xf0] }
 0x217   : > { %v1092_v14 = vpack.c.bf16 %v1052_v15, %v1052_v15  ;;  %v1804_v54 = vpop.f32.mrf.mxu1  ;;  %v3721_v36 = vld [vmem:[#allocation4 + $0x15c] sm:$0xf0] }
 0x218   : > { %v5246_v7 = vor.u32 %v4112_v19, %v3721_v36 }
 0x219   : > { %1160 = vst [vmem:[#allocation4 + $0x16c] sm:$0xf] %v1092_v14 }
 0x21a   : > { %6214 = vst [vmem:[#allocation32_spill] sm:$0xff] %v5246_v7  ;;  %2274 = vmatmul.bf16.gmra.mxu1 %v5017_v22 }
 0x21b   : > { %1188 = vst [vmem:[#allocation4 + $0x140] sm:$0xf] %v1092_v14  ;;  %1941 = vmatmul.bf16.vlgmr.msra.gmra.mxu3 %v5248_v60  ;;  %v5258_v14 = vor.u32 %v4075_v55, %v3571_v27  ;;  %v3583_v55 = vld [vmem:[#allocation4 + $0x38] sm:$0xf] }
 0x21c   : > { %1922 = vmatmul.bf16.gmra.mxu2 %v5246_v7  ;;  %v4081_v7 = vld [vmem:[#allocation4 + $0x58] sm:$0xf0] }
 0x21d   : > { %6218 = vst [vmem:[#allocation36_spill] sm:$0xff] %v5258_v14  ;;  %v5265_v36 = vpop.f32.mrf.mxu0 }
 0x21f   : > { %v1806_v16 = vpop.f32.mrf.mxu1 }
 0x220   : > { %2704 = vmatmul.bf16.gmra.mxu0 %v4928_v13  ;;  %v4115_v40 = vld [vmem:[#allocation4 + $0x16c] sm:$0xf] }
 0x221   : > { %v5260_v19 = vor.u32 %v4115_v40, %v3733_v59  ;;  %v5276_v59 = vor.u32 %v4078_v53, %v3583_v55 }
 0x223   : > { %6219 = vst [vmem:[#allocation37_spill] sm:$0xff] %v5260_v19 }
 0x224   : > { %6221 = vst [vmem:[#allocation39_spill] sm:$0xff] %v5276_v59 }
 0x225   : > { %v5274_v40 = vpop.f32.mrf.mxu0 }
 0x226   : > { %v1809_v13 = vpop.f32.mrf.mxu3 }
 0x227   : > { %v1888_v1 = vpop.f32.mrf.mxu2  ;;  %v5254_v23 = vpop.f32.mrf.mxu1 }
 0x228   : > { %6216 = vst [vmem:[#allocation34_spill] sm:$0xff] %v5254_v23  ;;  %v5256_v15 = vadd.f32 %v1888_v1, %v1799_v30  ;;  %v4188_v1 = vld [vmem:[#allocation8 + $0x230] sm:$0xff] }
 0x229   : > { %2870 = vmatpush.bf16.msra.mxu2 %v4188_v1 }
 0x22a   : > { %6217 = vst [vmem:[#allocation35_spill] sm:$0xff] %v5256_v15  ;;  %2279 = vmatmul.bf16.gmra.mxu1 %v5031_v47  ;;  %v3607_v15 = vld [vmem:[#allocation4 + $0x68] sm:$0xf] }
 0x22b   : > { %1946 = vmatmul.bf16.gmra.mxu3 %v5258_v14  ;;  %v4180_v14 = vld [vmem:[#allocation8 + $0x1f0] sm:$0xff] }
 0x22c   : > { %1927 = vmatmul.bf16.gmra.mxu2 %v5260_v19  ;;  %v4140_v19 = vld [vmem:[#allocation8 + $0x170] sm:$0xff]  ;;  %2781 = vmatpush.bf16.msra.mxu1 %v4180_v14 }
 0x22d   : > { %2410 = vmatpush.bf16.msrb.mxu3 %v4140_v19  ;;  %v5286_v53 = vpop.f32.mrf.mxu0 }
 0x22e   : > { %v1811_v30 = vpop.f32.mrf.mxu3 }
 0x22f   : > { %v1890_v38 = vpop.f32.mrf.mxu2  ;;  %v5267_v50 = vpop.f32.mrf.mxu1 }
 0x230   : > { %v5269_v37 = vadd.f32 %v1890_v38, %v1801_v51  ;;  %2709 = vmatmul.bf16.gmra.mxu0 %v4940_v34 }
 0x232   : > { %6220 = vst [vmem:[#allocation38_spill] sm:$0xff] %v5269_v37 }
 0x237   : > { %v5272_v27 = vpop.f32.mrf.mxu1 }
 0x23a   : > { %2284 = vmatmul.bf16.gmra.mxu1 %v5042_v0 }
 0x23b   : > { %1951 = vmatmul.bf16.gmra.mxu3 %v5276_v59  ;;  %v3595_v59 = vld [vmem:[#allocation4 + $0x50] sm:$0xf] }
 0x23c   : > { %2328 = vmatmul.bf16.vlgmr.msrb.gmra.mxu2 %v5036_v56 }
 0x23d   : > { %v1814_v51 = vpop.f32.mrf.mxu3 }
 0x23e   : > { %v1893_v38 = vpop.f32.mrf.mxu2 }
 0x23f   : > { %v5281_v34 = vadd.f32 %v1893_v38, %v1804_v54  ;;  %v5283_v23 = vpop.f32.mrf.mxu1  ;;  %v5292_v54 = vor.u32 %v4081_v7, %v3595_v59 }
 0x240   : > { %2714 = vmatmul.bf16.gmra.mxu0 %v4957_v52  ;;  %v5297_v52 = vpop.f32.mrf.mxu0 }
 0x241   : > { %6222 = vst [vmem:[#allocation40_spill] sm:$0xff] %v5281_v34 }
 0x242   : > { %6224 = vst [vmem:[#allocation42_spill] sm:$0xff] %v5292_v54 }
 0x245   : > { %v1816_v55 = vpop.f32.mrf.mxu3 }
 0x246   : > { %v1895_v60 = vpop.f32.mrf.mxu2 }
 0x247   : > { %v5288_v37 = vadd.f32 %v1895_v60, %v1806_v16  ;;  %v5290_v1 = vpop.f32.mrf.mxu1  ;;  %v4084_v16 = vld [vmem:[#allocation4 + $0x70] sm:$0xf0] }
 0x248   : > { %v5304_v7 = vpop.f32.mrf.mxu0  ;;  %v5310_v17 = vor.u32 %v4084_v16, %v3607_v15  ;;  %v3619_v16 = vld [vmem:[#allocation4 + $0x80] sm:$0xf] }
 0x249   : > { %6223 = vst [vmem:[#allocation41_spill] sm:$0xff] %v5288_v37 }
 0x24a   : > { %2289 = vmatmul.bf16.gmra.mxu1 %v5076_v42  ;;  %6228 = vst [vmem:[#allocation46_spill] sm:$0xff] %v5310_v17 }
 0x24b   : > { %1956 = vmatmul.bf16.gmra.mxu3 %v5292_v54 }
 0x24c   : > { %2333 = vmatmul.bf16.gmra.mxu2 %v5064_v25 }
 0x24d   : > { %v1819_v14 = vpop.f32.mrf.mxu3 }
 0x24e   : > { %v1898_v19 = vpop.f32.mrf.mxu2 }
 0x24f   : > { %v5299_v38 = vadd.f32 %v1898_v19, %v1809_v13  ;;  %v5301_v34 = vpop.f32.mrf.mxu1  ;;  %v4187_v13 = vld [vmem:[#allocation8 + $0x228] sm:$0xff] }
 0x250   : > { %2719 = vmatmul.bf16.gmra.mxu0 %v4969_v6  ;;  %2871 = vmatpush.bf16.msra.mxu2 %v4187_v13 }
 0x251   : > { %6225 = vst [vmem:[#allocation43_spill] sm:$0xff] %v5299_v38 }
 0x255   : > { %v1821_v60 = vpop.f32.mrf.mxu3 }
 0x256   : > { %v1900_v59 = vpop.f32.mrf.mxu2 }
 0x257   : > { %v5306_v54 = vadd.f32 %v1900_v59, %v1811_v30  ;;  %v5308_v37 = vpop.f32.mrf.mxu1  ;;  %v4139_v30 = vld [vmem:[#allocation8 + $0x168] sm:$0xff] }
 0x258   : > { %6227 = vst [vmem:[#allocation45_spill] sm:$0xff] %v5308_v37  ;;  %v4179_v59 = vld [vmem:[#allocation8 + $0x1e8] sm:$0xff]  ;;  %2411 = vmatpush.bf16.msrb.mxu3 %v4139_v30 }
 0x259   : > { %6226 = vst [vmem:[#allocation44_spill] sm:$0xff] %v5306_v54  ;;  %v5319_v54 = vpop.f32.mrf.mxu0  ;;  %2782 = vmatpush.bf16.msra.mxu1 %v4179_v59 }
 0x25a   : > { %2294 = vmatmul.bf16.gmra.mxu1 %v5103_v20 }
 0x25b   : > { %1961 = vmatmul.bf16.gmra.mxu3 %v5310_v17  ;;  %v4087_v17 = vld [vmem:[#allocation4 + $0x88] sm:$0xf0] }
 0x25c   : > { %2338 = vmatmul.bf16.gmra.mxu2 %v5085_v62 }
 0x25d   : > { %v1824_v6 = vpop.f32.mrf.mxu3 }
 0x25e   : > { %v1903_v19 = vpop.f32.mrf.mxu2 }
 0x25f   : > { %v5315_v38 = vadd.f32 %v1903_v19, %v1814_v51  ;;  %v5317_v28 = vpop.f32.mrf.mxu1  ;;  %v5326_v51 = vor.u32 %v4087_v17, %v3619_v16 }
 0x260   : > { %6230 = vst [vmem:[#allocation48_spill] sm:$0xff] %v5317_v28  ;;  %2724 = vmatmul.bf16.gmra.mxu0 %v4987_v29 }
 0x261   : > { %6229 = vst [vmem:[#allocation47_spill] sm:$0xff] %v5315_v38  ;;  %v5328_v19 = vpop.f32.mrf.mxu0 }
 0x262   : > { %6233 = vst [vmem:[#allocation51_spill] sm:$0xff] %v5326_v51 }
 0x265   : > { %v1826_v15 = vpop.f32.mrf.mxu3 }
 0x266   : > { %v1905_v31 = vpop.f32.mrf.mxu2 }
 0x267   : > { %v5322_v57 = vadd.f32 %v1905_v31, %v1816_v55  ;;  %v5324_v13 = vpop.f32.mrf.mxu1  ;;  %v4090_v55 = vld [vmem:[#allocation4 + $0xa0] sm:$0xf0] }
 0x268   : > { %6232 = vst [vmem:[#allocation50_spill] sm:$0xff] %v5324_v13  ;;  %v4178_v13 = vld [vmem:[#allocation8 + $0x1e0] sm:$0xff] }
 0x269   : > { %6231 = vst [vmem:[#allocation49_spill] sm:$0xff] %v5322_v57  ;;  %v5338_v31 = vpop.f32.mrf.mxu0  ;;  %2783 = vmatpush.bf16.msra.mxu1 %v4178_v13  ;;  %v4176_v13 = vld [vmem:[#allocation8 + $0x1d0] sm:$0xff] }
 0x26a   : > { %2299 = vmatmul.bf16.gmra.mxu1 %v5125_v8 }
 0x26b   : > { %1966 = vmatmul.bf16.gmra.mxu3 %v5326_v51  ;;  %v3631_v51 = vld [vmem:[#allocation4 + $0x98] sm:$0xf] }
 0x26c   : > { %2343 = vmatmul.bf16.gmra.mxu2 %v5113_v41  ;;  %v5344_v49 = vor.u32 %v4090_v55, %v3631_v51  ;;  %v4138_v51 = vld [vmem:[#allocation8 + $0x160] sm:$0xff] }
 0x26d   : > { %v1829_v29 = vpop.f32.mrf.mxu3  ;;  %2412 = vmatpush.bf16.msrb.mxu3 %v4138_v51 }
 0x26e   : > { %v1908_v30 = vpop.f32.mrf.mxu2  ;;  %6238 = vst [vmem:[#allocation56_spill] sm:$0xff] %v5344_v49 }
 0x26f   : > { %v5333_v59 = vadd.f32 %v1908_v30, %v1819_v14  ;;  %v5335_v38 = vpop.f32.mrf.mxu1  ;;  %v4177_v14 = vld [vmem:[#allocation8 + $0x1d8] sm:$0xff] }
 0x270   : > { %6235 = vst [vmem:[#allocation53_spill] sm:$0xff] %v5335_v38  ;;  %2729 = vmatmul.bf16.gmra.mxu0 %v5000_v61  ;;  %v4186_v61 = vld [vmem:[#allocation8 + $0x220] sm:$0xff]  ;;  %2784 = vmatpush.bf16.msra.mxu1 %v4177_v14  ;;  %v4093_v38 = vld [vmem:[#allocation4 + $0xb8] sm:$0xf0] }
 0x271   : > { %6234 = vst [vmem:[#allocation52_spill] sm:$0xff] %v5333_v59  ;;  %2872 = vmatpush.bf16.msra.mxu2 %v4186_v61 }
 0x274   : > { %2785 = vmatpush.bf16.msra.mxu1 %v4176_v13 }
 0x275   : > { %v1831_v17 = vpop.f32.mrf.mxu3 }
 0x276   : > { %v1910_v16 = vpop.f32.mrf.mxu2 }
 0x277   : > { %v5340_v57 = vadd.f32 %v1910_v16, %v1821_v60  ;;  %v5342_v28 = vpop.f32.mrf.mxu1  ;;  %v5349_v60 = vpop.f32.mrf.mxu0 }
 0x278   : > { %6237 = vst [vmem:[#allocation55_spill] sm:$0xff] %v5342_v28  ;;  %v3643_v28 = vld [vmem:[#allocation4 + $0xb0] sm:$0xf] }
 0x279   : > { %6236 = vst [vmem:[#allocation54_spill] sm:$0xff] %v5340_v57 }
 0x27a   : > { %2304 = vmatmul.bf16.gmra.mxu1 %v5162_v10 }
 0x27b   : > { %1971 = vmatmul.bf16.gmra.mxu3 %v5344_v49  ;;  %v4175_v49 = vld [vmem:[#allocation8 + $0x1c8] sm:$0xff] }
 0x27c   : > { %2348 = vmatmul.bf16.gmra.mxu2 %v5134_v33  ;;  %2786 = vmatpush.bf16.msra.mxu1 %v4175_v49 }
 0x27e   : > { %v1834_v30 = vpop.f32.mrf.mxu3 }
 0x27f   : > { %v1913_v16 = vpop.f32.mrf.mxu2  ;;  %v5354_v55 = vpop.f32.mrf.mxu1 }
 0x280   : > { %v5351_v57 = vadd.f32 %v1913_v16, %v1824_v6  ;;  %2734 = vmatmul.bf16.gmra.mxu0 %v5017_v22  ;;  %6240 = vst [vmem:[#allocation58_spill] sm:$0xff] %v5354_v55  ;;  %v5358_v14 = vpop.f32.mrf.mxu0  ;;  %v5360_v6 = vor.u32 %v4093_v38, %v3643_v28  ;;  %v4174_v16 = vld [vmem:[#allocation8 + $0x1c0] sm:$0xff] }
 0x281   : > { %2787 = vmatpush.bf16.msra.mxu1 %v4174_v16 }
 0x282   : > { %6239 = vst [vmem:[#allocation57_spill] sm:$0xff] %v5351_v57 }
 0x283   : > { %6242 = vst [vmem:[#allocation60_spill] sm:$0xff] %v5360_v6 }
 0x286   : > { %v1836_v59 = vpop.f32.mrf.mxu3 }
 0x287   : > { %v1915_v37 = vpop.f32.mrf.mxu2  ;;  %v5365_v22 = vpop.f32.mrf.mxu1 }
 0x288   : > { %v5356_v61 = vadd.f32 %v1915_v37, %v1826_v15  ;;  %6243 = vst [vmem:[#allocation61_spill] sm:$0xff] %v5365_v22  ;;  %v5370_v49 = vpop.f32.mrf.mxu0  ;;  %v4096_v37 = vld [vmem:[#allocation4 + $0xd0] sm:$0xf0] }
 0x28a   : > { %6241 = vst [vmem:[#allocation59_spill] sm:$0xff] %v5356_v61  ;;  %2309 = vmatmul.bf16.gmra.mxu1 %v5191_v45  ;;  %v3655_v61 = vld [vmem:[#allocation4 + $0xc8] sm:$0xf] }
 0x28b   : > { %1976 = vmatmul.bf16.gmra.mxu3 %v5360_v6  ;;  %v5376_v55 = vor.u32 %v4096_v37, %v3655_v61  ;;  %v4137_v37 = vld [vmem:[#allocation8 + $0x158] sm:$0xff] }
 0x28c   : > { %2353 = vmatmul.bf16.gmra.mxu2 %v5172_v48  ;;  %2413 = vmatpush.bf16.msrb.mxu3 %v4137_v37 }
 0x28d   : > { %6247 = vst [vmem:[#allocation65_spill] sm:$0xff] %v5376_v55 }
 0x28e   : > { %v1839_v51 = vpop.f32.mrf.mxu3 }
 0x28f   : > { %v1918_v13 = vpop.f32.mrf.mxu2  ;;  %v5372_v38 = vpop.f32.mrf.mxu1 }
 0x290   : > { %v5367_v57 = vadd.f32 %v1918_v13, %v1829_v29  ;;  %2739 = vmatmul.bf16.gmra.mxu0 %v5031_v47  ;;  %6245 = vst [vmem:[#allocation63_spill] sm:$0xff] %v5372_v38  ;;  %v4185_v29 = vld [vmem:[#allocation8 + $0x218] sm:$0xff]  ;;  %v1854_v47 = vadd.f32 %v5265_v36, %v5029_v44  ;;  %v5383_v16 = vpop.f32.mrf.mxu0  ;;  %v3667_v44 = vld [vmem:[#allocation4 + $0xe0] sm:$0xf]  ;;  %v4099_v36 = vld [vmem:[#allocation4 + $0xe8] sm:$0xf0] }
 0x291   : > { %2873 = vmatpush.bf16.msra.mxu2 %v4185_v29 }
 0x292   : > { %6244 = vst [vmem:[#allocation62_spill] sm:$0xff] %v5367_v57 }
 0x296   : > { %v1841_v28 = vpop.f32.mrf.mxu3 }
 0x297   : > { %v1920_v15 = vpop.f32.mrf.mxu2  ;;  %v5389_v61 = vpop.f32.mrf.mxu1 }
 0x298   : > { %v5374_v6 = vadd.f32 %v1920_v15, %v1831_v17  ;;  %v5394_v38 = vpop.f32.mrf.mxu0 }
 0x29a   : > { %6246 = vst [vmem:[#allocation64_spill] sm:$0xff] %v5374_v6  ;;  %2314 = vmatmul.bf16.gmra.mxu1 %v5230_v9 }
 0x29b   : > { %1981 = vmatmul.bf16.gmra.mxu3 %v5376_v55  ;;  %v1856_v55 = vadd.f32 %v5274_v40, %v5038_v58  ;;  %v1859_v40 = vadd.f32 %v5286_v53, %v5057_v12  ;;  %v4102_v12 = vld [vmem:[#allocation4 + $0x100] sm:$0xf0] }
 0x29c   : > { %2358 = vmatmul.bf16.gmra.mxu2 %v5207_v24 }
 0x29e   : > { %v1942_v13 = vpop.f32.mrf.mxu3 }
 0x29f   : > { %v1923_v57 = vpop.f32.mrf.mxu2  ;;  %v5385_v17 = vadd.f32 %v1942_v13, %v1854_v47  ;;  %v5402_v13 = vpop.f32.mrf.mxu1 }
 0x2a0   : > { %v5387_v15 = vadd.f32 %v1923_v57, %v1834_v30  ;;  %2744 = vmatmul.bf16.gmra.mxu0 %v5042_v0  ;;  %v5400_v0 = vor.u32 %v4099_v36, %v3667_v44  ;;  %v5415_v37 = vpop.f32.mrf.mxu0  ;;  %v1861_v36 = vadd.f32 %v5297_v52, %v5066_v26  ;;  %v1864_v52 = vadd.f32 %v5304_v7, %v5074_v39 }
 0x2a1   : > { %v6165_v30 = vrot.slane %v5385_v17, 7 }
 0x2a2   : > { %6248 = vst [vmem:[#allocation66_spill] sm:$0xff] %v5400_v0 }
 0x2a6   : > { %v1944_v6 = vpop.f32.mrf.mxu3 }
 0x2a7   : > { %v1925_v29 = vpop.f32.mrf.mxu2  ;;  %v1945_v22 = vadd.f32 %v1944_v6, %v1856_v55 }
 0x2a8   : > { %v5397_v57 = vadd.f32 %v1925_v29, %v1836_v59  ;;  %v5422_v29 = vpop.f32.mrf.mxu1 }
 0x2a9   : > { %v2023_v47 = vrot.slane %v1945_v22, 7 }
 0x2aa   : > { %2788 = vmatmul.bf16.vlgmr.msra.gmra.mxu1 %v5036_v56 }
 0x2ab   : > { %1986 = vmatmul.bf16.gmra.mxu3 %v5400_v0  ;;  %v2085_v58 = vsel %vm2054_vm7, %v6165_v30, %v2023_v47 }
 0x2ac   : > { %2363 = vmatmul.bf16.gmra.mxu2 %v5044_v3  ;;  %v2243_v7 = vadd.f32 %v5267_v50, %v2085_v58  ;;  %v1869_v50 = vadd.f32 %v5328_v19, %v5100_v18  ;;  %v1871_v18 = vadd.f32 %v5338_v31, %v5115_v43  ;;  %v1874_v31 = vadd.f32 %v5349_v60, %v5123_v2 }
 0x2ad   : > { %v1876_v2 = vadd.f32 %v5358_v14, %v5136_v35 }
 0x2ae   : > { %v1947_v59 = vpop.f32.mrf.mxu3 }
 0x2af   : > { %v1928_v55 = vpop.f32.mrf.mxu2  ;;  %v1948_v6 = vadd.f32 %v1947_v59, %v1859_v40 }
 0x2b0   : > { %v5413_v22 = vadd.f32 %v1928_v55, %v1839_v51  ;;  %2749 = vmatmul.bf16.gmra.mxu0 %v5076_v42  ;;  %v3679_v51 = vld [vmem:[#allocation4 + $0xf8] sm:$0xf]  ;;  %v4184_v42 = vld [vmem:[#allocation8 + $0x210] sm:$0xff] }
 0x2b1   : > { %v2024_v44 = vrot.slane %v1948_v6, 7  ;;  %v5426_v55 = vor.u32 %v4102_v12, %v3679_v51  ;;  %v5428_v6 = vpop.f32.mrf.mxu0  ;;  %2874 = vmatpush.bf16.msra.mxu2 %v4184_v42  ;;  %v1866_v12 = vadd.f32 %v5319_v54, %v5087_v63  ;;  %v3691_v51 = vld [vmem:[#allocation4 + $0x110] sm:$0xf]  ;;  %v4105_v42 = vld [vmem:[#allocation4 + $0x118] sm:$0xf0] }
 0x2b2   : > { %6249 = vst [vmem:[#allocation67_spill] sm:$0xff] %v5428_v6  ;;  %v5453_v6 = vor.u32 %v4105_v42, %v3691_v51 }
 0x2b3   : > { %v2084_v56 = vsel %vm2054_vm7, %v2023_v47, %v2024_v44 }
 0x2b4   : > { %v2246_v58 = vadd.f32 %v5272_v27, %v2084_v56  ;;  %v4108_v56 = vld [vmem:[#allocation4 + $0x130] sm:$0xf0] }
 0x2b6   : > { %v1949_v30 = vpop.f32.mrf.mxu3 }
 0x2b7   : > { %v1930_v53 = vpop.f32.mrf.mxu2  ;;  %v1950_v0 = vadd.f32 %v1949_v30, %v1861_v36  ;;  %v5437_v30 = vpop.f32.mrf.mxu1 }
 0x2b8   : > { %v5424_v40 = vadd.f32 %v1930_v53, %v1841_v28 }
 0x2b9   : > { %v2025_v59 = vrot.slane %v1950_v0, 7  ;;  %v5446_v53 = vpop.f32.mrf.mxu0 }
 0x2ba   : > { %2793 = vmatmul.bf16.gmra.mxu1 %v5064_v25  ;;  %v4136_v25 = vld [vmem:[#allocation8 + $0x150] sm:$0xff] }
 0x2bb   : > { %1991 = vmatmul.bf16.gmra.mxu3 %v5426_v55  ;;  %v2083_v26 = vsel %vm2054_vm7, %v2024_v44, %v2025_v59 }
 0x2bc   : > { %2368 = vmatmul.bf16.gmra.mxu2 %v5078_v46  ;;  %2414 = vmatpush.bf16.msrb.mxu3 %v4136_v25  ;;  %v2248_v27 = vadd.f32 %v5283_v23, %v2083_v26  ;;  %v4183_v23 = vld [vmem:[#allocation8 + $0x208] sm:$0xff] }
 0x2bd   : > { %2875 = vmatpush.bf16.msra.mxu2 %v4183_v23 }
 0x2be   : > { %v1952_v28 = vpop.f32.mrf.mxu3 }
 0x2bf   : > { %v1953_v47 = vadd.f32 %v1952_v28, %v1864_v52  ;;  %v5439_v0 = vpop.f32.mrf.mxu2 }
 0x2c0   : > { %6250 = vst [vmem:[#allocation68_spill] sm:$0xff] %v5439_v0  ;;  %2754 = vmatmul.bf16.gmra.mxu0 %v5103_v20  ;;  %v5451_v20 = vpop.f32.mrf.mxu1 }
 0x2c1   : > { %v2026_v36 = vrot.slane %v1953_v47, 7 }
 0x2c3   : > { %v2082_v44 = vsel %vm2054_vm7, %v2025_v59, %v2026_v36  ;;  %v5463_v59 = vpop.f32.mrf.mxu0 }
 0x2c6   : > { %v1954_v39 = vpop.f32.mrf.mxu3 }
 0x2c7   : > { %v1955_v52 = vadd.f32 %v1954_v39, %v1866_v12  ;;  %v2331_v28 = vpop.f32.mrf.mxu2 }
 0x2c8   : > { %v5449_v47 = vadd.f32 %v2331_v28, %v2243_v7  ;;  %v3703_v28 = vld [vmem:[#allocation4 + $0x128] sm:$0xf] }
 0x2c9   : > { %v2027_v0 = vrot.slane %v1955_v52, 7 }
 0x2ca   : > { %2798 = vmatmul.bf16.gmra.mxu1 %v5085_v62  ;;  %v5468_v62 = vpop.f32.mrf.mxu1 }
 0x2cb   : > { %1996 = vmatmul.bf16.gmra.mxu3 %v5453_v6  ;;  %v2081_v63 = vsel %vm2054_vm7, %v2026_v36, %v2027_v0 }
 0x2cc   : > { %2373 = vmatmul.bf16.gmra.mxu2 %v5105_v21 }
 0x2ce   : > { %v1957_v54 = vpop.f32.mrf.mxu3 }
 0x2cf   : > { %v1958_v25 = vadd.f32 %v1957_v54, %v1869_v50  ;;  %v2334_v12 = vpop.f32.mrf.mxu2  ;;  %v5477_v50 = vpop.f32.mrf.mxu0  ;;  %v5479_v54 = vor.u32 %v4108_v56, %v3703_v28  ;;  %v4111_v56 = vld [vmem:[#allocation4 + $0x148] sm:$0xf0] }
 0x2d0   : > { %v5465_v39 = vadd.f32 %v2334_v12, %v2246_v58  ;;  %2759 = vmatmul.bf16.gmra.mxu0 %v5125_v8  ;;  %v2251_v58 = vadd.f32 %v5290_v1, %v2082_v44  ;;  %v2253_v1 = vadd.f32 %v5301_v34, %v2081_v63  ;;  %v3715_v44 = vld [vmem:[#allocation4 + $0x140] sm:$0xf]  ;;  %v1879_v34 = vadd.f32 %v5370_v49, %v5154_v5 }
 0x2d1   : > { %v2028_v7 = vrot.slane %v1958_v25, 7 }
 0x2d2   : > { %v5488_v26 = vpop.f32.mrf.mxu1 }
 0x2d3   : > { %v2080_v36 = vsel %vm2054_vm7, %v2027_v0, %v2028_v7 }
 0x2d6   : > { %v1959_v19 = vpop.f32.mrf.mxu3 }
 0x2d7   : > { %v1960_v51 = vadd.f32 %v1959_v19, %v1871_v18  ;;  %v2336_v42 = vpop.f32.mrf.mxu2  ;;  %v5494_v19 = vpop.f32.mrf.mxu0 }
 0x2d8   : > { %v5475_v52 = vadd.f32 %v2336_v42, %v2248_v27 }
 0x2d9   : > { %v2029_v8 = vrot.slane %v1960_v51, 7 }
 0x2da   : > { %2803 = vmatmul.bf16.gmra.mxu1 %v5113_v41  ;;  %v5501_v51 = vpop.f32.mrf.mxu1 }
 0x2db   : > { %2001 = vmatmul.bf16.gmra.mxu3 %v5479_v54  ;;  %v2079_v43 = vsel %vm2054_vm7, %v2028_v7, %v2029_v8  ;;  %v4135_v7 = vld [vmem:[#allocation8 + $0x148] sm:$0xff] }
 0x2dc   : > { %2378 = vmatmul.bf16.gmra.mxu2 %v5127_v11  ;;  %2415 = vmatpush.bf16.msrb.mxu3 %v4135_v7 }
 0x2de   : > { %v1962_v0 = vpop.f32.mrf.mxu3 }
 0x2df   : > { %v1963_v25 = vadd.f32 %v1962_v0, %v1874_v31  ;;  %v2339_v12 = vpop.f32.mrf.mxu2  ;;  %v5505_v31 = vor.u32 %v4111_v56, %v3715_v44  ;;  %v5514_v14 = vpop.f32.mrf.mxu0  ;;  %v3727_v44 = vld [vmem:[#allocation4 + $0x158] sm:$0xf] }
 0x2e0   : > { %v5491_v18 = vadd.f32 %v2339_v12, %v2251_v58  ;;  %2764 = vmatmul.bf16.gmra.mxu0 %v5162_v10 }
 0x2e1   : > { %v2030_v41 = vrot.slane %v1963_v25, 7 }
 0x2e2   : > { %v5519_v7 = vpop.f32.mrf.mxu1 }
 0x2e3   : > { %v2078_v27 = vsel %vm2054_vm7, %v2029_v8, %v2030_v41  ;;  %v6252_v8 = vld [vmem:[#allocation45_spill] sm:$0xff] }
 0x2e4   : > { %v2256_v0 = vadd.f32 %v6252_v8, %v2080_v36  ;;  %v4114_v36 = vld [vmem:[#allocation4 + $0x160] sm:$0xf0] }
 0x2e5   : > { %v5531_v8 = vor.u32 %v4114_v36, %v3727_v44 }
 0x2e6   : > { %v1964_v60 = vpop.f32.mrf.mxu3 }
 0x2e7   : > { %v1965_v42 = vadd.f32 %v1964_v60, %v1876_v2  ;;  %v2341_v28 = vpop.f32.mrf.mxu2  ;;  %v6254_v2 = vld [vmem:[#allocation27_spill] sm:$0xff]  ;;  %v6255_v60 = vld [vmem:[#allocation48_spill] sm:$0xff]  ;;  %v5527_v56 = vpop.f32.mrf.mxu0 }
 0x2e8   : > { %v5503_v10 = vadd.f32 %v2341_v28, %v2253_v1  ;;  %v1881_v5 = vadd.f32 %v5383_v16, %v6254_v2  ;;  %v2258_v1 = vadd.f32 %v6255_v60, %v2079_v43  ;;  %6257 = vst [vmem:[#allocation48_spill] sm:$0xff] %v5531_v8  ;;  %v6258_v43 = vld [vmem:[#allocation29_spill] sm:$0xff] }
 0x2e9   : > { %v2031_v23 = vrot.slane %v1965_v42, 7 }
 0x2ea   : > { %6251 = vst [vmem:[#allocation69_spill] sm:$0xff] %v5503_v10  ;;  %2808 = vmatmul.bf16.gmra.mxu1 %v5134_v33 }
 0x2eb   : > { %2006 = vmatmul.bf16.gmra.mxu3 %v5505_v31  ;;  %v2077_v35 = vsel %vm2054_vm7, %v2030_v41, %v2031_v23 }
 0x2ec   : > { %2383 = vmatmul.bf16.gmra.mxu2 %v5164_v4 }
 0x2ee   : > { %v1967_v63 = vpop.f32.mrf.mxu3 }
 0x2ef   : > { %v1968_v58 = vadd.f32 %v1967_v63, %v1879_v34  ;;  %v2344_v25 = vpop.f32.mrf.mxu2  ;;  %v5545_v36 = vpop.f32.mrf.mxu0 }
 0x2f0   : > { %v5517_v12 = vadd.f32 %v2344_v25, %v2256_v0  ;;  %2769 = vmatmul.bf16.gmra.mxu0 %v5191_v45  ;;  %v4134_v45 = vld [vmem:[#allocation8 + $0x140] sm:$0xff]  ;;  %v5533_v0 = vpop.f32.mrf.mxu1 }
 0x2f1   : > { %v2032_v33 = vrot.slane %v1968_v58, 7  ;;  %2416 = vmatpush.bf16.msrb.mxu3 %v4134_v45  ;;  %v6259_v58 = vld [vmem:[#allocation28_spill] sm:$0xff] }
 0x2f2   : > { %6253 = vst [vmem:[#allocation45_spill] sm:$0xff] %v5517_v12  ;;  %v1884_v25 = vadd.f32 %v5394_v38, %v6259_v58  ;;  %v3739_v58 = vld [vmem:[#allocation4 + $0x170] sm:$0xf] }
 0x2f3   : > { %v2076_v41 = vsel %vm2054_vm7, %v2031_v23, %v2032_v33  ;;  %v4182_v23 = vld [vmem:[#allocation8 + $0x200] sm:$0xff]  ;;  %6262 = vst [vmem:[#allocation28_spill] sm:$0xff] %v5545_v36 }
 0x2f4   : > { %2876 = vmatpush.bf16.msra.mxu2 %v4182_v23 }
 0x2f6   : > { %v1969_v49 = vpop.f32.mrf.mxu3 }
 0x2f7   : > { %v1970_v42 = vadd.f32 %v1969_v49, %v1881_v5  ;;  %v2346_v28 = vpop.f32.mrf.mxu2  ;;  %v6260_v5 = vld [vmem:[#allocation50_spill] sm:$0xff] }
 0x2f8   : > { %v5529_v34 = vadd.f32 %v2346_v28, %v2258_v1  ;;  %v2261_v49 = vadd.f32 %v6260_v5, %v2078_v27  ;;  %v5552_v38 = vpop.f32.mrf.mxu1  ;;  %v6264_v27 = vld [vmem:[#allocation53_spill] sm:$0xff] }
 0x2f9   : > { %v2033_v63 = vrot.slane %v1970_v42, 7  ;;  %v6263_v42 = vld [vmem:[#allocation30_spill] sm:$0xff]  ;;  %v2263_v23 = vadd.f32 %v6264_v27, %v2077_v35  ;;  %v6268_v35 = vld [vmem:[#allocation55_spill] sm:$0xff] }
 0x2fa   : > { %6256 = vst [vmem:[#allocation27_spill] sm:$0xff] %v5529_v34  ;;  %2813 = vmatmul.bf16.gmra.mxu1 %v5172_v48  ;;  %v1886_v28 = vadd.f32 %v5415_v37, %v6263_v42  ;;  %v6267_v37 = vld [vmem:[#allocation31_spill] sm:$0xff]  ;;  %v2266_v42 = vadd.f32 %v6268_v35, %v2076_v41 }
 0x2fb   : > { %2011 = vmatmul.bf16.gmra.mxu3 %v5531_v8  ;;  %v2075_v16 = vsel %vm2054_vm7, %v2032_v33, %v2033_v63  ;;  %v6274_v8 = vld [vmem:[#allocation33_spill] sm:$0xff] }
 0x2fc   : > { %2388 = vmatmul.bf16.gmra.mxu2 %v6258_v43 }
 0x2fe   : > { %v1972_v2 = vpop.f32.mrf.mxu3 }
 0x2ff   : > { %v1973_v60 = vadd.f32 %v1972_v2, %v1884_v25  ;;  %v2349_v1 = vpop.f32.mrf.mxu2  ;;  %v4117_v25 = vld [vmem:[#allocation4 + $0x178] sm:$0xf0] }
 0x300   : > { %v5543_v44 = vadd.f32 %v2349_v1, %v2261_v49  ;;  %2774 = vmatmul.bf16.gmra.mxu0 %v5230_v9  ;;  %v5557_v1 = vor.u32 %v4117_v25, %v3739_v58  ;;  %v5565_v27 = vpop.f32.mrf.mxu1 }
 0x301   : > { %v2034_v48 = vrot.slane %v1973_v60, 7 }
 0x302   : > { %6261 = vst [vmem:[#allocation29_spill] sm:$0xff] %v5543_v44 }
 0x303   : > { %v2074_v33 = vsel %vm2054_vm7, %v2033_v63, %v2034_v48  ;;  %6266 = vst [vmem:[#allocation30_spill] sm:$0xff] %v5557_v1 }
 0x306   : > { %v1974_v45 = vpop.f32.mrf.mxu3 }
 0x307   : > { %v1975_v2 = vadd.f32 %v1974_v45, %v1886_v28  ;;  %v2351_v5 = vpop.f32.mrf.mxu2  ;;  %v6269_v28 = vld [vmem:[#allocation35_spill] sm:$0xff] }
 0x308   : > { %v5555_v49 = vadd.f32 %v2351_v5, %v2263_v23  ;;  %v6271_v5 = vld [vmem:[#allocation58_spill] sm:$0xff]  ;;  %v5576_v41 = vpop.f32.mrf.mxu1 }
 0x309   : > { %v2035_v60 = vrot.slane %v1975_v2, 7 }
 0x30a   : > { %6265 = vst [vmem:[#allocation50_spill] sm:$0xff] %v5555_v49  ;;  %2818 = vmatmul.bf16.gmra.mxu1 %v5207_v24  ;;  %v2268_v49 = vadd.f32 %v6271_v5, %v2075_v16 }
 0x30b   : > { %2016 = vmatmul.bf16.gmra.mxu3 %v5557_v1  ;;  %v2073_v9 = vsel %vm2054_vm7, %v2034_v48, %v2035_v60  ;;  %v6272_v48 = vld [vmem:[#allocation38_spill] sm:$0xff] }
 0x30c   : > { %2393 = vmatmul.bf16.gmra.mxu2 %v6267_v37 }
 0x30e   : > { %v1977_v63 = vpop.f32.mrf.mxu3 }
 0x30f   : > { %v1978_v45 = vadd.f32 %v1977_v63, %v6269_v28  ;;  %v2354_v23 = vpop.f32.mrf.mxu2  ;;  %v6276_v28 = vld [vmem:[#allocation61_spill] sm:$0xff] }
 0x310   : > { %v5568_v2 = vadd.f32 %v2354_v23, %v2266_v42  ;;  %v6275_v42 = vld [vmem:[#allocation32_spill] sm:$0xff]  ;;  %v2271_v16 = vadd.f32 %v6276_v28, %v2074_v33  ;;  %v5587_v5 = vpop.f32.mrf.mxu1 }
 0x311   : > { %v2036_v58 = vrot.slane %v1978_v45, 7  ;;  %v6277_v45 = vld [vmem:[#allocation40_spill] sm:$0xff] }
 0x312   : > { %6270 = vst [vmem:[#allocation53_spill] sm:$0xff] %v5568_v2  ;;  %v6282_v28 = vld [vmem:[#allocation36_spill] sm:$0xff] }
 0x313   : > { %v2072_v25 = vsel %vm2054_vm7, %v2035_v60, %v2036_v58 }
 0x316   : > { %v1979_v24 = vpop.f32.mrf.mxu3 }
 0x317   : > { %v1980_v1 = vadd.f32 %v1979_v24, %v6272_v48  ;;  %v2356_v44 = vpop.f32.mrf.mxu2  ;;  %v6279_v48 = vld [vmem:[#allocation63_spill] sm:$0xff] }
 0x318   : > { %v5574_v34 = vadd.f32 %v2356_v44, %v2268_v49 }
 0x319   : > { %v2037_v35 = vrot.slane %v1980_v1, 7 }
 0x31a   : > { %6273 = vst [vmem:[#allocation31_spill] sm:$0xff] %v5574_v34  ;;  %2823 = vmatmul.bf16.gmra.mxu1 %v5044_v3  ;;  %v2273_v34 = vadd.f32 %v6279_v48, %v2073_v9  ;;  %v2276_v9 = vadd.f32 %v5389_v61, %v2072_v25  ;;  %v6286_v25 = vld [vmem:[#allocation39_spill] sm:$0xff] }
 0x31b   : > { %2417 = vmatmul.bf16.vlgmr.msrb.gmra.mxu3 %v6274_v8  ;;  %v2071_v63 = vsel %vm2054_vm7, %v2036_v58, %v2037_v35  ;;  %v6280_v58 = vld [vmem:[#allocation41_spill] sm:$0xff] }
 0x31c   : > { %2398 = vmatmul.bf16.gmra.mxu2 %v6275_v42  ;;  %v2278_v48 = vadd.f32 %v5402_v13, %v2071_v63  ;;  %v6287_v63 = vld [vmem:[#allocation47_spill] sm:$0xff] }
 0x31e   : > { %v1982_v60 = vpop.f32.mrf.mxu3 }
 0x31f   : > { %v1983_v23 = vadd.f32 %v1982_v60, %v6277_v45  ;;  %v2359_v24 = vpop.f32.mrf.mxu2  ;;  %v5600_v45 = vpop.f32.mrf.mxu1 }
 0x320   : > { %v5585_v44 = vadd.f32 %v2359_v24, %v2271_v16  ;;  %v6283_v16 = vld [vmem:[#allocation37_spill] sm:$0xff] }
 0x321   : > { %v2038_v49 = vrot.slane %v1983_v23, 7  ;;  %v6284_v23 = vld [vmem:[#allocation43_spill] sm:$0xff] }
 0x322   : > { %6278 = vst [vmem:[#allocation55_spill] sm:$0xff] %v5585_v44 }
 0x323   : > { %v2070_v1 = vsel %vm2054_vm7, %v2037_v35, %v2038_v49 }
 0x324   : > { %v2281_v13 = vadd.f32 %v5422_v29, %v2070_v1 }
 0x326   : > { %v1984_v3 = vpop.f32.mrf.mxu3 }
 0x327   : > { %v1985_v2 = vadd.f32 %v1984_v3, %v6280_v58  ;;  %v2361_v12 = vpop.f32.mrf.mxu2  ;;  %v6285_v58 = vld [vmem:[#allocation44_spill] sm:$0xff] }
 0x328   : > { %v5593_v36 = vadd.f32 %v2361_v12, %v2273_v34 }
 0x329   : > { %v2039_v33 = vrot.slane %v1985_v2, 7 }
 0x32a   : > { %6281 = vst [vmem:[#allocation35_spill] sm:$0xff] %v5593_v36  ;;  %2828 = vmatmul.bf16.gmra.mxu1 %v5078_v46 }
 0x32b   : > { %2422 = vmatmul.bf16.gmra.mxu3 %v6282_v28  ;;  %v2069_v60 = vsel %vm2054_vm7, %v2038_v49, %v2039_v33  ;;  %v5609_v49 = vpop.f32.mrf.mxu1 }
 0x32c   : > { %2403 = vmatmul.bf16.gmra.mxu2 %v6283_v16 }
 0x32e   : > { %v1987_v35 = vpop.f32.mrf.mxu3 }
 0x32f   : > { %v1988_v24 = vadd.f32 %v1987_v35, %v6284_v23  ;;  %v2364_v3 = vpop.f32.mrf.mxu2 }
 0x330   : > { %v5604_v12 = vadd.f32 %v2364_v3, %v2276_v9 }
 0x331   : > { %v2040_v34 = vrot.slane %v1988_v24, 7 }
 0x333   : > { %v2068_v2 = vsel %vm2054_vm7, %v2039_v33, %v2040_v34 }
 0x336   : > { %v1989_v46 = vpop.f32.mrf.mxu3 }
 0x337   : > { %v1990_v36 = vadd.f32 %v1989_v46, %v6285_v58  ;;  %v2366_v44 = vpop.f32.mrf.mxu2  ;;  %v2283_v46 = vadd.f32 %v5437_v30, %v2069_v60  ;;  %v2286_v30 = vadd.f32 %v5451_v20, %v2068_v2  ;;  %v6291_v60 = vld [vmem:[#allocation52_spill] sm:$0xff]  ;;  %v6294_v2 = vld [vmem:[#allocation46_spill] sm:$0xff] }
 0x338   : > { %v5612_v10 = vadd.f32 %v2366_v44, %v2278_v48  ;;  %v5623_v44 = vpop.f32.mrf.mxu1 }
 0x339   : > { %v2041_v61 = vrot.slane %v1990_v36, 7 }
 0x33a   : > { %2833 = vmatmul.bf16.gmra.mxu1 %v5105_v21 }
 0x33b   : > { %2427 = vmatmul.bf16.gmra.mxu3 %v6286_v25  ;;  %v2067_v35 = vsel %vm2054_vm7, %v2040_v34, %v2041_v61  ;;  %v6288_v34 = vld [vmem:[#allocation49_spill] sm:$0xff] }
 0x33c   : > { %2877 = vmatmul.bf16.vlgmr.msra.gmra.mxu2 %v6274_v8 }
 0x33e   : > { %v1992_v33 = vpop.f32.mrf.mxu3 }
 0x33f   : > { %v1993_v9 = vadd.f32 %v1992_v33, %v6287_v63  ;;  %v2369_v23 = vpop.f32.mrf.mxu2  ;;  %v6290_v33 = vld [vmem:[#allocation42_spill] sm:$0xff] }
 0x340   : > { %v5621_v24 = vadd.f32 %v2369_v23, %v2281_v13  ;;  %v5631_v1 = vpop.f32.mrf.mxu1 }
 0x341   : > { %v2042_v36 = vrot.slane %v1993_v9, 7 }
 0x343   : > { %v2066_v3 = vsel %vm2054_vm7, %v2041_v61, %v2042_v36 }
 0x346   : > { %v1994_v21 = vpop.f32.mrf.mxu3 }
 0x347   : > { %v1995_v48 = vadd.f32 %v1994_v21, %v6288_v34  ;;  %v2371_v8 = vpop.f32.mrf.mxu2 }
 0x348   : > { %v5629_v58 = vadd.f32 %v2371_v8, %v2283_v46  ;;  %v5644_v34 = vpop.f32.mrf.mxu1 }
 0x349   : > { %v2043_v29 = vrot.slane %v1995_v48, 7  ;;  %v2288_v48 = vadd.f32 %v5468_v62, %v2067_v35  ;;  %v6295_v62 = vld [vmem:[#allocation57_spill] sm:$0xff] }
 0x34a   : > { %6289 = vst [vmem:[#allocation58_spill] sm:$0xff] %v5629_v58  ;;  %2838 = vmatmul.bf16.gmra.mxu1 %v5127_v11 }
 0x34b   : > { %2432 = vmatmul.bf16.gmra.mxu3 %v6290_v33  ;;  %v2065_v13 = vsel %vm2054_vm7, %v2042_v36, %v2043_v29  ;;  %v6292_v36 = vld [vmem:[#allocation54_spill] sm:$0xff] }
 0x34c   : > { %2882 = vmatmul.bf16.gmra.mxu2 %v6282_v28 }
 0x34e   : > { %v1997_v61 = vpop.f32.mrf.mxu3 }
 0x34f   : > { %v1998_v63 = vadd.f32 %v1997_v61, %v6291_v60  ;;  %v2374_v9 = vpop.f32.mrf.mxu2 }
 0x350   : > { %v5640_v23 = vadd.f32 %v2374_v9, %v2286_v30  ;;  %v2291_v30 = vadd.f32 %v5488_v26, %v2066_v3  ;;  %v5656_v60 = vpop.f32.mrf.mxu1 }
 0x351   : > { %v2044_v21 = vrot.slane %v1998_v63, 7 }
 0x353   : > { %v2064_v46 = vsel %vm2054_vm7, %v2043_v29, %v2044_v21 }
 0x356   : > { %v1999_v11 = vpop.f32.mrf.mxu3 }
 0x357   : > { %v2000_v8 = vadd.f32 %v1999_v11, %v6292_v36  ;;  %v2376_v28 = vpop.f32.mrf.mxu2  ;;  %v2293_v36 = vadd.f32 %v5501_v51, %v2065_v13  ;;  %v2296_v51 = vadd.f32 %v5519_v7, %v2064_v46  ;;  %v6298_v13 = vld [vmem:[#allocation62_spill] sm:$0xff]  ;;  %v6300_v46 = vld [vmem:[#allocation56_spill] sm:$0xff] }
 0x358   : > { %v5648_v58 = vadd.f32 %v2376_v28, %v2288_v48  ;;  %v5667_v26 = vpop.f32.mrf.mxu1 }
 0x359   : > { %v2045_v20 = vrot.slane %v2000_v8, 7 }
 0x35a   : > { %6293 = vst [vmem:[#allocation38_spill] sm:$0xff] %v5648_v58  ;;  %2843 = vmatmul.bf16.gmra.mxu1 %v5164_v4  ;;  %v6297_v58 = vld [vmem:[#allocation51_spill] sm:$0xff] }
 0x35b   : > { %2437 = vmatmul.bf16.gmra.mxu3 %v6294_v2  ;;  %v2063_v61 = vsel %vm2054_vm7, %v2044_v21, %v2045_v20  ;;  %v6296_v21 = vld [vmem:[#allocation59_spill] sm:$0xff] }
 0x35c   : > { %2887 = vmatmul.bf16.gmra.mxu2 %v6286_v25 }
 0x35e   : > { %v2002_v29 = vpop.f32.mrf.mxu3 }
 0x35f   : > { %v2003_v35 = vadd.f32 %v2002_v29, %v6295_v62  ;;  %v2379_v63 = vpop.f32.mrf.mxu2 }
 0x360   : > { %v5659_v9 = vadd.f32 %v2379_v63, %v2291_v30 }
 0x361   : > { %v2046_v11 = vrot.slane %v2003_v35, 7 }
 0x363   : > { %v2062_v48 = vsel %vm2054_vm7, %v2045_v20, %v2046_v11 }
 0x366   : > { %v2004_v4 = vpop.f32.mrf.mxu3 }
 0x367   : > { %v2005_v8 = vadd.f32 %v2004_v4, %v6296_v21  ;;  %v2381_v25 = vpop.f32.mrf.mxu2  ;;  %v5678_v4 = vpop.f32.mrf.mxu1  ;;  %v2298_v21 = vadd.f32 %v5533_v0, %v2063_v61  ;;  %v2301_v0 = vadd.f32 %v5552_v38, %v2062_v48  ;;  %v6301_v48 = vld [vmem:[#allocation60_spill] sm:$0xff] }
 0x368   : > { %v5665_v28 = vadd.f32 %v2381_v25, %v2293_v36 }
 0x369   : > { %v2047_v3 = vrot.slane %v2005_v8, 7 }
 0x36a   : > { %2848 = vmatmul.bf16.gmra.mxu1 %v6258_v43 }
 0x36b   : > { %2442 = vmatmul.bf16.gmra.mxu3 %v6297_v58  ;;  %v2061_v29 = vsel %vm2054_vm7, %v2046_v11, %v2047_v3  ;;  %v6299_v11 = vld [vmem:[#allocation64_spill] sm:$0xff] }
 0x36c   : > { %2892 = vmatmul.bf16.gmra.mxu2 %v6290_v33 }
 0x36e   : > { %v2007_v20 = vpop.f32.mrf.mxu3 }
 0x36f   : > { %v2008_v30 = vadd.f32 %v2007_v20, %v6298_v13  ;;  %v2384_v62 = vpop.f32.mrf.mxu2 }
 0x370   : > { %v5676_v35 = vadd.f32 %v2384_v62, %v2296_v51  ;;  %v5691_v51 = vpop.f32.mrf.mxu1 }
 0x371   : > { %v2048_v63 = vrot.slane %v2008_v30, 7 }
 0x373   : > { %v2060_v36 = vsel %vm2054_vm7, %v2047_v3, %v2048_v63 }
 0x376   : > { %v2009_v43 = vpop.f32.mrf.mxu3 }
 0x377   : > { %v2010_v8 = vadd.f32 %v2009_v43, %v6299_v11  ;;  %v2386_v33 = vpop.f32.mrf.mxu2 }
 0x378   : > { %v5684_v25 = vadd.f32 %v2386_v33, %v2298_v21  ;;  %v2303_v21 = vadd.f32 %v5565_v27, %v2061_v29  ;;  %v2306_v27 = vadd.f32 %v5576_v41, %v2060_v36 }
 0x379   : > { %v2049_v7 = vrot.slane %v2010_v8, 7 }
 0x37a   : > { %2853 = vmatmul.bf16.gmra.mxu1 %v6267_v37 }
 0x37b   : > { %2447 = vmatmul.bf16.gmra.mxu3 %v6300_v46  ;;  %v2059_v20 = vsel %vm2054_vm7, %v2048_v63, %v2049_v7  ;;  %v5700_v63 = vpop.f32.mrf.mxu1 }
 0x37c   : > { %2897 = vmatmul.bf16.gmra.mxu2 %v6294_v2 }
 0x37e   : > { %v2012_v3 = vpop.f32.mrf.mxu3 }
 0x37f   : > { %v2013_v61 = vadd.f32 %v2012_v3, %v5387_v15  ;;  %v2389_v13 = vpop.f32.mrf.mxu2 }
 0x380   : > { %v5695_v30 = vadd.f32 %v2389_v13, %v2301_v0  ;;  %v2308_v13 = vadd.f32 %v5587_v5, %v2059_v20 }
 0x381   : > { %v2050_v62 = vrot.slane %v2013_v61, 7 }
 0x383   : > { %v2058_v43 = vsel %vm2054_vm7, %v2049_v7, %v2050_v62  ;;  %v5714_v3 = vpop.f32.mrf.mxu1 }
 0x386   : > { %v2014_v37 = vpop.f32.mrf.mxu3 }
 0x387   : > { %v2015_v2 = vadd.f32 %v2014_v37, %v5397_v57  ;;  %v2391_v11 = vpop.f32.mrf.mxu2 }
 0x388   : > { %v5703_v8 = vadd.f32 %v2391_v11, %v2303_v21  ;;  %v6303_v21 = vrot.slane %v5385_v17, 7  ;;  %v6304_v17 = vld [vmem:[#allocation66_spill] sm:$0xff] }
 0x389   : > { %v2051_v38 = vrot.slane %v2015_v2, 7 }
 0x38a   : > { %2858 = vmatmul.bf16.gmra.mxu1 %v6275_v42 }
 0x38b   : > { %2452 = vmatmul.bf16.gmra.mxu3 %v6301_v48  ;;  %v2057_v15 = vsel %vm2054_vm7, %v2050_v62, %v2051_v38  ;;  %v5722_v36 = vpop.f32.mrf.mxu1 }
 0x38c   : > { %2902 = vmatmul.bf16.gmra.mxu2 %v6297_v58 }
 0x38e   : > { %v2017_v33 = vpop.f32.mrf.mxu3 }
 0x38f   : > { %v2018_v29 = vadd.f32 %v2017_v33, %v5413_v22  ;;  %v2394_v7 = vpop.f32.mrf.mxu2  ;;  %v6302_v22 = vld [vmem:[#allocation65_spill] sm:$0xff]  ;;  %v2313_v33 = vadd.f32 %v5609_v49, %v2057_v15 }
 0x390   : > { %v5712_v57 = vadd.f32 %v2394_v7, %v2306_v27 }
 0x391   : > { %v2052_v0 = vrot.slane %v2018_v29, 7 }
 0x393   : > { %v2056_v61 = vsel %vm2054_vm7, %v2051_v38, %v2052_v0 }
 0x394   : > { %v2316_v7 = vadd.f32 %v5623_v44, %v2056_v61  ;;  %v6306_v61 = vld [vmem:[#allocation67_spill] sm:$0xff] }
 0x396   : > { %v2019_v42 = vpop.f32.mrf.mxu3 }
 0x397   : > { %v2020_v62 = vadd.f32 %v2019_v42, %v5424_v40  ;;  %v2396_v58 = vpop.f32.mrf.mxu2  ;;  %v2311_v40 = vadd.f32 %v5600_v45, %v2058_v43 }
 0x398   : > { %v5720_v37 = vadd.f32 %v2396_v58, %v2308_v13  ;;  %v2790_v58 = vadd.f32 %v5644_v34, %v6306_v61  ;;  %v5771_v34 = vpop.f32.mrf.mxu1 }
 0x399   : > { %v2053_v41 = vrot.slane %v2020_v62, 7  ;;  %v6305_v62 = vld [vmem:[#allocation34_spill] sm:$0xff] }
 0x39a   : > { %2863 = vmatmul.bf16.gmra.mxu1 %v6283_v16 }
 0x39b   : > { %2457 = vmatmul.bf16.gmra.mxu3 %v6302_v22  ;;  %v2086_v2 = vsel %vm2054_vm7, %v2053_v41, %v6303_v21  ;;  %v2055_v5 = vsel %vm2054_vm7, %v2052_v0, %v2053_v41 }
 0x39c   : > { %2907 = vmatmul.bf16.gmra.mxu2 %v6300_v46  ;;  %v2318_v45 = vadd.f32 %v5631_v1, %v2055_v5  ;;  %v2241_v44 = vadd.f32 %v6305_v62, %v2086_v2  ;;  %v2792_v1 = vadd.f32 %v5656_v60, %v5446_v53  ;;  %v6307_v5 = vld [vmem:[#allocation68_spill] sm:$0xff] }
 0x39e   : > { %v2418_v20 = vpop.f32.mrf.mxu3 }
 0x39f   : > { %v2399_v11 = vpop.f32.mrf.mxu2 }
 0x3a0   : > { %v5734_v38 = vadd.f32 %v2399_v11, %v2311_v40  ;;  %v2330_v40 = vadd.f32 %v6307_v5, %v2241_v44 }
 0x3a2   : > { %v2419_v2 = vadd.f32 %v2418_v20, %v2330_v40  ;;  %v2795_v20 = vadd.f32 %v5667_v26, %v5463_v59  ;;  %v5798_v40 = vpop.f32.mrf.mxu1 }
 0x3a6   : > { %v2420_v27 = vpop.f32.mrf.mxu3 }
 0x3a7   : > { %v2401_v16 = vpop.f32.mrf.mxu2  ;;  %v2421_v61 = vadd.f32 %v2420_v27, %v5449_v47 }
 0x3a8   : > { %v5737_v29 = vadd.f32 %v2401_v16, %v2313_v33 }
 0x3ab   : > { %2462 = vmatmul.bf16.gmra.mxu3 %v6304_v17 }
 0x3ac   : > { %2912 = vmatmul.bf16.gmra.mxu2 %v6301_v48 }
 0x3ae   : > { %v2423_v0 = vpop.f32.mrf.mxu3 }
 0x3af   : > { %v2404_v46 = vpop.f32.mrf.mxu2 }
 0x3b0   : > { %v5742_v42 = vadd.f32 %v2404_v46, %v2316_v7  ;;  %v5776_v7 = vld [vmem:[%s6128_s5] ss:$0 sm:$0xff] }
 0x3b6   : > { %v5745_v43 = vpop.f32.mrf.mxu3 }
 0x3b7   : > { %v2406_v13 = vpop.f32.mrf.mxu2 }
 0x3b8   : > { %v5747_v49 = vadd.f32 %v2406_v13, %v2318_v45  ;;  %v5782_v45 = vpop.f32.mrf.mxu0 }
 0x3bb   : > { %2467 = vmatmul.bf16.gmra.mxu3 %v5426_v55 }
 0x3bc   : > { %2917 = vmatmul.bf16.gmra.mxu2 %v6302_v22 }
 0x3be   : > { %v5751_v15 = vpop.f32.mrf.mxu3 }
 0x3bf   : > { %v2878_v48 = vpop.f32.mrf.mxu2 }
 0x3c0   : > { %v5758_v41 = vadd.f32 %v2878_v48, %v2790_v58 }
 0x3c2   : > { %v2958_v22 = vrot.slane %v5758_v41, 1 }
 0x3c6   : > { %v5760_v21 = vpop.f32.mrf.mxu3 }
 0x3c7   : > { %v2880_v11 = vpop.f32.mrf.mxu2 }
 0x3c8   : > { %v2881_v33 = vadd.f32 %v2880_v11, %v2792_v1  ;;  %v2797_v1 = vadd.f32 %v5678_v4, %v5477_v50 }
 0x3ca   : > { %v2959_v16 = vrot.slane %v2881_v33, 1 }
 0x3cb   : > { %2472 = vmatmul.bf16.gmra.mxu3 %v5453_v6 }
 0x3cc   : > { %v3021_v53 = vsel %vm2990_vm4, %v2958_v22, %v2959_v16  ;;  %2922 = vmatmul.bf16.gmra.mxu2 %v6304_v17  ;;  %v5788_v17 = vld [vmem:[%s6129_s6] ss:$0 sm:$0xff] }
 0x3cd   : > { %v3023_v60 = vadd.f32 %v3021_v53, %v2419_v2  ;;  %v5801_v53 = vpop.f32.mrf.mxu0 }
 0x3ce   : > { %v5780_v46 = vpop.f32.mrf.mxu3 }
 0x3cf   : > { %v2883_v13 = vpop.f32.mrf.mxu2  ;;  %v3059_v62 = vmul.f32 %v5776_v7, %v3023_v60  ;;  %v2424_v60 = vadd.f32 %v2423_v0, %v5465_v39  ;;  %v5814_v0 = vpop.f32.mrf.mxu1 }
 0x3d0   : > { %v2884_v48 = vadd.f32 %v2883_v13, %v2795_v20 }
 0x3d1   : > { %v3095_v59 = vadd.f32 %v5788_v17, %v3059_v62  ;;  %v2800_v62 = vadd.f32 %v5691_v51, %v5494_v19 }
 0x3d2   : > { %v2960_v44 = vrot.slane %v2884_v48, 1 }
 0x3d3   : > { %v3159_v47 = vmul.f32 0.01, %v3095_v59  ;;  %vm3127_vm5 = vcmp.ge.f32.partialorder %v3095_v59, 0.0 }
 0x3d4   : > { %v3020_v58 = vsel %vm2990_vm4, %v2959_v16, %v2960_v44 }
 0x3d5   : > { %v3024_v26 = vadd.f32 %v3020_v58, %v2421_v61  ;;  %v3191_v20 = vsel %vm3127_vm5, %v3095_v59, %v3159_v47 }
 0x3d6   : > { %v5796_v5 = vpop.f32.mrf.mxu3 }
 0x3d7   : > { %v3060_v11 = vmul.f32 %v5776_v7, %v3024_v26  ;;  %v2885_v33 = vpop.f32.mrf.mxu2 }
 0x3d8   : > { %v2886_v2 = vadd.f32 %v2885_v33, %v2797_v1  ;;  %v2802_v33 = vadd.f32 %v5700_v63, %v5514_v14 }
 0x3d9   : > { %v3096_v27 = vadd.f32 %v5788_v17, %v3060_v11 }
 0x3da   : > { %v2961_v16 = vrot.slane %v2886_v2, 1 }
 0x3db   : > { %vm3128_vm6 = vcmp.ge.f32.partialorder %v3096_v27, 0.0  ;;  %v3160_v50 = vmul.f32 0.01, %v3096_v27  ;;  %2477 = vmatmul.bf16.gmra.mxu3 %v5479_v54 }
 0x3dc   : > { %v3019_v4 = vsel %vm2990_vm4, %v2960_v44, %v2961_v16  ;;  %2927 = vmatmul.bf16.gmra.mxu2 %v5426_v55  ;;  %v5817_v44 = vpop.f32.mrf.mxu0  ;;  %v2426_v55 = vadd.f32 %v5745_v43, %v5475_v52  ;;  %v5830_v43 = vpop.f32.mrf.mxu1 }
 0x3dd   : > { %v3192_v13 = vsel %vm3128_vm6, %v3096_v27, %v3160_v50  ;;  %v3025_v48 = vadd.f32 %v3019_v4, %v2424_v60 }
 0x3de   : > { %v4193_v61 = vpack.c.bf16 %v3192_v13, %v3191_v20  ;;  %v5811_v58 = vpop.f32.mrf.mxu3 }
 0x3df   : > { %v2888_v26 = vpop.f32.mrf.mxu2  ;;  %v3061_v1 = vmul.f32 %v5776_v7, %v3025_v48 }
 0x3e0   : > { %4194 = vst [vmem:[%s4854_s10] sm:$0xff] %v4193_v61   ;;  %v2889_v39 = vadd.f32 %v2888_v26, %v2800_v62  ;;  %v2805_v61 = vadd.f32 %v5714_v3, %v5527_v56  ;;  %v6309_v3 = vld [vmem:[#allocation28_spill] sm:$0xff] }
 0x3e1   : > { %v3097_v19 = vadd.f32 %v5788_v17, %v3061_v1 }
 0x3e2   : > { %v2962_v11 = vrot.slane %v2889_v39, 1 }
 0x3e3   : > { %v3161_v50 = vmul.f32 0.01, %v3097_v19  ;;  %vm3129_vm8 = vcmp.ge.f32.partialorder %v3097_v19, 0.0 }
 0x3e4   : > { %v3018_v59 = vsel %vm2990_vm4, %v2961_v16, %v2962_v11  ;;  %v2429_v16 = vadd.f32 %v5751_v15, %v5491_v18  ;;  %v5838_v63 = vpop.f32.mrf.mxu0 }
 0x3e5   : > { %v3026_v51 = vadd.f32 %v3018_v59, %v2426_v55  ;;  %v3193_v13 = vsel %vm3129_vm8, %v3097_v19, %v3161_v50  ;;  %v5850_v19 = vpop.f32.mrf.mxu1 }
 0x3e6   : > { %v5826_v2 = vpop.f32.mrf.mxu3 }
 0x3e7   : > { %v3062_v47 = vmul.f32 %v5776_v7, %v3026_v51  ;;  %v2890_v27 = vpop.f32.mrf.mxu2 }
 0x3e8   : > { %v2891_v60 = vadd.f32 %v2890_v27, %v2802_v33  ;;  %v2807_v33 = vadd.f32 %v5722_v36, %v6309_v3  ;;  %v6311_v36 = vld [vmem:[#allocation48_spill] sm:$0xff] }
 0x3e9   : > { %v3098_v4 = vadd.f32 %v5788_v17, %v3062_v47 }
 0x3ea   : > { %v2963_v52 = vrot.slane %v2891_v60, 1 }
 0x3eb   : > { %vm3130_vm9 = vcmp.ge.f32.partialorder %v3098_v4, 0.0  ;;  %v3162_v20 = vmul.f32 0.01, %v3098_v4  ;;  %2482 = vmatmul.bf16.gmra.mxu3 %v5505_v31 }
 0x3ec   : > { %v3017_v14 = vsel %vm2990_vm4, %v2962_v11, %v2963_v52  ;;  %2932 = vmatmul.bf16.gmra.mxu2 %v5453_v6  ;;  %v6308_v11 = vld [vmem:[#allocation69_spill] sm:$0xff]  ;;  %v5857_v27 = vpop.f32.mrf.mxu0 }
 0x3ed   : > { %v3194_v48 = vsel %vm3130_vm9, %v3098_v4, %v3162_v20  ;;  %v3027_v62 = vadd.f32 %v3017_v14, %v2429_v16  ;;  %v2431_v6 = vadd.f32 %v5760_v21, %v6308_v11  ;;  %v6310_v20 = vld [vmem:[#allocation45_spill] sm:$0xff]  ;;  %v5871_v11 = vpop.f32.mrf.mxu1 }
 0x3ee   : > { %v4198_v26 = vpack.c.bf16 %v3194_v48, %v3193_v13  ;;  %v5842_v39 = vpop.f32.mrf.mxu3  ;;  %v2434_v14 = vadd.f32 %v5780_v46, %v6310_v20 }
 0x3ef   : > { %v2893_v18 = vpop.f32.mrf.mxu2  ;;  %v3063_v1 = vmul.f32 %v5776_v7, %v3027_v62 }
 0x3f0   : > { %4270 = vst [vmem:[%s4854_s10 + $0x8] sm:$0xff] %v4198_v26   ;;  %v2894_v15 = vadd.f32 %v2893_v18, %v2805_v61  ;;  %v2810_v18 = vadd.f32 %v5771_v34, %v5782_v45 }
 0x3f1   : > { %v3099_v51 = vadd.f32 %v5788_v17, %v3063_v1 }
 0x3f2   : > { %v2964_v55 = vrot.slane %v2894_v15, 1 }
 0x3f3   : > { %v3163_v21 = vmul.f32 0.01, %v3099_v51  ;;  %vm3131_vm10 = vcmp.ge.f32.partialorder %v3099_v51, 0.0 }
 0x3f4   : > { %v3016_v59 = vsel %vm2990_vm4, %v2963_v52, %v2964_v55 }
 0x3f5   : > { %v3028_v56 = vadd.f32 %v3016_v59, %v2431_v6  ;;  %v3195_v62 = vsel %vm3131_vm10, %v3099_v51, %v3163_v21  ;;  %v5874_v59 = vpop.f32.mrf.mxu0 }
 0x3f6   : > { %v5855_v47 = vpop.f32.mrf.mxu3 }
 0x3f7   : > { %v3064_v60 = vmul.f32 %v5776_v7, %v3028_v56  ;;  %v2895_v50 = vpop.f32.mrf.mxu2 }
 0x3f8   : > { %v2896_v4 = vadd.f32 %v2895_v50, %v2807_v33  ;;  %v2812_v33 = vadd.f32 %v5798_v40, %v5801_v53  ;;  %v6314_v53 = vld [vmem:[#allocation30_spill] sm:$0xff] }
 0x3f9   : > { %v3100_v16 = vadd.f32 %v5788_v17, %v3064_v60 }
 0x3fa   : > { %v2965_v52 = vrot.slane %v2896_v4, 1 }
 0x3fb   : > { %vm3132_vm11 = vcmp.ge.f32.partialorder %v3100_v16, 0.0  ;;  %v3164_v13 = vmul.f32 0.01, %v3100_v16  ;;  %2487 = vmatmul.bf16.gmra.mxu3 %v6311_v36 }
 0x3fc   : > { %v3015_v48 = vsel %vm2990_vm4, %v2964_v55, %v2965_v52  ;;  %2937 = vmatmul.bf16.gmra.mxu2 %v5479_v54  ;;  %v6312_v54 = vld [vmem:[#allocation27_spill] sm:$0xff] }
 0x3fd   : > { %v3196_v61 = vsel %vm3132_vm11, %v3100_v16, %v3164_v13  ;;  %v3029_v26 = vadd.f32 %v3015_v48, %v2434_v14  ;;  %v2436_v51 = vadd.f32 %v5796_v5, %v6312_v54  ;;  %v5887_v16 = vpop.f32.mrf.mxu1  ;;  %v5890_v14 = vpop.f32.mrf.mxu0  ;;  %v6313_v13 = vld [vmem:[#allocation29_spill] sm:$0xff] }
 0x3fe   : > { %v4203_v15 = vpack.c.bf16 %v3196_v61, %v3195_v62  ;;  %v5869_v1 = vpop.f32.mrf.mxu3  ;;  %v2439_v48 = vadd.f32 %v5811_v58, %v6313_v13  ;;  %v6316_v13 = vld [vmem:[#allocation53_spill] sm:$0xff] }
 0x3ff   : > { %v2898_v46 = vpop.f32.mrf.mxu2  ;;  %v3065_v55 = vmul.f32 %v5776_v7, %v3029_v26 }
 0x400   : > { %4271 = vst [vmem:[%s4854_s10 + $0x10] sm:$0xff] %v4203_v15   ;;  %v2899_v6 = vadd.f32 %v2898_v46, %v2810_v18  ;;  %v2815_v15 = vadd.f32 %v5814_v0, %v5817_v44 }
 0x401   : > { %v3101_v34 = vadd.f32 %v5788_v17, %v3065_v55 }
 0x402   : > { %v2966_v56 = vrot.slane %v2899_v6, 1 }
 0x403   : > { %v3165_v20 = vmul.f32 0.01, %v3101_v34  ;;  %vm3133_vm12 = vcmp.ge.f32.partialorder %v3101_v34, 0.0 }
 0x404   : > { %v3014_v3 = vsel %vm2990_vm4, %v2965_v52, %v2966_v56 }
 0x405   : > { %v3030_v45 = vadd.f32 %v3014_v3, %v2436_v51  ;;  %v3197_v61 = vsel %vm3133_vm12, %v3101_v34, %v3165_v20  ;;  %v5904_v3 = vpop.f32.mrf.mxu1 }
 0x406   : > { %v5884_v60 = vpop.f32.mrf.mxu3 }
 0x407   : > { %v3066_v50 = vmul.f32 %v5776_v7, %v3030_v45  ;;  %v2900_v4 = vpop.f32.mrf.mxu2  ;;  %v5910_v45 = vpop.f32.mrf.mxu0 }
 0x408   : > { %v2901_v21 = vadd.f32 %v2900_v4, %v2812_v33  ;;  %v2817_v33 = vadd.f32 %v5830_v43, %v5838_v63 }
 0x409   : > { %v3102_v5 = vadd.f32 %v5788_v17, %v3066_v50 }
 0x40a   : > { %v2967_v52 = vrot.slane %v2901_v21, 1 }
 0x40b   : > { %vm3134_vm13 = vcmp.ge.f32.partialorder %v3102_v5, 0.0  ;;  %v3166_v40 = vmul.f32 0.01, %v3102_v5  ;;  %2492 = vmatmul.bf16.gmra.mxu3 %v6314_v53 }
 0x40c   : > { %v3013_v62 = vsel %vm2990_vm4, %v2966_v56, %v2967_v52  ;;  %2942 = vmatmul.bf16.gmra.mxu2 %v5505_v31  ;;  %v6315_v56 = vld [vmem:[#allocation50_spill] sm:$0xff] }
 0x40d   : > { %v3198_v26 = vsel %vm3134_vm13, %v3102_v5, %v3166_v40  ;;  %v3031_v18 = vadd.f32 %v3013_v62, %v2439_v48  ;;  %v2441_v31 = vadd.f32 %v5826_v2, %v6315_v56  ;;  %v2444_v48 = vadd.f32 %v5842_v39, %v6316_v13  ;;  %v5924_v63 = vpop.f32.mrf.mxu1  ;;  %v6317_v56 = vld [vmem:[#allocation31_spill] sm:$0xff] }
 0x40e   : > { %v4208_v46 = vpack.c.bf16 %v3198_v26, %v3197_v61  ;;  %v5900_v6 = vpop.f32.mrf.mxu3 }
 0x40f   : > { %v2903_v55 = vpop.f32.mrf.mxu2  ;;  %v3067_v54 = vmul.f32 %v5776_v7, %v3031_v18  ;;  %v2820_v18 = vadd.f32 %v5850_v19, %v5857_v27  ;;  %v2822_v19 = vadd.f32 %v5871_v11, %v5874_v59 }
 0x410   : > { %4272 = vst [vmem:[%s4854_s10 + $0x18] sm:$0xff] %v4208_v46   ;;  %v2904_v58 = vadd.f32 %v2903_v55, %v2815_v15  ;;  %v2740_v46 = vpop.f32.mrf.mxu0 }
 0x411   : > { %v3103_v0 = vadd.f32 %v5788_v17, %v3067_v54 }
 0x412   : > { %v2968_v51 = vrot.slane %v2904_v58, 1 }
 0x413   : > { %v3167_v5 = vmul.f32 0.01, %v3103_v0  ;;  %vm3135_vm14 = vcmp.ge.f32.partialorder %v3103_v0, 0.0 }
 0x414   : > { %v3012_v34 = vsel %vm2990_vm4, %v2967_v52, %v2968_v51 }
 0x415   : > { %v3032_v44 = vadd.f32 %v3012_v34, %v2441_v31  ;;  %v3199_v62 = vsel %vm3135_vm14, %v3103_v0, %v3167_v5  ;;  %v2831_v27 = vpop.f32.mrf.mxu1 }
 0x416   : > { %v5916_v21 = vpop.f32.mrf.mxu3 }
 0x417   : > { %v3068_v50 = vmul.f32 %v5776_v7, %v3032_v44  ;;  %v2905_v4 = vpop.f32.mrf.mxu2 }
 0x418   : > { %v2906_v20 = vadd.f32 %v2905_v4, %v2817_v33  ;;  %v2742_v4 = vpop.f32.mrf.mxu0 }
 0x419   : > { %v3104_v2 = vadd.f32 %v5788_v17, %v3068_v50 }
 0x41a   : > { %v2969_v52 = vrot.slane %v2906_v20, 1 }
 0x41b   : > { %vm3136_vm15 = vcmp.ge.f32.partialorder %v3104_v2, 0.0  ;;  %v3168_v40 = vmul.f32 0.01, %v3104_v2 }
 0x41c   : > { %v3011_v43 = vsel %vm2990_vm4, %v2968_v51, %v2969_v52  ;;  %2947 = vmatmul.bf16.gmra.mxu2 %v6311_v36  ;;  %v2446_v36 = vadd.f32 %v5855_v47, %v6317_v56 }
 0x41d   : > { %v3200_v61 = vsel %vm3136_vm15, %v3104_v2, %v3168_v40  ;;  %v3033_v26 = vadd.f32 %v3011_v43, %v2444_v48  ;;  %v6318_v2 = vld [vmem:[#allocation55_spill] sm:$0xff] }
 0x41e   : > { %v4213_v15 = vpack.c.bf16 %v3200_v61, %v3199_v62  ;;  %v5930_v54 = vpop.f32.mrf.mxu3  ;;  %v2825_v62 = vadd.f32 %v5887_v16, %v5890_v14  ;;  %v2827_v16 = vadd.f32 %v5904_v3, %v5910_v45 }
 0x41f   : > { %v2908_v55 = vpop.f32.mrf.mxu2  ;;  %v3069_v58 = vmul.f32 %v5776_v7, %v3033_v26 }
 0x420   : > { %4273 = vst [vmem:[%s4854_s10 + $0x20] sm:$0xff] %v4213_v15   ;;  %v2909_v39 = vadd.f32 %v2908_v55, %v2820_v18 }
 0x421   : > { %v3105_v34 = vadd.f32 %v5788_v17, %v3069_v58  ;;  %v6319_v58 = vld [vmem:[#allocation35_spill] sm:$0xff] }
 0x422   : > { %v2970_v51 = vrot.slane %v2909_v39, 1  ;;  %v2745_v39 = vpop.f32.mrf.mxu0 }
 0x423   : > { %v3169_v20 = vmul.f32 0.01, %v3105_v34  ;;  %vm3137_vm0 = vcmp.ge.f32.partialorder %v3105_v34, 0.0 }
 0x424   : > { %v3010_v31 = vsel %vm2990_vm4, %v2969_v52, %v2970_v51  ;;  %v2449_v52 = vadd.f32 %v5869_v1, %v6318_v2  ;;  %v2834_v1 = vpop.f32.mrf.mxu1 }
 0x425   : > { %v3034_v0 = vadd.f32 %v3010_v31, %v2446_v36  ;;  %v3201_v59 = vsel %vm3137_vm0, %v3105_v34, %v3169_v20 }
 0x426   : > { %v5943_v48 = vpop.f32.mrf.mxu3 }
 0x427   : > { %v3070_v44 = vmul.f32 %v5776_v7, %v3034_v0  ;;  %v2910_v33 = vpop.f32.mrf.mxu2 }
 0x428   : > { %v2911_v50 = vadd.f32 %v2910_v33, %v2822_v19 }
 0x429   : > { %v3106_v5 = vadd.f32 %v5788_v17, %v3070_v44 }
 0x42a   : > { %v2971_v47 = vrot.slane %v2911_v50, 1  ;;  %v2454_v50 = vadd.f32 %v5900_v6, %v5604_v12  ;;  %v2747_v45 = vpop.f32.mrf.mxu0  ;;  %v2456_v6 = vadd.f32 %v5916_v21, %v5612_v10  ;;  %v2459_v21 = vadd.f32 %v5930_v54, %v5621_v24 }
 0x42b   : > { %vm3138_vm1 = vcmp.ge.f32.partialorder %v3106_v5, 0.0  ;;  %v3170_v13 = vmul.f32 0.01, %v3106_v5 }
 0x42c   : > { %v3009_v11 = vsel %vm2990_vm4, %v2970_v51, %v2971_v47  ;;  %2952 = vmatmul.bf16.gmra.mxu2 %v6314_v53  ;;  %v2451_v51 = vadd.f32 %v5884_v60, %v6319_v58  ;;  %v2836_v33 = vpop.f32.mrf.mxu1 }
 0x42d   : > { %v3202_v40 = vsel %vm3138_vm1, %v3106_v5, %v3170_v13  ;;  %v3035_v43 = vadd.f32 %v3009_v11, %v2449_v52  ;;  %v2830_v52 = vadd.f32 %v5924_v63, %v2740_v46  ;;  %v2832_v63 = vadd.f32 %v2831_v27, %v2742_v4 }
 0x42e   : > { %v4218_v61 = vpack.c.bf16 %v3202_v40, %v3201_v59  ;;  %v5959_v14 = vpop.f32.mrf.mxu3 }
 0x42f   : > { %v2913_v26 = vpop.f32.mrf.mxu2  ;;  %v3071_v15 = vmul.f32 %v5776_v7, %v3035_v43 }
 0x430   : > { %4274 = vst [vmem:[%s4854_s10 + $0x28] sm:$0xff] %v4218_v61   ;;  %v2914_v18 = vadd.f32 %v2913_v26, %v2825_v62 }
 0x431   : > { %v3107_v56 = vadd.f32 %v5788_v17, %v3071_v15 }
 0x432   : > { %v2972_v55 = vrot.slane %v2914_v18, 1  ;;  %v2750_v46 = vpop.f32.mrf.mxu0 }
 0x433   : > { %v3171_v19 = vmul.f32 0.01, %v3107_v56  ;;  %vm3139_vm3 = vcmp.ge.f32.partialorder %v3107_v56, 0.0 }
 0x434   : > { %v3008_v53 = vsel %vm2990_vm4, %v2971_v47, %v2972_v55  ;;  %v2839_v61 = vpop.f32.mrf.mxu1 }
 0x435   : > { %v3036_v36 = vadd.f32 %v3008_v53, %v2451_v51  ;;  %v3203_v5 = vsel %vm3139_vm3, %v3107_v56, %v3171_v19 }
 0x436   : > { %v5969_v59 = vpop.f32.mrf.mxu3 }
 0x437   : > { %v3072_v31 = vmul.f32 %v5776_v7, %v3036_v36  ;;  %v2915_v34 = vpop.f32.mrf.mxu2 }
 0x438   : > { %v2916_v0 = vadd.f32 %v2915_v34, %v2827_v16  ;;  %v2835_v34 = vadd.f32 %v2834_v1, %v2745_v39  ;;  %v2837_v1 = vadd.f32 %v2836_v33, %v2747_v45 }
 0x439   : > { %v3108_v44 = vadd.f32 %v5788_v17, %v3072_v31 }
 0x43a   : > { %v2973_v60 = vrot.slane %v2916_v0, 1 }
 0x43b   : > { %vm3140_vm2 = vcmp.ge.f32.partialorder %v3108_v44, 0.0  ;;  %v3172_v20 = vmul.f32 0.01, %v3108_v44 }
 0x43c   : > { %v3007_v3 = vsel %vm2990_vm4, %v2972_v55, %v2973_v60  ;;  %v2841_v19 = vpop.f32.mrf.mxu1 }
 0x43d   : > { %v3204_v47 = vsel %vm3140_vm2, %v3108_v44, %v3172_v20  ;;  %v3037_v2 = vadd.f32 %v3007_v3, %v2454_v50  ;;  %v2752_v50 = vpop.f32.mrf.mxu0 }
 0x43e   : > { %v4223_v13 = vpack.c.bf16 %v3204_v47, %v3203_v5  ;;  %v5979_v56 = vpop.f32.mrf.mxu3  ;;  %v6320_v5 = vld [vmem:[#allocation58_spill] sm:$0xff] }
 0x43f   : > { %v2918_v11 = vpop.f32.mrf.mxu2  ;;  %v3073_v43 = vmul.f32 %v5776_v7, %v3037_v2  ;;  %v2461_v24 = vadd.f32 %v5943_v48, %v6320_v5 }
 0x440   : > { %4275 = vst [vmem:[%s4854_s10 + $0x30] sm:$0xff] %v4223_v13   ;;  %v2919_v40 = vadd.f32 %v2918_v11, %v2830_v52 }
 0x441   : > { %v3109_v26 = vadd.f32 %v5788_v17, %v3073_v43 }
 0x442   : > { %v2974_v12 = vrot.slane %v2919_v40, 1 }
 0x443   : > { %v3173_v51 = vmul.f32 0.01, %v3109_v26  ;;  %vm3141_vm7 = vcmp.ge.f32.partialorder %v3109_v26, 0.0 }
 0x444   : > { %v3006_v62 = vsel %vm2990_vm4, %v2973_v60, %v2974_v12  ;;  %v2844_v40 = vpop.f32.mrf.mxu1 }
 0x445   : > { %v3038_v18 = vadd.f32 %v3006_v62, %v2456_v6  ;;  %v3205_v4 = vsel %vm3141_vm7, %v3109_v26, %v3173_v51  ;;  %v2755_v48 = vpop.f32.mrf.mxu0  ;;  %v2464_v62 = vadd.f32 %v5959_v14, %v5640_v23 }
 0x446   : > { %v2470_v54 = vpop.f32.mrf.mxu3 }
 0x447   : > { %v3074_v15 = vmul.f32 %v5776_v7, %v3038_v18  ;;  %v2920_v55 = vpop.f32.mrf.mxu2 }
 0x448   : > { %v2921_v58 = vadd.f32 %v2920_v55, %v2832_v63 }
 0x449   : > { %v3110_v53 = vadd.f32 %v5788_v17, %v3074_v15  ;;  %v2840_v15 = vadd.f32 %v2839_v61, %v2750_v46  ;;  %v2842_v61 = vadd.f32 %v2841_v19, %v2752_v50 }
 0x44a   : > { %v2975_v10 = vrot.slane %v2921_v58, 1 }
 0x44b   : > { %vm3142_vm5 = vcmp.ge.f32.partialorder %v3110_v53, 0.0  ;;  %v3174_v36 = vmul.f32 0.01, %v3110_v53 }
 0x44c   : > { %v3005_v27 = vsel %vm2990_vm4, %v2974_v12, %v2975_v10 }
 0x44d   : > { %v3206_v16 = vsel %vm3142_vm5, %v3110_v53, %v3174_v36  ;;  %v3039_v31 = vadd.f32 %v3005_v27, %v2459_v21  ;;  %v2846_v36 = vpop.f32.mrf.mxu1  ;;  %v6321_v27 = vld [vmem:[#allocation38_spill] sm:$0xff] }
 0x44e   : > { %v4228_v0 = vpack.c.bf16 %v3206_v16, %v3205_v4  ;;  %v2473_v55 = vpop.f32.mrf.mxu3  ;;  %v2466_v23 = vadd.f32 %v5969_v59, %v6321_v27  ;;  %v2757_v4 = vpop.f32.mrf.mxu0  ;;  %v2469_v59 = vadd.f32 %v5979_v56, %v5659_v9  ;;  %v2471_v9 = vadd.f32 %v2470_v54, %v5665_v28 }
 0x44f   : > { %v2923_v44 = vpop.f32.mrf.mxu2  ;;  %v3075_v20 = vmul.f32 %v5776_v7, %v3039_v31  ;;  %v2474_v28 = vadd.f32 %v2473_v55, %v5676_v35 }
 0x450   : > { %4276 = vst [vmem:[%s4854_s10 + $0x38] sm:$0xff] %v4228_v0   ;;  %v2924_v60 = vadd.f32 %v2923_v44, %v2835_v34 }
 0x451   : > { %v3111_v2 = vadd.f32 %v5788_v17, %v3075_v20 }
 0x452   : > { %v2976_v3 = vrot.slane %v2924_v60, 1 }
 0x453   : > { %v3175_v43 = vmul.f32 0.01, %v3111_v2  ;;  %vm3143_vm6 = vcmp.ge.f32.partialorder %v3111_v2, 0.0 }
 0x454   : > { %v3004_v47 = vsel %vm2990_vm4, %v2975_v10, %v2976_v3 }
 0x455   : > { %v3040_v52 = vadd.f32 %v3004_v47, %v2461_v24  ;;  %v3207_v45 = vsel %vm3143_vm6, %v3111_v2, %v3175_v43  ;;  %v2849_v19 = vpop.f32.mrf.mxu1 }
 0x456   : > { %v2475_v0 = vpop.f32.mrf.mxu3 }
 0x457   : > { %v3076_v39 = vmul.f32 %v5776_v7, %v3040_v52  ;;  %v2925_v13 = vpop.f32.mrf.mxu2  ;;  %v2845_v52 = vadd.f32 %v2844_v40, %v2755_v48  ;;  %v2476_v35 = vadd.f32 %v2475_v0, %v5684_v25 }
 0x458   : > { %v2926_v11 = vadd.f32 %v2925_v13, %v2837_v1 }
 0x459   : > { %v3112_v12 = vadd.f32 %v5788_v17, %v3076_v39  ;;  %v2760_v39 = vpop.f32.mrf.mxu0 }
 0x45a   : > { %v2977_v6 = vrot.slane %v2926_v11, 1 }
 0x45b   : > { %vm3144_vm8 = vcmp.ge.f32.partialorder %v3112_v12, 0.0  ;;  %v3176_v26 = vmul.f32 0.01, %v3112_v12 }
 0x45c   : > { %v3003_v33 = vsel %vm2990_vm4, %v2976_v3, %v2977_v6 }
 0x45d   : > { %v3208_v18 = vsel %vm3144_vm8, %v3112_v12, %v3176_v26  ;;  %v3041_v63 = vadd.f32 %v3003_v33, %v2464_v62  ;;  %v2847_v33 = vadd.f32 %v2846_v36, %v2757_v4 }
 0x45e   : > { %v4233_v58 = vpack.c.bf16 %v3208_v18, %v3207_v45  ;;  %v2478_v12 = vpop.f32.mrf.mxu3  ;;  %v2851_v45 = vpop.f32.mrf.mxu1 }
 0x45f   : > { %v2928_v51 = vpop.f32.mrf.mxu2  ;;  %v3077_v10 = vmul.f32 %v5776_v7, %v3041_v63  ;;  %v2479_v25 = vadd.f32 %v2478_v12, %v5695_v30 }
 0x460   : > { %4277 = vst [vmem:[%s4854_s10 + $0x40] sm:$0xff] %v4233_v58   ;;  %v2929_v53 = vadd.f32 %v2928_v51, %v2840_v15 }
 0x461   : > { %v3113_v16 = vadd.f32 %v5788_v17, %v3077_v10  ;;  %v2762_v63 = vpop.f32.mrf.mxu0 }
 0x462   : > { %v2978_v21 = vrot.slane %v2929_v53, 1 }
 0x463   : > { %v3177_v60 = vmul.f32 0.01, %v3113_v16  ;;  %vm3145_vm9 = vcmp.ge.f32.partialorder %v3113_v16, 0.0 }
 0x464   : > { %v3002_v14 = vsel %vm2990_vm4, %v2977_v6, %v2978_v21 }
 0x465   : > { %v3042_v31 = vadd.f32 %v3002_v14, %v2466_v23  ;;  %v3209_v50 = vsel %vm3145_vm9, %v3113_v16, %v3177_v60  ;;  %v2850_v23 = vadd.f32 %v2849_v19, %v2760_v39 }
 0x466   : > { %v2480_v53 = vpop.f32.mrf.mxu3 }
 0x467   : > { %v3078_v46 = vmul.f32 %v5776_v7, %v3042_v31  ;;  %v2930_v34 = vpop.f32.mrf.mxu2  ;;  %v2854_v31 = vpop.f32.mrf.mxu1  ;;  %v2481_v30 = vadd.f32 %v2480_v53, %v5703_v8 }
 0x468   : > { %v2931_v44 = vadd.f32 %v2930_v34, %v2842_v61 }
 0x469   : > { %v3114_v20 = vadd.f32 %v5788_v17, %v3078_v46  ;;  %v2765_v34 = vpop.f32.mrf.mxu0 }
 0x46a   : > { %v2979_v3 = vrot.slane %v2931_v44, 1 }
 0x46b   : > { %vm3146_vm10 = vcmp.ge.f32.partialorder %v3114_v20, 0.0  ;;  %v3178_v5 = vmul.f32 0.01, %v3114_v20 }
 0x46c   : > { %v3001_v24 = vsel %vm2990_vm4, %v2978_v21, %v2979_v3 }
 0x46d   : > { %v3210_v47 = vsel %vm3146_vm10, %v3114_v20, %v3178_v5  ;;  %v3043_v2 = vadd.f32 %v3001_v24, %v2469_v59  ;;  %v2852_v20 = vadd.f32 %v2851_v45, %v2762_v63 }
 0x46e   : > { %v4238_v1 = vpack.c.bf16 %v3210_v47, %v3209_v50 }
 0x46f   : > { %v2933_v13 = vpop.f32.mrf.mxu2  ;;  %v3079_v43 = vmul.f32 %v5776_v7, %v3043_v2  ;;  %v2856_v2 = vpop.f32.mrf.mxu1 }
 0x470   : > { %4278 = vst [vmem:[%s4854_s10 + $0x48] sm:$0xff] %v4238_v1   ;;  %v2934_v11 = vadd.f32 %v2933_v13, %v2845_v52 }
 0x471   : > { %v3115_v62 = vadd.f32 %v5788_v17, %v3079_v43  ;;  %v2767_v1 = vpop.f32.mrf.mxu0  ;;  %v2855_v43 = vadd.f32 %v2854_v31, %v2765_v34 }
 0x472   : > { %v2980_v6 = vrot.slane %v2934_v11, 1 }
 0x473   : > { %v3179_v15 = vmul.f32 0.01, %v3115_v62  ;;  %vm3147_vm11 = vcmp.ge.f32.partialorder %v3115_v62, 0.0 }
 0x474   : > { %v3000_v56 = vsel %vm2990_vm4, %v2979_v3, %v2980_v6  ;;  %v2483_v3 = vpop.f32.mrf.mxu3 }
 0x475   : > { %v3044_v26 = vadd.f32 %v3000_v56, %v2471_v9  ;;  %v3211_v21 = vsel %vm3147_vm11, %v3115_v62, %v3179_v15  ;;  %v2484_v53 = vadd.f32 %v2483_v3, %v5712_v57 }
 0x477   : > { %v3080_v40 = vmul.f32 %v5776_v7, %v3044_v26  ;;  %v2935_v48 = vpop.f32.mrf.mxu2  ;;  %v2859_v45 = vpop.f32.mrf.mxu1 }
 0x478   : > { %v2936_v18 = vadd.f32 %v2935_v48, %v2847_v33 }
 0x479   : > { %v3116_v58 = vadd.f32 %v5788_v17, %v3080_v40  ;;  %v2770_v63 = vpop.f32.mrf.mxu0 }
 0x47a   : > { %v2981_v51 = vrot.slane %v2936_v18, 1  ;;  %v2857_v18 = vadd.f32 %v2856_v2, %v2767_v1 }
 0x47b   : > { %vm3148_vm12 = vcmp.ge.f32.partialorder %v3116_v58, 0.0  ;;  %v3180_v54 = vmul.f32 0.01, %v3116_v58 }
 0x47c   : > { %v2999_v10 = vsel %vm2990_vm4, %v2980_v6, %v2981_v51  ;;  %v2485_v56 = vpop.f32.mrf.mxu3 }
 0x47d   : > { %v3212_v36 = vsel %vm3148_vm12, %v3116_v58, %v3180_v54  ;;  %v3045_v27 = vadd.f32 %v2999_v10, %v2474_v28  ;;  %v2486_v57 = vadd.f32 %v2485_v56, %v5720_v37 }
 0x47e   : > { %v4243_v14 = vpack.c.bf16 %v3212_v36, %v3211_v21 }
 0x47f   : > { %v2938_v4 = vpop.f32.mrf.mxu2  ;;  %v3081_v61 = vmul.f32 %v5776_v7, %v3045_v27  ;;  %v2861_v31 = vpop.f32.mrf.mxu1 }
 0x480   : > { %4279 = vst [vmem:[%s4854_s10 + $0x50] sm:$0xff] %v4243_v14   ;;  %v2939_v16 = vadd.f32 %v2938_v4, %v2850_v23  ;;  %v2860_v4 = vadd.f32 %v2859_v45, %v2770_v63 }
 0x481   : > { %v3117_v44 = vadd.f32 %v5788_v17, %v3081_v61  ;;  %v2772_v34 = vpop.f32.mrf.mxu0 }
 0x482   : > { %v2982_v46 = vrot.slane %v2939_v16, 1 }
 0x483   : > { %v3181_v19 = vmul.f32 0.01, %v3117_v44  ;;  %vm3149_vm13 = vcmp.ge.f32.partialorder %v3117_v44, 0.0 }
 0x484   : > { %v2998_v55 = vsel %vm2990_vm4, %v2981_v51, %v2982_v46  ;;  %v2488_v10 = vpop.f32.mrf.mxu3 }
 0x485   : > { %v3046_v60 = vadd.f32 %v2998_v55, %v2476_v35  ;;  %v3213_v39 = vsel %vm3149_vm13, %v3117_v44, %v3181_v19 }
 0x487   : > { %v3082_v59 = vmul.f32 %v5776_v7, %v3046_v60  ;;  %v2940_v5 = vpop.f32.mrf.mxu2 }
 0x488   : > { %v2941_v24 = vadd.f32 %v2940_v5, %v2852_v20 }
 0x489   : > { %v3118_v50 = vadd.f32 %v5788_v17, %v3082_v59  ;;  %v2862_v59 = vadd.f32 %v2861_v31, %v2772_v34  ;;  %v2775_v37 = vpop.f32.mrf.mxu0 }
 0x48a   : > { %v2983_v47 = vrot.slane %v2941_v24, 1 }
 0x48b   : > { %vm3150_vm14 = vcmp.ge.f32.partialorder %v3118_v50, 0.0  ;;  %v3182_v0 = vmul.f32 0.01, %v3118_v50 }
 0x48c   : > { %v2997_v52 = vsel %vm2990_vm4, %v2982_v46, %v2983_v47  ;;  %v2490_v44 = vpop.f32.mrf.mxu3 }
 0x48d   : > { %v3214_v13 = vsel %vm3150_vm14, %v3118_v50, %v3182_v0  ;;  %v3047_v11 = vadd.f32 %v2997_v52, %v2479_v25  ;;  %v2864_v50 = vpop.f32.mrf.mxu1  ;;  %v2489_v0 = vadd.f32 %v2488_v10, %v5734_v38 }
 0x48e   : > { %v4248_v6 = vpack.c.bf16 %v3214_v13, %v3213_v39 }
 0x48f   : > { %v2943_v9 = vpop.f32.mrf.mxu2  ;;  %v3083_v26 = vmul.f32 %v5776_v7, %v3047_v11 }
 0x490   : > { %4280 = vst [vmem:[%s4854_s10 + $0x58] sm:$0xff] %v4248_v6   ;;  %v2944_v62 = vadd.f32 %v2943_v9, %v2855_v43  ;;  %v2865_v43 = vadd.f32 %v2864_v50, %v2775_v37 }
 0x491   : > { %v3119_v40 = vadd.f32 %v5788_v17, %v3083_v26  ;;  %v2777_v45 = vpop.f32.mrf.mxu0 }
 0x492   : > { %v2984_v33 = vrot.slane %v2944_v62, 1 }
 0x493   : > { %v3183_v28 = vmul.f32 0.01, %v3119_v40  ;;  %vm3151_vm15 = vcmp.ge.f32.partialorder %v3119_v40, 0.0 }
 0x494   : > { %v2996_v12 = vsel %vm2990_vm4, %v2983_v47, %v2984_v33  ;;  %v2493_v6 = vpop.f32.mrf.mxu3 }
 0x495   : > { %v3048_v48 = vadd.f32 %v2996_v12, %v2481_v30  ;;  %v3215_v27 = vsel %vm3151_vm15, %v3119_v40, %v3183_v28  ;;  %v2866_v38 = vpop.f32.mrf.mxu1  ;;  %v2491_v30 = vadd.f32 %v2490_v44, %v5737_v29  ;;  %v2494_v10 = vadd.f32 %v2493_v6, %v5742_v42 }
 0x497   : > { %v3084_v15 = vmul.f32 %v5776_v7, %v3048_v48  ;;  %v2945_v58 = vpop.f32.mrf.mxu2 }
 0x498   : > { %v2946_v51 = vadd.f32 %v2945_v58, %v2857_v18  ;;  %v2867_v18 = vadd.f32 %v2866_v38, %v2777_v45 }
 0x499   : > { %v3120_v54 = vadd.f32 %v5788_v17, %v3084_v15 }
 0x49a   : > { %v2985_v8 = vrot.slane %v2946_v51, 1 }
 0x49b   : > { %vm3152_vm0 = vcmp.ge.f32.partialorder %v3120_v54, 0.0  ;;  %v3184_v21 = vmul.f32 0.01, %v3120_v54 }
 0x49c   : > { %v2995_v36 = vsel %vm2990_vm4, %v2984_v33, %v2985_v8  ;;  %v2495_v58 = vpop.f32.mrf.mxu3 }
 0x49d   : > { %v3216_v23 = vsel %vm3152_vm0, %v3120_v54, %v3184_v21  ;;  %v3049_v14 = vadd.f32 %v2995_v36, %v2484_v53 }
 0x49e   : > { %v4253_v16 = vpack.c.bf16 %v3216_v23, %v3215_v27 }
 0x49f   : > { %v2948_v61 = vpop.f32.mrf.mxu2  ;;  %v3085_v35 = vmul.f32 %v5776_v7, %v3049_v14 }
 0x4a0   : > { %4281 = vst [vmem:[%s4854_s10 + $0x60] sm:$0xff] %v4253_v16   ;;  %v2949_v46 = vadd.f32 %v2948_v61, %v2860_v4 }
 0x4a1   : > { %v3121_v20 = vadd.f32 %v5788_v17, %v3085_v35 }
 0x4a2   : > { %v2986_v55 = vrot.slane %v2949_v46, 1 }
 0x4a3   : > { %v3185_v47 = vmul.f32 0.01, %v3121_v20  ;;  %vm3153_vm1 = vcmp.ge.f32.partialorder %v3121_v20, 0.0 }
 0x4a4   : > { %v2994_v60 = vsel %vm2990_vm4, %v2985_v8, %v2986_v55  ;;  %v2496_v8 = vadd.f32 %v2495_v58, %v5747_v49 }
 0x4a5   : > { %v3050_v3 = vadd.f32 %v2994_v60, %v2486_v57  ;;  %v3217_v39 = vsel %vm3153_vm1, %v3121_v20, %v3185_v47 }
 0x4a7   : > { %v3086_v5 = vmul.f32 %v5776_v7, %v3050_v3  ;;  %v2950_v24 = vpop.f32.mrf.mxu2 }
 0x4a8   : > { %v2951_v19 = vadd.f32 %v2950_v24, %v2862_v59 }
 0x4a9   : > { %v3122_v2 = vadd.f32 %v5788_v17, %v3086_v5 }
 0x4aa   : > { %v2987_v25 = vrot.slane %v2951_v19, 1 }
 0x4ab   : > { %vm3154_vm3 = vcmp.ge.f32.partialorder %v3122_v2, 0.0  ;;  %v3186_v52 = vmul.f32 0.01, %v3122_v2 }
 0x4ac   : > { %v2993_v1 = vsel %vm2990_vm4, %v2986_v55, %v2987_v25 }
 0x4ad   : > { %v3218_v13 = vsel %vm3154_vm3, %v3122_v2, %v3186_v52  ;;  %v3051_v11 = vadd.f32 %v2993_v1, %v2489_v0 }
 0x4ae   : > { %v4258_v9 = vpack.c.bf16 %v3218_v13, %v3217_v39 }
 0x4af   : > { %v2953_v56 = vpop.f32.mrf.mxu2  ;;  %v3087_v26 = vmul.f32 %v5776_v7, %v3051_v11 }
 0x4b0   : > { %4282 = vst [vmem:[%s4854_s10 + $0x68] sm:$0xff] %v4258_v9   ;;  %v2954_v62 = vadd.f32 %v2953_v56, %v2865_v43 }
 0x4b1   : > { %v3123_v40 = vadd.f32 %v5788_v17, %v3087_v26 }
 0x4b2   : > { %v2988_v33 = vrot.slane %v2954_v62, 1 }
 0x4b3   : > { %v3187_v28 = vmul.f32 0.01, %v3123_v40  ;;  %vm3155_vm2 = vcmp.ge.f32.partialorder %v3123_v40, 0.0 }
 0x4b4   : > { %v2992_v12 = vsel %vm2990_vm4, %v2987_v25, %v2988_v33 }
 0x4b5   : > { %v3052_v48 = vadd.f32 %v2992_v12, %v2491_v30  ;;  %v3219_v27 = vsel %vm3155_vm2, %v3123_v40, %v3187_v28 }
 0x4b7   : > { %v3088_v63 = vmul.f32 %v5776_v7, %v3052_v48  ;;  %v2955_v15 = vpop.f32.mrf.mxu2 }
 0x4b8   : > { %v2956_v51 = vadd.f32 %v2955_v15, %v2867_v18 }
 0x4b9   : > { %v3124_v54 = vadd.f32 %v5788_v17, %v3088_v63 }
 0x4ba   : > { %v2989_v29 = vrot.slane %v2956_v51, 1 }
 0x4bb   : > { %vm3156_vm7 = vcmp.ge.f32.partialorder %v3124_v54, 0.0  ;;  %v3188_v53 = vmul.f32 0.01, %v3124_v54 }
 0x4bc   : > { %v2991_v21 = vsel %vm2990_vm4, %v2988_v33, %v2989_v29  ;;  %v3022_v36 = vsel %vm2990_vm4, %v2989_v29, %v2958_v22 }
 0x4bd   : > { %v3220_v23 = vsel %vm3156_vm7, %v3124_v54, %v3188_v53  ;;  %v3053_v14 = vadd.f32 %v2991_v21, %v2494_v10  ;;  %v3054_v4 = vadd.f32 %v3022_v36, %v2496_v8 }
 0x4be   : > { %v4263_v16 = vpack.c.bf16 %v3220_v23, %v3219_v27 }
 0x4bf   : > { %v3089_v42 = vmul.f32 %v5776_v7, %v3053_v14  ;;  %v3090_v49 = vmul.f32 %v5776_v7, %v3054_v4 }
 0x4c0   : > { %4283 = vst [vmem:[%s4854_s10 + $0x70] sm:$0xff] %v4263_v16  }
 0x4c1   : > { %v3125_v32 = vadd.f32 %v5788_v17, %v3089_v42  ;;  %v3126_v41 = vadd.f32 %v5788_v17, %v3090_v49 }
 0x4c3   : > { %vm3157_vm4 = vcmp.ge.f32.partialorder %v3125_v32, 0.0  ;;  %vm3158_vm5 = vcmp.ge.f32.partialorder %v3126_v41, 0.0  ;;  %v3189_v22 = vmul.f32 0.01, %v3125_v32  ;;  %v3190_v31 = vmul.f32 0.01, %v3126_v41 }
 0x4c5   : > { %v3221_v61 = vsel %vm3157_vm4, %v3125_v32, %v3189_v22  ;;  %v3222_v7 = vsel %vm3158_vm5, %v3126_v41, %v3190_v31 }
 0x4c6   : > { %v4268_v46 = vpack.c.bf16 %v3222_v7, %v3221_v61 }
 0x4c8   : > { %4284 = vst [vmem:[%s4854_s10 + $0x78] sm:$0xff] %v4268_v46  }
 0x4c9   : > { %4562 = shalt.err (!%p4559_p7)
}
 0x4ca   : > { %s4647_s10 = smov 64   ;;  %s4648_s12 = smov 4  }
 0x4cb   : > { %4321 = dma.vmem_to_hbm [thread:$0]  (%p4741_p3), %s3303_s30, 2048, %s3305_s14, %s3288_s18, %s4647_s10, %s4647_s10, %s4648_s12  }
 0x4cc PF: > { %s6323_s23 = sld [smem:[#allocation25_spill]]  ;;  %p4340_p9 = scmp.ge.s32.totalorder %s4639_s8, 2 }
 0x4cd   : > { %s3319_s13 = sand.u32 1, %s4611_s24  }
 0x4ce   : > { %s3320_s9 = scalar_lea.sflag [#allocation7], %s3319_s13 }
 0x4d2   : > { %p6324_p10 = scmp.ne.s32.totalorder %s6323_s23, 0 }
 0x4d4   : > { %p4331_p11 = pnand %p4340_p9, %p6324_p10 }
 0x4d6   : > { %p4332_p12 = pneg %p4331_p11 }
 0x4d8   : > { %4606 = dma.done.wait (%p4332_p12), %s3320_s9, 2048  }
 0x4d9   : > { %4608 = vsyncadd (%p4332_p12), %s3320_s9, 4294965248  ;;  %s22_s8 = sadd.s32 1, %s4639_s8   ;;  %s6325_s27 = sld [smem:[#allocation26_spill]] }
 0x4da   : > { %p19_p0 = scmp.ge.s32.totalorder %s22_s8, 6   ;;  %s6326_s15 = sld [smem:[#allocation21_spill]] }
 0x4db   : > { %s6327_s28 = sld [smem:[#allocation22_spill]]  ;;  %s6330_s24 = smov %s4615_s25 }
 0x4dc   : > { %s6328_s29 = sld [smem:[#allocation23_spill]]  ;;  %s6331_s25 = smov %s4619_s26 }
 0x4dd   : > { %s6329_s30 = sld [smem:[#allocation24_spill]]  ;;  %21 = sbr.rel (!%p19_p0) target bundleno = 10 (0xa), region = 110 }
 0x4df   : > { %s6332_s26 = smov %s6325_s27 }
 0x4e0   : > { %s6333_s27 = smov %s6326_s15 }
 0x4e2   :  { %3326 = vsyncpa [#allocation6], 1 }
 0x4e3   :  { %3328 = vsyncpa [#allocation6 + $0x1], 1 }
 0x4e4   :  { %3329 = vsyncpa [#allocation9], 1 }
 0x4e5   :  { %3330 = vsyncpa [#allocation7], 1 }
 0x4e6   :  { %3332 = vsyncpa [#allocation7 + $0x1], 1 }
 0x4e7   :  { %3333 = vsyncmov [#allocation3] }
 0x4ea   :  { %s3334_s4 = vpop.sfrf %3333 }
 0x4eb   :  { %p4035_p3 = scmp.ne.s32.totalorder %s3334_s4, 0 }
 0x4ed   :  { %3338 = shalt.err (%p4035_p3)  }
 0x4ee   :  { %3340 = vsyncmov [#allocation3 + $0x1] }
 0x4f1   :  { %s3341_s14 = vpop.sfrf %3340 }
 0x4f2   :  { %p4036_p1 = scmp.ne.s32.totalorder %s3341_s14, 0 }
 0x4f4   :  { %3345 = shalt.err (%p4036_p1)  }

// kernel: tpu_custom_call.1
= control target key start
LH: loop header
LB: loop body
LE: loop exit
PB: predicated region body
PF: predicated region fallthrough
CT: control target
= control target key end

     0   :  { %s6123_s0 = inlined_call_operand.hbm [shape: bf16[2,576,128], index: 0, kind: input, shape index: {}]   ;;  %s6124_s1 = inlined_call_operand.hbm [shape: bf16[128,128], index: 1, kind: input, shape index: {}]   ;;  %s6125_s2 = inlined_call_operand.vmem [shape: f32[1,128], index: 2, kind: input, shape index: {}]   ;;  %s6126_s3 = inlined_call_operand.vmem [shape: f32[1,128], index: 3, kind: input, shape index: {}]   ;;  %s6127_s4 = inlined_call_operand.hbm [shape: bf16[3,384,128], index: 4, kind: input, shape index: {}]   ;;  %s6128_s5 = inlined_call_operand.vmem [shape: f32[1,128], index: 5, kind: input, shape index: {}]   ;;  %s6129_s6 = inlined_call_operand.vmem [shape: f32[1,128], index: 6, kind: input, shape index: {}]   ;;  %s6130_s7 = inlined_call_operand.hbm [shape: bf16[2,512,128], index: 7, kind: output, shape index: {}]  }
   0x1   :  { %6172 = sst [smem:[#allocation70_spill]] %s6124_s1 }
   0x2   :  { %6173 = sst [smem:[#allocation71_spill]] %s6127_s4 }
   0x3   :  { %12 = vsyncpa [#allocation6], 0 }
   0x4   :  { %13 = vsyncpa [#allocation9], 0 }
   0x5   :  { %14 = vsyncpa [#allocation7], 0 }
   0x6   :  { %16 = vsyncpa [#allocation7 + $0x1], 0  ;;  %s4689_s24 = smov 0   ;;  %s4691_s25 = smov 0  }
   0x7   :  { %s4693_s26 = smov 0   ;;  %s4695_s27 = smov 0  }
   0x8   :  { %s4697_s28 = smov 0   ;;  %s4699_s29 = smov 0  }
   0x9   :  { %s4701_s30 = smov 0   ;;  %s4703_s8 = smov 0  }
   0xa LB: > { %6174 = sst [smem:[#allocation21_spill]] %s4631_s29  ;;  %s3416_s9 = sadd.s32 4294967295, %s4639_s8   ;;  %s4639_s8 = sphi %s4703_s8, %s22_s8   ;;  %s4635_s30 = sphi %s4701_s30, %s6329_s30   ;;  %s4631_s29 = sphi %s4699_s29, %s6328_s29   ;;  %s4627_s28 = sphi %s4697_s28, %s6327_s28   ;;  %s4623_s27 = sphi %s4695_s27, %s6333_s27   ;;  %s4619_s26 = sphi %s4693_s26, %s6332_s26   ;;  %s4615_s25 = sphi %s4691_s25, %s6331_s25   ;;  %s4611_s24 = sphi %s4689_s24, %s6330_s24  }
   0xb   : > { %6175 = sst [smem:[#allocation22_spill]] %s4635_s30  ;;  %s3417_s10 = sadd.s32 4294967294, %s4639_s8  }
   0xc   : > { %s31_s11 = sadd.s32 1, %s4631_s29  ;;  %s34_s12 = sadd.s32 1, %s4635_s30 }
   0xd   : > { %p32_p0 = scmp.ge.s32.totalorder %s31_s11, 2  ;;  %s169_s13 = sadd.s32 1, %s4619_s26 }
   0xe   : > { %p179_p1 = scmp.ne.s32.totalorder %s4619_s26, %s4615_s25  ;;  %p180_p2 = scmp.eq.s32.totalorder %s3416_s9, 3 }
   0xf   : > { %s6335_s11 = smov (%p32_p0, %s31_s11), 0  ;;  %s6337_s12 = smov (!%p32_p0, %s34_s12), %s4635_s30 }
  0x10   : > { %6176 = sst [smem:[#allocation23_spill]] %s6335_s11  ;;  %s165_s14 = ssub.s32 %s4631_s29, %s6335_s11 }
  0x11   : > { %p4741_p3 = por %p180_p2, %p179_p1  ;;  %p36_p4 = scmp.ge.s32.totalorder %s6337_s12, 2 }
  0x12   : > { %p185_p5 = scmp.ne.s32.totalorder %s4615_s25, %s4611_s24  ;;  %p186_p6 = scmp.eq.s32.totalorder %s3417_s10, 3 }
  0x13   : > { %p3418_p7 = scmp.ge.s32.totalorder %s4639_s8, 1  ;;  %s6339_s12 = smov (%p36_p4, %s6337_s12), 0 }
  0x14   : > { %6178 = sst [smem:[#allocation24_spill]] %s6339_s12  ;;  %p4750_p8 = por %p186_p6, %p185_p5 }
  0x15   : > { %p193_p9 = scmp.lt.s32.totalorder %s4639_s8, 5  ;;  %s164_s17 = ssub.s32 %s4635_s30, %s6339_s12 }
  0x16   : > { %s6179_s16 = scalar_select %p4750_p8, 1, 0 }
  0x17   : > { %s166_s18 = sor.u32 %s165_s14, %s164_s17  ;;  %p4757_p10 = pnand %p3418_p7, %p193_p9 }
  0x18   : > { %6180 = sst [smem:[#allocation25_spill]] %s6179_s16  ;;  %p167_p11 = scmp.eq.s32.totalorder %s166_s18, 0 }
  0x19   : > { %p4761_p12 = scmp.eq.s32.totalorder %s3416_s9, 0  ;;  %p4323_p13 = pneg %p4757_p10 }
  0x1a   : > { %s6183_s1 = sld [smem:[#allocation70_spill]]  ;;  %s4641_s14 = smov [#allocation5]  }
  0x1b   : > { %s4771_s10 = scalar_select %p167_p11, %s4619_s26, %s169_s13  }
  0x1c   : > { %s206_s17 = sshll.u32 %s4641_s14, 4  ;;  %p4324_p0 = pnand %p4761_p12, %p4323_p13  ;;  %s207_s17 = int_to_ptr.vmem [resolvable:$true] %s206_s17 }
  0x1d   : > { %6184 = sst [smem:[#allocation26_spill]] %s4771_s10  ;;  %s4642_s18 = smov 64  }
  0x1e   : > { %s4643_s9 = smov 4   ;;  %s6185_s4 = sld [smem:[#allocation71_spill]] }
  0x1f   : > { %s4644_s29 = smov [#allocation8]  }
  0x20   : > { %s204_s23 = sshll.u32 %s6183_s1, 4  ;;  %s226_s16 = sshll.u32 %s4644_s29, 4  ;;  %s205_s23 = int_to_ptr.hbm [resolvable:$true] %s204_s23  ;;  %s227_s16 = int_to_ptr.vmem [resolvable:$true] %s226_s16 }
  0x21   : > { %4326 = dma.hbm_to_vmem [thread:$0]  (!%p4324_p0), %s205_s23, 1024, %s207_s17, [#allocation6], %s4642_s18, %s4642_s18, %s4643_s9  }
  0x22   : > { %248 = sbr.rel (%p4757_p10) target bundleno = 1228 (0x4cc), region = 44 }
  0x24   : > { %s224_s30 = sshll.u32 %s6185_s4, 4  ;;  %s225_s30 = int_to_ptr.hbm [resolvable:$true] %s224_s30 }
  0x25   : > { %4329 = dma.hbm_to_vmem [thread:$0]  (!%p4324_p0), %s225_s30, 9216, %s227_s16, [#allocation9], %s4642_s18, %s4642_s18, %s4643_s9  }
  0x27   : > { %4596 = dma.done.wait (%p4761_p12), [#allocation6], 1024  }
  0x28   : > { %4598 = vsyncadd (%p4761_p12), [#allocation6], 4294966272 }
  0x29   : > { %4600 = dma.done.wait (%p4761_p12), [#allocation9], 9216  }
  0x2a   : > { %4602 = vsyncadd (%p4761_p12), [#allocation9], 4294958080  ;;  %s6136_s29 = sand.u32 1, %s4615_s25   ;;  %p4338_p1 = scmp.eq.s32.totalorder %s4623_s27, 0 }
  0x2b   : > { %s4791_s30 = sshll.u32 %s6136_s29, 7  ;;  %s4037_s11 = smul.u32 288, %s4627_s28 }
  0x2c   : > { %p300_p2 = scmp.lt.s32.totalorder %s4623_s27, 0  ;;  %s6137_s19 = smov [#allocation2]  }
  0x2d   : > { %s286_s16 = scalar_lea.hbm %s6123_s0, %s4037_s11  ;;  %s296_s20 = sshll.u32 %s6137_s19, 4  ;;  %s297_s20 = int_to_ptr.vmem [resolvable:$true] %s296_s20 }
  0x2e   : > { %s294_s21 = sshll.u32 %s286_s16, 4  ;;  %s301_s22 = ssub.s32 0, %s4623_s27  ;;  %s295_s21 = int_to_ptr.hbm [resolvable:$true] %s294_s21 }
  0x2f   : > { %s4479_s23 = sshra.s32 %s295_s21, 4  ;;  %s6138_s9 = scalar_lea.hbm %s6123_s0, 576  ;;  %s4480_s23 = int_to_ptr.hbm [resolvable:$true] %s4479_s23 }
  0x30   : > { %s4481_s14 = scalar_lea.hbm %s4480_s23, 160  ;;  %p4486_p7 = scmp.lt.s32.totalorder %s4480_s23, %s6123_s0 }
  0x31   : > { %p4482_p4 = scmp.ne.s32.totalorder %s4480_s23, %s4481_s14  ;;  %p4487_p9 = scmp.lt.s32.totalorder %s6138_s9, %s4481_s14 }
  0x33   : > { %p4483_p5 = pnand %p4482_p4, %p4338_p1  ;;  %p4488_p10 = por %p4487_p9, %p4486_p7 }
  0x35   : > { %p4484_p6 = pneg %p4483_p5 }
  0x37   : > { %p4489_p11 = pnand %p4488_p10, %p4484_p6 }
  0x39   : > { %4492 = shalt.err (!%p4489_p11)  }
  0x3a   : > { %4318 = dma.hbm_to_vmem [thread:$0]  (%p4338_p1), %s295_s21, 2560, %s297_s20, [#allocation3] }
  0x3b   : > { %s3427_s17 = smin.u32 %s4623_s27, %s301_s22  ;;  %s312_s18 = sadd.s32 1, %s4623_s27 }
  0x3c   : > { %s303_s12 = sand.u32 1, %s3427_s17   ;;  %s4038_s11 = sshll.u32 %s4623_s27, 8 }
  0x3d   : > { %s304_s23 = ssub.s32 0, %s303_s12  ;;  %s321_s13 = smul.u32 72, %s4627_s28 }
  0x3e   : > { %s6341_s23 = smov (!%p300_p2, %s304_s23), %s303_s12  ;;  %s4039_s16 = sadd.s32 256, %s4038_s11 }
  0x3f   : > { %p3429_p12 = scmp.lt.s32.totalorder %s6341_s23, 0  ;;  %s310_s14 = sadd.s32 2, %s6341_s23 }
  0x40   : > { %p4823_p13 = scmp.lt.s32.totalorder %s312_s18, 2  ;;  %s319_s20 = sshra.s32 %s4039_s16, 3 }
  0x41   : > { %s6343_s14 = smov (!%p3429_p12, %s310_s14), %s6341_s23  ;;  %s322_s22 = sadd.s32 %s321_s13, %s319_s20 }
  0x42   : > { %s317_s21 = ssub.s32 1, %s6343_s14  ;;  %s3432_s17 = sshll.u32 %s322_s22, 2 }
  0x43   : > { %s4040_s19 = smul.u32 160, %s317_s21  ;;  %s324_s1 = scalar_lea.hbm %s6123_s0, %s3432_s17 }
  0x44   : > { %s336_s4 = sshll.u32 %s324_s1, 4  ;;  %s4041_s18 = smul.u32 160, %s6343_s14  ;;  %s4831_s4 = int_to_ptr.hbm [resolvable:$true] %s336_s4 }
  0x45   : > { %s327_s23 = scalar_lea.vmem [#allocation2], %s4040_s19  ;;  %s328_s16 = scalar_lea.sflag [#allocation3], %s317_s21 }
  0x46   : > { %s4833_s11 = sshll.u32 %s327_s23, 4  ;;  %s4507_s10 = sshra.s32 %s4831_s4, 4  ;;  %s339_s11 = int_to_ptr.vmem [resolvable:$true] %s4833_s11  ;;  %s4508_s10 = int_to_ptr.hbm [resolvable:$true] %s4507_s10 }
  0x47   : > { %s4509_s13 = scalar_lea.hbm %s4508_s10, 160  ;;  %p4514_p4 = scmp.lt.s32.totalorder %s4508_s10, %s6123_s0 }
  0x48   : > { %p4510_p0 = scmp.ne.s32.totalorder %s4508_s10, %s4509_s13  ;;  %s6187_s19 = scalar_lea.hbm %s6123_s0, 576 }
  0x49   : > { %p4515_p5 = scmp.lt.s32.totalorder %s6187_s19, %s4509_s13 }
  0x4a   : > { %p4511_p1 = pnand %p4510_p0, %p4823_p13 }
  0x4b   : > { %p4516_p6 = por %p4515_p5, %p4514_p4 }
  0x4c   : > { %p4512_p2 = pneg %p4511_p1 }
  0x4e   : > { %p4517_p7 = pnand %p4516_p6, %p4512_p2 }
  0x50   : > { %4520 = shalt.err (!%p4517_p7)  }
  0x51   : > { %s4521_s21 = sshra.s32 %s339_s11, 4  ;;  %s6188_s12 = smov [#allocation2]   ;;  %s4522_s21 = int_to_ptr.vmem [resolvable:$true] %s4521_s21 }
  0x52   : > { %s4523_s17 = scalar_lea.vmem %s4522_s21, 160  ;;  %s4527_s23 = scalar_lea.vmem %s6188_s12, 320 }
  0x53   : > { %p4524_p9 = scmp.ne.s32.totalorder %s4522_s21, %s4523_s17  ;;  %p4528_p12 = scmp.lt.s32.totalorder %s4522_s21, [#allocation2] }
  0x54   : > { %p4529_p0 = scmp.lt.s32.totalorder %s4527_s23, %s4523_s17 }
  0x55   : > { %p4525_p10 = pnand %p4524_p9, %p4823_p13 }
  0x56   : > { %p4530_p1 = por %p4529_p0, %p4528_p12 }
  0x57   : > { %p4526_p11 = pneg %p4525_p10 }
  0x59   : > { %p4531_p8 = pnand %p4530_p1, %p4526_p11 }
  0x5b   : > { %4534 = shalt.err (!%p4531_p8)  }
  0x5c   : > { %4320 = dma.hbm_to_vmem [thread:$0]  (%p4823_p13), %s4831_s4, 2560, %s339_s11, %s328_s16 }
  0x5d   : > { %s4854_s10 = scalar_lea.vmem [#allocation10], %s4791_s30  ;;  %s4856_s13 = scalar_lea.vmem [#allocation2], %s4041_s18 }
  0x5e   : > { %s345_s9 = scalar_lea.sflag [#allocation3], %s6343_s14 }
  0x5f   : > { %4603 = dma.done.wait %s345_s9, 2560 }
  0x60   : > { %4604 = vsyncadd %s345_s9, 4294964736  ;;  %v4069_v0 = vld [vmem:[#allocation5 + $0x38] sm:$0xff]  ;;  %v4068_v1 = vld [vmem:[#allocation5 + $0x30] sm:$0xff]  ;;  %s3547_s4 = sshll.u32 %s4623_s27, 3  ;;  %v891_v25 = vlaneseq  ;;  %v4646_v26 = vmov 0.0|0.0   ;;  %s4030_s23 = sshll.u32 %s4623_s27, 5 }
  0x61   : > { %574 = vmatpush.bf16.msra.mxu0 %v4069_v0  ;;  %4285 = vmatpush.bf16.msra.mxu3 %v4069_v0  ;;  %v4067_v2 = vld [vmem:[#allocation5 + $0x28] sm:$0xff]  ;;  %v4066_v3 = vld [vmem:[#allocation5 + $0x20] sm:$0xff]  ;;  %v4065_v4 = vld [vmem:[#allocation5 + $0x18] sm:$0xff]  ;;  %s3548_s14 = sadd.s32 4294967295, %s3547_s4  ;;  %1101 = vst [vmem:[#allocation4 + $0x24] sm:$0xf] %v4646_v26 }
  0x62   : > { %v4064_v5 = vld [vmem:[#allocation5 + $0x10] sm:$0xff]  ;;  %v4063_v6 = vld [vmem:[#allocation5 + $0x8] sm:$0xff]  ;;  %v4062_v7 = vld [vmem:[#allocation5] sm:$0xff]  ;;  %1105 = vst [vmem:[#allocation4 + $0x54] sm:$0xf] %v4646_v26  ;;  %v4879_v30 = vstv %s3548_s14  ;;  %v4882_v32 = vshrl.u32 %v891_v25, 7 }
  0x63   : > { %v4042_v8 = vld [vmem:[%s4856_s13] sm:$0xff]  ;;  %v4043_v9 = vld [vmem:[%s4856_s13 + $0x8] sm:$0xff]  ;;  %v4044_v10 = vld [vmem:[%s4856_s13 + $0x10] sm:$0xff]  ;;  %1109 = vst [vmem:[#allocation4 + $0x84] sm:$0xf] %v4646_v26  ;;  %vm968_vm0 = vcmp.ge.s32.totalorder %v4879_v30, 0 }
  0x64   : > { %v4045_v11 = vld [vmem:[%s4856_s13 + $0x18] sm:$0xff]  ;;  %v4046_v12 = vld [vmem:[%s4856_s13 + $0x20] sm:$0xff]  ;;  %v4047_v13 = vld [vmem:[%s4856_s13 + $0x28] sm:$0xff]  ;;  %1113 = vst [vmem:[#allocation4 + $0xb4] sm:$0xf] %v4646_v26  ;;  %vm978_vm1 = vcmp.lt.s32.totalorder %v4879_v30, 16 }
  0x65   : > { %575 = vmatpush.bf16.msra.mxu0 %v4068_v1  ;;  %4286 = vmatpush.bf16.msra.mxu3 %v4068_v1  ;;  %v4149_v14 = vld [vmem:[#allocation8 + $0x38] sm:$0xff]  ;;  %v4048_v15 = vld [vmem:[%s4856_s13 + $0x30] sm:$0xff]  ;;  %v4147_v17 = vld [vmem:[#allocation8 + $0x28] sm:$0xff]  ;;  %1117 = vst [vmem:[#allocation4 + $0xe4] sm:$0xf] %v4646_v26  ;;  %vm908_vm3 = vcmp.ge.s32.totalorder %v4882_v32, 1 }
  0x66   : > { %1755 = vmatpush.bf16.msra.mxu1 %v4149_v14  ;;  %v4148_v16 = vld [vmem:[#allocation8 + $0x30] sm:$0xff]  ;;  %v4146_v18 = vld [vmem:[#allocation8 + $0x20] sm:$0xff]  ;;  %v4145_v19 = vld [vmem:[#allocation8 + $0x18] sm:$0xff]  ;;  %1121 = vst [vmem:[#allocation4 + $0x114] sm:$0xf] %v4646_v26  ;;  %v4903_v50 = vadd.s32 16, %v4882_v32 }
  0x67   : > { %v4049_v20 = vld [vmem:[%s4856_s13 + $0x38] sm:$0xff]  ;;  %v4144_v21 = vld [vmem:[#allocation8 + $0x10] sm:$0xff]  ;;  %v4143_v22 = vld [vmem:[#allocation8 + $0x8] sm:$0xff]  ;;  %1125 = vst [vmem:[#allocation4 + $0x144] sm:$0xf] %v4646_v26  ;;  %v899_v61 = vadd.s32 1, %v4879_v30 }
  0x68   : > { %v4142_v23 = vld [vmem:[#allocation8] sm:$0xff]  ;;  %1129 = vst [vmem:[#allocation4 + $0x174] sm:$0xf] %v4646_v26  ;;  %vm4888_vm4 = vmand %vm968_vm0, %vm978_vm1  ;;  %v4051_v45 = vld [vmem:[%s4856_s13 + $0x48] sm:$0xff]  ;;  %vm914_vm7 = vcmp.le.s32.totalorder %v4903_v50, 16  ;;  %v900_v35 = vadd.s32 2, %v4879_v30 }
  0x69   : > { %576 = vmatpush.bf16.msra.mxu0 %v4067_v2  ;;  %4287 = vmatpush.bf16.msra.mxu3 %v4067_v2  ;;  %v4871_v24 = vld [vmem:[%s6125_s2] ss:$0 sm:$0xff]  ;;  %1133 = vst [vmem:[#allocation4 + $0x28] sm:$0xf] %v4646_v26  ;;  %v4052_v62 = vld [vmem:[%s4856_s13 + $0x50] sm:$0xff]  ;;  %vm969_vm8 = vcmp.ge.s32.totalorder %v899_v61, 0 }
  0x6a   : > { %1756 = vmatpush.bf16.msra.mxu1 %v4148_v16  ;;  %v4876_v27 = vld [vmem:[%s6126_s3] ss:$0 sm:$0xff]  ;;  %1137 = vst [vmem:[#allocation4 + $0x58] sm:$0xf] %v4646_v26  ;;  %vm979_vm9 = vcmp.lt.s32.totalorder %v899_v61, 16  ;;  %vm970_vm14 = vcmp.ge.s32.totalorder %v900_v35, 0 }
  0x6b   : > { %v4050_v28 = vld [vmem:[%s4856_s13 + $0x40] sm:$0xff]  ;;  %1141 = vst [vmem:[#allocation4 + $0x88] sm:$0xf] %v4646_v26  ;;  %vm4918_vm11 = vmand %vm969_vm8, %vm979_vm9  ;;  %vm980_vm15 = vcmp.lt.s32.totalorder %v900_v35, 16  ;;  %v4125_v35 = vld [vmem:[#allocation8 + $0xf8] sm:$0xff]  ;;  %s3302_s30 = sshll.u32 %s4854_s10, 4  ;;  %s3303_s30 = int_to_ptr.vmem [resolvable:$true] %s3302_s30 }
  0x6c   : > { %1145 = vst [vmem:[#allocation4 + $0xb8] sm:$0xf] %v4646_v26  ;;  %vm4947_vm1 = vmand %vm970_vm14, %vm980_vm15  ;;  %v4189_v50 = vld [vmem:[#allocation8 + $0x238] sm:$0xff]  ;;  %s6322_s11 = sand.u32 1, %s4615_s25   ;;  %s4555_s19 = scalar_lea.hbm %s6130_s7, 512 }
  0x6d   : > { %577 = vmatpush.bf16.msra.mxu0 %v4066_v3  ;;  %4288 = vmatpush.bf16.msra.mxu3 %v4066_v3  ;;  %1149 = vst [vmem:[#allocation4 + $0xe8] sm:$0xf] %v4646_v26  ;;  %s3288_s18 = scalar_lea.sflag [#allocation7], %s6322_s11 }
  0x6e   : > { %1757 = vmatpush.bf16.msra.mxu1 %v4147_v17  ;;  %1153 = vst [vmem:[#allocation4 + $0x118] sm:$0xf] %v4646_v26 }
  0x6f   : > { %1157 = vst [vmem:[#allocation4 + $0x148] sm:$0xf] %v4646_v26 }
  0x70   : > { %1161 = vst [vmem:[#allocation4 + $0x178] sm:$0xf] %v4646_v26 }
  0x71   : > { %578 = vmatpush.bf16.msra.mxu0 %v4065_v4  ;;  %4289 = vmatpush.bf16.msra.mxu3 %v4065_v4  ;;  %1165 = vst [vmem:[#allocation4 + $0x2c] sm:$0xf] %v4646_v26 }
  0x72   : > { %1758 = vmatpush.bf16.msra.mxu1 %v4146_v18  ;;  %1169 = vst [vmem:[#allocation4 + $0x5c] sm:$0xf] %v4646_v26 }
  0x73   : > { %1173 = vst [vmem:[#allocation4 + $0x8c] sm:$0xf] %v4646_v26 }
  0x74   : > { %1177 = vst [vmem:[#allocation4 + $0xbc] sm:$0xf] %v4646_v26 }
  0x75   : > { %579 = vmatpush.bf16.msra.mxu0 %v4064_v5  ;;  %4290 = vmatpush.bf16.msra.mxu3 %v4064_v5  ;;  %1181 = vst [vmem:[#allocation4 + $0xec] sm:$0xf] %v4646_v26 }
  0x76   : > { %1759 = vmatpush.bf16.msra.mxu1 %v4145_v19  ;;  %1185 = vst [vmem:[#allocation4 + $0x11c] sm:$0xf] %v4646_v26 }
  0x77   : > { %1189 = vst [vmem:[#allocation4 + $0x14c] sm:$0xf] %v4646_v26 }
  0x78   : > { %1193 = vst [vmem:[#allocation4 + $0x17c] sm:$0xf] %v4646_v26 }
  0x79   : > { %580 = vmatpush.bf16.msra.mxu0 %v4063_v6  ;;  %4291 = vmatpush.bf16.msra.mxu3 %v4063_v6 }
  0x7a   : > { %1760 = vmatpush.bf16.msra.mxu1 %v4144_v21 }
  0x7d   : > { %581 = vmatpush.bf16.msra.mxu0 %v4062_v7  ;;  %4292 = vmatpush.bf16.msra.mxu3 %v4062_v7 }
  0x7e   : > { %1761 = vmatpush.bf16.msra.mxu1 %v4143_v22 }
  0x80   : > { %582 = vmatmul.bf16.vlgmr.msra.gmra.mxu0 %v4042_v8  ;;  %v4074_v8 = vld [vmem:[#allocation4 + $0x20] sm:$0xf0] }
  0x81   : > { %4293 = vmatpush.bf16.msrb.mxu3 %v4149_v14 }
  0x82   : > { %1762 = vmatpush.bf16.msra.mxu1 %v4142_v23 }
  0x85   : > { %4294 = vmatpush.bf16.msrb.mxu3 %v4148_v16  ;;  %v4053_v16 = vld [vmem:[%s4856_s13 + $0x58] sm:$0xff] }
  0x86   : > { %2231 = vmatpush.bf16.msrb.mxu1 %v4125_v35 }
  0x89   : > { %4295 = vmatpush.bf16.msrb.mxu3 %v4147_v17 }
  0x8d   : > { %4296 = vmatpush.bf16.msrb.mxu3 %v4146_v18 }
  0x90   : > { %587 = vmatmul.bf16.gmra.mxu0 %v4043_v9 }
  0x91   : > { %4297 = vmatpush.bf16.msrb.mxu3 %v4145_v19 }
  0x95   : > { %4298 = vmatpush.bf16.msrb.mxu3 %v4144_v21 }
  0x99   : > { %4299 = vmatpush.bf16.msrb.mxu3 %v4143_v22 }
  0x9d   : > { %4300 = vmatpush.bf16.msrb.mxu3 %v4142_v23 }
  0xa0   : > { %592 = vmatmul.bf16.gmra.mxu0 %v4044_v10 }
  0xb0   : > { %597 = vmatmul.bf16.gmra.mxu0 %v4045_v11 }
  0xc0   : > { %602 = vmatmul.bf16.gmra.mxu0 %v4046_v12 }
  0xd0   : > { %607 = vmatmul.bf16.gmra.mxu0 %v4047_v13 }
  0xe0   : > { %612 = vmatmul.bf16.gmra.mxu0 %v4048_v15 }
  0xf0   : > { %617 = vmatmul.bf16.gmra.mxu0 %v4049_v20 }
  0xfd   : > { %v583_v29 = vpop.f32.mrf.mxu0 }
  0xfe   : > { %v687_v31 = vmul.f32 %v4871_v24, %v583_v29 }
 0x100   : > { %v731_v33 = vadd.f32 %v4876_v27, %v687_v31  ;;  %622 = vmatmul.bf16.gmra.mxu0 %v4050_v28 }
 0x102   : > { %vm771_vm2 = vcmp.ge.f32.partialorder %v731_v33, 0.0  ;;  %v811_v34 = vmul.f32 0.01, %v731_v33 }
 0x104   : > { %v851_v36 = vsel %vm771_vm2, %v731_v33, %v811_v34 }
 0x105   : > { %v928_v37 = vsel %vm908_vm3, %v851_v36, 0.0  ;;  %v585_v38 = vpop.f32.mrf.mxu0  ;;  %v4054_v36 = vld [vmem:[%s4856_s13 + $0x60] sm:$0xff] }
 0x106   : > { %v1018_v39 = vsel %vm4888_vm4, %v928_v37, 0.0  ;;  %v688_v40 = vmul.f32 %v4871_v24, %v585_v38 }
 0x107   : > { %v1058_v41 = vpack.c.bf16 %v1018_v39, %v1018_v39 }
 0x108   : > { %v732_v42 = vadd.f32 %v4876_v27, %v688_v40 }
 0x109   : > { %1098 = vst [vmem:[#allocation4] sm:$0xf] %v1058_v41 }
 0x10a   : > { %vm772_vm5 = vcmp.ge.f32.partialorder %v732_v42, 0.0  ;;  %v812_v43 = vmul.f32 0.01, %v732_v42 }
 0x10c   : > { %v852_v44 = vsel %vm772_vm5, %v732_v42, %v812_v43 }
 0x10d   : > { %v1019_v46 = vsel %vm4888_vm4, %v852_v44, 0.0  ;;  %v588_v47 = vpop.f32.mrf.mxu0 }
 0x10e   : > { %v1059_v48 = vpack.c.bf16 %v1019_v46, %v1019_v46  ;;  %v689_v49 = vmul.f32 %v4871_v24, %v588_v47  ;;  %v4080_v46 = vld [vmem:[#allocation4 + $0x50] sm:$0xf0] }
 0x110   : > { %1099 = vst [vmem:[#allocation4 + $0xc] sm:$0xf] %v1059_v48  ;;  %v733_v51 = vadd.f32 %v4876_v27, %v689_v49  ;;  %627 = vmatmul.bf16.gmra.mxu0 %v4051_v45  ;;  %v3551_v58 = vld [vmem:[#allocation4] sm:$0xf] }
 0x112   : > { %vm773_vm6 = vcmp.ge.f32.partialorder %v733_v51, 0.0  ;;  %v813_v52 = vmul.f32 0.01, %v733_v51 }
 0x114   : > { %v853_v53 = vsel %vm773_vm6, %v733_v51, %v813_v52 }
 0x115   : > { %v930_v54 = vsel %vm914_vm7, %v853_v53, 0.0  ;;  %v590_v55 = vpop.f32.mrf.mxu0 }
 0x116   : > { %v1020_v56 = vsel %vm4888_vm4, %v930_v54, 0.0  ;;  %v4055_v55 = vld [vmem:[%s4856_s13 + $0x68] sm:$0xff] }
 0x117   : > { %v1060_v57 = vpack.c.bf16 %v1020_v56, %v1020_v56  ;;  %v4071_v59 = vld [vmem:[#allocation4 + $0x8] sm:$0xf0] }
 0x118   : > { %v4911_v60 = vor.u32 %v4071_v59, %v3551_v58 }
 0x119   : > { %1100 = vst [vmem:[#allocation4 + $0x18] sm:$0xf] %v1060_v57 }
 0x11a   : > { %1763 = vmatmul.bf16.vlgmr.msra.gmra.mxu1 %v4911_v60 }
 0x11d   : > { %v593_v63 = vpop.f32.mrf.mxu0 }
 0x11e   : > { %v691_v0 = vmul.f32 %v4871_v24, %v593_v63 }
 0x120   : > { %v735_v1 = vadd.f32 %v4876_v27, %v691_v0  ;;  %632 = vmatmul.bf16.gmra.mxu0 %v4052_v62  ;;  %v3563_v7 = vld [vmem:[#allocation4 + $0x18] sm:$0xf] }
 0x121   : > { %v4928_v13 = vor.u32 %v4074_v8, %v3563_v7  ;;  %v901_v7 = vadd.s32 3, %v4879_v30  ;;  %v4056_v8 = vld [vmem:[%s4856_s13 + $0x70] sm:$0xff] }
 0x122   : > { %vm775_vm10 = vcmp.ge.f32.partialorder %v735_v1, 0.0  ;;  %v815_v2 = vmul.f32 0.01, %v735_v1 }
 0x123   : > { %vm971_vm5 = vcmp.ge.s32.totalorder %v901_v7, 0  ;;  %vm981_vm6 = vcmp.lt.s32.totalorder %v901_v7, 16 }
 0x124   : > { %v855_v4 = vsel %vm775_vm10, %v735_v1, %v815_v2  ;;  %vm4976_vm9 = vmand %vm971_vm5, %vm981_vm6 }
 0x125   : > { %v932_v5 = vsel %vm908_vm3, %v855_v4, 0.0  ;;  %v595_v6 = vpop.f32.mrf.mxu0 }
 0x126   : > { %v1022_v9 = vsel %vm4918_vm11, %v932_v5, 0.0  ;;  %v692_v10 = vmul.f32 %v4871_v24, %v595_v6 }
 0x127   : > { %v1062_v11 = vpack.c.bf16 %v1022_v9, %v1022_v9 }
 0x128   : > { %v736_v12 = vadd.f32 %v4876_v27, %v692_v10 }
 0x129   : > { %1102 = vst [vmem:[#allocation4 + $0x30] sm:$0xf] %v1062_v11 }
 0x12a   : > { %1130 = vst [vmem:[#allocation4 + $0x4] sm:$0xf] %v1062_v11  ;;  %vm776_vm12 = vcmp.ge.f32.partialorder %v736_v12, 0.0  ;;  %v816_v14 = vmul.f32 0.01, %v736_v12  ;;  %1768 = vmatmul.bf16.gmra.mxu1 %v4928_v13 }
 0x12c   : > { %v856_v15 = vsel %vm776_vm12, %v736_v12, %v816_v14  ;;  %v4157_v12 = vld [vmem:[#allocation8 + $0x78] sm:$0xff] }
 0x12d   : > { %v1023_v17 = vsel %vm4918_vm11, %v856_v15, 0.0  ;;  %v598_v18 = vpop.f32.mrf.mxu0  ;;  %1844 = vmatpush.bf16.msrb.mxu0 %v4157_v12  ;;  %4301 = vmatpush.bf16.msra.mxu2 %v4157_v12 }
 0x12e   : > { %v1063_v19 = vpack.c.bf16 %v1023_v17, %v1023_v17  ;;  %v693_v20 = vmul.f32 %v4871_v24, %v598_v18 }
 0x130   : > { %1103 = vst [vmem:[#allocation4 + $0x3c] sm:$0xf] %v1063_v19  ;;  %v737_v21 = vadd.f32 %v4876_v27, %v693_v20  ;;  %637 = vmatmul.bf16.gmra.mxu0 %v4053_v16  ;;  %v3575_v31 = vld [vmem:[#allocation4 + $0x30] sm:$0xf] }
 0x131   : > { %1131 = vst [vmem:[#allocation4 + $0x10] sm:$0xf] %v1063_v19  ;;  %v4060_v16 = vld [vmem:[%s4856_s13 + $0x90] sm:$0xff] }
 0x132   : > { %vm777_vm13 = vcmp.ge.f32.partialorder %v737_v21, 0.0  ;;  %v817_v22 = vmul.f32 0.01, %v737_v21  ;;  %672 = vmatmul.bf16.vlgmr.msra.gmra.mxu3 %v4060_v16  ;;  %v4092_v16 = vld [vmem:[#allocation4 + $0xb0] sm:$0xf0] }
 0x134   : > { %v857_v23 = vsel %vm777_vm13, %v737_v21, %v817_v22  ;;  %v4086_v21 = vld [vmem:[#allocation4 + $0x80] sm:$0xf0]  ;;  %v4156_v22 = vld [vmem:[#allocation8 + $0x70] sm:$0xff] }
 0x135   : > { %v934_v25 = vsel %vm914_vm7, %v857_v23, 0.0  ;;  %v600_v26 = vpop.f32.mrf.mxu0  ;;  %1845 = vmatpush.bf16.msrb.mxu0 %v4156_v22  ;;  %4302 = vmatpush.bf16.msra.mxu2 %v4156_v22 }
 0x136   : > { %v1024_v28 = vsel %vm4918_vm11, %v934_v25, 0.0 }
 0x137   : > { %v1064_v29 = vpack.c.bf16 %v1024_v28, %v1024_v28  ;;  %v4077_v33 = vld [vmem:[#allocation4 + $0x38] sm:$0xf0] }
 0x138   : > { %v4940_v34 = vor.u32 %v4077_v33, %v3575_v31  ;;  %v4155_v31 = vld [vmem:[#allocation8 + $0x68] sm:$0xff] }
 0x139   : > { %1104 = vst [vmem:[#allocation4 + $0x48] sm:$0xf] %v1064_v29  ;;  %1846 = vmatpush.bf16.msrb.mxu0 %v4155_v31  ;;  %4303 = vmatpush.bf16.msra.mxu2 %v4155_v31 }
 0x13a   : > { %1132 = vst [vmem:[#allocation4 + $0x1c] sm:$0xf] %v1064_v29  ;;  %1773 = vmatmul.bf16.gmra.mxu1 %v4940_v34 }
 0x13d   : > { %v603_v37 = vpop.f32.mrf.mxu0 }
 0x13e   : > { %v695_v38 = vmul.f32 %v4871_v24, %v603_v37  ;;  %v4057_v37 = vld [vmem:[%s4856_s13 + $0x78] sm:$0xff] }
 0x140   : > { %v739_v39 = vadd.f32 %v4876_v27, %v695_v38  ;;  %642 = vmatmul.bf16.gmra.mxu0 %v4054_v36  ;;  %v3587_v45 = vld [vmem:[#allocation4 + $0x48] sm:$0xf] }
 0x141   : > { %v4957_v52 = vor.u32 %v4080_v46, %v3587_v45  ;;  %v4153_v45 = vld [vmem:[#allocation8 + $0x58] sm:$0xff] }
 0x142   : > { %vm779_vm0 = vcmp.ge.f32.partialorder %v739_v39, 0.0  ;;  %v819_v40 = vmul.f32 0.01, %v739_v39 }
 0x144   : > { %v859_v42 = vsel %vm779_vm0, %v739_v39, %v819_v40  ;;  %v4154_v40 = vld [vmem:[#allocation8 + $0x60] sm:$0xff] }
 0x145   : > { %v936_v43 = vsel %vm908_vm3, %v859_v42, 0.0  ;;  %v605_v44 = vpop.f32.mrf.mxu0  ;;  %1847 = vmatpush.bf16.msrb.mxu0 %v4154_v40  ;;  %4304 = vmatpush.bf16.msra.mxu2 %v4154_v40 }
 0x146   : > { %v1026_v47 = vsel %vm4947_vm1, %v936_v43, 0.0  ;;  %v696_v48 = vmul.f32 %v4871_v24, %v605_v44  ;;  %v4124_v43 = vld [vmem:[#allocation8 + $0xf0] sm:$0xff] }
 0x147   : > { %v1066_v49 = vpack.c.bf16 %v1026_v47, %v1026_v47  ;;  %2232 = vmatpush.bf16.msrb.mxu1 %v4124_v43  ;;  %v4061_v47 = vld [vmem:[%s4856_s13 + $0x98] sm:$0xff] }
 0x148   : > { %v740_v51 = vadd.f32 %v4876_v27, %v696_v48  ;;  %v4123_v48 = vld [vmem:[#allocation8 + $0xe8] sm:$0xff]  ;;  %677 = vmatmul.bf16.gmra.mxu3 %v4061_v47 }
 0x149   : > { %1106 = vst [vmem:[#allocation4 + $0x60] sm:$0xf] %v1066_v49  ;;  %1848 = vmatpush.bf16.msrb.mxu0 %v4153_v45  ;;  %4305 = vmatpush.bf16.msra.mxu2 %v4153_v45 }
 0x14a   : > { %1134 = vst [vmem:[#allocation4 + $0x34] sm:$0xf] %v1066_v49  ;;  %vm780_vm2 = vcmp.ge.f32.partialorder %v740_v51, 0.0  ;;  %v820_v53 = vmul.f32 0.01, %v740_v51  ;;  %1778 = vmatmul.bf16.gmra.mxu1 %v4957_v52 }
 0x14b   : > { %1162 = vst [vmem:[#allocation4 + $0x8] sm:$0xf] %v1066_v49  ;;  %2233 = vmatpush.bf16.msrb.mxu1 %v4123_v48  ;;  %v3553_v48 = vld [vmem:[#allocation4 + $0xc] sm:$0xf0] }
 0x14c   : > { %v860_v54 = vsel %vm780_vm2, %v740_v51, %v820_v53 }
 0x14d   : > { %v1027_v56 = vsel %vm4947_vm1, %v860_v54, 0.0  ;;  %v608_v57 = vpop.f32.mrf.mxu0  ;;  %v4152_v54 = vld [vmem:[#allocation8 + $0x50] sm:$0xff] }
 0x14e   : > { %v1067_v58 = vpack.c.bf16 %v1027_v56, %v1027_v56  ;;  %v697_v59 = vmul.f32 %v4871_v24, %v608_v57  ;;  %1849 = vmatpush.bf16.msrb.mxu0 %v4152_v54  ;;  %4306 = vmatpush.bf16.msra.mxu2 %v4152_v54  ;;  %v4070_v54 = vld [vmem:[#allocation4 + $0x4] sm:$0xf] }
 0x150   : > { %1107 = vst [vmem:[#allocation4 + $0x6c] sm:$0xf] %v1067_v58  ;;  %v741_v61 = vadd.f32 %v4876_v27, %v697_v59  ;;  %647 = vmatmul.bf16.gmra.mxu0 %v4055_v55  ;;  %v3599_v4 = vld [vmem:[#allocation4 + $0x60] sm:$0xf] }
 0x151   : > { %1135 = vst [vmem:[#allocation4 + $0x40] sm:$0xf] %v1067_v58  ;;  %v4122_v59 = vld [vmem:[#allocation8 + $0xe0] sm:$0xff] }
 0x152   : > { %1163 = vst [vmem:[#allocation4 + $0x14] sm:$0xf] %v1067_v58  ;;  %vm781_vm4 = vcmp.ge.f32.partialorder %v741_v61, 0.0  ;;  %v821_v62 = vmul.f32 0.01, %v741_v61  ;;  %2234 = vmatpush.bf16.msrb.mxu1 %v4122_v59 }
 0x153   : > { %v3637_v59 = vld [vmem:[#allocation4 + $0xb4] sm:$0xf0] }
 0x154   : > { %v861_v63 = vsel %vm781_vm4, %v741_v61, %v821_v62  ;;  %v4151_v62 = vld [vmem:[#allocation8 + $0x48] sm:$0xff] }
 0x155   : > { %v938_v0 = vsel %vm914_vm7, %v861_v63, 0.0  ;;  %v610_v1 = vpop.f32.mrf.mxu0  ;;  %1850 = vmatpush.bf16.msrb.mxu0 %v4151_v62  ;;  %v4121_v63 = vld [vmem:[#allocation8 + $0xd8] sm:$0xff]  ;;  %4307 = vmatpush.bf16.msra.mxu2 %v4151_v62 }
 0x156   : > { %v1028_v2 = vsel %vm4947_vm1, %v938_v0, 0.0  ;;  %v902_v0 = vadd.s32 4, %v4879_v30  ;;  %v4058_v1 = vld [vmem:[%s4856_s13 + $0x80] sm:$0xff]  ;;  %2235 = vmatpush.bf16.msrb.mxu1 %v4121_v63 }
 0x157   : > { %v1068_v3 = vpack.c.bf16 %v1028_v2, %v1028_v2  ;;  %v4083_v5 = vld [vmem:[#allocation4 + $0x68] sm:$0xf0] }
 0x158   : > { %v4969_v6 = vor.u32 %v4083_v5, %v3599_v4  ;;  %v4120_v5 = vld [vmem:[#allocation8 + $0xd0] sm:$0xff]  ;;  %vm972_vm12 = vcmp.ge.s32.totalorder %v902_v0, 0  ;;  %vm982_vm13 = vcmp.lt.s32.totalorder %v902_v0, 16 }
 0x159   : > { %1108 = vst [vmem:[#allocation4 + $0x78] sm:$0xf] %v1068_v3  ;;  %vm5007_vm15 = vmand %vm972_vm12, %vm982_vm13 }
 0x15a   : > { %1136 = vst [vmem:[#allocation4 + $0x4c] sm:$0xf] %v1068_v3  ;;  %1783 = vmatmul.bf16.gmra.mxu1 %v4969_v6 }
 0x15b   : > { %1164 = vst [vmem:[#allocation4 + $0x20] sm:$0xf] %v1068_v3  ;;  %v4150_v3 = vld [vmem:[#allocation8 + $0x40] sm:$0xff]  ;;  %2236 = vmatpush.bf16.msrb.mxu1 %v4120_v5 }
 0x15c   : > { %1851 = vmatpush.bf16.msrb.mxu0 %v4150_v3  ;;  %4308 = vmatpush.bf16.msra.mxu2 %v4150_v3 }
 0x15d   : > { %v613_v9 = vpop.f32.mrf.mxu0 }
 0x15e   : > { %v699_v10 = vmul.f32 %v4871_v24, %v613_v9 }
 0x160   : > { %v743_v11 = vadd.f32 %v4876_v27, %v699_v10  ;;  %652 = vmatmul.bf16.gmra.mxu0 %v4056_v8  ;;  %v3611_v20 = vld [vmem:[#allocation4 + $0x78] sm:$0xf]  ;;  %v4119_v10 = vld [vmem:[#allocation8 + $0xc8] sm:$0xff] }
 0x161   : > { %v4987_v29 = vor.u32 %v4086_v21, %v3611_v20  ;;  %2237 = vmatpush.bf16.msrb.mxu1 %v4119_v10  ;;  %v4118_v20 = vld [vmem:[#allocation8 + $0xc0] sm:$0xff] }
 0x162   : > { %vm783_vm8 = vcmp.ge.f32.partialorder %v743_v11, 0.0  ;;  %v823_v14 = vmul.f32 0.01, %v743_v11 }
 0x164   : > { %v863_v17 = vsel %vm783_vm8, %v743_v11, %v823_v14 }
 0x165   : > { %v940_v18 = vsel %vm908_vm3, %v863_v17, 0.0  ;;  %v615_v19 = vpop.f32.mrf.mxu0  ;;  %2238 = vmatpush.bf16.msrb.mxu1 %v4118_v20 }
 0x166   : > { %v1030_v23 = vsel %vm4976_vm9, %v940_v18, 0.0  ;;  %v700_v25 = vmul.f32 %v4871_v24, %v615_v19 }
 0x167   : > { %v1070_v26 = vpack.c.bf16 %v1030_v23, %v1030_v23 }
 0x168   : > { %v744_v28 = vadd.f32 %v4876_v27, %v700_v25 }
 0x169   : > { %1110 = vst [vmem:[#allocation4 + $0x90] sm:$0xf] %v1070_v26 }
 0x16a   : > { %1138 = vst [vmem:[#allocation4 + $0x64] sm:$0xf] %v1070_v26  ;;  %vm784_vm10 = vcmp.ge.f32.partialorder %v744_v28, 0.0  ;;  %v824_v33 = vmul.f32 0.01, %v744_v28  ;;  %1788 = vmatmul.bf16.gmra.mxu1 %v4987_v29 }
 0x16b   : > { %1166 = vst [vmem:[#allocation4 + $0x38] sm:$0xf] %v1070_v26  ;;  %v4059_v26 = vld [vmem:[%s4856_s13 + $0x88] sm:$0xff]  ;;  %s4031_s13 = sshll.u32 %s4627_s28, 6 }
 0x16c   : > { %v864_v36 = vsel %vm784_vm10, %v744_v28, %v824_v33  ;;  %s3299_s9 = sadd.s32 %s4031_s13, %s4030_s23 }
 0x16d   : > { %v1031_v38 = vsel %vm4976_vm9, %v864_v36, 0.0  ;;  %v618_v39 = vpop.f32.mrf.mxu0  ;;  %s4032_s27 = sshll.u32 %s3299_s9, 2 }
 0x16e   : > { %v1071_v41 = vpack.c.bf16 %v1031_v38, %v1031_v38  ;;  %v701_v42 = vmul.f32 %v4871_v24, %v618_v39  ;;  %v4133_v38 = vld [vmem:[#allocation8 + $0x138] sm:$0xff]  ;;  %s3301_s29 = scalar_lea.hbm %s6130_s7, %s4032_s27 }
 0x16f   : > { %2320 = vmatpush.bf16.msrb.mxu2 %v4133_v38  ;;  %s3304_s14 = sshll.u32 %s3301_s29, 4  ;;  %s3305_s14 = int_to_ptr.hbm [resolvable:$true] %s3304_s14 }
 0x170   : > { %1111 = vst [vmem:[#allocation4 + $0x9c] sm:$0xf] %v1071_v41  ;;  %v745_v44 = vadd.f32 %v4876_v27, %v701_v42  ;;  %657 = vmatmul.bf16.gmra.mxu0 %v4057_v37  ;;  %v3623_v57 = vld [vmem:[#allocation4 + $0x90] sm:$0xf]  ;;  %s4549_s16 = sshra.s32 %s3305_s14, 4  ;;  %s4550_s16 = int_to_ptr.hbm [resolvable:$true] %s4549_s16 }
 0x171   : > { %1139 = vst [vmem:[#allocation4 + $0x70] sm:$0xf] %v1071_v41  ;;  %s4551_s20 = scalar_lea.hbm %s4550_s16, 128  ;;  %p4556_p4 = scmp.lt.s32.totalorder %s4550_s16, %s6130_s7 }
 0x172   : > { %1167 = vst [vmem:[#allocation4 + $0x44] sm:$0xf] %v1071_v41  ;;  %vm785_vm11 = vcmp.ge.f32.partialorder %v745_v44, 0.0  ;;  %v825_v46 = vmul.f32 0.01, %v745_v44  ;;  %p4552_p8 = scmp.ne.s32.totalorder %s4550_s16, %s4551_s20  ;;  %p4557_p5 = scmp.lt.s32.totalorder %s4555_s19, %s4551_s20 }
 0x174   : > { %v865_v49 = vsel %vm785_vm11, %v745_v44, %v825_v46  ;;  %p4553_p13 = pnand %p4552_p8, %p4741_p3  ;;  %p4558_p6 = por %p4557_p5, %p4556_p4 }
 0x175   : > { %v942_v51 = vsel %vm914_vm7, %v865_v49, 0.0  ;;  %v620_v53 = vpop.f32.mrf.mxu0  ;;  %v4132_v49 = vld [vmem:[#allocation8 + $0x130] sm:$0xff] }
 0x176   : > { %v1032_v55 = vsel %vm4976_vm9, %v942_v51, 0.0  ;;  %v903_v51 = vadd.s32 5, %v4879_v30  ;;  %2321 = vmatpush.bf16.msrb.mxu2 %v4132_v49  ;;  %v4165_v49 = vld [vmem:[#allocation8 + $0xb8] sm:$0xff]  ;;  %p4554_p2 = pneg %p4553_p13 }
 0x177   : > { %v1072_v56 = vpack.c.bf16 %v1032_v55, %v1032_v55  ;;  %v4089_v58 = vld [vmem:[#allocation4 + $0x98] sm:$0xf0]  ;;  %1933 = vmatpush.bf16.msra.mxu3 %v4165_v49 }
 0x178   : > { %v5000_v61 = vor.u32 %v4089_v58, %v3623_v57  ;;  %v4098_v57 = vld [vmem:[#allocation4 + $0xe0] sm:$0xf0]  ;;  %vm973_vm2 = vcmp.ge.s32.totalorder %v903_v51, 0  ;;  %vm983_vm4 = vcmp.lt.s32.totalorder %v903_v51, 16  ;;  %v4131_v51 = vld [vmem:[#allocation8 + $0x128] sm:$0xff]  ;;  %p4559_p7 = pnand %p4558_p6, %p4554_p2 }
 0x179   : > { %1112 = vst [vmem:[#allocation4 + $0xa8] sm:$0xf] %v1072_v56  ;;  %vm5046_vm6 = vmand %vm973_vm2, %vm983_vm4 }
 0x17a   : > { %1140 = vst [vmem:[#allocation4 + $0x7c] sm:$0xf] %v1072_v56  ;;  %1793 = vmatmul.bf16.gmra.mxu1 %v5000_v61  ;;  %2322 = vmatpush.bf16.msrb.mxu2 %v4131_v51  ;;  %v4163_v51 = vld [vmem:[#allocation8 + $0xa8] sm:$0xff] }
 0x17b   : > { %1168 = vst [vmem:[#allocation4 + $0x50] sm:$0xf] %v1072_v56  ;;  %v5036_v56 = vor.u32 %v4070_v54, %v3553_v48  ;;  %v3577_v48 = vld [vmem:[#allocation4 + $0x3c] sm:$0xf0] }
 0x17d   : > { %v623_v2 = vpop.f32.mrf.mxu0 }
 0x17e   : > { %v703_v4 = vmul.f32 %v4871_v24, %v623_v2 }
 0x180   : > { %v747_v7 = vadd.f32 %v4876_v27, %v703_v4  ;;  %662 = vmatmul.bf16.gmra.mxu0 %v4058_v1  ;;  %v3635_v15 = vld [vmem:[#allocation4 + $0xa8] sm:$0xf]  ;;  %v3601_v4 = vld [vmem:[#allocation4 + $0x6c] sm:$0xf0] }
 0x181   : > { %v5017_v22 = vor.u32 %v4092_v16, %v3635_v15  ;;  %v4073_v16 = vld [vmem:[#allocation4 + $0x1c] sm:$0xf] }
 0x182   : > { %vm787_vm14 = vcmp.ge.f32.partialorder %v747_v7, 0.0  ;;  %v827_v8 = vmul.f32 0.01, %v747_v7 }
 0x184   : > { %v867_v11 = vsel %vm787_vm14, %v747_v7, %v827_v8 }
 0x185   : > { %v944_v12 = vsel %vm908_vm3, %v867_v11, 0.0  ;;  %v625_v14 = vpop.f32.mrf.mxu0 }
 0x186   : > { %v1034_v17 = vsel %vm5007_vm15, %v944_v12, 0.0  ;;  %v704_v18 = vmul.f32 %v4871_v24, %v625_v14 }
 0x187   : > { %v1074_v19 = vpack.c.bf16 %v1034_v17, %v1034_v17  ;;  %v3565_v17 = vld [vmem:[#allocation4 + $0x24] sm:$0xf0] }
 0x188   : > { %v748_v21 = vadd.f32 %v4876_v27, %v704_v18 }
 0x189   : > { %1114 = vst [vmem:[#allocation4 + $0xc0] sm:$0xf] %v1074_v19 }
 0x18a   : > { %1142 = vst [vmem:[#allocation4 + $0x94] sm:$0xf] %v1074_v19  ;;  %vm788_vm0 = vcmp.ge.f32.partialorder %v748_v21, 0.0  ;;  %v828_v23 = vmul.f32 0.01, %v748_v21  ;;  %1798 = vmatmul.bf16.gmra.mxu1 %v5017_v22 }
 0x18b   : > { %1170 = vst [vmem:[#allocation4 + $0x68] sm:$0xf] %v1074_v19 }
 0x18c   : > { %v868_v25 = vsel %vm788_vm0, %v748_v21, %v828_v23 }
 0x18d   : > { %v1035_v28 = vsel %vm5007_vm15, %v868_v25, 0.0  ;;  %v628_v31 = vpop.f32.mrf.mxu0  ;;  %v5064_v25 = vor.u32 %v4073_v16, %v3565_v17  ;;  %v3661_v16 = vld [vmem:[#allocation4 + $0xe4] sm:$0xf0] }
 0x18e   : > { %v1075_v33 = vpack.c.bf16 %v1035_v28, %v1035_v28  ;;  %v705_v35 = vmul.f32 %v4871_v24, %v628_v31 }
 0x190   : > { %1115 = vst [vmem:[#allocation4 + $0xcc] sm:$0xf] %v1075_v33  ;;  %v749_v36 = vadd.f32 %v4876_v27, %v705_v35  ;;  %667 = vmatmul.bf16.gmra.mxu0 %v4059_v26  ;;  %v3647_v45 = vld [vmem:[#allocation4 + $0xc0] sm:$0xf] }
 0x191   : > { %1143 = vst [vmem:[#allocation4 + $0xa0] sm:$0xf] %v1075_v33 }
 0x192   : > { %1171 = vst [vmem:[#allocation4 + $0x74] sm:$0xf] %v1075_v33  ;;  %vm789_vm1 = vcmp.ge.f32.partialorder %v749_v36, 0.0  ;;  %v829_v37 = vmul.f32 0.01, %v749_v36 }
 0x194   : > { %v869_v39 = vsel %vm789_vm1, %v749_v36, %v829_v37 }
 0x195   : > { %v946_v40 = vsel %vm914_vm7, %v869_v39, 0.0  ;;  %v630_v41 = vpop.f32.mrf.mxu0 }
 0x196   : > { %v1036_v42 = vsel %vm5007_vm15, %v946_v40, 0.0 }
 0x197   : > { %v1076_v43 = vpack.c.bf16 %v1036_v42, %v1036_v42  ;;  %v5029_v44 = vpop.f32.mrf.mxu1  ;;  %v4095_v46 = vld [vmem:[#allocation4 + $0xc8] sm:$0xf0] }
 0x198   : > { %v5031_v47 = vor.u32 %v4095_v46, %v3647_v45 }
 0x199   : > { %1116 = vst [vmem:[#allocation4 + $0xd8] sm:$0xf] %v1076_v43 }
 0x19a   : > { %1144 = vst [vmem:[#allocation4 + $0xac] sm:$0xf] %v1076_v43  ;;  %1803 = vmatmul.bf16.gmra.mxu1 %v5031_v47 }
 0x19b   : > { %1172 = vst [vmem:[#allocation4 + $0x80] sm:$0xf] %v1076_v43 }
 0x19d   : > { %v633_v53 = vpop.f32.mrf.mxu0 }
 0x19e   : > { %v707_v55 = vmul.f32 %v4871_v24, %v633_v53  ;;  %v904_v53 = vadd.s32 6, %v4879_v30 }
 0x19f   : > { %v5038_v58 = vpop.f32.mrf.mxu1 }
 0x1a0   : > { %v751_v62 = vadd.f32 %v4876_v27, %v707_v55  ;;  %1852 = vmatmul.bf16.vlgmr.msrb.gmra.mxu0 %v5036_v56  ;;  %v3659_v63 = vld [vmem:[#allocation4 + $0xd8] sm:$0xf]  ;;  %v4076_v55 = vld [vmem:[#allocation4 + $0x34] sm:$0xf]  ;;  %vm974_vm10 = vcmp.ge.s32.totalorder %v904_v53, 0  ;;  %vm984_vm11 = vcmp.lt.s32.totalorder %v904_v53, 16 }
 0x1a1   : > { %v5042_v0 = vor.u32 %v4098_v57, %v3659_v63  ;;  %v4091_v1 = vld [vmem:[#allocation4 + $0xac] sm:$0xf]  ;;  %v4164_v57 = vld [vmem:[#allocation8 + $0xb0] sm:$0xff]  ;;  %vm5091_vm13 = vmand %vm974_vm10, %vm984_vm11 }
 0x1a2   : > { %vm791_vm5 = vcmp.ge.f32.partialorder %v751_v62, 0.0  ;;  %v831_v2 = vmul.f32 0.01, %v751_v62  ;;  %v5044_v3 = vor.u32 %v4091_v1, %v3637_v59  ;;  %1934 = vmatpush.bf16.msra.mxu3 %v4164_v57  ;;  %v4172_v57 = vld [vmem:[#allocation8 + $0x1b0] sm:$0xff] }
 0x1a3   : > { %1808 = vmatmul.bf16.vlgmr.msrb.gmra.mxu3 %v5042_v0 }
 0x1a4   : > { %v871_v5 = vsel %vm791_vm5, %v751_v62, %v831_v2  ;;  %1887 = vmatmul.bf16.vlgmr.msra.gmra.mxu2 %v5044_v3  ;;  %v5085_v62 = vor.u32 %v4076_v55, %v3577_v48  ;;  %v4173_v48 = vld [vmem:[#allocation8 + $0x1b8] sm:$0xff] }
 0x1a5   : > { %v948_v7 = vsel %vm908_vm3, %v871_v5, 0.0  ;;  %v635_v8 = vpop.f32.mrf.mxu0  ;;  %2691 = vmatpush.bf16.msra.mxu0 %v4173_v48 }
 0x1a6   : > { %v1038_v9 = vsel %vm5046_vm6, %v948_v7, 0.0  ;;  %v708_v10 = vmul.f32 %v4871_v24, %v635_v8  ;;  %1935 = vmatpush.bf16.msra.mxu3 %v4163_v51  ;;  %v4110_v51 = vld [vmem:[#allocation4 + $0x140] sm:$0xf0] }
 0x1a7   : > { %v1078_v11 = vpack.c.bf16 %v1038_v9, %v1038_v9  ;;  %v5057_v12 = vpop.f32.mrf.mxu1 }
 0x1a8   : > { %v752_v14 = vadd.f32 %v4876_v27, %v708_v10  ;;  %v4104_v10 = vld [vmem:[#allocation4 + $0x110] sm:$0xf0] }
 0x1a9   : > { %1118 = vst [vmem:[#allocation4 + $0xf0] sm:$0xf] %v1078_v11  ;;  %2692 = vmatpush.bf16.msra.mxu0 %v4172_v57 }
 0x1aa   : > { %1146 = vst [vmem:[#allocation4 + $0xc4] sm:$0xf] %v1078_v11  ;;  %vm792_vm8 = vcmp.ge.f32.partialorder %v752_v14, 0.0  ;;  %v832_v15 = vmul.f32 0.01, %v752_v14  ;;  %2239 = vmatmul.bf16.vlgmr.msrb.gmra.mxu1 %v4911_v60 }
 0x1ab   : > { %1174 = vst [vmem:[#allocation4 + $0x98] sm:$0xf] %v1078_v11 }
 0x1ac   : > { %v872_v18 = vsel %vm792_vm8, %v752_v14, %v832_v15 }
 0x1ad   : > { %v1039_v19 = vsel %vm5046_vm6, %v872_v18, 0.0  ;;  %v638_v20 = vpop.f32.mrf.mxu0 }
 0x1ae   : > { %v1079_v21 = vpack.c.bf16 %v1039_v19, %v1039_v19  ;;  %v709_v23 = vmul.f32 %v4871_v24, %v638_v20 }
 0x1af   : > { %v5066_v26 = vpop.f32.mrf.mxu1 }
 0x1b0   : > { %1119 = vst [vmem:[#allocation4 + $0xfc] sm:$0xf] %v1079_v21  ;;  %v753_v28 = vadd.f32 %v4876_v27, %v709_v23  ;;  %1857 = vmatmul.bf16.gmra.mxu0 %v5064_v25  ;;  %v3671_v40 = vld [vmem:[#allocation4 + $0xf0] sm:$0xf]  ;;  %v3589_v23 = vld [vmem:[#allocation4 + $0x54] sm:$0xf0] }
 0x1b1   : > { %1147 = vst [vmem:[#allocation4 + $0xd0] sm:$0xf] %v1079_v21  ;;  %v4094_v43 = vld [vmem:[#allocation4 + $0xc4] sm:$0xf] }
 0x1b2   : > { %1175 = vst [vmem:[#allocation4 + $0xa4] sm:$0xf] %v1079_v21  ;;  %vm793_vm9 = vcmp.ge.f32.partialorder %v753_v28, 0.0  ;;  %v833_v31 = vmul.f32 0.01, %v753_v28 }
 0x1b4   : > { %v873_v33 = vsel %vm793_vm9, %v753_v28, %v833_v31  ;;  %v4079_v31 = vld [vmem:[#allocation4 + $0x4c] sm:$0xf] }
 0x1b5   : > { %v950_v35 = vsel %vm914_vm7, %v873_v33, 0.0  ;;  %v640_v36 = vpop.f32.mrf.mxu0  ;;  %v4130_v33 = vld [vmem:[#allocation8 + $0x120] sm:$0xff] }
 0x1b6   : > { %v1040_v37 = vsel %vm5046_vm6, %v950_v35, 0.0  ;;  %2323 = vmatpush.bf16.msrb.mxu2 %v4130_v33 }
 0x1b7   : > { %v1080_v38 = vpack.c.bf16 %v1040_v37, %v1040_v37  ;;  %v5074_v39 = vpop.f32.mrf.mxu1  ;;  %v4101_v41 = vld [vmem:[#allocation4 + $0xf8] sm:$0xf0] }
 0x1b8   : > { %v5076_v42 = vor.u32 %v4101_v41, %v3671_v40  ;;  %v3649_v45 = vld [vmem:[#allocation4 + $0xcc] sm:$0xf0]  ;;  %v5113_v41 = vor.u32 %v4079_v31, %v3589_v23  ;;  %v4082_v23 = vld [vmem:[#allocation4 + $0x64] sm:$0xf] }
 0x1b9   : > { %1120 = vst [vmem:[#allocation4 + $0x108] sm:$0xf] %v1080_v38  ;;  %v5078_v46 = vor.u32 %v4094_v43, %v3649_v45  ;;  %v5134_v33 = vor.u32 %v4082_v23, %v3601_v4  ;;  %v4085_v23 = vld [vmem:[#allocation4 + $0x7c] sm:$0xf] }
 0x1ba   : > { %1148 = vst [vmem:[#allocation4 + $0xdc] sm:$0xf] %v1080_v38  ;;  %1813 = vmatmul.bf16.gmra.mxu3 %v5076_v42  ;;  %2244 = vmatmul.bf16.gmra.mxu1 %v4928_v13 }
 0x1bb   : > { %1176 = vst [vmem:[#allocation4 + $0xb0] sm:$0xf] %v1080_v38  ;;  %1892 = vmatmul.bf16.gmra.mxu2 %v5078_v46 }
 0x1bd   : > { %v643_v54 = vpop.f32.mrf.mxu0 }
 0x1be   : > { %v711_v59 = vmul.f32 %v4871_v24, %v643_v54 }
 0x1bf   : > { %v5087_v63 = vpop.f32.mrf.mxu1 }
 0x1c0   : > { %v755_v1 = vadd.f32 %v4876_v27, %v711_v59  ;;  %1862 = vmatmul.bf16.gmra.mxu0 %v5085_v62  ;;  %v3683_v9 = vld [vmem:[#allocation4 + $0x108] sm:$0xf] }
 0x1c1   : > { %v4097_v15 = vld [vmem:[#allocation4 + $0xdc] sm:$0xf]  ;;  %v5103_v20 = vor.u32 %v4104_v10, %v3683_v9 }
 0x1c2   : > { %vm795_vm12 = vcmp.ge.f32.partialorder %v755_v1, 0.0  ;;  %v835_v2 = vmul.f32 0.01, %v755_v1  ;;  %v5105_v21 = vor.u32 %v4097_v15, %v3661_v16  ;;  %v4129_v15 = vld [vmem:[#allocation8 + $0x118] sm:$0xff]  ;;  %v4162_v16 = vld [vmem:[#allocation8 + $0xa0] sm:$0xff] }
 0x1c3   : > { %2324 = vmatpush.bf16.msrb.mxu2 %v4129_v15  ;;  %1936 = vmatpush.bf16.msra.mxu3 %v4162_v16  ;;  %v3613_v15 = vld [vmem:[#allocation4 + $0x84] sm:$0xf0] }
 0x1c4   : > { %v875_v5 = vsel %vm795_vm12, %v755_v1, %v835_v2  ;;  %v4167_v16 = vld [vmem:[#allocation8 + $0x188] sm:$0xff] }
 0x1c5   : > { %v952_v7 = vsel %vm908_vm3, %v875_v5, 0.0  ;;  %v645_v8 = vpop.f32.mrf.mxu0 }
 0x1c6   : > { %v1042_v11 = vsel %vm5091_vm13, %v952_v7, 0.0  ;;  %v712_v14 = vmul.f32 %v4871_v24, %v645_v8 }
 0x1c7   : > { %v1082_v17 = vpack.c.bf16 %v1042_v11, %v1042_v11  ;;  %v5100_v18 = vpop.f32.mrf.mxu1 }
 0x1c8   : > { %v756_v19 = vadd.f32 %v4876_v27, %v712_v14  ;;  %v4171_v14 = vld [vmem:[#allocation8 + $0x1a8] sm:$0xff] }
 0x1c9   : > { %1122 = vst [vmem:[#allocation4 + $0x120] sm:$0xf] %v1082_v17  ;;  %2693 = vmatpush.bf16.msra.mxu0 %v4171_v14  ;;  %v673_v14 = vpop.f32.mrf.mxu3 }
 0x1ca   : > { %1150 = vst [vmem:[#allocation4 + $0xf4] sm:$0xf] %v1082_v17  ;;  %vm796_vm14 = vcmp.ge.f32.partialorder %v756_v19, 0.0  ;;  %v836_v28 = vmul.f32 0.01, %v756_v19  ;;  %1818 = vmatmul.bf16.gmra.mxu3 %v5103_v20  ;;  %2249 = vmatmul.bf16.gmra.mxu1 %v4940_v34 }
 0x1cb   : > { %1178 = vst [vmem:[#allocation4 + $0xc8] sm:$0xf] %v1082_v17  ;;  %1897 = vmatmul.bf16.gmra.mxu2 %v5105_v21  ;;  %v905_v17 = vadd.s32 7, %v4879_v30 }
 0x1cc   : > { %v876_v35 = vsel %vm796_vm14, %v756_v19, %v836_v28  ;;  %v4170_v28 = vld [vmem:[#allocation8 + $0x1a0] sm:$0xff] }
 0x1cd   : > { %v1043_v36 = vsel %vm5091_vm13, %v876_v35, 0.0  ;;  %v648_v37 = vpop.f32.mrf.mxu0  ;;  %2694 = vmatpush.bf16.msra.mxu0 %v4170_v28  ;;  %vm975_vm0 = vcmp.ge.s32.totalorder %v905_v17, 0  ;;  %vm985_vm1 = vcmp.lt.s32.totalorder %v905_v17, 16  ;;  %v4161_v28 = vld [vmem:[#allocation8 + $0x98] sm:$0xff] }
 0x1ce   : > { %v1083_v38 = vpack.c.bf16 %v1043_v36, %v1043_v36  ;;  %v713_v40 = vmul.f32 %v4871_v24, %v648_v37  ;;  %v4169_v37 = vld [vmem:[#allocation8 + $0x198] sm:$0xff]  ;;  %vm5140_vm4 = vmand %vm975_vm0, %vm985_vm1  ;;  %1937 = vmatpush.bf16.msra.mxu3 %v4161_v28 }
 0x1cf   : > { %v5115_v43 = vpop.f32.mrf.mxu1 }
 0x1d0   : > { %1123 = vst [vmem:[#allocation4 + $0x12c] sm:$0xf] %v1083_v38  ;;  %v757_v45 = vadd.f32 %v4876_v27, %v713_v40  ;;  %1867 = vmatmul.bf16.gmra.mxu0 %v5113_v41  ;;  %v3695_v5 = vld [vmem:[#allocation4 + $0x120] sm:$0xf] }
 0x1d1   : > { %1151 = vst [vmem:[#allocation4 + $0x100] sm:$0xf] %v1083_v38  ;;  %v4100_v9 = vld [vmem:[#allocation4 + $0xf4] sm:$0xf]  ;;  %2695 = vmatpush.bf16.msra.mxu0 %v4169_v37 }
 0x1d2   : > { %1179 = vst [vmem:[#allocation4 + $0xd4] sm:$0xf] %v1083_v38  ;;  %vm797_vm15 = vcmp.ge.f32.partialorder %v757_v45, 0.0  ;;  %v837_v49 = vmul.f32 0.01, %v757_v45 }
 0x1d4   : > { %v877_v53 = vsel %vm797_vm15, %v757_v45, %v837_v49 }
 0x1d5   : > { %v954_v54 = vsel %vm914_vm7, %v877_v53, 0.0  ;;  %v650_v55 = vpop.f32.mrf.mxu0 }
 0x1d6   : > { %v1044_v59 = vsel %vm5091_vm13, %v954_v54, 0.0  ;;  %v5151_v54 = vld [vmem:[%s6125_s2] ss:$0 sm:$0xff] }
 0x1d7   : > { %v1084_v1 = vpack.c.bf16 %v1044_v59, %v1044_v59  ;;  %v5123_v2 = vpop.f32.mrf.mxu1  ;;  %v4107_v7 = vld [vmem:[#allocation4 + $0x128] sm:$0xf0]  ;;  %v3685_v59 = vld [vmem:[#allocation4 + $0x114] sm:$0xf0] }
 0x1d8   : > { %v5125_v8 = vor.u32 %v4107_v7, %v3695_v5  ;;  %v3673_v10 = vld [vmem:[#allocation4 + $0xfc] sm:$0xf0] }
 0x1d9   : > { %1124 = vst [vmem:[#allocation4 + $0x138] sm:$0xf] %v1084_v1  ;;  %v5127_v11 = vor.u32 %v4100_v9, %v3673_v10  ;;  %v5159_v7 = vld [vmem:[%s6126_s3] ss:$0 sm:$0xff] }
 0x1da   : > { %1152 = vst [vmem:[#allocation4 + $0x10c] sm:$0xf] %v1084_v1  ;;  %1823 = vmatmul.bf16.gmra.mxu3 %v5125_v8  ;;  %2254 = vmatmul.bf16.gmra.mxu1 %v4957_v52 }
 0x1db   : > { %1180 = vst [vmem:[#allocation4 + $0xe0] sm:$0xf] %v1084_v1  ;;  %1902 = vmatmul.bf16.gmra.mxu2 %v5127_v11 }
 0x1dd   : > { %v653_v19 = vpop.f32.mrf.mxu0 }
 0x1de   : > { %v715_v31 = vmul.f32 %v4871_v24, %v653_v19  ;;  %v4128_v19 = vld [vmem:[#allocation8 + $0x110] sm:$0xff] }
 0x1df   : > { %v5136_v35 = vpop.f32.mrf.mxu1  ;;  %2325 = vmatpush.bf16.msrb.mxu2 %v4128_v19 }
 0x1e0   : > { %v759_v36 = vadd.f32 %v4876_v27, %v715_v31  ;;  %1872 = vmatmul.bf16.gmra.mxu0 %v5134_v33  ;;  %v3707_v49 = vld [vmem:[#allocation4 + $0x138] sm:$0xf]  ;;  %v4168_v27 = vld [vmem:[#allocation8 + $0x190] sm:$0xff] }
 0x1e1   : > { %v4103_v57 = vld [vmem:[#allocation4 + $0x10c] sm:$0xf]  ;;  %2696 = vmatpush.bf16.msra.mxu0 %v4168_v27  ;;  %v5162_v10 = vor.u32 %v4110_v51, %v3707_v49  ;;  %v4160_v51 = vld [vmem:[#allocation8 + $0x90] sm:$0xff] }
 0x1e2   : > { %vm799_vm2 = vcmp.ge.f32.partialorder %v759_v36, 0.0  ;;  %v839_v38 = vmul.f32 0.01, %v759_v36  ;;  %v5164_v4 = vor.u32 %v4103_v57, %v3685_v59  ;;  %v907_v57 = vadd.s32 9, %v4879_v30  ;;  %1938 = vmatpush.bf16.msra.mxu3 %v4160_v51 }
 0x1e4   : > { %v879_v24 = vsel %vm799_vm2, %v759_v36, %v839_v38  ;;  %v4166_v38 = vld [vmem:[#allocation8 + $0x180] sm:$0xff]  ;;  %vm977_vm8 = vcmp.ge.s32.totalorder %v907_v57, 0  ;;  %vm987_vm9 = vcmp.lt.s32.totalorder %v907_v57, 16 }
 0x1e5   : > { %v956_v45 = vsel %vm908_vm3, %v879_v24, 0.0  ;;  %v655_v48 = vpop.f32.mrf.mxu0  ;;  %2697 = vmatpush.bf16.msra.mxu0 %v4167_v16  ;;  %vm5185_vm11 = vmand %vm977_vm8, %vm987_vm9 }
 0x1e6   : > { %v1046_v53 = vsel %vm5140_vm4, %v956_v45, 0.0  ;;  %v716_v55 = vmul.f32 %v5151_v54, %v655_v48  ;;  %v5172_v48 = vor.u32 %v4085_v23, %v3613_v15 }
 0x1e7   : > { %v1086_v1 = vpack.c.bf16 %v1046_v53, %v1046_v53  ;;  %v5154_v5 = vpop.f32.mrf.mxu1  ;;  %v675_v53 = vpop.f32.mrf.mxu3 }
 0x1e8   : > { %v760_v9 = vadd.f32 %v5159_v7, %v716_v55  ;;  %v723_v55 = vmul.f32 %v5151_v54, %v673_v14 }
 0x1e9   : > { %1126 = vst [vmem:[#allocation4 + $0x150] sm:$0xf] %v1086_v1  ;;  %2698 = vmatpush.bf16.msra.mxu0 %v4166_v38 }
 0x1ea   : > { %1154 = vst [vmem:[#allocation4 + $0x124] sm:$0xf] %v1086_v1  ;;  %vm800_vm5 = vcmp.ge.f32.partialorder %v760_v9, 0.0  ;;  %v840_v17 = vmul.f32 0.01, %v760_v9  ;;  %1828 = vmatmul.bf16.gmra.mxu3 %v5162_v10  ;;  %2259 = vmatmul.bf16.gmra.mxu1 %v4969_v6 }
 0x1eb   : > { %1182 = vst [vmem:[#allocation4 + $0xf8] sm:$0xf] %v1086_v1  ;;  %1907 = vmatmul.bf16.gmra.mxu2 %v5164_v4  ;;  %v767_v1 = vadd.f32 %v5159_v7, %v723_v55 }
 0x1ec   : > { %v880_v31 = vsel %vm800_vm5, %v760_v9, %v840_v17  ;;  %v4159_v9 = vld [vmem:[#allocation8 + $0x88] sm:$0xff] }
 0x1ed   : > { %v1047_v36 = vsel %vm5140_vm4, %v880_v31, 0.0  ;;  %v658_v37 = vpop.f32.mrf.mxu0  ;;  %vm807_vm10 = vcmp.ge.f32.partialorder %v767_v1, 0.0  ;;  %v847_v19 = vmul.f32 0.01, %v767_v1  ;;  %1939 = vmatpush.bf16.msra.mxu3 %v4159_v9 }
 0x1ee   : > { %v1087_v24 = vpack.c.bf16 %v1047_v36, %v1047_v36  ;;  %v717_v45 = vmul.f32 %v5151_v54, %v658_v37 }
 0x1ef   : > { %v5174_v49 = vpop.f32.mrf.mxu1  ;;  %v887_v38 = vsel %vm807_vm10, %v767_v1, %v847_v19  ;;  %v678_v40 = vpop.f32.mrf.mxu3  ;;  %v3625_v1 = vld [vmem:[#allocation4 + $0x9c] sm:$0xf0]  ;;  %v906_v19 = vadd.s32 8, %v4879_v30 }
 0x1f0   : > { %6205 = vst [vmem:[#allocation27_spill] sm:$0xff] %v5174_v49  ;;  %v761_v27 = vadd.f32 %v5159_v7, %v717_v45  ;;  %1877 = vmatmul.bf16.gmra.mxu0 %v5172_v48  ;;  %v3719_v36 = vld [vmem:[#allocation4 + $0x150] sm:$0xf]  ;;  %v964_v55 = vsel %vm908_vm3, %v887_v38, 0.0 }
 0x1f1   : > { %1127 = vst [vmem:[#allocation4 + $0x15c] sm:$0xf] %v1087_v24  ;;  %v4106_v51 = vld [vmem:[#allocation4 + $0x124] sm:$0xf]  ;;  %vm976_vm14 = vcmp.ge.s32.totalorder %v906_v19, 0  ;;  %vm986_vm15 = vcmp.lt.s32.totalorder %v906_v19, 16 }
 0x1f2   : > { %1155 = vst [vmem:[#allocation4 + $0x130] sm:$0xf] %v1087_v24  ;;  %vm801_vm6 = vcmp.ge.f32.partialorder %v761_v27, 0.0  ;;  %v841_v59 = vmul.f32 0.01, %v761_v27  ;;  %vm5216_vm1 = vmand %vm976_vm14, %vm986_vm15 }
 0x1f3   : > { %1183 = vst [vmem:[#allocation4 + $0x104] sm:$0xf] %v1087_v24  ;;  %v4158_v24 = vld [vmem:[#allocation8 + $0x80] sm:$0xff] }
 0x1f4   : > { %v881_v15 = vsel %vm801_vm6, %v761_v27, %v841_v59  ;;  %v1054_v59 = vsel %vm5185_vm11, %v964_v55, 0.0  ;;  %1940 = vmatpush.bf16.msra.mxu3 %v4158_v24 }
 0x1f5   : > { %v958_v16 = vsel %vm914_vm7, %v881_v15, 0.0  ;;  %v660_v17 = vpop.f32.mrf.mxu0  ;;  %v1094_v9 = vpack.c.bf16 %v1054_v59, %v1054_v59  ;;  %v724_v15 = vmul.f32 %v5151_v54, %v675_v53 }
 0x1f6   : > { %v1048_v14 = vsel %vm5140_vm4, %v958_v16, 0.0  ;;  %v725_v16 = vmul.f32 %v5151_v54, %v678_v40  ;;  %v4127_v17 = vld [vmem:[#allocation8 + $0x108] sm:$0xff]  ;;  %vm2990_vm4 = vcmp.lt.s32.totalorder %v4882_v32, 7 }
 0x1f7   : > { %v1088_v28 = vpack.c.bf16 %v1048_v14, %v1048_v14  ;;  %v5189_v31 = vpop.f32.mrf.mxu1  ;;  %v4088_v14 = vld [vmem:[#allocation4 + $0x94] sm:$0xf]  ;;  %1190 = vst [vmem:[#allocation4 + $0x158] sm:$0xf] %v1094_v9  ;;  %2326 = vmatpush.bf16.msrb.mxu2 %v4127_v17  ;;  %v680_v40 = vpop.f32.mrf.mxu3 }
 0x1f8   : > { %6208 = vst [vmem:[#allocation28_spill] sm:$0xff] %v5189_v31  ;;  %v4113_v37 = vld [vmem:[#allocation4 + $0x158] sm:$0xf0]  ;;  %v5207_v24 = vor.u32 %v4088_v14, %v3625_v1 }
 0x1f9   : > { %v5191_v45 = vor.u32 %v4113_v37, %v3719_v36  ;;  %v3697_v27 = vld [vmem:[#allocation4 + $0x12c] sm:$0xf0]  ;;  %1128 = vst [vmem:[#allocation4 + $0x168] sm:$0xf] %v1088_v28  ;;  %v768_v36 = vadd.f32 %v5159_v7, %v724_v15  ;;  %v769_v37 = vadd.f32 %v5159_v7, %v725_v16 }
 0x1fa   : > { %v5195_v57 = vor.u32 %v4106_v51, %v3697_v27  ;;  %1156 = vst [vmem:[#allocation4 + $0x13c] sm:$0xf] %v1088_v28  ;;  %2264 = vmatmul.bf16.gmra.mxu1 %v4987_v29 }
 0x1fb   : > { %1833 = vmatmul.bf16.gmra.mxu3 %v5191_v45  ;;  %1184 = vst [vmem:[#allocation4 + $0x110] sm:$0xf] %v1088_v28  ;;  %vm808_vm12 = vcmp.ge.f32.partialorder %v768_v36, 0.0  ;;  %v848_v51 = vmul.f32 0.01, %v768_v36  ;;  %vm809_vm13 = vcmp.ge.f32.partialorder %v769_v37, 0.0 }
 0x1fc   : > { %6209 = vst [vmem:[#allocation29_spill] sm:$0xff] %v5195_v57  ;;  %1912 = vmatmul.bf16.gmra.mxu2 %v5195_v57  ;;  %v849_v27 = vmul.f32 0.01, %v769_v37 }
 0x1fd   : > { %v663_v38 = vpop.f32.mrf.mxu0  ;;  %v888_v55 = vsel %vm808_vm12, %v768_v36, %v848_v51 }
 0x1fe   : > { %v719_v53 = vmul.f32 %v5151_v54, %v663_v38  ;;  %v1055_v59 = vsel %vm5185_vm11, %v888_v55, 0.0  ;;  %v889_v1 = vsel %vm809_vm13, %v769_v37, %v849_v27 }
 0x1ff   : > { %v5210_v28 = vpop.f32.mrf.mxu1  ;;  %v1095_v15 = vpack.c.bf16 %v1055_v59, %v1055_v59  ;;  %v966_v17 = vsel %vm914_vm7, %v889_v1, 0.0  ;;  %v3709_v59 = vld [vmem:[#allocation4 + $0x144] sm:$0xf0] }
 0x200   : > { %6210 = vst [vmem:[#allocation30_spill] sm:$0xff] %v5210_v28  ;;  %v763_v30 = vadd.f32 %v5159_v7, %v719_v53  ;;  %1882 = vmatmul.bf16.gmra.mxu0 %v5207_v24  ;;  %v1056_v19 = vsel %vm5185_vm11, %v966_v17, 0.0  ;;  %v3731_v37 = vld [vmem:[#allocation4 + $0x168] sm:$0xf]  ;;  %v4116_v53 = vld [vmem:[#allocation4 + $0x170] sm:$0xf0] }
 0x201   : > { %1191 = vst [vmem:[#allocation4 + $0x164] sm:$0xf] %v1095_v15  ;;  %v1096_v51 = vpack.c.bf16 %v1056_v19, %v1056_v19  ;;  %v4109_v40 = vld [vmem:[#allocation4 + $0x13c] sm:$0xf]  ;;  %v4126_v15 = vld [vmem:[#allocation8 + $0x100] sm:$0xff] }
 0x202   : > { %vm803_vm0 = vcmp.ge.f32.partialorder %v763_v30, 0.0  ;;  %v843_v9 = vmul.f32 0.01, %v763_v30  ;;  %v5232_v17 = vor.u32 %v4109_v40, %v3709_v59  ;;  %2327 = vmatpush.bf16.msrb.mxu2 %v4126_v15 }
 0x203   : > { %1192 = vst [vmem:[#allocation4 + $0x170] sm:$0xf] %v1096_v51 }
 0x204   : > { %v883_v14 = vsel %vm803_vm0, %v763_v30, %v843_v9  ;;  %v5230_v9 = vor.u32 %v4116_v53, %v3731_v37  ;;  %6213 = vst [vmem:[#allocation31_spill] sm:$0xff] %v5232_v17 }
 0x205   : > { %v960_v36 = vsel %vm908_vm3, %v883_v14, 0.0  ;;  %v665_v38 = vpop.f32.mrf.mxu0 }
 0x206   : > { %v1050_v27 = vsel %vm5216_vm1, %v960_v36, 0.0  ;;  %v720_v55 = vmul.f32 %v5151_v54, %v665_v38  ;;  %2869 = vmatpush.bf16.msra.mxu2 %v4189_v50 }
 0x207   : > { %v1090_v1 = vpack.c.bf16 %v1050_v27, %v1050_v27  ;;  %v1799_v30 = vpop.f32.mrf.mxu1 }
 0x208   : > { %v764_v23 = vadd.f32 %v5159_v7, %v720_v55 }
 0x209   : > { %1158 = vst [vmem:[#allocation4 + $0x154] sm:$0xf] %v1090_v1 }
 0x20a   : > { %1186 = vst [vmem:[#allocation4 + $0x128] sm:$0xf] %v1090_v1  ;;  %vm804_vm3 = vcmp.ge.f32.partialorder %v764_v23, 0.0  ;;  %v844_v14 = vmul.f32 0.01, %v764_v23  ;;  %2269 = vmatmul.bf16.gmra.mxu1 %v5000_v61 }
 0x20b   : > { %1838 = vmatmul.bf16.gmra.mxu3 %v5230_v9 }
 0x20c   : > { %1917 = vmatmul.bf16.gmra.mxu2 %v5232_v17  ;;  %v884_v19 = vsel %vm804_vm3, %v764_v23, %v844_v14  ;;  %v4072_v23 = vld [vmem:[#allocation4 + $0x10] sm:$0xf0] }
 0x20d   : > { %v1051_v36 = vsel %vm5216_vm1, %v884_v19, 0.0  ;;  %v668_v38 = vpop.f32.mrf.mxu0 }
 0x20e   : > { %v1091_v37 = vpack.c.bf16 %v1051_v36, %v1051_v36  ;;  %v721_v53 = vmul.f32 %v5151_v54, %v668_v38  ;;  %v3559_v38 = vld [vmem:[#allocation4 + $0x8] sm:$0xf] }
 0x20f   : > { %v1801_v51 = vpop.f32.mrf.mxu1 }
 0x210   : > { %1159 = vst [vmem:[#allocation4 + $0x160] sm:$0xf] %v1091_v37  ;;  %v765_v27 = vadd.f32 %v5159_v7, %v721_v53  ;;  %2699 = vmatmul.bf16.vlgmr.msra.gmra.mxu0 %v4911_v60  ;;  %v4112_v19 = vld [vmem:[#allocation4 + $0x154] sm:$0xf]  ;;  %v5248_v60 = vor.u32 %v4072_v23, %v3559_v38  ;;  %v4181_v53 = vld [vmem:[#allocation8 + $0x1f8] sm:$0xff] }
 0x211   : > { %1187 = vst [vmem:[#allocation4 + $0x134] sm:$0xf] %v1091_v37  ;;  %v4141_v37 = vld [vmem:[#allocation8 + $0x178] sm:$0xff]  ;;  %2780 = vmatpush.bf16.msra.mxu1 %v4181_v53  ;;  %v4078_v53 = vld [vmem:[#allocation4 + $0x40] sm:$0xf0] }
 0x212   : > { %vm805_vm2 = vcmp.ge.f32.partialorder %v765_v27, 0.0  ;;  %v845_v55 = vmul.f32 0.01, %v765_v27  ;;  %6215 = vst [vmem:[#allocation33_spill] sm:$0xff] %v5248_v60  ;;  %2409 = vmatpush.bf16.msrb.mxu3 %v4141_v37 }
 0x214   : > { %v885_v40 = vsel %vm805_vm2, %v765_v27, %v845_v55  ;;  %v3571_v27 = vld [vmem:[#allocation4 + $0x20] sm:$0xf]  ;;  %v4075_v55 = vld [vmem:[#allocation4 + $0x28] sm:$0xf0] }
 0x215   : > { %v962_v59 = vsel %vm914_vm7, %v885_v40, 0.0  ;;  %v670_v1 = vpop.f32.mrf.mxu0  ;;  %vm2054_vm7 = vcmp.lt.s32.totalorder %v4882_v32, 1 }
 0x216   : > { %v1052_v15 = vsel %vm5216_vm1, %v962_v59, 0.0  ;;  %v3733_v59 = vld [vmem:[#allocation4 + $0x174] sm:$0xf0] }
 0x217   : > { %v1092_v14 = vpack.c.bf16 %v1052_v15, %v1052_v15  ;;  %v1804_v54 = vpop.f32.mrf.mxu1  ;;  %v3721_v36 = vld [vmem:[#allocation4 + $0x15c] sm:$0xf0] }
 0x218   : > { %v5246_v7 = vor.u32 %v4112_v19, %v3721_v36 }
 0x219   : > { %1160 = vst [vmem:[#allocation4 + $0x16c] sm:$0xf] %v1092_v14 }
 0x21a   : > { %6214 = vst [vmem:[#allocation32_spill] sm:$0xff] %v5246_v7  ;;  %2274 = vmatmul.bf16.gmra.mxu1 %v5017_v22 }
 0x21b   : > { %1188 = vst [vmem:[#allocation4 + $0x140] sm:$0xf] %v1092_v14  ;;  %1941 = vmatmul.bf16.vlgmr.msra.gmra.mxu3 %v5248_v60  ;;  %v5258_v14 = vor.u32 %v4075_v55, %v3571_v27  ;;  %v3583_v55 = vld [vmem:[#allocation4 + $0x38] sm:$0xf] }
 0x21c   : > { %1922 = vmatmul.bf16.gmra.mxu2 %v5246_v7  ;;  %v4081_v7 = vld [vmem:[#allocation4 + $0x58] sm:$0xf0] }
 0x21d   : > { %6218 = vst [vmem:[#allocation36_spill] sm:$0xff] %v5258_v14  ;;  %v5265_v36 = vpop.f32.mrf.mxu0 }
 0x21f   : > { %v1806_v16 = vpop.f32.mrf.mxu1 }
 0x220   : > { %2704 = vmatmul.bf16.gmra.mxu0 %v4928_v13  ;;  %v4115_v40 = vld [vmem:[#allocation4 + $0x16c] sm:$0xf] }
 0x221   : > { %v5260_v19 = vor.u32 %v4115_v40, %v3733_v59  ;;  %v5276_v59 = vor.u32 %v4078_v53, %v3583_v55 }
 0x223   : > { %6219 = vst [vmem:[#allocation37_spill] sm:$0xff] %v5260_v19 }
 0x224   : > { %6221 = vst [vmem:[#allocation39_spill] sm:$0xff] %v5276_v59 }
 0x225   : > { %v5274_v40 = vpop.f32.mrf.mxu0 }
 0x226   : > { %v1809_v13 = vpop.f32.mrf.mxu3 }
 0x227   : > { %v1888_v1 = vpop.f32.mrf.mxu2  ;;  %v5254_v23 = vpop.f32.mrf.mxu1 }
 0x228   : > { %6216 = vst [vmem:[#allocation34_spill] sm:$0xff] %v5254_v23  ;;  %v5256_v15 = vadd.f32 %v1888_v1, %v1799_v30  ;;  %v4188_v1 = vld [vmem:[#allocation8 + $0x230] sm:$0xff] }
 0x229   : > { %2870 = vmatpush.bf16.msra.mxu2 %v4188_v1 }
 0x22a   : > { %6217 = vst [vmem:[#allocation35_spill] sm:$0xff] %v5256_v15  ;;  %2279 = vmatmul.bf16.gmra.mxu1 %v5031_v47  ;;  %v3607_v15 = vld [vmem:[#allocation4 + $0x68] sm:$0xf] }
 0x22b   : > { %1946 = vmatmul.bf16.gmra.mxu3 %v5258_v14  ;;  %v4180_v14 = vld [vmem:[#allocation8 + $0x1f0] sm:$0xff] }
 0x22c   : > { %1927 = vmatmul.bf16.gmra.mxu2 %v5260_v19  ;;  %v4140_v19 = vld [vmem:[#allocation8 + $0x170] sm:$0xff]  ;;  %2781 = vmatpush.bf16.msra.mxu1 %v4180_v14 }
 0x22d   : > { %2410 = vmatpush.bf16.msrb.mxu3 %v4140_v19  ;;  %v5286_v53 = vpop.f32.mrf.mxu0 }
 0x22e   : > { %v1811_v30 = vpop.f32.mrf.mxu3 }
 0x22f   : > { %v1890_v38 = vpop.f32.mrf.mxu2  ;;  %v5267_v50 = vpop.f32.mrf.mxu1 }
 0x230   : > { %v5269_v37 = vadd.f32 %v1890_v38, %v1801_v51  ;;  %2709 = vmatmul.bf16.gmra.mxu0 %v4940_v34 }
 0x232   : > { %6220 = vst [vmem:[#allocation38_spill] sm:$0xff] %v5269_v37 }
 0x237   : > { %v5272_v27 = vpop.f32.mrf.mxu1 }
 0x23a   : > { %2284 = vmatmul.bf16.gmra.mxu1 %v5042_v0 }
 0x23b   : > { %1951 = vmatmul.bf16.gmra.mxu3 %v5276_v59  ;;  %v3595_v59 = vld [vmem:[#allocation4 + $0x50] sm:$0xf] }
 0x23c   : > { %2328 = vmatmul.bf16.vlgmr.msrb.gmra.mxu2 %v5036_v56 }
 0x23d   : > { %v1814_v51 = vpop.f32.mrf.mxu3 }
 0x23e   : > { %v1893_v38 = vpop.f32.mrf.mxu2 }
 0x23f   : > { %v5281_v34 = vadd.f32 %v1893_v38, %v1804_v54  ;;  %v5283_v23 = vpop.f32.mrf.mxu1  ;;  %v5292_v54 = vor.u32 %v4081_v7, %v3595_v59 }
 0x240   : > { %2714 = vmatmul.bf16.gmra.mxu0 %v4957_v52  ;;  %v5297_v52 = vpop.f32.mrf.mxu0 }
 0x241   : > { %6222 = vst [vmem:[#allocation40_spill] sm:$0xff] %v5281_v34 }
 0x242   : > { %6224 = vst [vmem:[#allocation42_spill] sm:$0xff] %v5292_v54 }
 0x245   : > { %v1816_v55 = vpop.f32.mrf.mxu3 }
 0x246   : > { %v1895_v60 = vpop.f32.mrf.mxu2 }
 0x247   : > { %v5288_v37 = vadd.f32 %v1895_v60, %v1806_v16  ;;  %v5290_v1 = vpop.f32.mrf.mxu1  ;;  %v4084_v16 = vld [vmem:[#allocation4 + $0x70] sm:$0xf0] }
 0x248   : > { %v5304_v7 = vpop.f32.mrf.mxu0  ;;  %v5310_v17 = vor.u32 %v4084_v16, %v3607_v15  ;;  %v3619_v16 = vld [vmem:[#allocation4 + $0x80] sm:$0xf] }
 0x249   : > { %6223 = vst [vmem:[#allocation41_spill] sm:$0xff] %v5288_v37 }
 0x24a   : > { %2289 = vmatmul.bf16.gmra.mxu1 %v5076_v42  ;;  %6228 = vst [vmem:[#allocation46_spill] sm:$0xff] %v5310_v17 }
 0x24b   : > { %1956 = vmatmul.bf16.gmra.mxu3 %v5292_v54 }
 0x24c   : > { %2333 = vmatmul.bf16.gmra.mxu2 %v5064_v25 }
 0x24d   : > { %v1819_v14 = vpop.f32.mrf.mxu3 }
 0x24e   : > { %v1898_v19 = vpop.f32.mrf.mxu2 }
 0x24f   : > { %v5299_v38 = vadd.f32 %v1898_v19, %v1809_v13  ;;  %v5301_v34 = vpop.f32.mrf.mxu1  ;;  %v4187_v13 = vld [vmem:[#allocation8 + $0x228] sm:$0xff] }
 0x250   : > { %2719 = vmatmul.bf16.gmra.mxu0 %v4969_v6  ;;  %2871 = vmatpush.bf16.msra.mxu2 %v4187_v13 }
 0x251   : > { %6225 = vst [vmem:[#allocation43_spill] sm:$0xff] %v5299_v38 }
 0x255   : > { %v1821_v60 = vpop.f32.mrf.mxu3 }
 0x256   : > { %v1900_v59 = vpop.f32.mrf.mxu2 }
 0x257   : > { %v5306_v54 = vadd.f32 %v1900_v59, %v1811_v30  ;;  %v5308_v37 = vpop.f32.mrf.mxu1  ;;  %v4139_v30 = vld [vmem:[#allocation8 + $0x168] sm:$0xff] }
 0x258   : > { %6227 = vst [vmem:[#allocation45_spill] sm:$0xff] %v5308_v37  ;;  %v4179_v59 = vld [vmem:[#allocation8 + $0x1e8] sm:$0xff]  ;;  %2411 = vmatpush.bf16.msrb.mxu3 %v4139_v30 }
 0x259   : > { %6226 = vst [vmem:[#allocation44_spill] sm:$0xff] %v5306_v54  ;;  %v5319_v54 = vpop.f32.mrf.mxu0  ;;  %2782 = vmatpush.bf16.msra.mxu1 %v4179_v59 }
 0x25a   : > { %2294 = vmatmul.bf16.gmra.mxu1 %v5103_v20 }
 0x25b   : > { %1961 = vmatmul.bf16.gmra.mxu3 %v5310_v17  ;;  %v4087_v17 = vld [vmem:[#allocation4 + $0x88] sm:$0xf0] }
 0x25c   : > { %2338 = vmatmul.bf16.gmra.mxu2 %v5085_v62 }
 0x25d   : > { %v1824_v6 = vpop.f32.mrf.mxu3 }
 0x25e   : > { %v1903_v19 = vpop.f32.mrf.mxu2 }
 0x25f   : > { %v5315_v38 = vadd.f32 %v1903_v19, %v1814_v51  ;;  %v5317_v28 = vpop.f32.mrf.mxu1  ;;  %v5326_v51 = vor.u32 %v4087_v17, %v3619_v16 }
 0x260   : > { %6230 = vst [vmem:[#allocation48_spill] sm:$0xff] %v5317_v28  ;;  %2724 = vmatmul.bf16.gmra.mxu0 %v4987_v29 }
 0x261   : > { %6229 = vst [vmem:[#allocation47_spill] sm:$0xff] %v5315_v38  ;;  %v5328_v19 = vpop.f32.mrf.mxu0 }
 0x262   : > { %6233 = vst [vmem:[#allocation51_spill] sm:$0xff] %v5326_v51 }
 0x265   : > { %v1826_v15 = vpop.f32.mrf.mxu3 }
 0x266   : > { %v1905_v31 = vpop.f32.mrf.mxu2 }
 0x267   : > { %v5322_v57 = vadd.f32 %v1905_v31, %v1816_v55  ;;  %v5324_v13 = vpop.f32.mrf.mxu1  ;;  %v4090_v55 = vld [vmem:[#allocation4 + $0xa0] sm:$0xf0] }
 0x268   : > { %6232 = vst [vmem:[#allocation50_spill] sm:$0xff] %v5324_v13  ;;  %v4178_v13 = vld [vmem:[#allocation8 + $0x1e0] sm:$0xff] }
 0x269   : > { %6231 = vst [vmem:[#allocation49_spill] sm:$0xff] %v5322_v57  ;;  %v5338_v31 = vpop.f32.mrf.mxu0  ;;  %2783 = vmatpush.bf16.msra.mxu1 %v4178_v13  ;;  %v4176_v13 = vld [vmem:[#allocation8 + $0x1d0] sm:$0xff] }
 0x26a   : > { %2299 = vmatmul.bf16.gmra.mxu1 %v5125_v8 }
 0x26b   : > { %1966 = vmatmul.bf16.gmra.mxu3 %v5326_v51  ;;  %v3631_v51 = vld [vmem:[#allocation4 + $0x98] sm:$0xf] }
 0x26c   : > { %2343 = vmatmul.bf16.gmra.mxu2 %v5113_v41  ;;  %v5344_v49 = vor.u32 %v4090_v55, %v3631_v51  ;;  %v4138_v51 = vld [vmem:[#allocation8 + $0x160] sm:$0xff] }
 0x26d   : > { %v1829_v29 = vpop.f32.mrf.mxu3  ;;  %2412 = vmatpush.bf16.msrb.mxu3 %v4138_v51 }
 0x26e   : > { %v1908_v30 = vpop.f32.mrf.mxu2  ;;  %6238 = vst [vmem:[#allocation56_spill] sm:$0xff] %v5344_v49 }
 0x26f   : > { %v5333_v59 = vadd.f32 %v1908_v30, %v1819_v14  ;;  %v5335_v38 = vpop.f32.mrf.mxu1  ;;  %v4177_v14 = vld [vmem:[#allocation8 + $0x1d8] sm:$0xff] }
 0x270   : > { %6235 = vst [vmem:[#allocation53_spill] sm:$0xff] %v5335_v38  ;;  %2729 = vmatmul.bf16.gmra.mxu0 %v5000_v61  ;;  %v4186_v61 = vld [vmem:[#allocation8 + $0x220] sm:$0xff]  ;;  %2784 = vmatpush.bf16.msra.mxu1 %v4177_v14  ;;  %v4093_v38 = vld [vmem:[#allocation4 + $0xb8] sm:$0xf0] }
 0x271   : > { %6234 = vst [vmem:[#allocation52_spill] sm:$0xff] %v5333_v59  ;;  %2872 = vmatpush.bf16.msra.mxu2 %v4186_v61 }
 0x274   : > { %2785 = vmatpush.bf16.msra.mxu1 %v4176_v13 }
 0x275   : > { %v1831_v17 = vpop.f32.mrf.mxu3 }
 0x276   : > { %v1910_v16 = vpop.f32.mrf.mxu2 }
 0x277   : > { %v5340_v57 = vadd.f32 %v1910_v16, %v1821_v60  ;;  %v5342_v28 = vpop.f32.mrf.mxu1  ;;  %v5349_v60 = vpop.f32.mrf.mxu0 }
 0x278   : > { %6237 = vst [vmem:[#allocation55_spill] sm:$0xff] %v5342_v28  ;;  %v3643_v28 = vld [vmem:[#allocation4 + $0xb0] sm:$0xf] }
 0x279   : > { %6236 = vst [vmem:[#allocation54_spill] sm:$0xff] %v5340_v57 }
 0x27a   : > { %2304 = vmatmul.bf16.gmra.mxu1 %v5162_v10 }
 0x27b   : > { %1971 = vmatmul.bf16.gmra.mxu3 %v5344_v49  ;;  %v4175_v49 = vld [vmem:[#allocation8 + $0x1c8] sm:$0xff] }
 0x27c   : > { %2348 = vmatmul.bf16.gmra.mxu2 %v5134_v33  ;;  %2786 = vmatpush.bf16.msra.mxu1 %v4175_v49 }
 0x27e   : > { %v1834_v30 = vpop.f32.mrf.mxu3 }
 0x27f   : > { %v1913_v16 = vpop.f32.mrf.mxu2  ;;  %v5354_v55 = vpop.f32.mrf.mxu1 }
 0x280   : > { %v5351_v57 = vadd.f32 %v1913_v16, %v1824_v6  ;;  %2734 = vmatmul.bf16.gmra.mxu0 %v5017_v22  ;;  %6240 = vst [vmem:[#allocation58_spill] sm:$0xff] %v5354_v55  ;;  %v5358_v14 = vpop.f32.mrf.mxu0  ;;  %v5360_v6 = vor.u32 %v4093_v38, %v3643_v28  ;;  %v4174_v16 = vld [vmem:[#allocation8 + $0x1c0] sm:$0xff] }
 0x281   : > { %2787 = vmatpush.bf16.msra.mxu1 %v4174_v16 }
 0x282   : > { %6239 = vst [vmem:[#allocation57_spill] sm:$0xff] %v5351_v57 }
 0x283   : > { %6242 = vst [vmem:[#allocation60_spill] sm:$0xff] %v5360_v6 }
 0x286   : > { %v1836_v59 = vpop.f32.mrf.mxu3 }
 0x287   : > { %v1915_v37 = vpop.f32.mrf.mxu2  ;;  %v5365_v22 = vpop.f32.mrf.mxu1 }
 0x288   : > { %v5356_v61 = vadd.f32 %v1915_v37, %v1826_v15  ;;  %6243 = vst [vmem:[#allocation61_spill] sm:$0xff] %v5365_v22  ;;  %v5370_v49 = vpop.f32.mrf.mxu0  ;;  %v4096_v37 = vld [vmem:[#allocation4 + $0xd0] sm:$0xf0] }
 0x28a   : > { %6241 = vst [vmem:[#allocation59_spill] sm:$0xff] %v5356_v61  ;;  %2309 = vmatmul.bf16.gmra.mxu1 %v5191_v45  ;;  %v3655_v61 = vld [vmem:[#allocation4 + $0xc8] sm:$0xf] }
 0x28b   : > { %1976 = vmatmul.bf16.gmra.mxu3 %v5360_v6  ;;  %v5376_v55 = vor.u32 %v4096_v37, %v3655_v61  ;;  %v4137_v37 = vld [vmem:[#allocation8 + $0x158] sm:$0xff] }
 0x28c   : > { %2353 = vmatmul.bf16.gmra.mxu2 %v5172_v48  ;;  %2413 = vmatpush.bf16.msrb.mxu3 %v4137_v37 }
 0x28d   : > { %6247 = vst [vmem:[#allocation65_spill] sm:$0xff] %v5376_v55 }
 0x28e   : > { %v1839_v51 = vpop.f32.mrf.mxu3 }
 0x28f   : > { %v1918_v13 = vpop.f32.mrf.mxu2  ;;  %v5372_v38 = vpop.f32.mrf.mxu1 }
 0x290   : > { %v5367_v57 = vadd.f32 %v1918_v13, %v1829_v29  ;;  %2739 = vmatmul.bf16.gmra.mxu0 %v5031_v47  ;;  %6245 = vst [vmem:[#allocation63_spill] sm:$0xff] %v5372_v38  ;;  %v4185_v29 = vld [vmem:[#allocation8 + $0x218] sm:$0xff]  ;;  %v1854_v47 = vadd.f32 %v5265_v36, %v5029_v44  ;;  %v5383_v16 = vpop.f32.mrf.mxu0  ;;  %v3667_v44 = vld [vmem:[#allocation4 + $0xe0] sm:$0xf]  ;;  %v4099_v36 = vld [vmem:[#allocation4 + $0xe8] sm:$0xf0] }
 0x291   : > { %2873 = vmatpush.bf16.msra.mxu2 %v4185_v29 }
 0x292   : > { %6244 = vst [vmem:[#allocation62_spill] sm:$0xff] %v5367_v57 }
 0x296   : > { %v1841_v28 = vpop.f32.mrf.mxu3 }
 0x297   : > { %v1920_v15 = vpop.f32.mrf.mxu2  ;;  %v5389_v61 = vpop.f32.mrf.mxu1 }
 0x298   : > { %v5374_v6 = vadd.f32 %v1920_v15, %v1831_v17  ;;  %v5394_v38 = vpop.f32.mrf.mxu0 }
 0x29a   : > { %6246 = vst [vmem:[#allocation64_spill] sm:$0xff] %v5374_v6  ;;  %2314 = vmatmul.bf16.gmra.mxu1 %v5230_v9 }
 0x29b   : > { %1981 = vmatmul.bf16.gmra.mxu3 %v5376_v55  ;;  %v1856_v55 = vadd.f32 %v5274_v40, %v5038_v58  ;;  %v1859_v40 = vadd.f32 %v5286_v53, %v5057_v12  ;;  %v4102_v12 = vld [vmem:[#allocation4 + $0x100] sm:$0xf0] }
 0x29c   : > { %2358 = vmatmul.bf16.gmra.mxu2 %v5207_v24 }
 0x29e   : > { %v1942_v13 = vpop.f32.mrf.mxu3 }
 0x29f   : > { %v1923_v57 = vpop.f32.mrf.mxu2  ;;  %v5385_v17 = vadd.f32 %v1942_v13, %v1854_v47  ;;  %v5402_v13 = vpop.f32.mrf.mxu1 }
 0x2a0   : > { %v5387_v15 = vadd.f32 %v1923_v57, %v1834_v30  ;;  %2744 = vmatmul.bf16.gmra.mxu0 %v5042_v0  ;;  %v5400_v0 = vor.u32 %v4099_v36, %v3667_v44  ;;  %v5415_v37 = vpop.f32.mrf.mxu0  ;;  %v1861_v36 = vadd.f32 %v5297_v52, %v5066_v26  ;;  %v1864_v52 = vadd.f32 %v5304_v7, %v5074_v39 }
 0x2a1   : > { %v6165_v30 = vrot.slane %v5385_v17, 7 }
 0x2a2   : > { %6248 = vst [vmem:[#allocation66_spill] sm:$0xff] %v5400_v0 }
 0x2a6   : > { %v1944_v6 = vpop.f32.mrf.mxu3 }
 0x2a7   : > { %v1925_v29 = vpop.f32.mrf.mxu2  ;;  %v1945_v22 = vadd.f32 %v1944_v6, %v1856_v55 }
 0x2a8   : > { %v5397_v57 = vadd.f32 %v1925_v29, %v1836_v59  ;;  %v5422_v29 = vpop.f32.mrf.mxu1 }
 0x2a9   : > { %v2023_v47 = vrot.slane %v1945_v22, 7 }
 0x2aa   : > { %2788 = vmatmul.bf16.vlgmr.msra.gmra.mxu1 %v5036_v56 }
 0x2ab   : > { %1986 = vmatmul.bf16.gmra.mxu3 %v5400_v0  ;;  %v2085_v58 = vsel %vm2054_vm7, %v6165_v30, %v2023_v47 }
 0x2ac   : > { %2363 = vmatmul.bf16.gmra.mxu2 %v5044_v3  ;;  %v2243_v7 = vadd.f32 %v5267_v50, %v2085_v58  ;;  %v1869_v50 = vadd.f32 %v5328_v19, %v5100_v18  ;;  %v1871_v18 = vadd.f32 %v5338_v31, %v5115_v43  ;;  %v1874_v31 = vadd.f32 %v5349_v60, %v5123_v2 }
 0x2ad   : > { %v1876_v2 = vadd.f32 %v5358_v14, %v5136_v35 }
 0x2ae   : > { %v1947_v59 = vpop.f32.mrf.mxu3 }
 0x2af   : > { %v1928_v55 = vpop.f32.mrf.mxu2  ;;  %v1948_v6 = vadd.f32 %v1947_v59, %v1859_v40 }
 0x2b0   : > { %v5413_v22 = vadd.f32 %v1928_v55, %v1839_v51  ;;  %2749 = vmatmul.bf16.gmra.mxu0 %v5076_v42  ;;  %v3679_v51 = vld [vmem:[#allocation4 + $0xf8] sm:$0xf]  ;;  %v4184_v42 = vld [vmem:[#allocation8 + $0x210] sm:$0xff] }
 0x2b1   : > { %v2024_v44 = vrot.slane %v1948_v6, 7  ;;  %v5426_v55 = vor.u32 %v4102_v12, %v3679_v51  ;;  %v5428_v6 = vpop.f32.mrf.mxu0  ;;  %2874 = vmatpush.bf16.msra.mxu2 %v4184_v42  ;;  %v1866_v12 = vadd.f32 %v5319_v54, %v5087_v63  ;;  %v3691_v51 = vld [vmem:[#allocation4 + $0x110] sm:$0xf]  ;;  %v4105_v42 = vld [vmem:[#allocation4 + $0x118] sm:$0xf0] }
 0x2b2   : > { %6249 = vst [vmem:[#allocation67_spill] sm:$0xff] %v5428_v6  ;;  %v5453_v6 = vor.u32 %v4105_v42, %v3691_v51 }
 0x2b3   : > { %v2084_v56 = vsel %vm2054_vm7, %v2023_v47, %v2024_v44 }
 0x2b4   : > { %v2246_v58 = vadd.f32 %v5272_v27, %v2084_v56  ;;  %v4108_v56 = vld [vmem:[#allocation4 + $0x130] sm:$0xf0] }
 0x2b6   : > { %v1949_v30 = vpop.f32.mrf.mxu3 }
 0x2b7   : > { %v1930_v53 = vpop.f32.mrf.mxu2  ;;  %v1950_v0 = vadd.f32 %v1949_v30, %v1861_v36  ;;  %v5437_v30 = vpop.f32.mrf.mxu1 }
 0x2b8   : > { %v5424_v40 = vadd.f32 %v1930_v53, %v1841_v28 }
 0x2b9   : > { %v2025_v59 = vrot.slane %v1950_v0, 7  ;;  %v5446_v53 = vpop.f32.mrf.mxu0 }
 0x2ba   : > { %2793 = vmatmul.bf16.gmra.mxu1 %v5064_v25  ;;  %v4136_v25 = vld [vmem:[#allocation8 + $0x150] sm:$0xff] }
 0x2bb   : > { %1991 = vmatmul.bf16.gmra.mxu3 %v5426_v55  ;;  %v2083_v26 = vsel %vm2054_vm7, %v2024_v44, %v2025_v59 }
 0x2bc   : > { %2368 = vmatmul.bf16.gmra.mxu2 %v5078_v46  ;;  %2414 = vmatpush.bf16.msrb.mxu3 %v4136_v25  ;;  %v2248_v27 = vadd.f32 %v5283_v23, %v2083_v26  ;;  %v4183_v23 = vld [vmem:[#allocation8 + $0x208] sm:$0xff] }
 0x2bd   : > { %2875 = vmatpush.bf16.msra.mxu2 %v4183_v23 }
 0x2be   : > { %v1952_v28 = vpop.f32.mrf.mxu3 }
 0x2bf   : > { %v1953_v47 = vadd.f32 %v1952_v28, %v1864_v52  ;;  %v5439_v0 = vpop.f32.mrf.mxu2 }
 0x2c0   : > { %6250 = vst [vmem:[#allocation68_spill] sm:$0xff] %v5439_v0  ;;  %2754 = vmatmul.bf16.gmra.mxu0 %v5103_v20  ;;  %v5451_v20 = vpop.f32.mrf.mxu1 }
 0x2c1   : > { %v2026_v36 = vrot.slane %v1953_v47, 7 }
 0x2c3   : > { %v2082_v44 = vsel %vm2054_vm7, %v2025_v59, %v2026_v36  ;;  %v5463_v59 = vpop.f32.mrf.mxu0 }
 0x2c6   : > { %v1954_v39 = vpop.f32.mrf.mxu3 }
 0x2c7   : > { %v1955_v52 = vadd.f32 %v1954_v39, %v1866_v12  ;;  %v2331_v28 = vpop.f32.mrf.mxu2 }
 0x2c8   : > { %v5449_v47 = vadd.f32 %v2331_v28, %v2243_v7  ;;  %v3703_v28 = vld [vmem:[#allocation4 + $0x128] sm:$0xf] }
 0x2c9   : > { %v2027_v0 = vrot.slane %v1955_v52, 7 }
 0x2ca   : > { %2798 = vmatmul.bf16.gmra.mxu1 %v5085_v62  ;;  %v5468_v62 = vpop.f32.mrf.mxu1 }
 0x2cb   : > { %1996 = vmatmul.bf16.gmra.mxu3 %v5453_v6  ;;  %v2081_v63 = vsel %vm2054_vm7, %v2026_v36, %v2027_v0 }
 0x2cc   : > { %2373 = vmatmul.bf16.gmra.mxu2 %v5105_v21 }
 0x2ce   : > { %v1957_v54 = vpop.f32.mrf.mxu3 }
 0x2cf   : > { %v1958_v25 = vadd.f32 %v1957_v54, %v1869_v50  ;;  %v2334_v12 = vpop.f32.mrf.mxu2  ;;  %v5477_v50 = vpop.f32.mrf.mxu0  ;;  %v5479_v54 = vor.u32 %v4108_v56, %v3703_v28  ;;  %v4111_v56 = vld [vmem:[#allocation4 + $0x148] sm:$0xf0] }
 0x2d0   : > { %v5465_v39 = vadd.f32 %v2334_v12, %v2246_v58  ;;  %2759 = vmatmul.bf16.gmra.mxu0 %v5125_v8  ;;  %v2251_v58 = vadd.f32 %v5290_v1, %v2082_v44  ;;  %v2253_v1 = vadd.f32 %v5301_v34, %v2081_v63  ;;  %v3715_v44 = vld [vmem:[#allocation4 + $0x140] sm:$0xf]  ;;  %v1879_v34 = vadd.f32 %v5370_v49, %v5154_v5 }
 0x2d1   : > { %v2028_v7 = vrot.slane %v1958_v25, 7 }
 0x2d2   : > { %v5488_v26 = vpop.f32.mrf.mxu1 }
 0x2d3   : > { %v2080_v36 = vsel %vm2054_vm7, %v2027_v0, %v2028_v7 }
 0x2d6   : > { %v1959_v19 = vpop.f32.mrf.mxu3 }
 0x2d7   : > { %v1960_v51 = vadd.f32 %v1959_v19, %v1871_v18  ;;  %v2336_v42 = vpop.f32.mrf.mxu2  ;;  %v5494_v19 = vpop.f32.mrf.mxu0 }
 0x2d8   : > { %v5475_v52 = vadd.f32 %v2336_v42, %v2248_v27 }
 0x2d9   : > { %v2029_v8 = vrot.slane %v1960_v51, 7 }
 0x2da   : > { %2803 = vmatmul.bf16.gmra.mxu1 %v5113_v41  ;;  %v5501_v51 = vpop.f32.mrf.mxu1 }
 0x2db   : > { %2001 = vmatmul.bf16.gmra.mxu3 %v5479_v54  ;;  %v2079_v43 = vsel %vm2054_vm7, %v2028_v7, %v2029_v8  ;;  %v4135_v7 = vld [vmem:[#allocation8 + $0x148] sm:$0xff] }
 0x2dc   : > { %2378 = vmatmul.bf16.gmra.mxu2 %v5127_v11  ;;  %2415 = vmatpush.bf16.msrb.mxu3 %v4135_v7 }
 0x2de   : > { %v1962_v0 = vpop.f32.mrf.mxu3 }
 0x2df   : > { %v1963_v25 = vadd.f32 %v1962_v0, %v1874_v31  ;;  %v2339_v12 = vpop.f32.mrf.mxu2  ;;  %v5505_v31 = vor.u32 %v4111_v56, %v3715_v44  ;;  %v5514_v14 = vpop.f32.mrf.mxu0  ;;  %v3727_v44 = vld [vmem:[#allocation4 + $0x158] sm:$0xf] }
 0x2e0   : > { %v5491_v18 = vadd.f32 %v2339_v12, %v2251_v58  ;;  %2764 = vmatmul.bf16.gmra.mxu0 %v5162_v10 }
 0x2e1   : > { %v2030_v41 = vrot.slane %v1963_v25, 7 }
 0x2e2   : > { %v5519_v7 = vpop.f32.mrf.mxu1 }
 0x2e3   : > { %v2078_v27 = vsel %vm2054_vm7, %v2029_v8, %v2030_v41  ;;  %v6252_v8 = vld [vmem:[#allocation45_spill] sm:$0xff] }
 0x2e4   : > { %v2256_v0 = vadd.f32 %v6252_v8, %v2080_v36  ;;  %v4114_v36 = vld [vmem:[#allocation4 + $0x160] sm:$0xf0] }
 0x2e5   : > { %v5531_v8 = vor.u32 %v4114_v36, %v3727_v44 }
 0x2e6   : > { %v1964_v60 = vpop.f32.mrf.mxu3 }
 0x2e7   : > { %v1965_v42 = vadd.f32 %v1964_v60, %v1876_v2  ;;  %v2341_v28 = vpop.f32.mrf.mxu2  ;;  %v6254_v2 = vld [vmem:[#allocation27_spill] sm:$0xff]  ;;  %v6255_v60 = vld [vmem:[#allocation48_spill] sm:$0xff]  ;;  %v5527_v56 = vpop.f32.mrf.mxu0 }
 0x2e8   : > { %v5503_v10 = vadd.f32 %v2341_v28, %v2253_v1  ;;  %v1881_v5 = vadd.f32 %v5383_v16, %v6254_v2  ;;  %v2258_v1 = vadd.f32 %v6255_v60, %v2079_v43  ;;  %6257 = vst [vmem:[#allocation48_spill] sm:$0xff] %v5531_v8  ;;  %v6258_v43 = vld [vmem:[#allocation29_spill] sm:$0xff] }
 0x2e9   : > { %v2031_v23 = vrot.slane %v1965_v42, 7 }
 0x2ea   : > { %6251 = vst [vmem:[#allocation69_spill] sm:$0xff] %v5503_v10  ;;  %2808 = vmatmul.bf16.gmra.mxu1 %v5134_v33 }
 0x2eb   : > { %2006 = vmatmul.bf16.gmra.mxu3 %v5505_v31  ;;  %v2077_v35 = vsel %vm2054_vm7, %v2030_v41, %v2031_v23 }
 0x2ec   : > { %2383 = vmatmul.bf16.gmra.mxu2 %v5164_v4 }
 0x2ee   : > { %v1967_v63 = vpop.f32.mrf.mxu3 }
 0x2ef   : > { %v1968_v58 = vadd.f32 %v1967_v63, %v1879_v34  ;;  %v2344_v25 = vpop.f32.mrf.mxu2  ;;  %v5545_v36 = vpop.f32.mrf.mxu0 }
 0x2f0   : > { %v5517_v12 = vadd.f32 %v2344_v25, %v2256_v0  ;;  %2769 = vmatmul.bf16.gmra.mxu0 %v5191_v45  ;;  %v4134_v45 = vld [vmem:[#allocation8 + $0x140] sm:$0xff]  ;;  %v5533_v0 = vpop.f32.mrf.mxu1 }
 0x2f1   : > { %v2032_v33 = vrot.slane %v1968_v58, 7  ;;  %2416 = vmatpush.bf16.msrb.mxu3 %v4134_v45  ;;  %v6259_v58 = vld [vmem:[#allocation28_spill] sm:$0xff] }
 0x2f2   : > { %6253 = vst [vmem:[#allocation45_spill] sm:$0xff] %v5517_v12  ;;  %v1884_v25 = vadd.f32 %v5394_v38, %v6259_v58  ;;  %v3739_v58 = vld [vmem:[#allocation4 + $0x170] sm:$0xf] }
 0x2f3   : > { %v2076_v41 = vsel %vm2054_vm7, %v2031_v23, %v2032_v33  ;;  %v4182_v23 = vld [vmem:[#allocation8 + $0x200] sm:$0xff]  ;;  %6262 = vst [vmem:[#allocation28_spill] sm:$0xff] %v5545_v36 }
 0x2f4   : > { %2876 = vmatpush.bf16.msra.mxu2 %v4182_v23 }
 0x2f6   : > { %v1969_v49 = vpop.f32.mrf.mxu3 }
 0x2f7   : > { %v1970_v42 = vadd.f32 %v1969_v49, %v1881_v5  ;;  %v2346_v28 = vpop.f32.mrf.mxu2  ;;  %v6260_v5 = vld [vmem:[#allocation50_spill] sm:$0xff] }
 0x2f8   : > { %v5529_v34 = vadd.f32 %v2346_v28, %v2258_v1  ;;  %v2261_v49 = vadd.f32 %v6260_v5, %v2078_v27  ;;  %v5552_v38 = vpop.f32.mrf.mxu1  ;;  %v6264_v27 = vld [vmem:[#allocation53_spill] sm:$0xff] }
 0x2f9   : > { %v2033_v63 = vrot.slane %v1970_v42, 7  ;;  %v6263_v42 = vld [vmem:[#allocation30_spill] sm:$0xff]  ;;  %v2263_v23 = vadd.f32 %v6264_v27, %v2077_v35  ;;  %v6268_v35 = vld [vmem:[#allocation55_spill] sm:$0xff] }
 0x2fa   : > { %6256 = vst [vmem:[#allocation27_spill] sm:$0xff] %v5529_v34  ;;  %2813 = vmatmul.bf16.gmra.mxu1 %v5172_v48  ;;  %v1886_v28 = vadd.f32 %v5415_v37, %v6263_v42  ;;  %v6267_v37 = vld [vmem:[#allocation31_spill] sm:$0xff]  ;;  %v2266_v42 = vadd.f32 %v6268_v35, %v2076_v41 }
 0x2fb   : > { %2011 = vmatmul.bf16.gmra.mxu3 %v5531_v8  ;;  %v2075_v16 = vsel %vm2054_vm7, %v2032_v33, %v2033_v63  ;;  %v6274_v8 = vld [vmem:[#allocation33_spill] sm:$0xff] }
 0x2fc   : > { %2388 = vmatmul.bf16.gmra.mxu2 %v6258_v43 }
 0x2fe   : > { %v1972_v2 = vpop.f32.mrf.mxu3 }
 0x2ff   : > { %v1973_v60 = vadd.f32 %v1972_v2, %v1884_v25  ;;  %v2349_v1 = vpop.f32.mrf.mxu2  ;;  %v4117_v25 = vld [vmem:[#allocation4 + $0x178] sm:$0xf0] }
 0x300   : > { %v5543_v44 = vadd.f32 %v2349_v1, %v2261_v49  ;;  %2774 = vmatmul.bf16.gmra.mxu0 %v5230_v9  ;;  %v5557_v1 = vor.u32 %v4117_v25, %v3739_v58  ;;  %v5565_v27 = vpop.f32.mrf.mxu1 }
 0x301   : > { %v2034_v48 = vrot.slane %v1973_v60, 7 }
 0x302   : > { %6261 = vst [vmem:[#allocation29_spill] sm:$0xff] %v5543_v44 }
 0x303   : > { %v2074_v33 = vsel %vm2054_vm7, %v2033_v63, %v2034_v48  ;;  %6266 = vst [vmem:[#allocation30_spill] sm:$0xff] %v5557_v1 }
 0x306   : > { %v1974_v45 = vpop.f32.mrf.mxu3 }
 0x307   : > { %v1975_v2 = vadd.f32 %v1974_v45, %v1886_v28  ;;  %v2351_v5 = vpop.f32.mrf.mxu2  ;;  %v6269_v28 = vld [vmem:[#allocation35_spill] sm:$0xff] }
 0x308   : > { %v5555_v49 = vadd.f32 %v2351_v5, %v2263_v23  ;;  %v6271_v5 = vld [vmem:[#allocation58_spill] sm:$0xff]  ;;  %v5576_v41 = vpop.f32.mrf.mxu1 }
 0x309   : > { %v2035_v60 = vrot.slane %v1975_v2, 7 }
 0x30a   : > { %6265 = vst [vmem:[#allocation50_spill] sm:$0xff] %v5555_v49  ;;  %2818 = vmatmul.bf16.gmra.mxu1 %v5207_v24  ;;  %v2268_v49 = vadd.f32 %v6271_v5, %v2075_v16 }
 0x30b   : > { %2016 = vmatmul.bf16.gmra.mxu3 %v5557_v1  ;;  %v2073_v9 = vsel %vm2054_vm7, %v2034_v48, %v2035_v60  ;;  %v6272_v48 = vld [vmem:[#allocation38_spill] sm:$0xff] }
 0x30c   : > { %2393 = vmatmul.bf16.gmra.mxu2 %v6267_v37 }
 0x30e   : > { %v1977_v63 = vpop.f32.mrf.mxu3 }
 0x30f   : > { %v1978_v45 = vadd.f32 %v1977_v63, %v6269_v28  ;;  %v2354_v23 = vpop.f32.mrf.mxu2  ;;  %v6276_v28 = vld [vmem:[#allocation61_spill] sm:$0xff] }
 0x310   : > { %v5568_v2 = vadd.f32 %v2354_v23, %v2266_v42  ;;  %v6275_v42 = vld [vmem:[#allocation32_spill] sm:$0xff]  ;;  %v2271_v16 = vadd.f32 %v6276_v28, %v2074_v33  ;;  %v5587_v5 = vpop.f32.mrf.mxu1 }
 0x311   : > { %v2036_v58 = vrot.slane %v1978_v45, 7  ;;  %v6277_v45 = vld [vmem:[#allocation40_spill] sm:$0xff] }
 0x312   : > { %6270 = vst [vmem:[#allocation53_spill] sm:$0xff] %v5568_v2  ;;  %v6282_v28 = vld [vmem:[#allocation36_spill] sm:$0xff] }
 0x313   : > { %v2072_v25 = vsel %vm2054_vm7, %v2035_v60, %v2036_v58 }
 0x316   : > { %v1979_v24 = vpop.f32.mrf.mxu3 }
 0x317   : > { %v1980_v1 = vadd.f32 %v1979_v24, %v6272_v48  ;;  %v2356_v44 = vpop.f32.mrf.mxu2  ;;  %v6279_v48 = vld [vmem:[#allocation63_spill] sm:$0xff] }
 0x318   : > { %v5574_v34 = vadd.f32 %v2356_v44, %v2268_v49 }
 0x319   : > { %v2037_v35 = vrot.slane %v1980_v1, 7 }
 0x31a   : > { %6273 = vst [vmem:[#allocation31_spill] sm:$0xff] %v5574_v34  ;;  %2823 = vmatmul.bf16.gmra.mxu1 %v5044_v3  ;;  %v2273_v34 = vadd.f32 %v6279_v48, %v2073_v9  ;;  %v2276_v9 = vadd.f32 %v5389_v61, %v2072_v25  ;;  %v6286_v25 = vld [vmem:[#allocation39_spill] sm:$0xff] }
 0x31b   : > { %2417 = vmatmul.bf16.vlgmr.msrb.gmra.mxu3 %v6274_v8  ;;  %v2071_v63 = vsel %vm2054_vm7, %v2036_v58, %v2037_v35  ;;  %v6280_v58 = vld [vmem:[#allocation41_spill] sm:$0xff] }
 0x31c   : > { %2398 = vmatmul.bf16.gmra.mxu2 %v6275_v42  ;;  %v2278_v48 = vadd.f32 %v5402_v13, %v2071_v63  ;;  %v6287_v63 = vld [vmem:[#allocation47_spill] sm:$0xff] }
 0x31e   : > { %v1982_v60 = vpop.f32.mrf.mxu3 }
 0x31f   : > { %v1983_v23 = vadd.f32 %v1982_v60, %v6277_v45  ;;  %v2359_v24 = vpop.f32.mrf.mxu2  ;;  %v5600_v45 = vpop.f32.mrf.mxu1 }
 0x320   : > { %v5585_v44 = vadd.f32 %v2359_v24, %v2271_v16  ;;  %v6283_v16 = vld [vmem:[#allocation37_spill] sm:$0xff] }
 0x321   : > { %v2038_v49 = vrot.slane %v1983_v23, 7  ;;  %v6284_v23 = vld [vmem:[#allocation43_spill] sm:$0xff] }
 0x322   : > { %6278 = vst [vmem:[#allocation55_spill] sm:$0xff] %v5585_v44 }
 0x323   : > { %v2070_v1 = vsel %vm2054_vm7, %v2037_v35, %v2038_v49 }
 0x324   : > { %v2281_v13 = vadd.f32 %v5422_v29, %v2070_v1 }
 0x326   : > { %v1984_v3 = vpop.f32.mrf.mxu3 }
 0x327   : > { %v1985_v2 = vadd.f32 %v1984_v3, %v6280_v58  ;;  %v2361_v12 = vpop.f32.mrf.mxu2  ;;  %v6285_v58 = vld [vmem:[#allocation44_spill] sm:$0xff] }
 0x328   : > { %v5593_v36 = vadd.f32 %v2361_v12, %v2273_v34 }
 0x329   : > { %v2039_v33 = vrot.slane %v1985_v2, 7 }
 0x32a   : > { %6281 = vst [vmem:[#allocation35_spill] sm:$0xff] %v5593_v36  ;;  %2828 = vmatmul.bf16.gmra.mxu1 %v5078_v46 }
 0x32b   : > { %2422 = vmatmul.bf16.gmra.mxu3 %v6282_v28  ;;  %v2069_v60 = vsel %vm2054_vm7, %v2038_v49, %v2039_v33  ;;  %v5609_v49 = vpop.f32.mrf.mxu1 }
 0x32c   : > { %2403 = vmatmul.bf16.gmra.mxu2 %v6283_v16 }
 0x32e   : > { %v1987_v35 = vpop.f32.mrf.mxu3 }
 0x32f   : > { %v1988_v24 = vadd.f32 %v1987_v35, %v6284_v23  ;;  %v2364_v3 = vpop.f32.mrf.mxu2 }
 0x330   : > { %v5604_v12 = vadd.f32 %v2364_v3, %v2276_v9 }
 0x331   : > { %v2040_v34 = vrot.slane %v1988_v24, 7 }
 0x333   : > { %v2068_v2 = vsel %vm2054_vm7, %v2039_v33, %v2040_v34 }
 0x336   : > { %v1989_v46 = vpop.f32.mrf.mxu3 }
 0x337   : > { %v1990_v36 = vadd.f32 %v1989_v46, %v6285_v58  ;;  %v2366_v44 = vpop.f32.mrf.mxu2  ;;  %v2283_v46 = vadd.f32 %v5437_v30, %v2069_v60  ;;  %v2286_v30 = vadd.f32 %v5451_v20, %v2068_v2  ;;  %v6291_v60 = vld [vmem:[#allocation52_spill] sm:$0xff]  ;;  %v6294_v2 = vld [vmem:[#allocation46_spill] sm:$0xff] }
 0x338   : > { %v5612_v10 = vadd.f32 %v2366_v44, %v2278_v48  ;;  %v5623_v44 = vpop.f32.mrf.mxu1 }
 0x339   : > { %v2041_v61 = vrot.slane %v1990_v36, 7 }
 0x33a   : > { %2833 = vmatmul.bf16.gmra.mxu1 %v5105_v21 }
 0x33b   : > { %2427 = vmatmul.bf16.gmra.mxu3 %v6286_v25  ;;  %v2067_v35 = vsel %vm2054_vm7, %v2040_v34, %v2041_v61  ;;  %v6288_v34 = vld [vmem:[#allocation49_spill] sm:$0xff] }
 0x33c   : > { %2877 = vmatmul.bf16.vlgmr.msra.gmra.mxu2 %v6274_v8 }
 0x33e   : > { %v1992_v33 = vpop.f32.mrf.mxu3 }
 0x33f   : > { %v1993_v9 = vadd.f32 %v1992_v33, %v6287_v63  ;;  %v2369_v23 = vpop.f32.mrf.mxu2  ;;  %v6290_v33 = vld [vmem:[#allocation42_spill] sm:$0xff] }
 0x340   : > { %v5621_v24 = vadd.f32 %v2369_v23, %v2281_v13  ;;  %v5631_v1 = vpop.f32.mrf.mxu1 }
 0x341   : > { %v2042_v36 = vrot.slane %v1993_v9, 7 }
 0x343   : > { %v2066_v3 = vsel %vm2054_vm7, %v2041_v61, %v2042_v36 }
 0x346   : > { %v1994_v21 = vpop.f32.mrf.mxu3 }
 0x347   : > { %v1995_v48 = vadd.f32 %v1994_v21, %v6288_v34  ;;  %v2371_v8 = vpop.f32.mrf.mxu2 }
 0x348   : > { %v5629_v58 = vadd.f32 %v2371_v8, %v2283_v46  ;;  %v5644_v34 = vpop.f32.mrf.mxu1 }
 0x349   : > { %v2043_v29 = vrot.slane %v1995_v48, 7  ;;  %v2288_v48 = vadd.f32 %v5468_v62, %v2067_v35  ;;  %v6295_v62 = vld [vmem:[#allocation57_spill] sm:$0xff] }
 0x34a   : > { %6289 = vst [vmem:[#allocation58_spill] sm:$0xff] %v5629_v58  ;;  %2838 = vmatmul.bf16.gmra.mxu1 %v5127_v11 }
 0x34b   : > { %2432 = vmatmul.bf16.gmra.mxu3 %v6290_v33  ;;  %v2065_v13 = vsel %vm2054_vm7, %v2042_v36, %v2043_v29  ;;  %v6292_v36 = vld [vmem:[#allocation54_spill] sm:$0xff] }
 0x34c   : > { %2882 = vmatmul.bf16.gmra.mxu2 %v6282_v28 }
 0x34e   : > { %v1997_v61 = vpop.f32.mrf.mxu3 }
 0x34f   : > { %v1998_v63 = vadd.f32 %v1997_v61, %v6291_v60  ;;  %v2374_v9 = vpop.f32.mrf.mxu2 }
 0x350   : > { %v5640_v23 = vadd.f32 %v2374_v9, %v2286_v30  ;;  %v2291_v30 = vadd.f32 %v5488_v26, %v2066_v3  ;;  %v5656_v60 = vpop.f32.mrf.mxu1 }
 0x351   : > { %v2044_v21 = vrot.slane %v1998_v63, 7 }
 0x353   : > { %v2064_v46 = vsel %vm2054_vm7, %v2043_v29, %v2044_v21 }
 0x356   : > { %v1999_v11 = vpop.f32.mrf.mxu3 }
 0x357   : > { %v2000_v8 = vadd.f32 %v1999_v11, %v6292_v36  ;;  %v2376_v28 = vpop.f32.mrf.mxu2  ;;  %v2293_v36 = vadd.f32 %v5501_v51, %v2065_v13  ;;  %v2296_v51 = vadd.f32 %v5519_v7, %v2064_v46  ;;  %v6298_v13 = vld [vmem:[#allocation62_spill] sm:$0xff]  ;;  %v6300_v46 = vld [vmem:[#allocation56_spill] sm:$0xff] }
 0x358   : > { %v5648_v58 = vadd.f32 %v2376_v28, %v2288_v48  ;;  %v5667_v26 = vpop.f32.mrf.mxu1 }
 0x359   : > { %v2045_v20 = vrot.slane %v2000_v8, 7 }
 0x35a   : > { %6293 = vst [vmem:[#allocation38_spill] sm:$0xff] %v5648_v58  ;;  %2843 = vmatmul.bf16.gmra.mxu1 %v5164_v4  ;;  %v6297_v58 = vld [vmem:[#allocation51_spill] sm:$0xff] }
 0x35b   : > { %2437 = vmatmul.bf16.gmra.mxu3 %v6294_v2  ;;  %v2063_v61 = vsel %vm2054_vm7, %v2044_v21, %v2045_v20  ;;  %v6296_v21 = vld [vmem:[#allocation59_spill] sm:$0xff] }
 0x35c   : > { %2887 = vmatmul.bf16.gmra.mxu2 %v6286_v25 }
 0x35e   : > { %v2002_v29 = vpop.f32.mrf.mxu3 }
 0x35f   : > { %v2003_v35 = vadd.f32 %v2002_v29, %v6295_v62  ;;  %v2379_v63 = vpop.f32.mrf.mxu2 }
 0x360   : > { %v5659_v9 = vadd.f32 %v2379_v63, %v2291_v30 }
 0x361   : > { %v2046_v11 = vrot.slane %v2003_v35, 7 }
 0x363   : > { %v2062_v48 = vsel %vm2054_vm7, %v2045_v20, %v2046_v11 }
 0x366   : > { %v2004_v4 = vpop.f32.mrf.mxu3 }
 0x367   : > { %v2005_v8 = vadd.f32 %v2004_v4, %v6296_v21  ;;  %v2381_v25 = vpop.f32.mrf.mxu2  ;;  %v5678_v4 = vpop.f32.mrf.mxu1  ;;  %v2298_v21 = vadd.f32 %v5533_v0, %v2063_v61  ;;  %v2301_v0 = vadd.f32 %v5552_v38, %v2062_v48  ;;  %v6301_v48 = vld [vmem:[#allocation60_spill] sm:$0xff] }
 0x368   : > { %v5665_v28 = vadd.f32 %v2381_v25, %v2293_v36 }
 0x369   : > { %v2047_v3 = vrot.slane %v2005_v8, 7 }
 0x36a   : > { %2848 = vmatmul.bf16.gmra.mxu1 %v6258_v43 }
 0x36b   : > { %2442 = vmatmul.bf16.gmra.mxu3 %v6297_v58  ;;  %v2061_v29 = vsel %vm2054_vm7, %v2046_v11, %v2047_v3  ;;  %v6299_v11 = vld [vmem:[#allocation64_spill] sm:$0xff] }
 0x36c   : > { %2892 = vmatmul.bf16.gmra.mxu2 %v6290_v33 }
 0x36e   : > { %v2007_v20 = vpop.f32.mrf.mxu3 }
 0x36f   : > { %v2008_v30 = vadd.f32 %v2007_v20, %v6298_v13  ;;  %v2384_v62 = vpop.f32.mrf.mxu2 }
 0x370   : > { %v5676_v35 = vadd.f32 %v2384_v62, %v2296_v51  ;;  %v5691_v51 = vpop.f32.mrf.mxu1 }
 0x371   : > { %v2048_v63 = vrot.slane %v2008_v30, 7 }
 0x373   : > { %v2060_v36 = vsel %vm2054_vm7, %v2047_v3, %v2048_v63 }
 0x376   : > { %v2009_v43 = vpop.f32.mrf.mxu3 }
 0x377   : > { %v2010_v8 = vadd.f32 %v2009_v43, %v6299_v11  ;;  %v2386_v33 = vpop.f32.mrf.mxu2 }
 0x378   : > { %v5684_v25 = vadd.f32 %v2386_v33, %v2298_v21  ;;  %v2303_v21 = vadd.f32 %v5565_v27, %v2061_v29  ;;  %v2306_v27 = vadd.f32 %v5576_v41, %v2060_v36 }
 0x379   : > { %v2049_v7 = vrot.slane %v2010_v8, 7 }
 0x37a   : > { %2853 = vmatmul.bf16.gmra.mxu1 %v6267_v37 }
 0x37b   : > { %2447 = vmatmul.bf16.gmra.mxu3 %v6300_v46  ;;  %v2059_v20 = vsel %vm2054_vm7, %v2048_v63, %v2049_v7  ;;  %v5700_v63 = vpop.f32.mrf.mxu1 }
 0x37c   : > { %2897 = vmatmul.bf16.gmra.mxu2 %v6294_v2 }
 0x37e   : > { %v2012_v3 = vpop.f32.mrf.mxu3 }
 0x37f   : > { %v2013_v61 = vadd.f32 %v2012_v3, %v5387_v15  ;;  %v2389_v13 = vpop.f32.mrf.mxu2 }
 0x380   : > { %v5695_v30 = vadd.f32 %v2389_v13, %v2301_v0  ;;  %v2308_v13 = vadd.f32 %v5587_v5, %v2059_v20 }
 0x381   : > { %v2050_v62 = vrot.slane %v2013_v61, 7 }
 0x383   : > { %v2058_v43 = vsel %vm2054_vm7, %v2049_v7, %v2050_v62  ;;  %v5714_v3 = vpop.f32.mrf.mxu1 }
 0x386   : > { %v2014_v37 = vpop.f32.mrf.mxu3 }
 0x387   : > { %v2015_v2 = vadd.f32 %v2014_v37, %v5397_v57  ;;  %v2391_v11 = vpop.f32.mrf.mxu2 }
 0x388   : > { %v5703_v8 = vadd.f32 %v2391_v11, %v2303_v21  ;;  %v6303_v21 = vrot.slane %v5385_v17, 7  ;;  %v6304_v17 = vld [vmem:[#allocation66_spill] sm:$0xff] }
 0x389   : > { %v2051_v38 = vrot.slane %v2015_v2, 7 }
 0x38a   : > { %2858 = vmatmul.bf16.gmra.mxu1 %v6275_v42 }
 0x38b   : > { %2452 = vmatmul.bf16.gmra.mxu3 %v6301_v48  ;;  %v2057_v15 = vsel %vm2054_vm7, %v2050_v62, %v2051_v38  ;;  %v5722_v36 = vpop.f32.mrf.mxu1 }
 0x38c   : > { %2902 = vmatmul.bf16.gmra.mxu2 %v6297_v58 }
 0x38e   : > { %v2017_v33 = vpop.f32.mrf.mxu3 }
 0x38f   : > { %v2018_v29 = vadd.f32 %v2017_v33, %v5413_v22  ;;  %v2394_v7 = vpop.f32.mrf.mxu2  ;;  %v6302_v22 = vld [vmem:[#allocation65_spill] sm:$0xff]  ;;  %v2313_v33 = vadd.f32 %v5609_v49, %v2057_v15 }
 0x390   : > { %v5712_v57 = vadd.f32 %v2394_v7, %v2306_v27 }
 0x391   : > { %v2052_v0 = vrot.slane %v2018_v29, 7 }
 0x393   : > { %v2056_v61 = vsel %vm2054_vm7, %v2051_v38, %v2052_v0 }
 0x394   : > { %v2316_v7 = vadd.f32 %v5623_v44, %v2056_v61  ;;  %v6306_v61 = vld [vmem:[#allocation67_spill] sm:$0xff] }
 0x396   : > { %v2019_v42 = vpop.f32.mrf.mxu3 }
 0x397   : > { %v2020_v62 = vadd.f32 %v2019_v42, %v5424_v40  ;;  %v2396_v58 = vpop.f32.mrf.mxu2  ;;  %v2311_v40 = vadd.f32 %v5600_v45, %v2058_v43 }
 0x398   : > { %v5720_v37 = vadd.f32 %v2396_v58, %v2308_v13  ;;  %v2790_v58 = vadd.f32 %v5644_v34, %v6306_v61  ;;  %v5771_v34 = vpop.f32.mrf.mxu1 }
 0x399   : > { %v2053_v41 = vrot.slane %v2020_v62, 7  ;;  %v6305_v62 = vld [vmem:[#allocation34_spill] sm:$0xff] }
 0x39a   : > { %2863 = vmatmul.bf16.gmra.mxu1 %v6283_v16 }
 0x39b   : > { %2457 = vmatmul.bf16.gmra.mxu3 %v6302_v22  ;;  %v2086_v2 = vsel %vm2054_vm7, %v2053_v41, %v6303_v21  ;;  %v2055_v5 = vsel %vm2054_vm7, %v2052_v0, %v2053_v41 }
 0x39c   : > { %2907 = vmatmul.bf16.gmra.mxu2 %v6300_v46  ;;  %v2318_v45 = vadd.f32 %v5631_v1, %v2055_v5  ;;  %v2241_v44 = vadd.f32 %v6305_v62, %v2086_v2  ;;  %v2792_v1 = vadd.f32 %v5656_v60, %v5446_v53  ;;  %v6307_v5 = vld [vmem:[#allocation68_spill] sm:$0xff] }
 0x39e   : > { %v2418_v20 = vpop.f32.mrf.mxu3 }
 0x39f   : > { %v2399_v11 = vpop.f32.mrf.mxu2 }
 0x3a0   : > { %v5734_v38 = vadd.f32 %v2399_v11, %v2311_v40  ;;  %v2330_v40 = vadd.f32 %v6307_v5, %v2241_v44 }
 0x3a2   : > { %v2419_v2 = vadd.f32 %v2418_v20, %v2330_v40  ;;  %v2795_v20 = vadd.f32 %v5667_v26, %v5463_v59  ;;  %v5798_v40 = vpop.f32.mrf.mxu1 }
 0x3a6   : > { %v2420_v27 = vpop.f32.mrf.mxu3 }
 0x3a7   : > { %v2401_v16 = vpop.f32.mrf.mxu2  ;;  %v2421_v61 = vadd.f32 %v2420_v27, %v5449_v47 }
 0x3a8   : > { %v5737_v29 = vadd.f32 %v2401_v16, %v2313_v33 }
 0x3ab   : > { %2462 = vmatmul.bf16.gmra.mxu3 %v6304_v17 }
 0x3ac   : > { %2912 = vmatmul.bf16.gmra.mxu2 %v6301_v48 }
 0x3ae   : > { %v2423_v0 = vpop.f32.mrf.mxu3 }
 0x3af   : > { %v2404_v46 = vpop.f32.mrf.mxu2 }
 0x3b0   : > { %v5742_v42 = vadd.f32 %v2404_v46, %v2316_v7  ;;  %v5776_v7 = vld [vmem:[%s6128_s5] ss:$0 sm:$0xff] }
 0x3b6   : > { %v5745_v43 = vpop.f32.mrf.mxu3 }
 0x3b7   : > { %v2406_v13 = vpop.f32.mrf.mxu2 }
 0x3b8   : > { %v5747_v49 = vadd.f32 %v2406_v13, %v2318_v45  ;;  %v5782_v45 = vpop.f32.mrf.mxu0 }
 0x3bb   : > { %2467 = vmatmul.bf16.gmra.mxu3 %v5426_v55 }
 0x3bc   : > { %2917 = vmatmul.bf16.gmra.mxu2 %v6302_v22 }
 0x3be   : > { %v5751_v15 = vpop.f32.mrf.mxu3 }
 0x3bf   : > { %v2878_v48 = vpop.f32.mrf.mxu2 }
 0x3c0   : > { %v5758_v41 = vadd.f32 %v2878_v48, %v2790_v58 }
 0x3c2   : > { %v2958_v22 = vrot.slane %v5758_v41, 1 }
 0x3c6   : > { %v5760_v21 = vpop.f32.mrf.mxu3 }
 0x3c7   : > { %v2880_v11 = vpop.f32.mrf.mxu2 }
 0x3c8   : > { %v2881_v33 = vadd.f32 %v2880_v11, %v2792_v1  ;;  %v2797_v1 = vadd.f32 %v5678_v4, %v5477_v50 }
 0x3ca   : > { %v2959_v16 = vrot.slane %v2881_v33, 1 }
 0x3cb   : > { %2472 = vmatmul.bf16.gmra.mxu3 %v5453_v6 }
 0x3cc   : > { %v3021_v53 = vsel %vm2990_vm4, %v2958_v22, %v2959_v16  ;;  %2922 = vmatmul.bf16.gmra.mxu2 %v6304_v17  ;;  %v5788_v17 = vld [vmem:[%s6129_s6] ss:$0 sm:$0xff] }
 0x3cd   : > { %v3023_v60 = vadd.f32 %v3021_v53, %v2419_v2  ;;  %v5801_v53 = vpop.f32.mrf.mxu0 }
 0x3ce   : > { %v5780_v46 = vpop.f32.mrf.mxu3 }
 0x3cf   : > { %v2883_v13 = vpop.f32.mrf.mxu2  ;;  %v3059_v62 = vmul.f32 %v5776_v7, %v3023_v60  ;;  %v2424_v60 = vadd.f32 %v2423_v0, %v5465_v39  ;;  %v5814_v0 = vpop.f32.mrf.mxu1 }
 0x3d0   : > { %v2884_v48 = vadd.f32 %v2883_v13, %v2795_v20 }
 0x3d1   : > { %v3095_v59 = vadd.f32 %v5788_v17, %v3059_v62  ;;  %v2800_v62 = vadd.f32 %v5691_v51, %v5494_v19 }
 0x3d2   : > { %v2960_v44 = vrot.slane %v2884_v48, 1 }
 0x3d3   : > { %v3159_v47 = vmul.f32 0.01, %v3095_v59  ;;  %vm3127_vm5 = vcmp.ge.f32.partialorder %v3095_v59, 0.0 }
 0x3d4   : > { %v3020_v58 = vsel %vm2990_vm4, %v2959_v16, %v2960_v44 }
 0x3d5   : > { %v3024_v26 = vadd.f32 %v3020_v58, %v2421_v61  ;;  %v3191_v20 = vsel %vm3127_vm5, %v3095_v59, %v3159_v47 }
 0x3d6   : > { %v5796_v5 = vpop.f32.mrf.mxu3 }
 0x3d7   : > { %v3060_v11 = vmul.f32 %v5776_v7, %v3024_v26  ;;  %v2885_v33 = vpop.f32.mrf.mxu2 }
 0x3d8   : > { %v2886_v2 = vadd.f32 %v2885_v33, %v2797_v1  ;;  %v2802_v33 = vadd.f32 %v5700_v63, %v5514_v14 }
 0x3d9   : > { %v3096_v27 = vadd.f32 %v5788_v17, %v3060_v11 }
 0x3da   : > { %v2961_v16 = vrot.slane %v2886_v2, 1 }
 0x3db   : > { %vm3128_vm6 = vcmp.ge.f32.partialorder %v3096_v27, 0.0  ;;  %v3160_v50 = vmul.f32 0.01, %v3096_v27  ;;  %2477 = vmatmul.bf16.gmra.mxu3 %v5479_v54 }
 0x3dc   : > { %v3019_v4 = vsel %vm2990_vm4, %v2960_v44, %v2961_v16  ;;  %2927 = vmatmul.bf16.gmra.mxu2 %v5426_v55  ;;  %v5817_v44 = vpop.f32.mrf.mxu0  ;;  %v2426_v55 = vadd.f32 %v5745_v43, %v5475_v52  ;;  %v5830_v43 = vpop.f32.mrf.mxu1 }
 0x3dd   : > { %v3192_v13 = vsel %vm3128_vm6, %v3096_v27, %v3160_v50  ;;  %v3025_v48 = vadd.f32 %v3019_v4, %v2424_v60 }
 0x3de   : > { %v4193_v61 = vpack.c.bf16 %v3192_v13, %v3191_v20  ;;  %v5811_v58 = vpop.f32.mrf.mxu3 }
 0x3df   : > { %v2888_v26 = vpop.f32.mrf.mxu2  ;;  %v3061_v1 = vmul.f32 %v5776_v7, %v3025_v48 }
 0x3e0   : > { %4194 = vst [vmem:[%s4854_s10] sm:$0xff] %v4193_v61   ;;  %v2889_v39 = vadd.f32 %v2888_v26, %v2800_v62  ;;  %v2805_v61 = vadd.f32 %v5714_v3, %v5527_v56  ;;  %v6309_v3 = vld [vmem:[#allocation28_spill] sm:$0xff] }
 0x3e1   : > { %v3097_v19 = vadd.f32 %v5788_v17, %v3061_v1 }
 0x3e2   : > { %v2962_v11 = vrot.slane %v2889_v39, 1 }
 0x3e3   : > { %v3161_v50 = vmul.f32 0.01, %v3097_v19  ;;  %vm3129_vm8 = vcmp.ge.f32.partialorder %v3097_v19, 0.0 }
 0x3e4   : > { %v3018_v59 = vsel %vm2990_vm4, %v2961_v16, %v2962_v11  ;;  %v2429_v16 = vadd.f32 %v5751_v15, %v5491_v18  ;;  %v5838_v63 = vpop.f32.mrf.mxu0 }
 0x3e5   : > { %v3026_v51 = vadd.f32 %v3018_v59, %v2426_v55  ;;  %v3193_v13 = vsel %vm3129_vm8, %v3097_v19, %v3161_v50  ;;  %v5850_v19 = vpop.f32.mrf.mxu1 }
 0x3e6   : > { %v5826_v2 = vpop.f32.mrf.mxu3 }
 0x3e7   : > { %v3062_v47 = vmul.f32 %v5776_v7, %v3026_v51  ;;  %v2890_v27 = vpop.f32.mrf.mxu2 }
 0x3e8   : > { %v2891_v60 = vadd.f32 %v2890_v27, %v2802_v33  ;;  %v2807_v33 = vadd.f32 %v5722_v36, %v6309_v3  ;;  %v6311_v36 = vld [vmem:[#allocation48_spill] sm:$0xff] }
 0x3e9   : > { %v3098_v4 = vadd.f32 %v5788_v17, %v3062_v47 }
 0x3ea   : > { %v2963_v52 = vrot.slane %v2891_v60, 1 }
 0x3eb   : > { %vm3130_vm9 = vcmp.ge.f32.partialorder %v3098_v4, 0.0  ;;  %v3162_v20 = vmul.f32 0.01, %v3098_v4  ;;  %2482 = vmatmul.bf16.gmra.mxu3 %v5505_v31 }
 0x3ec   : > { %v3017_v14 = vsel %vm2990_vm4, %v2962_v11, %v2963_v52  ;;  %2932 = vmatmul.bf16.gmra.mxu2 %v5453_v6  ;;  %v6308_v11 = vld [vmem:[#allocation69_spill] sm:$0xff]  ;;  %v5857_v27 = vpop.f32.mrf.mxu0 }
 0x3ed   : > { %v3194_v48 = vsel %vm3130_vm9, %v3098_v4, %v3162_v20  ;;  %v3027_v62 = vadd.f32 %v3017_v14, %v2429_v16  ;;  %v2431_v6 = vadd.f32 %v5760_v21, %v6308_v11  ;;  %v6310_v20 = vld [vmem:[#allocation45_spill] sm:$0xff]  ;;  %v5871_v11 = vpop.f32.mrf.mxu1 }
 0x3ee   : > { %v4198_v26 = vpack.c.bf16 %v3194_v48, %v3193_v13  ;;  %v5842_v39 = vpop.f32.mrf.mxu3  ;;  %v2434_v14 = vadd.f32 %v5780_v46, %v6310_v20 }
 0x3ef   : > { %v2893_v18 = vpop.f32.mrf.mxu2  ;;  %v3063_v1 = vmul.f32 %v5776_v7, %v3027_v62 }
 0x3f0   : > { %4270 = vst [vmem:[%s4854_s10 + $0x8] sm:$0xff] %v4198_v26   ;;  %v2894_v15 = vadd.f32 %v2893_v18, %v2805_v61  ;;  %v2810_v18 = vadd.f32 %v5771_v34, %v5782_v45 }
 0x3f1   : > { %v3099_v51 = vadd.f32 %v5788_v17, %v3063_v1 }
 0x3f2   : > { %v2964_v55 = vrot.slane %v2894_v15, 1 }
 0x3f3   : > { %v3163_v21 = vmul.f32 0.01, %v3099_v51  ;;  %vm3131_vm10 = vcmp.ge.f32.partialorder %v3099_v51, 0.0 }
 0x3f4   : > { %v3016_v59 = vsel %vm2990_vm4, %v2963_v52, %v2964_v55 }
 0x3f5   : > { %v3028_v56 = vadd.f32 %v3016_v59, %v2431_v6  ;;  %v3195_v62 = vsel %vm3131_vm10, %v3099_v51, %v3163_v21  ;;  %v5874_v59 = vpop.f32.mrf.mxu0 }
 0x3f6   : > { %v5855_v47 = vpop.f32.mrf.mxu3 }
 0x3f7   : > { %v3064_v60 = vmul.f32 %v5776_v7, %v3028_v56  ;;  %v2895_v50 = vpop.f32.mrf.mxu2 }
 0x3f8   : > { %v2896_v4 = vadd.f32 %v2895_v50, %v2807_v33  ;;  %v2812_v33 = vadd.f32 %v5798_v40, %v5801_v53  ;;  %v6314_v53 = vld [vmem:[#allocation30_spill] sm:$0xff] }
 0x3f9   : > { %v3100_v16 = vadd.f32 %v5788_v17, %v3064_v60 }
 0x3fa   : > { %v2965_v52 = vrot.slane %v2896_v4, 1 }
 0x3fb   : > { %vm3132_vm11 = vcmp.ge.f32.partialorder %v3100_v16, 0.0  ;;  %v3164_v13 = vmul.f32 0.01, %v3100_v16  ;;  %2487 = vmatmul.bf16.gmra.mxu3 %v6311_v36 }
 0x3fc   : > { %v3015_v48 = vsel %vm2990_vm4, %v2964_v55, %v2965_v52  ;;  %2937 = vmatmul.bf16.gmra.mxu2 %v5479_v54  ;;  %v6312_v54 = vld [vmem:[#allocation27_spill] sm:$0xff] }
 0x3fd   : > { %v3196_v61 = vsel %vm3132_vm11, %v3100_v16, %v3164_v13  ;;  %v3029_v26 = vadd.f32 %v3015_v48, %v2434_v14  ;;  %v2436_v51 = vadd.f32 %v5796_v5, %v6312_v54  ;;  %v5887_v16 = vpop.f32.mrf.mxu1  ;;  %v5890_v14 = vpop.f32.mrf.mxu0  ;;  %v6313_v13 = vld [vmem:[#allocation29_spill] sm:$0xff] }
 0x3fe   : > { %v4203_v15 = vpack.c.bf16 %v3196_v61, %v3195_v62  ;;  %v5869_v1 = vpop.f32.mrf.mxu3  ;;  %v2439_v48 = vadd.f32 %v5811_v58, %v6313_v13  ;;  %v6316_v13 = vld [vmem:[#allocation53_spill] sm:$0xff] }
 0x3ff   : > { %v2898_v46 = vpop.f32.mrf.mxu2  ;;  %v3065_v55 = vmul.f32 %v5776_v7, %v3029_v26 }
 0x400   : > { %4271 = vst [vmem:[%s4854_s10 + $0x10] sm:$0xff] %v4203_v15   ;;  %v2899_v6 = vadd.f32 %v2898_v46, %v2810_v18  ;;  %v2815_v15 = vadd.f32 %v5814_v0, %v5817_v44 }
 0x401   : > { %v3101_v34 = vadd.f32 %v5788_v17, %v3065_v55 }
 0x402   : > { %v2966_v56 = vrot.slane %v2899_v6, 1 }
 0x403   : > { %v3165_v20 = vmul.f32 0.01, %v3101_v34  ;;  %vm3133_vm12 = vcmp.ge.f32.partialorder %v3101_v34, 0.0 }
 0x404   : > { %v3014_v3 = vsel %vm2990_vm4, %v2965_v52, %v2966_v56 }
 0x405   : > { %v3030_v45 = vadd.f32 %v3014_v3, %v2436_v51  ;;  %v3197_v61 = vsel %vm3133_vm12, %v3101_v34, %v3165_v20  ;;  %v5904_v3 = vpop.f32.mrf.mxu1 }
 0x406   : > { %v5884_v60 = vpop.f32.mrf.mxu3 }
 0x407   : > { %v3066_v50 = vmul.f32 %v5776_v7, %v3030_v45  ;;  %v2900_v4 = vpop.f32.mrf.mxu2  ;;  %v5910_v45 = vpop.f32.mrf.mxu0 }
 0x408   : > { %v2901_v21 = vadd.f32 %v2900_v4, %v2812_v33  ;;  %v2817_v33 = vadd.f32 %v5830_v43, %v5838_v63 }
 0x409   : > { %v3102_v5 = vadd.f32 %v5788_v17, %v3066_v50 }
 0x40a   : > { %v2967_v52 = vrot.slane %v2901_v21, 1 }
 0x40b   : > { %vm3134_vm13 = vcmp.ge.f32.partialorder %v3102_v5, 0.0  ;;  %v3166_v40 = vmul.f32 0.01, %v3102_v5  ;;  %2492 = vmatmul.bf16.gmra.mxu3 %v6314_v53 }
 0x40c   : > { %v3013_v62 = vsel %vm2990_vm4, %v2966_v56, %v2967_v52  ;;  %2942 = vmatmul.bf16.gmra.mxu2 %v5505_v31  ;;  %v6315_v56 = vld [vmem:[#allocation50_spill] sm:$0xff] }
 0x40d   : > { %v3198_v26 = vsel %vm3134_vm13, %v3102_v5, %v3166_v40  ;;  %v3031_v18 = vadd.f32 %v3013_v62, %v2439_v48  ;;  %v2441_v31 = vadd.f32 %v5826_v2, %v6315_v56  ;;  %v2444_v48 = vadd.f32 %v5842_v39, %v6316_v13  ;;  %v5924_v63 = vpop.f32.mrf.mxu1  ;;  %v6317_v56 = vld [vmem:[#allocation31_spill] sm:$0xff] }
 0x40e   : > { %v4208_v46 = vpack.c.bf16 %v3198_v26, %v3197_v61  ;;  %v5900_v6 = vpop.f32.mrf.mxu3 }
 0x40f   : > { %v2903_v55 = vpop.f32.mrf.mxu2  ;;  %v3067_v54 = vmul.f32 %v5776_v7, %v3031_v18  ;;  %v2820_v18 = vadd.f32 %v5850_v19, %v5857_v27  ;;  %v2822_v19 = vadd.f32 %v5871_v11, %v5874_v59 }
 0x410   : > { %4272 = vst [vmem:[%s4854_s10 + $0x18] sm:$0xff] %v4208_v46   ;;  %v2904_v58 = vadd.f32 %v2903_v55, %v2815_v15  ;;  %v2740_v46 = vpop.f32.mrf.mxu0 }
 0x411   : > { %v3103_v0 = vadd.f32 %v5788_v17, %v3067_v54 }
 0x412   : > { %v2968_v51 = vrot.slane %v2904_v58, 1 }
 0x413   : > { %v3167_v5 = vmul.f32 0.01, %v3103_v0  ;;  %vm3135_vm14 = vcmp.ge.f32.partialorder %v3103_v0, 0.0 }
 0x414   : > { %v3012_v34 = vsel %vm2990_vm4, %v2967_v52, %v2968_v51 }
 0x415   : > { %v3032_v44 = vadd.f32 %v3012_v34, %v2441_v31  ;;  %v3199_v62 = vsel %vm3135_vm14, %v3103_v0, %v3167_v5  ;;  %v2831_v27 = vpop.f32.mrf.mxu1 }
 0x416   : > { %v5916_v21 = vpop.f32.mrf.mxu3 }
 0x417   : > { %v3068_v50 = vmul.f32 %v5776_v7, %v3032_v44  ;;  %v2905_v4 = vpop.f32.mrf.mxu2 }
 0x418   : > { %v2906_v20 = vadd.f32 %v2905_v4, %v2817_v33  ;;  %v2742_v4 = vpop.f32.mrf.mxu0 }
 0x419   : > { %v3104_v2 = vadd.f32 %v5788_v17, %v3068_v50 }
 0x41a   : > { %v2969_v52 = vrot.slane %v2906_v20, 1 }
 0x41b   : > { %vm3136_vm15 = vcmp.ge.f32.partialorder %v3104_v2, 0.0  ;;  %v3168_v40 = vmul.f32 0.01, %v3104_v2 }
 0x41c   : > { %v3011_v43 = vsel %vm2990_vm4, %v2968_v51, %v2969_v52  ;;  %2947 = vmatmul.bf16.gmra.mxu2 %v6311_v36  ;;  %v2446_v36 = vadd.f32 %v5855_v47, %v6317_v56 }
 0x41d   : > { %v3200_v61 = vsel %vm3136_vm15, %v3104_v2, %v3168_v40  ;;  %v3033_v26 = vadd.f32 %v3011_v43, %v2444_v48  ;;  %v6318_v2 = vld [vmem:[#allocation55_spill] sm:$0xff] }
 0x41e   : > { %v4213_v15 = vpack.c.bf16 %v3200_v61, %v3199_v62  ;;  %v5930_v54 = vpop.f32.mrf.mxu3  ;;  %v2825_v62 = vadd.f32 %v5887_v16, %v5890_v14  ;;  %v2827_v16 = vadd.f32 %v5904_v3, %v5910_v45 }
 0x41f   : > { %v2908_v55 = vpop.f32.mrf.mxu2  ;;  %v3069_v58 = vmul.f32 %v5776_v7, %v3033_v26 }
 0x420   : > { %4273 = vst [vmem:[%s4854_s10 + $0x20] sm:$0xff] %v4213_v15   ;;  %v2909_v39 = vadd.f32 %v2908_v55, %v2820_v18 }
 0x421   : > { %v3105_v34 = vadd.f32 %v5788_v17, %v3069_v58  ;;  %v6319_v58 = vld [vmem:[#allocation35_spill] sm:$0xff] }
 0x422   : > { %v2970_v51 = vrot.slane %v2909_v39, 1  ;;  %v2745_v39 = vpop.f32.mrf.mxu0 }
 0x423   : > { %v3169_v20 = vmul.f32 0.01, %v3105_v34  ;;  %vm3137_vm0 = vcmp.ge.f32.partialorder %v3105_v34, 0.0 }
 0x424   : > { %v3010_v31 = vsel %vm2990_vm4, %v2969_v52, %v2970_v51  ;;  %v2449_v52 = vadd.f32 %v5869_v1, %v6318_v2  ;;  %v2834_v1 = vpop.f32.mrf.mxu1 }
 0x425   : > { %v3034_v0 = vadd.f32 %v3010_v31, %v2446_v36  ;;  %v3201_v59 = vsel %vm3137_vm0, %v3105_v34, %v3169_v20 }
 0x426   : > { %v5943_v48 = vpop.f32.mrf.mxu3 }
 0x427   : > { %v3070_v44 = vmul.f32 %v5776_v7, %v3034_v0  ;;  %v2910_v33 = vpop.f32.mrf.mxu2 }
 0x428   : > { %v2911_v50 = vadd.f32 %v2910_v33, %v2822_v19 }
 0x429   : > { %v3106_v5 = vadd.f32 %v5788_v17, %v3070_v44 }
 0x42a   : > { %v2971_v47 = vrot.slane %v2911_v50, 1  ;;  %v2454_v50 = vadd.f32 %v5900_v6, %v5604_v12  ;;  %v2747_v45 = vpop.f32.mrf.mxu0  ;;  %v2456_v6 = vadd.f32 %v5916_v21, %v5612_v10  ;;  %v2459_v21 = vadd.f32 %v5930_v54, %v5621_v24 }
 0x42b   : > { %vm3138_vm1 = vcmp.ge.f32.partialorder %v3106_v5, 0.0  ;;  %v3170_v13 = vmul.f32 0.01, %v3106_v5 }
 0x42c   : > { %v3009_v11 = vsel %vm2990_vm4, %v2970_v51, %v2971_v47  ;;  %2952 = vmatmul.bf16.gmra.mxu2 %v6314_v53  ;;  %v2451_v51 = vadd.f32 %v5884_v60, %v6319_v58  ;;  %v2836_v33 = vpop.f32.mrf.mxu1 }
 0x42d   : > { %v3202_v40 = vsel %vm3138_vm1, %v3106_v5, %v3170_v13  ;;  %v3035_v43 = vadd.f32 %v3009_v11, %v2449_v52  ;;  %v2830_v52 = vadd.f32 %v5924_v63, %v2740_v46  ;;  %v2832_v63 = vadd.f32 %v2831_v27, %v2742_v4 }
 0x42e   : > { %v4218_v61 = vpack.c.bf16 %v3202_v40, %v3201_v59  ;;  %v5959_v14 = vpop.f32.mrf.mxu3 }
 0x42f   : > { %v2913_v26 = vpop.f32.mrf.mxu2  ;;  %v3071_v15 = vmul.f32 %v5776_v7, %v3035_v43 }
 0x430   : > { %4274 = vst [vmem:[%s4854_s10 + $0x28] sm:$0xff] %v4218_v61   ;;  %v2914_v18 = vadd.f32 %v2913_v26, %v2825_v62 }
 0x431   : > { %v3107_v56 = vadd.f32 %v5788_v17, %v3071_v15 }
 0x432   : > { %v2972_v55 = vrot.slane %v2914_v18, 1  ;;  %v2750_v46 = vpop.f32.mrf.mxu0 }
 0x433   : > { %v3171_v19 = vmul.f32 0.01, %v3107_v56  ;;  %vm3139_vm3 = vcmp.ge.f32.partialorder %v3107_v56, 0.0 }
 0x434   : > { %v3008_v53 = vsel %vm2990_vm4, %v2971_v47, %v2972_v55  ;;  %v2839_v61 = vpop.f32.mrf.mxu1 }
 0x435   : > { %v3036_v36 = vadd.f32 %v3008_v53, %v2451_v51  ;;  %v3203_v5 = vsel %vm3139_vm3, %v3107_v56, %v3171_v19 }
 0x436   : > { %v5969_v59 = vpop.f32.mrf.mxu3 }
 0x437   : > { %v3072_v31 = vmul.f32 %v5776_v7, %v3036_v36  ;;  %v2915_v34 = vpop.f32.mrf.mxu2 }
 0x438   : > { %v2916_v0 = vadd.f32 %v2915_v34, %v2827_v16  ;;  %v2835_v34 = vadd.f32 %v2834_v1, %v2745_v39  ;;  %v2837_v1 = vadd.f32 %v2836_v33, %v2747_v45 }
 0x439   : > { %v3108_v44 = vadd.f32 %v5788_v17, %v3072_v31 }
 0x43a   : > { %v2973_v60 = vrot.slane %v2916_v0, 1 }
 0x43b   : > { %vm3140_vm2 = vcmp.ge.f32.partialorder %v3108_v44, 0.0  ;;  %v3172_v20 = vmul.f32 0.01, %v3108_v44 }
 0x43c   : > { %v3007_v3 = vsel %vm2990_vm4, %v2972_v55, %v2973_v60  ;;  %v2841_v19 = vpop.f32.mrf.mxu1 }
 0x43d   : > { %v3204_v47 = vsel %vm3140_vm2, %v3108_v44, %v3172_v20  ;;  %v3037_v2 = vadd.f32 %v3007_v3, %v2454_v50  ;;  %v2752_v50 = vpop.f32.mrf.mxu0 }
 0x43e   : > { %v4223_v13 = vpack.c.bf16 %v3204_v47, %v3203_v5  ;;  %v5979_v56 = vpop.f32.mrf.mxu3  ;;  %v6320_v5 = vld [vmem:[#allocation58_spill] sm:$0xff] }
 0x43f   : > { %v2918_v11 = vpop.f32.mrf.mxu2  ;;  %v3073_v43 = vmul.f32 %v5776_v7, %v3037_v2  ;;  %v2461_v24 = vadd.f32 %v5943_v48, %v6320_v5 }
 0x440   : > { %4275 = vst [vmem:[%s4854_s10 + $0x30] sm:$0xff] %v4223_v13   ;;  %v2919_v40 = vadd.f32 %v2918_v11, %v2830_v52 }
 0x441   : > { %v3109_v26 = vadd.f32 %v5788_v17, %v3073_v43 }
 0x442   : > { %v2974_v12 = vrot.slane %v2919_v40, 1 }
 0x443   : > { %v3173_v51 = vmul.f32 0.01, %v3109_v26  ;;  %vm3141_vm7 = vcmp.ge.f32.partialorder %v3109_v26, 0.0 }
 0x444   : > { %v3006_v62 = vsel %vm2990_vm4, %v2973_v60, %v2974_v12  ;;  %v2844_v40 = vpop.f32.mrf.mxu1 }
 0x445   : > { %v3038_v18 = vadd.f32 %v3006_v62, %v2456_v6  ;;  %v3205_v4 = vsel %vm3141_vm7, %v3109_v26, %v3173_v51  ;;  %v2755_v48 = vpop.f32.mrf.mxu0  ;;  %v2464_v62 = vadd.f32 %v5959_v14, %v5640_v23 }
 0x446   : > { %v2470_v54 = vpop.f32.mrf.mxu3 }
 0x447   : > { %v3074_v15 = vmul.f32 %v5776_v7, %v3038_v18  ;;  %v2920_v55 = vpop.f32.mrf.mxu2 }
 0x448   : > { %v2921_v58 = vadd.f32 %v2920_v55, %v2832_v63 }
 0x449   : > { %v3110_v53 = vadd.f32 %v5788_v17, %v3074_v15  ;;  %v2840_v15 = vadd.f32 %v2839_v61, %v2750_v46  ;;  %v2842_v61 = vadd.f32 %v2841_v19, %v2752_v50 }
 0x44a   : > { %v2975_v10 = vrot.slane %v2921_v58, 1 }
 0x44b   : > { %vm3142_vm5 = vcmp.ge.f32.partialorder %v3110_v53, 0.0  ;;  %v3174_v36 = vmul.f32 0.01, %v3110_v53 }
 0x44c   : > { %v3005_v27 = vsel %vm2990_vm4, %v2974_v12, %v2975_v10 }
 0x44d   : > { %v3206_v16 = vsel %vm3142_vm5, %v3110_v53, %v3174_v36  ;;  %v3039_v31 = vadd.f32 %v3005_v27, %v2459_v21  ;;  %v2846_v36 = vpop.f32.mrf.mxu1  ;;  %v6321_v27 = vld [vmem:[#allocation38_spill] sm:$0xff] }
 0x44e   : > { %v4228_v0 = vpack.c.bf16 %v3206_v16, %v3205_v4  ;;  %v2473_v55 = vpop.f32.mrf.mxu3  ;;  %v2466_v23 = vadd.f32 %v5969_v59, %v6321_v27  ;;  %v2757_v4 = vpop.f32.mrf.mxu0  ;;  %v2469_v59 = vadd.f32 %v5979_v56, %v5659_v9  ;;  %v2471_v9 = vadd.f32 %v2470_v54, %v5665_v28 }
 0x44f   : > { %v2923_v44 = vpop.f32.mrf.mxu2  ;;  %v3075_v20 = vmul.f32 %v5776_v7, %v3039_v31  ;;  %v2474_v28 = vadd.f32 %v2473_v55, %v5676_v35 }
 0x450   : > { %4276 = vst [vmem:[%s4854_s10 + $0x38] sm:$0xff] %v4228_v0   ;;  %v2924_v60 = vadd.f32 %v2923_v44, %v2835_v34 }
 0x451   : > { %v3111_v2 = vadd.f32 %v5788_v17, %v3075_v20 }
 0x452   : > { %v2976_v3 = vrot.slane %v2924_v60, 1 }
 0x453   : > { %v3175_v43 = vmul.f32 0.01, %v3111_v2  ;;  %vm3143_vm6 = vcmp.ge.f32.partialorder %v3111_v2, 0.0 }
 0x454   : > { %v3004_v47 = vsel %vm2990_vm4, %v2975_v10, %v2976_v3 }
 0x455   : > { %v3040_v52 = vadd.f32 %v3004_v47, %v2461_v24  ;;  %v3207_v45 = vsel %vm3143_vm6, %v3111_v2, %v3175_v43  ;;  %v2849_v19 = vpop.f32.mrf.mxu1 }
 0x456   : > { %v2475_v0 = vpop.f32.mrf.mxu3 }
 0x457   : > { %v3076_v39 = vmul.f32 %v5776_v7, %v3040_v52  ;;  %v2925_v13 = vpop.f32.mrf.mxu2  ;;  %v2845_v52 = vadd.f32 %v2844_v40, %v2755_v48  ;;  %v2476_v35 = vadd.f32 %v2475_v0, %v5684_v25 }
 0x458   : > { %v2926_v11 = vadd.f32 %v2925_v13, %v2837_v1 }
 0x459   : > { %v3112_v12 = vadd.f32 %v5788_v17, %v3076_v39  ;;  %v2760_v39 = vpop.f32.mrf.mxu0 }
 0x45a   : > { %v2977_v6 = vrot.slane %v2926_v11, 1 }
 0x45b   : > { %vm3144_vm8 = vcmp.ge.f32.partialorder %v3112_v12, 0.0  ;;  %v3176_v26 = vmul.f32 0.01, %v3112_v12 }
 0x45c   : > { %v3003_v33 = vsel %vm2990_vm4, %v2976_v3, %v2977_v6 }
 0x45d   : > { %v3208_v18 = vsel %vm3144_vm8, %v3112_v12, %v3176_v26  ;;  %v3041_v63 = vadd.f32 %v3003_v33, %v2464_v62  ;;  %v2847_v33 = vadd.f32 %v2846_v36, %v2757_v4 }
 0x45e   : > { %v4233_v58 = vpack.c.bf16 %v3208_v18, %v3207_v45  ;;  %v2478_v12 = vpop.f32.mrf.mxu3  ;;  %v2851_v45 = vpop.f32.mrf.mxu1 }
 0x45f   : > { %v2928_v51 = vpop.f32.mrf.mxu2  ;;  %v3077_v10 = vmul.f32 %v5776_v7, %v3041_v63  ;;  %v2479_v25 = vadd.f32 %v2478_v12, %v5695_v30 }
 0x460   : > { %4277 = vst [vmem:[%s4854_s10 + $0x40] sm:$0xff] %v4233_v58   ;;  %v2929_v53 = vadd.f32 %v2928_v51, %v2840_v15 }
 0x461   : > { %v3113_v16 = vadd.f32 %v5788_v17, %v3077_v10  ;;  %v2762_v63 = vpop.f32.mrf.mxu0 }
 0x462   : > { %v2978_v21 = vrot.slane %v2929_v53, 1 }
 0x463   : > { %v3177_v60 = vmul.f32 0.01, %v3113_v16  ;;  %vm3145_vm9 = vcmp.ge.f32.partialorder %v3113_v16, 0.0 }
 0x464   : > { %v3002_v14 = vsel %vm2990_vm4, %v2977_v6, %v2978_v21 }
 0x465   : > { %v3042_v31 = vadd.f32 %v3002_v14, %v2466_v23  ;;  %v3209_v50 = vsel %vm3145_vm9, %v3113_v16, %v3177_v60  ;;  %v2850_v23 = vadd.f32 %v2849_v19, %v2760_v39 }
 0x466   : > { %v2480_v53 = vpop.f32.mrf.mxu3 }
 0x467   : > { %v3078_v46 = vmul.f32 %v5776_v7, %v3042_v31  ;;  %v2930_v34 = vpop.f32.mrf.mxu2  ;;  %v2854_v31 = vpop.f32.mrf.mxu1  ;;  %v2481_v30 = vadd.f32 %v2480_v53, %v5703_v8 }
 0x468   : > { %v2931_v44 = vadd.f32 %v2930_v34, %v2842_v61 }
 0x469   : > { %v3114_v20 = vadd.f32 %v5788_v17, %v3078_v46  ;;  %v2765_v34 = vpop.f32.mrf.mxu0 }
 0x46a   : > { %v2979_v3 = vrot.slane %v2931_v44, 1 }
 0x46b   : > { %vm3146_vm10 = vcmp.ge.f32.partialorder %v3114_v20, 0.0  ;;  %v3178_v5 = vmul.f32 0.01, %v3114_v20 }
 0x46c   : > { %v3001_v24 = vsel %vm2990_vm4, %v2978_v21, %v2979_v3 }
 0x46d   : > { %v3210_v47 = vsel %vm3146_vm10, %v3114_v20, %v3178_v5  ;;  %v3043_v2 = vadd.f32 %v3001_v24, %v2469_v59  ;;  %v2852_v20 = vadd.f32 %v2851_v45, %v2762_v63 }
 0x46e   : > { %v4238_v1 = vpack.c.bf16 %v3210_v47, %v3209_v50 }
 0x46f   : > { %v2933_v13 = vpop.f32.mrf.mxu2  ;;  %v3079_v43 = vmul.f32 %v5776_v7, %v3043_v2  ;;  %v2856_v2 = vpop.f32.mrf.mxu1 }
 0x470   : > { %4278 = vst [vmem:[%s4854_s10 + $0x48] sm:$0xff] %v4238_v1   ;;  %v2934_v11 = vadd.f32 %v2933_v13, %v2845_v52 }
 0x471   : > { %v3115_v62 = vadd.f32 %v5788_v17, %v3079_v43  ;;  %v2767_v1 = vpop.f32.mrf.mxu0  ;;  %v2855_v43 = vadd.f32 %v2854_v31, %v2765_v34 }
 0x472   : > { %v2980_v6 = vrot.slane %v2934_v11, 1 }
 0x473   : > { %v3179_v15 = vmul.f32 0.01, %v3115_v62  ;;  %vm3147_vm11 = vcmp.ge.f32.partialorder %v3115_v62, 0.0 }
 0x474   : > { %v3000_v56 = vsel %vm2990_vm4, %v2979_v3, %v2980_v6  ;;  %v2483_v3 = vpop.f32.mrf.mxu3 }
 0x475   : > { %v3044_v26 = vadd.f32 %v3000_v56, %v2471_v9  ;;  %v3211_v21 = vsel %vm3147_vm11, %v3115_v62, %v3179_v15  ;;  %v2484_v53 = vadd.f32 %v2483_v3, %v5712_v57 }
 0x477   : > { %v3080_v40 = vmul.f32 %v5776_v7, %v3044_v26  ;;  %v2935_v48 = vpop.f32.mrf.mxu2  ;;  %v2859_v45 = vpop.f32.mrf.mxu1 }
 0x478   : > { %v2936_v18 = vadd.f32 %v2935_v48, %v2847_v33 }
 0x479   : > { %v3116_v58 = vadd.f32 %v5788_v17, %v3080_v40  ;;  %v2770_v63 = vpop.f32.mrf.mxu0 }
 0x47a   : > { %v2981_v51 = vrot.slane %v2936_v18, 1  ;;  %v2857_v18 = vadd.f32 %v2856_v2, %v2767_v1 }
 0x47b   : > { %vm3148_vm12 = vcmp.ge.f32.partialorder %v3116_v58, 0.0  ;;  %v3180_v54 = vmul.f32 0.01, %v3116_v58 }
 0x47c   : > { %v2999_v10 = vsel %vm2990_vm4, %v2980_v6, %v2981_v51  ;;  %v2485_v56 = vpop.f32.mrf.mxu3 }
 0x47d   : > { %v3212_v36 = vsel %vm3148_vm12, %v3116_v58, %v3180_v54  ;;  %v3045_v27 = vadd.f32 %v2999_v10, %v2474_v28  ;;  %v2486_v57 = vadd.f32 %v2485_v56, %v5720_v37 }
 0x47e   : > { %v4243_v14 = vpack.c.bf16 %v3212_v36, %v3211_v21 }
 0x47f   : > { %v2938_v4 = vpop.f32.mrf.mxu2  ;;  %v3081_v61 = vmul.f32 %v5776_v7, %v3045_v27  ;;  %v2861_v31 = vpop.f32.mrf.mxu1 }
 0x480   : > { %4279 = vst [vmem:[%s4854_s10 + $0x50] sm:$0xff] %v4243_v14   ;;  %v2939_v16 = vadd.f32 %v2938_v4, %v2850_v23  ;;  %v2860_v4 = vadd.f32 %v2859_v45, %v2770_v63 }
 0x481   : > { %v3117_v44 = vadd.f32 %v5788_v17, %v3081_v61  ;;  %v2772_v34 = vpop.f32.mrf.mxu0 }
 0x482   : > { %v2982_v46 = vrot.slane %v2939_v16, 1 }
 0x483   : > { %v3181_v19 = vmul.f32 0.01, %v3117_v44  ;;  %vm3149_vm13 = vcmp.ge.f32.partialorder %v3117_v44, 0.0 }
 0x484   : > { %v2998_v55 = vsel %vm2990_vm4, %v2981_v51, %v2982_v46  ;;  %v2488_v10 = vpop.f32.mrf.mxu3 }
 0x485   : > { %v3046_v60 = vadd.f32 %v2998_v55, %v2476_v35  ;;  %v3213_v39 = vsel %vm3149_vm13, %v3117_v44, %v3181_v19 }
 0x487   : > { %v3082_v59 = vmul.f32 %v5776_v7, %v3046_v60  ;;  %v2940_v5 = vpop.f32.mrf.mxu2 }
 0x488   : > { %v2941_v24 = vadd.f32 %v2940_v5, %v2852_v20 }
 0x489   : > { %v3118_v50 = vadd.f32 %v5788_v17, %v3082_v59  ;;  %v2862_v59 = vadd.f32 %v2861_v31, %v2772_v34  ;;  %v2775_v37 = vpop.f32.mrf.mxu0 }
 0x48a   : > { %v2983_v47 = vrot.slane %v2941_v24, 1 }
 0x48b   : > { %vm3150_vm14 = vcmp.ge.f32.partialorder %v3118_v50, 0.0  ;;  %v3182_v0 = vmul.f32 0.01, %v3118_v50 }
 0x48c   : > { %v2997_v52 = vsel %vm2990_vm4, %v2982_v46, %v2983_v47  ;;  %v2490_v44 = vpop.f32.mrf.mxu3 }
 0x48d   : > { %v3214_v13 = vsel %vm3150_vm14, %v3118_v50, %v3182_v0  ;;  %v3047_v11 = vadd.f32 %v2997_v52, %v2479_v25  ;;  %v2864_v50 = vpop.f32.mrf.mxu1  ;;  %v2489_v0 = vadd.f32 %v2488_v10, %v5734_v38 }
 0x48e   : > { %v4248_v6 = vpack.c.bf16 %v3214_v13, %v3213_v39 }
 0x48f   : > { %v2943_v9 = vpop.f32.mrf.mxu2  ;;  %v3083_v26 = vmul.f32 %v5776_v7, %v3047_v11 }
 0x490   : > { %4280 = vst [vmem:[%s4854_s10 + $0x58] sm:$0xff] %v4248_v6   ;;  %v2944_v62 = vadd.f32 %v2943_v9, %v2855_v43  ;;  %v2865_v43 = vadd.f32 %v2864_v50, %v2775_v37 }
 0x491   : > { %v3119_v40 = vadd.f32 %v5788_v17, %v3083_v26  ;;  %v2777_v45 = vpop.f32.mrf.mxu0 }
 0x492   : > { %v2984_v33 = vrot.slane %v2944_v62, 1 }
 0x493   : > { %v3183_v28 = vmul.f32 0.01, %v3119_v40  ;;  %vm3151_vm15 = vcmp.ge.f32.partialorder %v3119_v40, 0.0 }
 0x494   : > { %v2996_v12 = vsel %vm2990_vm4, %v2983_v47, %v2984_v33  ;;  %v2493_v6 = vpop.f32.mrf.mxu3 }
 0x495   : > { %v3048_v48 = vadd.f32 %v2996_v12, %v2481_v30  ;;  %v3215_v27 = vsel %vm3151_vm15, %v3119_v40, %v3183_v28  ;;  %v2866_v38 = vpop.f32.mrf.mxu1  ;;  %v2491_v30 = vadd.f32 %v2490_v44, %v5737_v29  ;;  %v2494_v10 = vadd.f32 %v2493_v6, %v5742_v42 }
 0x497   : > { %v3084_v15 = vmul.f32 %v5776_v7, %v3048_v48  ;;  %v2945_v58 = vpop.f32.mrf.mxu2 }
 0x498   : > { %v2946_v51 = vadd.f32 %v2945_v58, %v2857_v18  ;;  %v2867_v18 = vadd.f32 %v2866_v38, %v2777_v45 }
 0x499   : > { %v3120_v54 = vadd.f32 %v5788_v17, %v3084_v15 }
 0x49a   : > { %v2985_v8 = vrot.slane %v2946_v51, 1 }
 0x49b   : > { %vm3152_vm0 = vcmp.ge.f32.partialorder %v3120_v54, 0.0  ;;  %v3184_v21 = vmul.f32 0.01, %v3120_v54 }
 0x49c   : > { %v2995_v36 = vsel %vm2990_vm4, %v2984_v33, %v2985_v8  ;;  %v2495_v58 = vpop.f32.mrf.mxu3 }
 0x49d   : > { %v3216_v23 = vsel %vm3152_vm0, %v3120_v54, %v3184_v21  ;;  %v3049_v14 = vadd.f32 %v2995_v36, %v2484_v53 }
 0x49e   : > { %v4253_v16 = vpack.c.bf16 %v3216_v23, %v3215_v27 }
 0x49f   : > { %v2948_v61 = vpop.f32.mrf.mxu2  ;;  %v3085_v35 = vmul.f32 %v5776_v7, %v3049_v14 }
 0x4a0   : > { %4281 = vst [vmem:[%s4854_s10 + $0x60] sm:$0xff] %v4253_v16   ;;  %v2949_v46 = vadd.f32 %v2948_v61, %v2860_v4 }
 0x4a1   : > { %v3121_v20 = vadd.f32 %v5788_v17, %v3085_v35 }
 0x4a2   : > { %v2986_v55 = vrot.slane %v2949_v46, 1 }
 0x4a3   : > { %v3185_v47 = vmul.f32 0.01, %v3121_v20  ;;  %vm3153_vm1 = vcmp.ge.f32.partialorder %v3121_v20, 0.0 }
 0x4a4   : > { %v2994_v60 = vsel %vm2990_vm4, %v2985_v8, %v2986_v55  ;;  %v2496_v8 = vadd.f32 %v2495_v58, %v5747_v49 }
 0x4a5   : > { %v3050_v3 = vadd.f32 %v2994_v60, %v2486_v57  ;;  %v3217_v39 = vsel %vm3153_vm1, %v3121_v20, %v3185_v47 }
 0x4a7   : > { %v3086_v5 = vmul.f32 %v5776_v7, %v3050_v3  ;;  %v2950_v24 = vpop.f32.mrf.mxu2 }
 0x4a8   : > { %v2951_v19 = vadd.f32 %v2950_v24, %v2862_v59 }
 0x4a9   : > { %v3122_v2 = vadd.f32 %v5788_v17, %v3086_v5 }
 0x4aa   : > { %v2987_v25 = vrot.slane %v2951_v19, 1 }
 0x4ab   : > { %vm3154_vm3 = vcmp.ge.f32.partialorder %v3122_v2, 0.0  ;;  %v3186_v52 = vmul.f32 0.01, %v3122_v2 }
 0x4ac   : > { %v2993_v1 = vsel %vm2990_vm4, %v2986_v55, %v2987_v25 }
 0x4ad   : > { %v3218_v13 = vsel %vm3154_vm3, %v3122_v2, %v3186_v52  ;;  %v3051_v11 = vadd.f32 %v2993_v1, %v2489_v0 }
 0x4ae   : > { %v4258_v9 = vpack.c.bf16 %v3218_v13, %v3217_v39 }
 0x4af   : > { %v2953_v56 = vpop.f32.mrf.mxu2  ;;  %v3087_v26 = vmul.f32 %v5776_v7, %v3051_v11 }
 0x4b0   : > { %4282 = vst [vmem:[%s4854_s10 + $0x68] sm:$0xff] %v4258_v9   ;;  %v2954_v62 = vadd.f32 %v2953_v56, %v2865_v43 }
 0x4b1   : > { %v3123_v40 = vadd.f32 %v5788_v17, %v3087_v26 }
 0x4b2   : > { %v2988_v33 = vrot.slane %v2954_v62, 1 }
 0x4b3   : > { %v3187_v28 = vmul.f32 0.01, %v3123_v40  ;;  %vm3155_vm2 = vcmp.ge.f32.partialorder %v3123_v40, 0.0 }
 0x4b4   : > { %v2992_v12 = vsel %vm2990_vm4, %v2987_v25, %v2988_v33 }
 0x4b5   : > { %v3052_v48 = vadd.f32 %v2992_v12, %v2491_v30  ;;  %v3219_v27 = vsel %vm3155_vm2, %v3123_v40, %v3187_v28 }
 0x4b7   : > { %v3088_v63 = vmul.f32 %v5776_v7, %v3052_v48  ;;  %v2955_v15 = vpop.f32.mrf.mxu2 }
 0x4b8   : > { %v2956_v51 = vadd.f32 %v2955_v15, %v2867_v18 }
 0x4b9   : > { %v3124_v54 = vadd.f32 %v5788_v17, %v3088_v63 }
 0x4ba   : > { %v2989_v29 = vrot.slane %v2956_v51, 1 }
 0x4bb   : > { %vm3156_vm7 = vcmp.ge.f32.partialorder %v3124_v54, 0.0  ;;  %v3188_v53 = vmul.f32 0.01, %v3124_v54 }
 0x4bc   : > { %v2991_v21 = vsel %vm2990_vm4, %v2988_v33, %v2989_v29  ;;  %v3022_v36 = vsel %vm2990_vm4, %v2989_v29, %v2958_v22 }
 0x4bd   : > { %v3220_v23 = vsel %vm3156_vm7, %v3124_v54, %v3188_v53  ;;  %v3053_v14 = vadd.f32 %v2991_v21, %v2494_v10  ;;  %v3054_v4 = vadd.f32 %v3022_v36, %v2496_v8 }
 0x4be   : > { %v4263_v16 = vpack.c.bf16 %v3220_v23, %v3219_v27 }
 0x4bf   : > { %v3089_v42 = vmul.f32 %v5776_v7, %v3053_v14  ;;  %v3090_v49 = vmul.f32 %v5776_v7, %v3054_v4 }
 0x4c0   : > { %4283 = vst [vmem:[%s4854_s10 + $0x70] sm:$0xff] %v4263_v16  }
 0x4c1   : > { %v3125_v32 = vadd.f32 %v5788_v17, %v3089_v42  ;;  %v3126_v41 = vadd.f32 %v5788_v17, %v3090_v49 }
 0x4c3   : > { %vm3157_vm4 = vcmp.ge.f32.partialorder %v3125_v32, 0.0  ;;  %vm3158_vm5 = vcmp.ge.f32.partialorder %v3126_v41, 0.0  ;;  %v3189_v22 = vmul.f32 0.01, %v3125_v32  ;;  %v3190_v31 = vmul.f32 0.01, %v3126_v41 }
 0x4c5   : > { %v3221_v61 = vsel %vm3157_vm4, %v3125_v32, %v3189_v22  ;;  %v3222_v7 = vsel %vm3158_vm5, %v3126_v41, %v3190_v31 }
 0x4c6   : > { %v4268_v46 = vpack.c.bf16 %v3222_v7, %v3221_v61 }
 0x4c8   : > { %4284 = vst [vmem:[%s4854_s10 + $0x78] sm:$0xff] %v4268_v46  }
 0x4c9   : > { %4562 = shalt.err (!%p4559_p7)
}
 0x4ca   : > { %s4647_s10 = smov 64   ;;  %s4648_s12 = smov 4  }
 0x4cb   : > { %4321 = dma.vmem_to_hbm [thread:$0]  (%p4741_p3), %s3303_s30, 2048, %s3305_s14, %s3288_s18, %s4647_s10, %s4647_s10, %s4648_s12  }
 0x4cc PF: > { %s6323_s23 = sld [smem:[#allocation25_spill]]  ;;  %p4340_p9 = scmp.ge.s32.totalorder %s4639_s8, 2 }
 0x4cd   : > { %s3319_s13 = sand.u32 1, %s4611_s24  }
 0x4ce   : > { %s3320_s9 = scalar_lea.sflag [#allocation7], %s3319_s13 }
 0x4d2   : > { %p6324_p10 = scmp.ne.s32.totalorder %s6323_s23, 0 }
 0x4d4   : > { %p4331_p11 = pnand %p4340_p9, %p6324_p10 }
 0x4d6   : > { %p4332_p12 = pneg %p4331_p11 }
 0x4d8   : > { %4606 = dma.done.wait (%p4332_p12), %s3320_s9, 2048  }
 0x4d9   : > { %4608 = vsyncadd (%p4332_p12), %s3320_s9, 4294965248  ;;  %s22_s8 = sadd.s32 1, %s4639_s8   ;;  %s6325_s27 = sld [smem:[#allocation26_spill]] }
 0x4da   : > { %p19_p0 = scmp.ge.s32.totalorder %s22_s8, 6   ;;  %s6326_s15 = sld [smem:[#allocation21_spill]] }
 0x4db   : > { %s6327_s28 = sld [smem:[#allocation22_spill]]  ;;  %s6330_s24 = smov %s4615_s25 }
 0x4dc   : > { %s6328_s29 = sld [smem:[#allocation23_spill]]  ;;  %s6331_s25 = smov %s4619_s26 }
 0x4dd   : > { %s6329_s30 = sld [smem:[#allocation24_spill]]  ;;  %21 = sbr.rel (!%p19_p0) target bundleno = 10 (0xa), region = 110 }
 0x4df   : > { %s6332_s26 = smov %s6325_s27 }
 0x4e0   : > { %s6333_s27 = smov %s6326_s15 }
 0x4e2   :  { %3326 = vsyncpa [#allocation6], 1 }
 0x4e3   :  { %3328 = vsyncpa [#allocation6 + $0x1], 1 }
 0x4e4   :  { %3329 = vsyncpa [#allocation9], 1 }
 0x4e5   :  { %3330 = vsyncpa [#allocation7], 1 }
 0x4e6   :  { %3332 = vsyncpa [#allocation7 + $0x1], 1 }
 0x4e7   :  { %3333 = vsyncmov [#allocation3] }
 0x4ea   :  { %s3334_s4 = vpop.sfrf %3333 }
 0x4eb   :  { %p4035_p3 = scmp.ne.s32.totalorder %s3334_s4, 0 }
 0x4ed   :  { %3338 = shalt.err (%p4035_p3)  }
 0x4ee   :  { %3340 = vsyncmov [#allocation3 + $0x1] }
 0x4f1   :  { %s3341_s14 = vpop.sfrf %3340 }
 0x4f2   :  { %p4036_p1 = scmp.ne.s32.totalorder %s3341_s14, 0 }
 0x4f4   :  { %3345 = shalt.err (%p4036_p1)  }

</bundles_post_ra>
